<compile_context>
chip_gen: v7x
topology: tpu7x:2x2x1
jax: 0.10.0
libtpu: 0.0.40
codegen_flags: <defaults>
</compile_context>

<pallas_src>
import functools
import numpy as np
import jax
import jax.numpy as jnp
from jax.experimental import pallas as pl
from jax.experimental.pallas import tpu as pltpu

CN = 8    # out_channels_n (small synthetic stand-in for 128)
CM = 12   # out_channels_m (small synthetic stand-in for 192)


# ----------------------------- Pallas kernels ---------------------------------

def _taps_matmul(x_ref, w_ref, offsets, L):
    """sum_t  w[t] (Ct,cin) @ x[:, off_t:off_t+L] (cin,L)  -> (Ct, L) f32 accumulation on MXU."""
    acc = None
    for t, off in enumerate(offsets):
        x_tap = x_ref[:, off:off + L].astype(jnp.bfloat16)
        d = jnp.dot(w_ref[t], x_tap, preferred_element_type=jnp.float32)
        acc = d if acc is None else acc + d
    return acc


def _deconv_bias_kernel(x_ref, w_ref, b_ref, o_ref, *, offsets, L, relu):
    """Polyphase deconv (or plain conv): per-tap matmuls + bias [+ ReLU]."""
    y = _taps_matmul(x_ref, w_ref, offsets, L) + b_ref[...]
    if relu:
        y = jnp.maximum(y, 0.0)
    o_ref[...] = y


def _deconv_igdn_kernel(x_ref, w_ref, b_ref, g_ref, beta_ref, o_ref, *, offsets, L, cout):
    """Polyphase deconv fused with IGDN epilogue: y_i = x_i * sqrt(beta_i + sum_j gamma[j,i] x_j^2)."""
    y = _taps_matmul(x_ref, w_ref, offsets, L) + b_ref[...]
    g = g_ref[...]          # (cout, cout) bf16, g[i, j] = gamma[j, i]
    beta = beta_ref[...]    # (cout, 1)   f32
    for p in range(4):      # channel mixing happens within each output phase independently
        xp_ = y[p * cout:(p + 1) * cout, :]
        norm = beta + jnp.dot(g, (xp_ * xp_).astype(jnp.bfloat16),
                              preferred_element_type=jnp.float32)
        o_ref[p * cout:(p + 1) * cout, :] = xp_ * jnp.sqrt(norm)


def _conv_quant_kernel(x_ref, f_ref, w_ref, b_ref, o_ref, *, offsets, L):
    """k3/s1 conv producing recon_mu, fused with quantize_st(feature, mu) = round(f - mu) + mu."""
    mu = _taps_matmul(x_ref, w_ref, offsets, L) + b_ref[...]
    f = f_ref[...]
    o_ref[...] = jnp.round(f - mu) + mu


# ----------------------------- Wrappers (glue) ---------------------------------

_VMEM = pl.BlockSpec(memory_space=pltpu.MemorySpace.VMEM)


def _flatten_padded(x):
    """NCHW -> zero-pad H,W by 1 -> flatten rows (row length W+2) -> 2 slack elems at the end.

    With flat output index f = t*(W+2)+s (2 garbage columns per row), the conv tap (a, b),
    a,b in {-1,0,1}, is the contiguous slice starting at f + (a+1)*(W+2) + (b+1).
    """
    n, c, h, w = x.shape
    xp = jnp.pad(x, ((0, 0), (0, 0), (1, 1), (1, 1))).reshape(n, c, (h + 2) * (w + 2))
    return jnp.pad(xp, ((0, 0), (0, 0), (0, 2)))   # slack: garbage-column taps read 2 past the end


def _tap_offsets(w):
    return tuple((a + 1) * (w + 2) + (b + 1) for a in (-1, 0, 1) for b in (-1, 0, 1))


def _dephase(out_flat, cout, h, w):
    """(n, 4*cout, h*(w+2)) phase-major flat output -> (n, cout, 2h, 2w) NCHW."""
    n = out_flat.shape[0]
    y = out_flat.reshape(n, 2, 2, cout, h, w + 2)[..., :w]      # (n, ph, pw, co, H, W)
    return y.transpose(0, 3, 4, 1, 5, 2).reshape(n, cout, 2 * h, 2 * w)


def deconv_s2(x, w_phase, b_phase, *, cout, relu):
    """ConvTranspose2d(cin->cout, k5, s2, p2, op1) [+ReLU] via polyphase MXU matmuls."""
    n, cin, h, w = x.shape
    L = h * (w + 2)
    xp = _flatten_padded(x)
    lp = xp.shape[-1]
    kern = functools.partial(_deconv_bias_kernel, offsets=_tap_offsets(w), L=L, relu=relu)
    out = pl.pallas_call(
        kern,
        out_shape=jax.ShapeDtypeStruct((n, 4 * cout, L), jnp.float32),
        grid=(n,),
        in_specs=[pl.BlockSpec((None, cin, lp), lambda i: (i, 0, 0)), _VMEM, _VMEM],
        out_specs=pl.BlockSpec((None, 4 * cout, L), lambda i: (i, 0, 0)),
        compiler_params=pltpu.CompilerParams(dimension_semantics=("parallel",)),
    )(xp, w_phase, b_phase)
    return _dephase(out, cout, h, w)


def deconv_s2_igdn(x, w_phase, b_phase, gammaT, beta, *, cout):
    """ConvTranspose2d(k5, s2, p2, op1) with fused IGDN epilogue."""
    n, cin, h, w = x.shape
    L = h * (w + 2)
    xp = _flatten_padded(x)
    lp = xp.shape[-1]
    kern = functools.partial(_deconv_igdn_kernel, offsets=_tap_offsets(w), L=L, cout=cout)
    out = pl.pallas_call(
        kern,
        out_shape=jax.ShapeDtypeStruct((n, 4 * cout, L), jnp.float32),
        grid=(n,),
        in_specs=[pl.BlockSpec((None, cin, lp), lambda i: (i, 0, 0)),
                  _VMEM, _VMEM, _VMEM, _VMEM],
        out_specs=pl.BlockSpec((None, 4 * cout, L), lambda i: (i, 0, 0)),
        compiler_params=pltpu.CompilerParams(dimension_semantics=("parallel",)),
    )(xp, w_phase, b_phase, gammaT, beta)
    return _dephase(out, cout, h, w)


def conv_s1_quant(x, feature, w_taps, bias, *, cout):
    """ConvTranspose2d(k3, s1, p1) -> recon_mu, fused with quantize_st(feature, recon_mu)."""
    n, cin, h, w = x.shape
    L = h * (w + 2)
    xp = _flatten_padded(x)
    lp = xp.shape[-1]
    fpad = jnp.pad(feature, ((0, 0), (0, 0), (0, 0), (0, 2))).reshape(n, cout, L)
    kern = functools.partial(_conv_quant_kernel, offsets=_tap_offsets(w), L=L)
    out = pl.pallas_call(
        kern,
        out_shape=jax.ShapeDtypeStruct((n, cout, L), jnp.float32),
        grid=(n,),
        in_specs=[pl.BlockSpec((None, cin, lp), lambda i: (i, 0, 0)),
                  pl.BlockSpec((None, cout, L), lambda i: (i, 0, 0)),
                  _VMEM, _VMEM],
        out_specs=pl.BlockSpec((None, cout, L), lambda i: (i, 0, 0)),
        compiler_params=pltpu.CompilerParams(dimension_semantics=("parallel",)),
    )(xp, fpad, w_taps, bias)
    return out.reshape(n, cout, h, w + 2)[..., :w]


# ----------------------------- Parameters ---------------------------------

def _conv_form_weight(key, k, cin, cout):
    # conv-form weight; corresponds to a ConvTranspose2d kernel flipped in (kh, kw).
    w = jax.random.normal(key, (k, k, cin, cout), jnp.float32) / np.sqrt(k * k * cin)
    return np.asarray(w)


def _phase_weight_s2(w):
    """(5,5,cin,cout) conv-form -> (9, 4*cout, cin) per-tap, per-phase matmul weights (bf16).

    Output pixel (2t+ph, 2s+pw) = sum_{a,b,ci} w[2+2a-ph, 2+2b-pw, ci, co] * x[ci, t+a, s+b]
    (out-of-range kernel indices contribute zero; x is zero-padded by 1).
    """
    k, cin, cout = 5, w.shape[2], w.shape[3]
    wp = np.zeros((9, 4 * cout, cin), np.float32)
    for ai, a in enumerate((-1, 0, 1)):
        for bi, b in enumerate((-1, 0, 1)):
            for ph in (0, 1):
                for pw in (0, 1):
                    kh, kw = 2 + 2 * a - ph, 2 + 2 * b - pw
                    if 0 <= kh < k and 0 <= kw < k:
                        p = ph * 2 + pw
                        wp[ai * 3 + bi, p * cout:(p + 1) * cout, :] = w[kh, kw].T
    return jnp.asarray(wp, jnp.bfloat16)


def _tap_weight_s1(w):
    """(3,3,cin,cout) conv-form -> (9, cout, cin) per-tap matmul weights (bf16)."""
    cin, cout = w.shape[2], w.shape[3]
    wt = np.zeros((9, cout, cin), np.float32)
    for ai in range(3):
        for bi in range(3):
            wt[ai * 3 + bi] = w[ai, bi].T
    return jnp.asarray(wt, jnp.bfloat16)


def init_params(key):
    ks = jax.random.split(key, 7)
    p = {}
    # SynthesisPriorNet (mu branch). For a real checkpoint, stride-2 biases are tiled 4x (phase-major).
    p["p1_w"] = _phase_weight_s2(_conv_form_weight(ks[0], 5, CN, CN)); p["p1_b"] = jnp.zeros((4 * CN, 1), jnp.float32)
    p["p2_w"] = _phase_weight_s2(_conv_form_weight(ks[1], 5, CN, CN)); p["p2_b"] = jnp.zeros((4 * CN, 1), jnp.float32)
    p["p3_w"] = _tap_weight_s1(_conv_form_weight(ks[2], 3, CN, CM));   p["p3_b"] = jnp.zeros((CM, 1), jnp.float32)
    # SynthesisNet
    p["d1_w"] = _phase_weight_s2(_conv_form_weight(ks[3], 5, CM, CN)); p["d1_b"] = jnp.zeros((4 * CN, 1), jnp.float32)
    p["d2_w"] = _phase_weight_s2(_conv_form_weight(ks[4], 5, CN, CN)); p["d2_b"] = jnp.zeros((4 * CN, 1), jnp.float32)
    p["d3_w"] = _phase_weight_s2(_conv_form_weight(ks[5], 5, CN, CN)); p["d3_b"] = jnp.zeros((4 * CN, 1), jnp.float32)
    p["d4_w"] = _phase_weight_s2(_conv_form_weight(ks[6], 5, CN, 3));  p["d4_b"] = jnp.zeros((4 * 3, 1), jnp.float32)
    # IGDN params (GDN default init: beta=1, gamma=0.1*I); gT[i, j] = gamma[j, i]
    for name in ("g1", "g2", "g3"):
        p[name + "_gT"] = jnp.asarray(0.1 * np.eye(CN), jnp.bfloat16)
        p[name + "_beta"] = jnp.ones((CN, 1), jnp.float32)
    return p


# ----------------------------- Forward ---------------------------------

def edic_decoder_forward(params, feature, z):
    # recon_mu = SynthesisPriorNet(z)
    h = deconv_s2(z, params["p1_w"], params["p1_b"], cout=CN, relu=True)
    h = deconv_s2(h, params["p2_w"], params["p2_b"], cout=CN, relu=True)
    # feature = quantize_st(feature, recon_mu)   (fused into the p3 conv epilogue)
    fq = conv_s1_quant(h, feature, params["p3_w"], params["p3_b"], cout=CM)
    # recon_image = SynthesisNet(feature)  (IGDN fused into the producing deconvs)
    h = deconv_s2_igdn(fq, params["d1_w"], params["d1_b"], params["g1_gT"], params["g1_beta"], cout=CN)
    h = deconv_s2_igdn(h, params["d2_w"], params["d2_b"], params["g2_gT"], params["g2_beta"], cout=CN)
    h = deconv_s2_igdn(h, params["d3_w"], params["d3_b"], params["g3_gT"], params["g3_beta"], cout=CN)
    recon_image = deconv_s2(h, params["d4_w"], params["d4_b"], cout=3, relu=False)
    return recon_image


if __name__ == "__main__":
    key = jax.random.PRNGKey(0)
    kp, kf, kz = jax.random.split(key, 3)
    params = init_params(kp)

    batch = 2
    # z: hyper-latent (N, CN, 2, 2); feature: latent (N, CM, 8, 8) = 4x z spatial.
    z = jax.random.normal(kz, (batch, CN, 2, 2), jnp.float32)
    feature = jax.random.normal(kf, (batch, CM, 8, 8), jnp.float32) * 4.0

    recon = jax.jit(edic_decoder_forward)(params, feature, z)
    recon = jax.block_until_ready(recon)
    assert recon.shape == (batch, 3, 128, 128), recon.shape
    assert recon.dtype == jnp.float32
    assert bool(jnp.all(jnp.isfinite(recon)))
    print("KERNEL_OK")
</pallas_src>

<mosaic_0001>
module attributes {stable_mosaic.version = 11 : i64} {
  func.func @_deconv_bias_kernel(%arg0: i32, %arg1: memref<1x8x18xf32, #tpu.memory_space<vmem>>, %arg2: memref<9x32x8xbf16, #tpu.memory_space<vmem>>, %arg3: memref<32x1xf32, #tpu.memory_space<vmem>>, %arg4: memref<1x32x8xf32, #tpu.memory_space<vmem>>) attributes {dimension_semantics = [#tpu.dimension_semantics<parallel>], iteration_bounds = array<i64: 2>, scalar_prefetch = 0 : i64, scratch_operands = 0 : i64, tpu.core_type = #tpu.core_type<tc>, window_params = [{transform_indices = @transform_0, window_bounds = array<i64: 1, 8, 18>}, {pipeline_mode = #tpu.pipeline_mode<synchronous>, transform_indices = @transform_1, window_bounds = array<i64: 9, 32, 8>}, {pipeline_mode = #tpu.pipeline_mode<synchronous>, transform_indices = @transform_2, window_bounds = array<i64: 32, 1>}, {transform_indices = @transform_3, window_bounds = array<i64: 1, 32, 8>}]} {
    %c0 = arith.constant 0 : index
    %c0_0 = arith.constant 0 : index
    %c0_1 = arith.constant 0 : index
    %0 = vector.load %arg1[%c0, %c0_0, %c0_1] : memref<1x8x18xf32, #tpu.memory_space<vmem>>, vector<1x8x8xf32>
    %1 = vector.shape_cast %0 : vector<1x8x8xf32> to vector<8x8xf32>
    %2 = arith.truncf %1 : vector<8x8xf32> to vector<8x8xbf16>
    %c0_2 = arith.constant 0 : index
    %c0_3 = arith.constant 0 : index
    %c0_4 = arith.constant 0 : index
    %3 = vector.load %arg2[%c0_2, %c0_3, %c0_4] : memref<9x32x8xbf16, #tpu.memory_space<vmem>>, vector<1x32x8xbf16>
    %4 = vector.shape_cast %3 : vector<1x32x8xbf16> to vector<32x8xbf16>
    %cst = arith.constant dense<0.000000e+00> : vector<32x8xf32>
    %5 = tpu.matmul %4, %2, %cst {dimension_numbers = #tpu.dot_dimension_numbers<[1], [0], [0], [1], [0, 0, 1, 1], [], []>} : vector<32x8xbf16>, vector<8x8xbf16>, vector<32x8xf32> -> vector<32x8xf32>
    %c0_5 = arith.constant 0 : index
    %c0_6 = arith.constant 0 : index
    %c1 = arith.constant 1 : index
    %6 = vector.load %arg1[%c0_5, %c0_6, %c1] : memref<1x8x18xf32, #tpu.memory_space<vmem>>, vector<1x8x8xf32>
    %7 = vector.shape_cast %6 : vector<1x8x8xf32> to vector<8x8xf32>
    %8 = arith.truncf %7 : vector<8x8xf32> to vector<8x8xbf16>
    %c1_7 = arith.constant 1 : index
    %c0_8 = arith.constant 0 : index
    %c0_9 = arith.constant 0 : index
    %9 = vector.load %arg2[%c1_7, %c0_8, %c0_9] : memref<9x32x8xbf16, #tpu.memory_space<vmem>>, vector<1x32x8xbf16>
    %10 = vector.shape_cast %9 : vector<1x32x8xbf16> to vector<32x8xbf16>
    %cst_10 = arith.constant dense<0.000000e+00> : vector<32x8xf32>
    %11 = tpu.matmul %10, %8, %cst_10 {dimension_numbers = #tpu.dot_dimension_numbers<[1], [0], [0], [1], [0, 0, 1, 1], [], []>} : vector<32x8xbf16>, vector<8x8xbf16>, vector<32x8xf32> -> vector<32x8xf32>
    %12 = arith.addf %5, %11 : vector<32x8xf32>
    %c0_11 = arith.constant 0 : index
    %c0_12 = arith.constant 0 : index
    %c2 = arith.constant 2 : index
    %13 = vector.load %arg1[%c0_11, %c0_12, %c2] : memref<1x8x18xf32, #tpu.memory_space<vmem>>, vector<1x8x8xf32>
    %14 = vector.shape_cast %13 : vector<1x8x8xf32> to vector<8x8xf32>
    %15 = arith.truncf %14 : vector<8x8xf32> to vector<8x8xbf16>
    %c2_13 = arith.constant 2 : index
    %c0_14 = arith.constant 0 : index
    %c0_15 = arith.constant 0 : index
    %16 = vector.load %arg2[%c2_13, %c0_14, %c0_15] : memref<9x32x8xbf16, #tpu.memory_space<vmem>>, vector<1x32x8xbf16>
    %17 = vector.shape_cast %16 : vector<1x32x8xbf16> to vector<32x8xbf16>
    %cst_16 = arith.constant dense<0.000000e+00> : vector<32x8xf32>
    %18 = tpu.matmul %17, %15, %cst_16 {dimension_numbers = #tpu.dot_dimension_numbers<[1], [0], [0], [1], [0, 0, 1, 1], [], []>} : vector<32x8xbf16>, vector<8x8xbf16>, vector<32x8xf32> -> vector<32x8xf32>
    %19 = arith.addf %12, %18 : vector<32x8xf32>
    %c0_17 = arith.constant 0 : index
    %c0_18 = arith.constant 0 : index
    %c4 = arith.constant 4 : index
    %20 = vector.load %arg1[%c0_17, %c0_18, %c4] : memref<1x8x18xf32, #tpu.memory_space<vmem>>, vector<1x8x8xf32>
    %21 = vector.shape_cast %20 : vector<1x8x8xf32> to vector<8x8xf32>
    %22 = arith.truncf %21 : vector<8x8xf32> to vector<8x8xbf16>
    %c3 = arith.constant 3 : index
    %c0_19 = arith.constant 0 : index
    %c0_20 = arith.constant 0 : index
    %23 = vector.load %arg2[%c3, %c0_19, %c0_20] : memref<9x32x8xbf16, #tpu.memory_space<vmem>>, vector<1x32x8xbf16>
    %24 = vector.shape_cast %23 : vector<1x32x8xbf16> to vector<32x8xbf16>
    %cst_21 = arith.constant dense<0.000000e+00> : vector<32x8xf32>
    %25 = tpu.matmul %24, %22, %cst_21 {dimension_numbers = #tpu.dot_dimension_numbers<[1], [0], [0], [1], [0, 0, 1, 1], [], []>} : vector<32x8xbf16>, vector<8x8xbf16>, vector<32x8xf32> -> vector<32x8xf32>
    %26 = arith.addf %19, %25 : vector<32x8xf32>
    %c0_22 = arith.constant 0 : index
    %c0_23 = arith.constant 0 : index
    %c5 = arith.constant 5 : index
    %27 = vector.load %arg1[%c0_22, %c0_23, %c5] : memref<1x8x18xf32, #tpu.memory_space<vmem>>, vector<1x8x8xf32>
    %28 = vector.shape_cast %27 : vector<1x8x8xf32> to vector<8x8xf32>
    %29 = arith.truncf %28 : vector<8x8xf32> to vector<8x8xbf16>
    %c4_24 = arith.constant 4 : index
    %c0_25 = arith.constant 0 : index
    %c0_26 = arith.constant 0 : index
    %30 = vector.load %arg2[%c4_24, %c0_25, %c0_26] : memref<9x32x8xbf16, #tpu.memory_space<vmem>>, vector<1x32x8xbf16>
    %31 = vector.shape_cast %30 : vector<1x32x8xbf16> to vector<32x8xbf16>
    %cst_27 = arith.constant dense<0.000000e+00> : vector<32x8xf32>
    %32 = tpu.matmul %31, %29, %cst_27 {dimension_numbers = #tpu.dot_dimension_numbers<[1], [0], [0], [1], [0, 0, 1, 1], [], []>} : vector<32x8xbf16>, vector<8x8xbf16>, vector<32x8xf32> -> vector<32x8xf32>
    %33 = arith.addf %26, %32 : vector<32x8xf32>
    %c0_28 = arith.constant 0 : index
    %c0_29 = arith.constant 0 : index
    %c6 = arith.constant 6 : index
    %34 = vector.load %arg1[%c0_28, %c0_29, %c6] : memref<1x8x18xf32, #tpu.memory_space<vmem>>, vector<1x8x8xf32>
    %35 = vector.shape_cast %34 : vector<1x8x8xf32> to vector<8x8xf32>
    %36 = arith.truncf %35 : vector<8x8xf32> to vector<8x8xbf16>
    %c5_30 = arith.constant 5 : index
    %c0_31 = arith.constant 0 : index
    %c0_32 = arith.constant 0 : index
    %37 = vector.load %arg2[%c5_30, %c0_31, %c0_32] : memref<9x32x8xbf16, #tpu.memory_space<vmem>>, vector<1x32x8xbf16>
    %38 = vector.shape_cast %37 : vector<1x32x8xbf16> to vector<32x8xbf16>
    %cst_33 = arith.constant dense<0.000000e+00> : vector<32x8xf32>
    %39 = tpu.matmul %38, %36, %cst_33 {dimension_numbers = #tpu.dot_dimension_numbers<[1], [0], [0], [1], [0, 0, 1, 1], [], []>} : vector<32x8xbf16>, vector<8x8xbf16>, vector<32x8xf32> -> vector<32x8xf32>
    %40 = arith.addf %33, %39 : vector<32x8xf32>
    %c0_34 = arith.constant 0 : index
    %c0_35 = arith.constant 0 : index
    %c8 = arith.constant 8 : index
    %41 = vector.load %arg1[%c0_34, %c0_35, %c8] : memref<1x8x18xf32, #tpu.memory_space<vmem>>, vector<1x8x8xf32>
    %42 = vector.shape_cast %41 : vector<1x8x8xf32> to vector<8x8xf32>
    %43 = arith.truncf %42 : vector<8x8xf32> to vector<8x8xbf16>
    %c6_36 = arith.constant 6 : index
    %c0_37 = arith.constant 0 : index
    %c0_38 = arith.constant 0 : index
    %44 = vector.load %arg2[%c6_36, %c0_37, %c0_38] : memref<9x32x8xbf16, #tpu.memory_space<vmem>>, vector<1x32x8xbf16>
    %45 = vector.shape_cast %44 : vector<1x32x8xbf16> to vector<32x8xbf16>
    %cst_39 = arith.constant dense<0.000000e+00> : vector<32x8xf32>
    %46 = tpu.matmul %45, %43, %cst_39 {dimension_numbers = #tpu.dot_dimension_numbers<[1], [0], [0], [1], [0, 0, 1, 1], [], []>} : vector<32x8xbf16>, vector<8x8xbf16>, vector<32x8xf32> -> vector<32x8xf32>
    %47 = arith.addf %40, %46 : vector<32x8xf32>
    %c0_40 = arith.constant 0 : index
    %c0_41 = arith.constant 0 : index
    %c9 = arith.constant 9 : index
    %48 = vector.load %arg1[%c0_40, %c0_41, %c9] : memref<1x8x18xf32, #tpu.memory_space<vmem>>, vector<1x8x8xf32>
    %49 = vector.shape_cast %48 : vector<1x8x8xf32> to vector<8x8xf32>
    %50 = arith.truncf %49 : vector<8x8xf32> to vector<8x8xbf16>
    %c7 = arith.constant 7 : index
    %c0_42 = arith.constant 0 : index
    %c0_43 = arith.constant 0 : index
    %51 = vector.load %arg2[%c7, %c0_42, %c0_43] : memref<9x32x8xbf16, #tpu.memory_space<vmem>>, vector<1x32x8xbf16>
    %52 = vector.shape_cast %51 : vector<1x32x8xbf16> to vector<32x8xbf16>
    %cst_44 = arith.constant dense<0.000000e+00> : vector<32x8xf32>
    %53 = tpu.matmul %52, %50, %cst_44 {dimension_numbers = #tpu.dot_dimension_numbers<[1], [0], [0], [1], [0, 0, 1, 1], [], []>} : vector<32x8xbf16>, vector<8x8xbf16>, vector<32x8xf32> -> vector<32x8xf32>
    %54 = arith.addf %47, %53 : vector<32x8xf32>
    %c0_45 = arith.constant 0 : index
    %c0_46 = arith.constant 0 : index
    %c10 = arith.constant 10 : index
    %55 = vector.load %arg1[%c0_45, %c0_46, %c10] : memref<1x8x18xf32, #tpu.memory_space<vmem>>, vector<1x8x8xf32>
    %56 = vector.shape_cast %55 : vector<1x8x8xf32> to vector<8x8xf32>
    %57 = arith.truncf %56 : vector<8x8xf32> to vector<8x8xbf16>
    %c8_47 = arith.constant 8 : index
    %c0_48 = arith.constant 0 : index
    %c0_49 = arith.constant 0 : index
    %58 = vector.load %arg2[%c8_47, %c0_48, %c0_49] : memref<9x32x8xbf16, #tpu.memory_space<vmem>>, vector<1x32x8xbf16>
    %59 = vector.shape_cast %58 : vector<1x32x8xbf16> to vector<32x8xbf16>
    %cst_50 = arith.constant dense<0.000000e+00> : vector<32x8xf32>
    %60 = tpu.matmul %59, %57, %cst_50 {dimension_numbers = #tpu.dot_dimension_numbers<[1], [0], [0], [1], [0, 0, 1, 1], [], []>} : vector<32x8xbf16>, vector<8x8xbf16>, vector<32x8xf32> -> vector<32x8xf32>
    %61 = arith.addf %54, %60 : vector<32x8xf32>
    %c0_51 = arith.constant 0 : index
    %c0_52 = arith.constant 0 : index
    %62 = vector.load %arg3[%c0_51, %c0_52] : memref<32x1xf32, #tpu.memory_space<vmem>>, vector<32x1xf32>
    %63 = vector.broadcast %62 : vector<32x1xf32> to vector<32x8xf32>
    %64 = arith.addf %61, %63 : vector<32x8xf32>
    %cst_53 = arith.constant 0.000000e+00 : f32
    %65 = vector.broadcast %cst_53 : f32 to vector<32x8xf32>
    %66 = arith.maximumf %64, %65 : vector<32x8xf32>
    %c0_54 = arith.constant 0 : index
    %c0_55 = arith.constant 0 : index
    %c0_56 = arith.constant 0 : index
    %67 = vector.load %arg4[%c0_54, %c0_55, %c0_56] : memref<1x32x8xf32, #tpu.memory_space<vmem>>, vector<1x32x8xf32>
    %68 = vector.shape_cast %67 : vector<1x32x8xf32> to vector<32x8xf32>
    %69 = vector.shape_cast %66 : vector<32x8xf32> to vector<1x32x8xf32>
    tpu.vector_store %arg4[%c0_54, %c0_55, %c0_56], %69 {strides = array<i32>} : memref<1x32x8xf32, #tpu.memory_space<vmem>>, vector<1x32x8xf32>,
    return
  }
  func.func @transform_0(%arg0: i32) -> (i32, i32, i32) {
    %c0_i32 = arith.constant 0 : i32
    %c0_i32_0 = arith.constant 0 : i32
    %c0_i32_1 = arith.constant 0 : i32
    return %arg0, %c0_i32, %c0_i32_0 : i32, i32, i32
  }
  func.func @transform_1(%arg0: i32) -> (i32, i32, i32) {
    %c0_i32 = arith.constant 0 : i32
    %c0_i32_0 = arith.constant 0 : i32
    %c0_i32_1 = arith.constant 0 : i32
    %c0_i32_2 = arith.constant 0 : i32
    return %c0_i32, %c0_i32_0, %c0_i32_1 : i32, i32, i32
  }
  func.func @transform_2(%arg0: i32) -> (i32, i32) {
    %c0_i32 = arith.constant 0 : i32
    %c0_i32_0 = arith.constant 0 : i32
    %c0_i32_1 = arith.constant 0 : i32
    return %c0_i32, %c0_i32_0 : i32, i32
  }
  func.func @transform_3(%arg0: i32) -> (i32, i32, i32) {
    %c0_i32 = arith.constant 0 : i32
    %c0_i32_0 = arith.constant 0 : i32
    %c0_i32_1 = arith.constant 0 : i32
    return %arg0, %c0_i32, %c0_i32_0 : i32, i32, i32
  }
}

module attributes {stable_mosaic.version = 11 : i64} {
  func.func @_deconv_bias_kernel(%arg0: i32, %arg1: memref<1x8x38xf32, #tpu.memory_space<vmem>>, %arg2: memref<9x32x8xbf16, #tpu.memory_space<vmem>>, %arg3: memref<32x1xf32, #tpu.memory_space<vmem>>, %arg4: memref<1x32x24xf32, #tpu.memory_space<vmem>>) attributes {dimension_semantics = [#tpu.dimension_semantics<parallel>], iteration_bounds = array<i64: 2>, scalar_prefetch = 0 : i64, scratch_operands = 0 : i64, tpu.core_type = #tpu.core_type<tc>, window_params = [{transform_indices = @transform_0, window_bounds = array<i64: 1, 8, 38>}, {pipeline_mode = #tpu.pipeline_mode<synchronous>, transform_indices = @transform_1, window_bounds = array<i64: 9, 32, 8>}, {pipeline_mode = #tpu.pipeline_mode<synchronous>, transform_indices = @transform_2, window_bounds = array<i64: 32, 1>}, {transform_indices = @transform_3, window_bounds = array<i64: 1, 32, 24>}]} {
    %c0 = arith.constant 0 : index
    %c0_0 = arith.constant 0 : index
    %c0_1 = arith.constant 0 : index
    %0 = vector.load %arg1[%c0, %c0_0, %c0_1] : memref<1x8x38xf32, #tpu.memory_space<vmem>>, vector<1x8x24xf32>
    %1 = vector.shape_cast %0 : vector<1x8x24xf32> to vector<8x24xf32>
    %2 = arith.truncf %1 : vector<8x24xf32> to vector<8x24xbf16>
    %c0_2 = arith.constant 0 : index
    %c0_3 = arith.constant 0 : index
    %c0_4 = arith.constant 0 : index
    %3 = vector.load %arg2[%c0_2, %c0_3, %c0_4] : memref<9x32x8xbf16, #tpu.memory_space<vmem>>, vector<1x32x8xbf16>
    %4 = vector.shape_cast %3 : vector<1x32x8xbf16> to vector<32x8xbf16>
    %cst = arith.constant dense<0.000000e+00> : vector<32x24xf32>
    %5 = tpu.matmul %4, %2, %cst {dimension_numbers = #tpu.dot_dimension_numbers<[1], [0], [0], [1], [0, 0, 1, 1], [], []>} : vector<32x8xbf16>, vector<8x24xbf16>, vector<32x24xf32> -> vector<32x24xf32>
    %c0_5 = arith.constant 0 : index
    %c0_6 = arith.constant 0 : index
    %c1 = arith.constant 1 : index
    %6 = vector.load %arg1[%c0_5, %c0_6, %c1] : memref<1x8x38xf32, #tpu.memory_space<vmem>>, vector<1x8x24xf32>
    %7 = vector.shape_cast %6 : vector<1x8x24xf32> to vector<8x24xf32>
    %8 = arith.truncf %7 : vector<8x24xf32> to vector<8x24xbf16>
    %c1_7 = arith.constant 1 : index
    %c0_8 = arith.constant 0 : index
    %c0_9 = arith.constant 0 : index
    %9 = vector.load %arg2[%c1_7, %c0_8, %c0_9] : memref<9x32x8xbf16, #tpu.memory_space<vmem>>, vector<1x32x8xbf16>
    %10 = vector.shape_cast %9 : vector<1x32x8xbf16> to vector<32x8xbf16>
    %cst_10 = arith.constant dense<0.000000e+00> : vector<32x24xf32>
    %11 = tpu.matmul %10, %8, %cst_10 {dimension_numbers = #tpu.dot_dimension_numbers<[1], [0], [0], [1], [0, 0, 1, 1], [], []>} : vector<32x8xbf16>, vector<8x24xbf16>, vector<32x24xf32> -> vector<32x24xf32>
    %12 = arith.addf %5, %11 : vector<32x24xf32>
    %c0_11 = arith.constant 0 : index
    %c0_12 = arith.constant 0 : index
    %c2 = arith.constant 2 : index
    %13 = vector.load %arg1[%c0_11, %c0_12, %c2] : memref<1x8x38xf32, #tpu.memory_space<vmem>>, vector<1x8x24xf32>
    %14 = vector.shape_cast %13 : vector<1x8x24xf32> to vector<8x24xf32>
    %15 = arith.truncf %14 : vector<8x24xf32> to vector<8x24xbf16>
    %c2_13 = arith.constant 2 : index
    %c0_14 = arith.constant 0 : index
    %c0_15 = arith.constant 0 : index
    %16 = vector.load %arg2[%c2_13, %c0_14, %c0_15] : memref<9x32x8xbf16, #tpu.memory_space<vmem>>, vector<1x32x8xbf16>
    %17 = vector.shape_cast %16 : vector<1x32x8xbf16> to vector<32x8xbf16>
    %cst_16 = arith.constant dense<0.000000e+00> : vector<32x24xf32>
    %18 = tpu.matmul %17, %15, %cst_16 {dimension_numbers = #tpu.dot_dimension_numbers<[1], [0], [0], [1], [0, 0, 1, 1], [], []>} : vector<32x8xbf16>, vector<8x24xbf16>, vector<32x24xf32> -> vector<32x24xf32>
    %19 = arith.addf %12, %18 : vector<32x24xf32>
    %c0_17 = arith.constant 0 : index
    %c0_18 = arith.constant 0 : index
    %c6 = arith.constant 6 : index
    %20 = vector.load %arg1[%c0_17, %c0_18, %c6] : memref<1x8x38xf32, #tpu.memory_space<vmem>>, vector<1x8x24xf32>
    %21 = vector.shape_cast %20 : vector<1x8x24xf32> to vector<8x24xf32>
    %22 = arith.truncf %21 : vector<8x24xf32> to vector<8x24xbf16>
    %c3 = arith.constant 3 : index
    %c0_19 = arith.constant 0 : index
    %c0_20 = arith.constant 0 : index
    %23 = vector.load %arg2[%c3, %c0_19, %c0_20] : memref<9x32x8xbf16, #tpu.memory_space<vmem>>, vector<1x32x8xbf16>
    %24 = vector.shape_cast %23 : vector<1x32x8xbf16> to vector<32x8xbf16>
    %cst_21 = arith.constant dense<0.000000e+00> : vector<32x24xf32>
    %25 = tpu.matmul %24, %22, %cst_21 {dimension_numbers = #tpu.dot_dimension_numbers<[1], [0], [0], [1], [0, 0, 1, 1], [], []>} : vector<32x8xbf16>, vector<8x24xbf16>, vector<32x24xf32> -> vector<32x24xf32>
    %26 = arith.addf %19, %25 : vector<32x24xf32>
    %c0_22 = arith.constant 0 : index
    %c0_23 = arith.constant 0 : index
    %c7 = arith.constant 7 : index
    %27 = vector.load %arg1[%c0_22, %c0_23, %c7] : memref<1x8x38xf32, #tpu.memory_space<vmem>>, vector<1x8x24xf32>
    %28 = vector.shape_cast %27 : vector<1x8x24xf32> to vector<8x24xf32>
    %29 = arith.truncf %28 : vector<8x24xf32> to vector<8x24xbf16>
    %c4 = arith.constant 4 : index
    %c0_24 = arith.constant 0 : index
    %c0_25 = arith.constant 0 : index
    %30 = vector.load %arg2[%c4, %c0_24, %c0_25] : memref<9x32x8xbf16, #tpu.memory_space<vmem>>, vector<1x32x8xbf16>
    %31 = vector.shape_cast %30 : vector<1x32x8xbf16> to vector<32x8xbf16>
    %cst_26 = arith.constant dense<0.000000e+00> : vector<32x24xf32>
    %32 = tpu.matmul %31, %29, %cst_26 {dimension_numbers = #tpu.dot_dimension_numbers<[1], [0], [0], [1], [0, 0, 1, 1], [], []>} : vector<32x8xbf16>, vector<8x24xbf16>, vector<32x24xf32> -> vector<32x24xf32>
    %33 = arith.addf %26, %32 : vector<32x24xf32>
    %c0_27 = arith.constant 0 : index
    %c0_28 = arith.constant 0 : index
    %c8 = arith.constant 8 : index
    %34 = vector.load %arg1[%c0_27, %c0_28, %c8] : memref<1x8x38xf32, #tpu.memory_space<vmem>>, vector<1x8x24xf32>
    %35 = vector.shape_cast %34 : vector<1x8x24xf32> to vector<8x24xf32>
    %36 = arith.truncf %35 : vector<8x24xf32> to vector<8x24xbf16>
    %c5 = arith.constant 5 : index
    %c0_29 = arith.constant 0 : index
    %c0_30 = arith.constant 0 : index
    %37 = vector.load %arg2[%c5, %c0_29, %c0_30] : memref<9x32x8xbf16, #tpu.memory_space<vmem>>, vector<1x32x8xbf16>
    %38 = vector.shape_cast %37 : vector<1x32x8xbf16> to vector<32x8xbf16>
    %cst_31 = arith.constant dense<0.000000e+00> : vector<32x24xf32>
    %39 = tpu.matmul %38, %36, %cst_31 {dimension_numbers = #tpu.dot_dimension_numbers<[1], [0], [0], [1], [0, 0, 1, 1], [], []>} : vector<32x8xbf16>, vector<8x24xbf16>, vector<32x24xf32> -> vector<32x24xf32>
    %40 = arith.addf %33, %39 : vector<32x24xf32>
    %c0_32 = arith.constant 0 : index
    %c0_33 = arith.constant 0 : index
    %c12 = arith.constant 12 : index
    %41 = vector.load %arg1[%c0_32, %c0_33, %c12] : memref<1x8x38xf32, #tpu.memory_space<vmem>>, vector<1x8x24xf32>
    %42 = vector.shape_cast %41 : vector<1x8x24xf32> to vector<8x24xf32>
    %43 = arith.truncf %42 : vector<8x24xf32> to vector<8x24xbf16>
    %c6_34 = arith.constant 6 : index
    %c0_35 = arith.constant 0 : index
    %c0_36 = arith.constant 0 : index
    %44 = vector.load %arg2[%c6_34, %c0_35, %c0_36] : memref<9x32x8xbf16, #tpu.memory_space<vmem>>, vector<1x32x8xbf16>
    %45 = vector.shape_cast %44 : vector<1x32x8xbf16> to vector<32x8xbf16>
    %cst_37 = arith.constant dense<0.000000e+00> : vector<32x24xf32>
    %46 = tpu.matmul %45, %43, %cst_37 {dimension_numbers = #tpu.dot_dimension_numbers<[1], [0], [0], [1], [0, 0, 1, 1], [], []>} : vector<32x8xbf16>, vector<8x24xbf16>, vector<32x24xf32> -> vector<32x24xf32>
    %47 = arith.addf %40, %46 : vector<32x24xf32>
    %c0_38 = arith.constant 0 : index
    %c0_39 = arith.constant 0 : index
    %c13 = arith.constant 13 : index
    %48 = vector.load %arg1[%c0_38, %c0_39, %c13] : memref<1x8x38xf32, #tpu.memory_space<vmem>>, vector<1x8x24xf32>
    %49 = vector.shape_cast %48 : vector<1x8x24xf32> to vector<8x24xf32>
    %50 = arith.truncf %49 : vector<8x24xf32> to vector<8x24xbf16>
    %c7_40 = arith.constant 7 : index
    %c0_41 = arith.constant 0 : index
    %c0_42 = arith.constant 0 : index
    %51 = vector.load %arg2[%c7_40, %c0_41, %c0_42] : memref<9x32x8xbf16, #tpu.memory_space<vmem>>, vector<1x32x8xbf16>
    %52 = vector.shape_cast %51 : vector<1x32x8xbf16> to vector<32x8xbf16>
    %cst_43 = arith.constant dense<0.000000e+00> : vector<32x24xf32>
    %53 = tpu.matmul %52, %50, %cst_43 {dimension_numbers = #tpu.dot_dimension_numbers<[1], [0], [0], [1], [0, 0, 1, 1], [], []>} : vector<32x8xbf16>, vector<8x24xbf16>, vector<32x24xf32> -> vector<32x24xf32>
    %54 = arith.addf %47, %53 : vector<32x24xf32>
    %c0_44 = arith.constant 0 : index
    %c0_45 = arith.constant 0 : index
    %c14 = arith.constant 14 : index
    %55 = vector.load %arg1[%c0_44, %c0_45, %c14] : memref<1x8x38xf32, #tpu.memory_space<vmem>>, vector<1x8x24xf32>
    %56 = vector.shape_cast %55 : vector<1x8x24xf32> to vector<8x24xf32>
    %57 = arith.truncf %56 : vector<8x24xf32> to vector<8x24xbf16>
    %c8_46 = arith.constant 8 : index
    %c0_47 = arith.constant 0 : index
    %c0_48 = arith.constant 0 : index
    %58 = vector.load %arg2[%c8_46, %c0_47, %c0_48] : memref<9x32x8xbf16, #tpu.memory_space<vmem>>, vector<1x32x8xbf16>
    %59 = vector.shape_cast %58 : vector<1x32x8xbf16> to vector<32x8xbf16>
    %cst_49 = arith.constant dense<0.000000e+00> : vector<32x24xf32>
    %60 = tpu.matmul %59, %57, %cst_49 {dimension_numbers = #tpu.dot_dimension_numbers<[1], [0], [0], [1], [0, 0, 1, 1], [], []>} : vector<32x8xbf16>, vector<8x24xbf16>, vector<32x24xf32> -> vector<32x24xf32>
    %61 = arith.addf %54, %60 : vector<32x24xf32>
    %c0_50 = arith.constant 0 : index
    %c0_51 = arith.constant 0 : index
    %62 = vector.load %arg3[%c0_50, %c0_51] : memref<32x1xf32, #tpu.memory_space<vmem>>, vector<32x1xf32>
    %63 = vector.broadcast %62 : vector<32x1xf32> to vector<32x24xf32>
    %64 = arith.addf %61, %63 : vector<32x24xf32>
    %cst_52 = arith.constant 0.000000e+00 : f32
    %65 = vector.broadcast %cst_52 : f32 to vector<32x24xf32>
    %66 = arith.maximumf %64, %65 : vector<32x24xf32>
    %c0_53 = arith.constant 0 : index
    %c0_54 = arith.constant 0 : index
    %c0_55 = arith.constant 0 : index
    %67 = vector.load %arg4[%c0_53, %c0_54, %c0_55] : memref<1x32x24xf32, #tpu.memory_space<vmem>>, vector<1x32x24xf32>
    %68 = vector.shape_cast %67 : vector<1x32x24xf32> to vector<32x24xf32>
    %69 = vector.shape_cast %66 : vector<32x24xf32> to vector<1x32x24xf32>
    tpu.vector_store %arg4[%c0_53, %c0_54, %c0_55], %69 {strides = array<i32>} : memref<1x32x24xf32, #tpu.memory_space<vmem>>, vector<1x32x24xf32>,
    return
  }
  func.func @transform_0(%arg0: i32) -> (i32, i32, i32) {
    %c0_i32 = arith.constant 0 : i32
    %c0_i32_0 = arith.constant 0 : i32
    %c0_i32_1 = arith.constant 0 : i32
    return %arg0, %c0_i32, %c0_i32_0 : i32, i32, i32
  }
  func.func @transform_1(%arg0: i32) -> (i32, i32, i32) {
    %c0_i32 = arith.constant 0 : i32
    %c0_i32_0 = arith.constant 0 : i32
    %c0_i32_1 = arith.constant 0 : i32
    %c0_i32_2 = arith.constant 0 : i32
    return %c0_i32, %c0_i32_0, %c0_i32_1 : i32, i32, i32
  }
  func.func @transform_2(%arg0: i32) -> (i32, i32) {
    %c0_i32 = arith.constant 0 : i32
    %c0_i32_0 = arith.constant 0 : i32
    %c0_i32_1 = arith.constant 0 : i32
    return %c0_i32, %c0_i32_0 : i32, i32
  }
  func.func @transform_3(%arg0: i32) -> (i32, i32, i32) {
    %c0_i32 = arith.constant 0 : i32
    %c0_i32_0 = arith.constant 0 : i32
    %c0_i32_1 = arith.constant 0 : i32
    return %arg0, %c0_i32, %c0_i32_0 : i32, i32, i32
  }
}

module attributes {stable_mosaic.version = 11 : i64} {
  func.func @_conv_quant_kernel(%arg0: i32, %arg1: memref<1x8x102xf32, #tpu.memory_space<vmem>>, %arg2: memref<1x12x80xf32, #tpu.memory_space<vmem>>, %arg3: memref<9x12x8xbf16, #tpu.memory_space<vmem>>, %arg4: memref<12x1xf32, #tpu.memory_space<vmem>>, %arg5: memref<1x12x80xf32, #tpu.memory_space<vmem>>) attributes {dimension_semantics = [#tpu.dimension_semantics<parallel>], iteration_bounds = array<i64: 2>, scalar_prefetch = 0 : i64, scratch_operands = 0 : i64, tpu.core_type = #tpu.core_type<tc>, window_params = [{transform_indices = @transform_0, window_bounds = array<i64: 1, 8, 102>}, {transform_indices = @transform_1, window_bounds = array<i64: 1, 12, 80>}, {pipeline_mode = #tpu.pipeline_mode<synchronous>, transform_indices = @transform_2, window_bounds = array<i64: 9, 12, 8>}, {pipeline_mode = #tpu.pipeline_mode<synchronous>, transform_indices = @transform_3, window_bounds = array<i64: 12, 1>}, {transform_indices = @transform_4, window_bounds = array<i64: 1, 12, 80>}]} {
    %c0 = arith.constant 0 : index
    %c0_0 = arith.constant 0 : index
    %c0_1 = arith.constant 0 : index
    %0 = vector.load %arg1[%c0, %c0_0, %c0_1] : memref<1x8x102xf32, #tpu.memory_space<vmem>>, vector<1x8x80xf32>
    %1 = vector.shape_cast %0 : vector<1x8x80xf32> to vector<8x80xf32>
    %2 = arith.truncf %1 : vector<8x80xf32> to vector<8x80xbf16>
    %c0_2 = arith.constant 0 : index
    %c0_3 = arith.constant 0 : index
    %c0_4 = arith.constant 0 : index
    %3 = vector.load %arg3[%c0_2, %c0_3, %c0_4] : memref<9x12x8xbf16, #tpu.memory_space<vmem>>, vector<1x12x8xbf16>
    %4 = vector.shape_cast %3 : vector<1x12x8xbf16> to vector<12x8xbf16>
    %cst = arith.constant dense<0.000000e+00> : vector<12x80xf32>
    %5 = tpu.matmul %4, %2, %cst {dimension_numbers = #tpu.dot_dimension_numbers<[1], [0], [0], [1], [0, 0, 1, 1], [], []>} : vector<12x8xbf16>, vector<8x80xbf16>, vector<12x80xf32> -> vector<12x80xf32>
    %c0_5 = arith.constant 0 : index
    %c0_6 = arith.constant 0 : index
    %c1 = arith.constant 1 : index
    %6 = vector.load %arg1[%c0_5, %c0_6, %c1] : memref<1x8x102xf32, #tpu.memory_space<vmem>>, vector<1x8x80xf32>
    %7 = vector.shape_cast %6 : vector<1x8x80xf32> to vector<8x80xf32>
    %8 = arith.truncf %7 : vector<8x80xf32> to vector<8x80xbf16>
    %c1_7 = arith.constant 1 : index
    %c0_8 = arith.constant 0 : index
    %c0_9 = arith.constant 0 : index
    %9 = vector.load %arg3[%c1_7, %c0_8, %c0_9] : memref<9x12x8xbf16, #tpu.memory_space<vmem>>, vector<1x12x8xbf16>
    %10 = vector.shape_cast %9 : vector<1x12x8xbf16> to vector<12x8xbf16>
    %cst_10 = arith.constant dense<0.000000e+00> : vector<12x80xf32>
    %11 = tpu.matmul %10, %8, %cst_10 {dimension_numbers = #tpu.dot_dimension_numbers<[1], [0], [0], [1], [0, 0, 1, 1], [], []>} : vector<12x8xbf16>, vector<8x80xbf16>, vector<12x80xf32> -> vector<12x80xf32>
    %12 = arith.addf %5, %11 : vector<12x80xf32>
    %c0_11 = arith.constant 0 : index
    %c0_12 = arith.constant 0 : index
    %c2 = arith.constant 2 : index
    %13 = vector.load %arg1[%c0_11, %c0_12, %c2] : memref<1x8x102xf32, #tpu.memory_space<vmem>>, vector<1x8x80xf32>
    %14 = vector.shape_cast %13 : vector<1x8x80xf32> to vector<8x80xf32>
    %15 = arith.truncf %14 : vector<8x80xf32> to vector<8x80xbf16>
    %c2_13 = arith.constant 2 : index
    %c0_14 = arith.constant 0 : index
    %c0_15 = arith.constant 0 : index
    %16 = vector.load %arg3[%c2_13, %c0_14, %c0_15] : memref<9x12x8xbf16, #tpu.memory_space<vmem>>, vector<1x12x8xbf16>
    %17 = vector.shape_cast %16 : vector<1x12x8xbf16> to vector<12x8xbf16>
    %cst_16 = arith.constant dense<0.000000e+00> : vector<12x80xf32>
    %18 = tpu.matmul %17, %15, %cst_16 {dimension_numbers = #tpu.dot_dimension_numbers<[1], [0], [0], [1], [0, 0, 1, 1], [], []>} : vector<12x8xbf16>, vector<8x80xbf16>, vector<12x80xf32> -> vector<12x80xf32>
    %19 = arith.addf %12, %18 : vector<12x80xf32>
    %c0_17 = arith.constant 0 : index
    %c0_18 = arith.constant 0 : index
    %c10 = arith.constant 10 : index
    %20 = vector.load %arg1[%c0_17, %c0_18, %c10] : memref<1x8x102xf32, #tpu.memory_space<vmem>>, vector<1x8x80xf32>
    %21 = vector.shape_cast %20 : vector<1x8x80xf32> to vector<8x80xf32>
    %22 = arith.truncf %21 : vector<8x80xf32> to vector<8x80xbf16>
    %c3 = arith.constant 3 : index
    %c0_19 = arith.constant 0 : index
    %c0_20 = arith.constant 0 : index
    %23 = vector.load %arg3[%c3, %c0_19, %c0_20] : memref<9x12x8xbf16, #tpu.memory_space<vmem>>, vector<1x12x8xbf16>
    %24 = vector.shape_cast %23 : vector<1x12x8xbf16> to vector<12x8xbf16>
    %cst_21 = arith.constant dense<0.000000e+00> : vector<12x80xf32>
    %25 = tpu.matmul %24, %22, %cst_21 {dimension_numbers = #tpu.dot_dimension_numbers<[1], [0], [0], [1], [0, 0, 1, 1], [], []>} : vector<12x8xbf16>, vector<8x80xbf16>, vector<12x80xf32> -> vector<12x80xf32>
    %26 = arith.addf %19, %25 : vector<12x80xf32>
    %c0_22 = arith.constant 0 : index
    %c0_23 = arith.constant 0 : index
    %c11 = arith.constant 11 : index
    %27 = vector.load %arg1[%c0_22, %c0_23, %c11] : memref<1x8x102xf32, #tpu.memory_space<vmem>>, vector<1x8x80xf32>
    %28 = vector.shape_cast %27 : vector<1x8x80xf32> to vector<8x80xf32>
    %29 = arith.truncf %28 : vector<8x80xf32> to vector<8x80xbf16>
    %c4 = arith.constant 4 : index
    %c0_24 = arith.constant 0 : index
    %c0_25 = arith.constant 0 : index
    %30 = vector.load %arg3[%c4, %c0_24, %c0_25] : memref<9x12x8xbf16, #tpu.memory_space<vmem>>, vector<1x12x8xbf16>
    %31 = vector.shape_cast %30 : vector<1x12x8xbf16> to vector<12x8xbf16>
    %cst_26 = arith.constant dense<0.000000e+00> : vector<12x80xf32>
    %32 = tpu.matmul %31, %29, %cst_26 {dimension_numbers = #tpu.dot_dimension_numbers<[1], [0], [0], [1], [0, 0, 1, 1], [], []>} : vector<12x8xbf16>, vector<8x80xbf16>, vector<12x80xf32> -> vector<12x80xf32>
    %33 = arith.addf %26, %32 : vector<12x80xf32>
    %c0_27 = arith.constant 0 : index
    %c0_28 = arith.constant 0 : index
    %c12 = arith.constant 12 : index
    %34 = vector.load %arg1[%c0_27, %c0_28, %c12] : memref<1x8x102xf32, #tpu.memory_space<vmem>>, vector<1x8x80xf32>
    %35 = vector.shape_cast %34 : vector<1x8x80xf32> to vector<8x80xf32>
    %36 = arith.truncf %35 : vector<8x80xf32> to vector<8x80xbf16>
    %c5 = arith.constant 5 : index
    %c0_29 = arith.constant 0 : index
    %c0_30 = arith.constant 0 : index
    %37 = vector.load %arg3[%c5, %c0_29, %c0_30] : memref<9x12x8xbf16, #tpu.memory_space<vmem>>, vector<1x12x8xbf16>
    %38 = vector.shape_cast %37 : vector<1x12x8xbf16> to vector<12x8xbf16>
    %cst_31 = arith.constant dense<0.000000e+00> : vector<12x80xf32>
    %39 = tpu.matmul %38, %36, %cst_31 {dimension_numbers = #tpu.dot_dimension_numbers<[1], [0], [0], [1], [0, 0, 1, 1], [], []>} : vector<12x8xbf16>, vector<8x80xbf16>, vector<12x80xf32> -> vector<12x80xf32>
    %40 = arith.addf %33, %39 : vector<12x80xf32>
    %c0_32 = arith.constant 0 : index
    %c0_33 = arith.constant 0 : index
    %c20 = arith.constant 20 : index
    %41 = vector.load %arg1[%c0_32, %c0_33, %c20] : memref<1x8x102xf32, #tpu.memory_space<vmem>>, vector<1x8x80xf32>
    %42 = vector.shape_cast %41 : vector<1x8x80xf32> to vector<8x80xf32>
    %43 = arith.truncf %42 : vector<8x80xf32> to vector<8x80xbf16>
    %c6 = arith.constant 6 : index
    %c0_34 = arith.constant 0 : index
    %c0_35 = arith.constant 0 : index
    %44 = vector.load %arg3[%c6, %c0_34, %c0_35] : memref<9x12x8xbf16, #tpu.memory_space<vmem>>, vector<1x12x8xbf16>
    %45 = vector.shape_cast %44 : vector<1x12x8xbf16> to vector<12x8xbf16>
    %cst_36 = arith.constant dense<0.000000e+00> : vector<12x80xf32>
    %46 = tpu.matmul %45, %43, %cst_36 {dimension_numbers = #tpu.dot_dimension_numbers<[1], [0], [0], [1], [0, 0, 1, 1], [], []>} : vector<12x8xbf16>, vector<8x80xbf16>, vector<12x80xf32> -> vector<12x80xf32>
    %47 = arith.addf %40, %46 : vector<12x80xf32>
    %c0_37 = arith.constant 0 : index
    %c0_38 = arith.constant 0 : index
    %c21 = arith.constant 21 : index
    %48 = vector.load %arg1[%c0_37, %c0_38, %c21] : memref<1x8x102xf32, #tpu.memory_space<vmem>>, vector<1x8x80xf32>
    %49 = vector.shape_cast %48 : vector<1x8x80xf32> to vector<8x80xf32>
    %50 = arith.truncf %49 : vector<8x80xf32> to vector<8x80xbf16>
    %c7 = arith.constant 7 : index
    %c0_39 = arith.constant 0 : index
    %c0_40 = arith.constant 0 : index
    %51 = vector.load %arg3[%c7, %c0_39, %c0_40] : memref<9x12x8xbf16, #tpu.memory_space<vmem>>, vector<1x12x8xbf16>
    %52 = vector.shape_cast %51 : vector<1x12x8xbf16> to vector<12x8xbf16>
    %cst_41 = arith.constant dense<0.000000e+00> : vector<12x80xf32>
    %53 = tpu.matmul %52, %50, %cst_41 {dimension_numbers = #tpu.dot_dimension_numbers<[1], [0], [0], [1], [0, 0, 1, 1], [], []>} : vector<12x8xbf16>, vector<8x80xbf16>, vector<12x80xf32> -> vector<12x80xf32>
    %54 = arith.addf %47, %53 : vector<12x80xf32>
    %c0_42 = arith.constant 0 : index
    %c0_43 = arith.constant 0 : index
    %c22 = arith.constant 22 : index
    %55 = vector.load %arg1[%c0_42, %c0_43, %c22] : memref<1x8x102xf32, #tpu.memory_space<vmem>>, vector<1x8x80xf32>
    %56 = vector.shape_cast %55 : vector<1x8x80xf32> to vector<8x80xf32>
    %57 = arith.truncf %56 : vector<8x80xf32> to vector<8x80xbf16>
    %c8 = arith.constant 8 : index
    %c0_44 = arith.constant 0 : index
    %c0_45 = arith.constant 0 : index
    %58 = vector.load %arg3[%c8, %c0_44, %c0_45] : memref<9x12x8xbf16, #tpu.memory_space<vmem>>, vector<1x12x8xbf16>
    %59 = vector.shape_cast %58 : vector<1x12x8xbf16> to vector<12x8xbf16>
    %cst_46 = arith.constant dense<0.000000e+00> : vector<12x80xf32>
    %60 = tpu.matmul %59, %57, %cst_46 {dimension_numbers = #tpu.dot_dimension_numbers<[1], [0], [0], [1], [0, 0, 1, 1], [], []>} : vector<12x8xbf16>, vector<8x80xbf16>, vector<12x80xf32> -> vector<12x80xf32>
    %61 = arith.addf %54, %60 : vector<12x80xf32>
    %c0_47 = arith.constant 0 : index
    %c0_48 = arith.constant 0 : index
    %62 = vector.load %arg4[%c0_47, %c0_48] : memref<12x1xf32, #tpu.memory_space<vmem>>, vector<12x1xf32>
    %63 = vector.broadcast %62 : vector<12x1xf32> to vector<12x80xf32>
    %64 = arith.addf %61, %63 : vector<12x80xf32>
    %c0_49 = arith.constant 0 : index
    %c0_50 = arith.constant 0 : index
    %c0_51 = arith.constant 0 : index
    %65 = vector.load %arg2[%c0_49, %c0_50, %c0_51] : memref<1x12x80xf32, #tpu.memory_space<vmem>>, vector<1x12x80xf32>
    %66 = vector.shape_cast %65 : vector<1x12x80xf32> to vector<12x80xf32>
    %67 = arith.subf %66, %64 : vector<12x80xf32>
    %68 = math.roundeven %67 : vector<12x80xf32>
    %69 = arith.addf %68, %64 : vector<12x80xf32>
    %c0_52 = arith.constant 0 : index
    %c0_53 = arith.constant 0 : index
    %c0_54 = arith.constant 0 : index
    %70 = vector.load %arg5[%c0_52, %c0_53, %c0_54] : memref<1x12x80xf32, #tpu.memory_space<vmem>>, vector<1x12x80xf32>
    %71 = vector.shape_cast %70 : vector<1x12x80xf32> to vector<12x80xf32>
    %72 = vector.shape_cast %69 : vector<12x80xf32> to vector<1x12x80xf32>
    tpu.vector_store %arg5[%c0_52, %c0_53, %c0_54], %72 {strides = array<i32>} : memref<1x12x80xf32, #tpu.memory_space<vmem>>, vector<1x12x80xf32>,
    return
  }
  func.func @transform_0(%arg0: i32) -> (i32, i32, i32) {
    %c0_i32 = arith.constant 0 : i32
    %c0_i32_0 = arith.constant 0 : i32
    %c0_i32_1 = arith.constant 0 : i32
    return %arg0, %c0_i32, %c0_i32_0 : i32, i32, i32
  }
  func.func @transform_1(%arg0: i32) -> (i32, i32, i32) {
    %c0_i32 = arith.constant 0 : i32
    %c0_i32_0 = arith.constant 0 : i32
    %c0_i32_1 = arith.constant 0 : i32
    return %arg0, %c0_i32, %c0_i32_0 : i32, i32, i32
  }
  func.func @transform_2(%arg0: i32) -> (i32, i32, i32) {
    %c0_i32 = arith.constant 0 : i32
    %c0_i32_0 = arith.constant 0 : i32
    %c0_i32_1 = arith.constant 0 : i32
    %c0_i32_2 = arith.constant 0 : i32
    return %c0_i32, %c0_i32_0, %c0_i32_1 : i32, i32, i32
  }
  func.func @transform_3(%arg0: i32) -> (i32, i32) {
    %c0_i32 = arith.constant 0 : i32
    %c0_i32_0 = arith.constant 0 : i32
    %c0_i32_1 = arith.constant 0 : i32
    return %c0_i32, %c0_i32_0 : i32, i32
  }
  func.func @transform_4(%arg0: i32) -> (i32, i32, i32) {
    %c0_i32 = arith.constant 0 : i32
    %c0_i32_0 = arith.constant 0 : i32
    %c0_i32_1 = arith.constant 0 : i32
    return %arg0, %c0_i32, %c0_i32_0 : i32, i32, i32
  }
}

module attributes {stable_mosaic.version = 11 : i64} {
  func.func @_deconv_igdn_kernel(%arg0: i32, %arg1: memref<1x12x102xf32, #tpu.memory_space<vmem>>, %arg2: memref<9x32x12xbf16, #tpu.memory_space<vmem>>, %arg3: memref<32x1xf32, #tpu.memory_space<vmem>>, %arg4: memref<8x8xbf16, #tpu.memory_space<vmem>>, %arg5: memref<8x1xf32, #tpu.memory_space<vmem>>, %arg6: memref<1x32x80xf32, #tpu.memory_space<vmem>>) attributes {dimension_semantics = [#tpu.dimension_semantics<parallel>], iteration_bounds = array<i64: 2>, scalar_prefetch = 0 : i64, scratch_operands = 0 : i64, tpu.core_type = #tpu.core_type<tc>, window_params = [{transform_indices = @transform_0, window_bounds = array<i64: 1, 12, 102>}, {pipeline_mode = #tpu.pipeline_mode<synchronous>, transform_indices = @transform_1, window_bounds = array<i64: 9, 32, 12>}, {pipeline_mode = #tpu.pipeline_mode<synchronous>, transform_indices = @transform_2, window_bounds = array<i64: 32, 1>}, {pipeline_mode = #tpu.pipeline_mode<synchronous>, transform_indices = @transform_3, window_bounds = array<i64: 8, 8>}, {pipeline_mode = #tpu.pipeline_mode<synchronous>, transform_indices = @transform_4, window_bounds = array<i64: 8, 1>}, {transform_indices = @transform_5, window_bounds = array<i64: 1, 32, 80>}]} {
    %c0 = arith.constant 0 : index
    %c0_0 = arith.constant 0 : index
    %c0_1 = arith.constant 0 : index
    %0 = vector.load %arg1[%c0, %c0_0, %c0_1] : memref<1x12x102xf32, #tpu.memory_space<vmem>>, vector<1x12x80xf32>
    %1 = vector.shape_cast %0 : vector<1x12x80xf32> to vector<12x80xf32>
    %2 = arith.truncf %1 : vector<12x80xf32> to vector<12x80xbf16>
    %c0_2 = arith.constant 0 : index
    %c0_3 = arith.constant 0 : index
    %c0_4 = arith.constant 0 : index
    %3 = vector.load %arg2[%c0_2, %c0_3, %c0_4] : memref<9x32x12xbf16, #tpu.memory_space<vmem>>, vector<1x32x12xbf16>
    %4 = vector.shape_cast %3 : vector<1x32x12xbf16> to vector<32x12xbf16>
    %cst = arith.constant dense<0.000000e+00> : vector<32x80xf32>
    %5 = tpu.matmul %4, %2, %cst {dimension_numbers = #tpu.dot_dimension_numbers<[1], [0], [0], [1], [0, 0, 1, 1], [], []>} : vector<32x12xbf16>, vector<12x80xbf16>, vector<32x80xf32> -> vector<32x80xf32>
    %c0_5 = arith.constant 0 : index
    %c0_6 = arith.constant 0 : index
    %c1 = arith.constant 1 : index
    %6 = vector.load %arg1[%c0_5, %c0_6, %c1] : memref<1x12x102xf32, #tpu.memory_space<vmem>>, vector<1x12x80xf32>
    %7 = vector.shape_cast %6 : vector<1x12x80xf32> to vector<12x80xf32>
    %8 = arith.truncf %7 : vector<12x80xf32> to vector<12x80xbf16>
    %c1_7 = arith.constant 1 : index
    %c0_8 = arith.constant 0 : index
    %c0_9 = arith.constant 0 : index
    %9 = vector.load %arg2[%c1_7, %c0_8, %c0_9] : memref<9x32x12xbf16, #tpu.memory_space<vmem>>, vector<1x32x12xbf16>
    %10 = vector.shape_cast %9 : vector<1x32x12xbf16> to vector<32x12xbf16>
    %cst_10 = arith.constant dense<0.000000e+00> : vector<32x80xf32>
    %11 = tpu.matmul %10, %8, %cst_10 {dimension_numbers = #tpu.dot_dimension_numbers<[1], [0], [0], [1], [0, 0, 1, 1], [], []>} : vector<32x12xbf16>, vector<12x80xbf16>, vector<32x80xf32> -> vector<32x80xf32>
    %12 = arith.addf %5, %11 : vector<32x80xf32>
    %c0_11 = arith.constant 0 : index
    %c0_12 = arith.constant 0 : index
    %c2 = arith.constant 2 : index
    %13 = vector.load %arg1[%c0_11, %c0_12, %c2] : memref<1x12x102xf32, #tpu.memory_space<vmem>>, vector<1x12x80xf32>
    %14 = vector.shape_cast %13 : vector<1x12x80xf32> to vector<12x80xf32>
    %15 = arith.truncf %14 : vector<12x80xf32> to vector<12x80xbf16>
    %c2_13 = arith.constant 2 : index
    %c0_14 = arith.constant 0 : index
    %c0_15 = arith.constant 0 : index
    %16 = vector.load %arg2[%c2_13, %c0_14, %c0_15] : memref<9x32x12xbf16, #tpu.memory_space<vmem>>, vector<1x32x12xbf16>
    %17 = vector.shape_cast %16 : vector<1x32x12xbf16> to vector<32x12xbf16>
    %cst_16 = arith.constant dense<0.000000e+00> : vector<32x80xf32>
    %18 = tpu.matmul %17, %15, %cst_16 {dimension_numbers = #tpu.dot_dimension_numbers<[1], [0], [0], [1], [0, 0, 1, 1], [], []>} : vector<32x12xbf16>, vector<12x80xbf16>, vector<32x80xf32> -> vector<32x80xf32>
    %19 = arith.addf %12, %18 : vector<32x80xf32>
    %c0_17 = arith.constant 0 : index
    %c0_18 = arith.constant 0 : index
    %c10 = arith.constant 10 : index
    %20 = vector.load %arg1[%c0_17, %c0_18, %c10] : memref<1x12x102xf32, #tpu.memory_space<vmem>>, vector<1x12x80xf32>
    %21 = vector.shape_cast %20 : vector<1x12x80xf32> to vector<12x80xf32>
    %22 = arith.truncf %21 : vector<12x80xf32> to vector<12x80xbf16>
    %c3 = arith.constant 3 : index
    %c0_19 = arith.constant 0 : index
    %c0_20 = arith.constant 0 : index
    %23 = vector.load %arg2[%c3, %c0_19, %c0_20] : memref<9x32x12xbf16, #tpu.memory_space<vmem>>, vector<1x32x12xbf16>
    %24 = vector.shape_cast %23 : vector<1x32x12xbf16> to vector<32x12xbf16>
    %cst_21 = arith.constant dense<0.000000e+00> : vector<32x80xf32>
    %25 = tpu.matmul %24, %22, %cst_21 {dimension_numbers = #tpu.dot_dimension_numbers<[1], [0], [0], [1], [0, 0, 1, 1], [], []>} : vector<32x12xbf16>, vector<12x80xbf16>, vector<32x80xf32> -> vector<32x80xf32>
    %26 = arith.addf %19, %25 : vector<32x80xf32>
    %c0_22 = arith.constant 0 : index
    %c0_23 = arith.constant 0 : index
    %c11 = arith.constant 11 : index
    %27 = vector.load %arg1[%c0_22, %c0_23, %c11] : memref<1x12x102xf32, #tpu.memory_space<vmem>>, vector<1x12x80xf32>
    %28 = vector.shape_cast %27 : vector<1x12x80xf32> to vector<12x80xf32>
    %29 = arith.truncf %28 : vector<12x80xf32> to vector<12x80xbf16>
    %c4 = arith.constant 4 : index
    %c0_24 = arith.constant 0 : index
    %c0_25 = arith.constant 0 : index
    %30 = vector.load %arg2[%c4, %c0_24, %c0_25] : memref<9x32x12xbf16, #tpu.memory_space<vmem>>, vector<1x32x12xbf16>
    %31 = vector.shape_cast %30 : vector<1x32x12xbf16> to vector<32x12xbf16>
    %cst_26 = arith.constant dense<0.000000e+00> : vector<32x80xf32>
    %32 = tpu.matmul %31, %29, %cst_26 {dimension_numbers = #tpu.dot_dimension_numbers<[1], [0], [0], [1], [0, 0, 1, 1], [], []>} : vector<32x12xbf16>, vector<12x80xbf16>, vector<32x80xf32> -> vector<32x80xf32>
    %33 = arith.addf %26, %32 : vector<32x80xf32>
    %c0_27 = arith.constant 0 : index
    %c0_28 = arith.constant 0 : index
    %c12 = arith.constant 12 : index
    %34 = vector.load %arg1[%c0_27, %c0_28, %c12] : memref<1x12x102xf32, #tpu.memory_space<vmem>>, vector<1x12x80xf32>
    %35 = vector.shape_cast %34 : vector<1x12x80xf32> to vector<12x80xf32>
    %36 = arith.truncf %35 : vector<12x80xf32> to vector<12x80xbf16>
    %c5 = arith.constant 5 : index
    %c0_29 = arith.constant 0 : index
    %c0_30 = arith.constant 0 : index
    %37 = vector.load %arg2[%c5, %c0_29, %c0_30] : memref<9x32x12xbf16, #tpu.memory_space<vmem>>, vector<1x32x12xbf16>
    %38 = vector.shape_cast %37 : vector<1x32x12xbf16> to vector<32x12xbf16>
    %cst_31 = arith.constant dense<0.000000e+00> : vector<32x80xf32>
    %39 = tpu.matmul %38, %36, %cst_31 {dimension_numbers = #tpu.dot_dimension_numbers<[1], [0], [0], [1], [0, 0, 1, 1], [], []>} : vector<32x12xbf16>, vector<12x80xbf16>, vector<32x80xf32> -> vector<32x80xf32>
    %40 = arith.addf %33, %39 : vector<32x80xf32>
    %c0_32 = arith.constant 0 : index
    %c0_33 = arith.constant 0 : index
    %c20 = arith.constant 20 : index
    %41 = vector.load %arg1[%c0_32, %c0_33, %c20] : memref<1x12x102xf32, #tpu.memory_space<vmem>>, vector<1x12x80xf32>
    %42 = vector.shape_cast %41 : vector<1x12x80xf32> to vector<12x80xf32>
    %43 = arith.truncf %42 : vector<12x80xf32> to vector<12x80xbf16>
    %c6 = arith.constant 6 : index
    %c0_34 = arith.constant 0 : index
    %c0_35 = arith.constant 0 : index
    %44 = vector.load %arg2[%c6, %c0_34, %c0_35] : memref<9x32x12xbf16, #tpu.memory_space<vmem>>, vector<1x32x12xbf16>
    %45 = vector.shape_cast %44 : vector<1x32x12xbf16> to vector<32x12xbf16>
    %cst_36 = arith.constant dense<0.000000e+00> : vector<32x80xf32>
    %46 = tpu.matmul %45, %43, %cst_36 {dimension_numbers = #tpu.dot_dimension_numbers<[1], [0], [0], [1], [0, 0, 1, 1], [], []>} : vector<32x12xbf16>, vector<12x80xbf16>, vector<32x80xf32> -> vector<32x80xf32>
    %47 = arith.addf %40, %46 : vector<32x80xf32>
    %c0_37 = arith.constant 0 : index
    %c0_38 = arith.constant 0 : index
    %c21 = arith.constant 21 : index
    %48 = vector.load %arg1[%c0_37, %c0_38, %c21] : memref<1x12x102xf32, #tpu.memory_space<vmem>>, vector<1x12x80xf32>
    %49 = vector.shape_cast %48 : vector<1x12x80xf32> to vector<12x80xf32>
    %50 = arith.truncf %49 : vector<12x80xf32> to vector<12x80xbf16>
    %c7 = arith.constant 7 : index
    %c0_39 = arith.constant 0 : index
    %c0_40 = arith.constant 0 : index
    %51 = vector.load %arg2[%c7, %c0_39, %c0_40] : memref<9x32x12xbf16, #tpu.memory_space<vmem>>, vector<1x32x12xbf16>
    %52 = vector.shape_cast %51 : vector<1x32x12xbf16> to vector<32x12xbf16>
    %cst_41 = arith.constant dense<0.000000e+00> : vector<32x80xf32>
    %53 = tpu.matmul %52, %50, %cst_41 {dimension_numbers = #tpu.dot_dimension_numbers<[1], [0], [0], [1], [0, 0, 1, 1], [], []>} : vector<32x12xbf16>, vector<12x80xbf16>, vector<32x80xf32> -> vector<32x80xf32>
    %54 = arith.addf %47, %53 : vector<32x80xf32>
    %c0_42 = arith.constant 0 : index
    %c0_43 = arith.constant 0 : index
    %c22 = arith.constant 22 : index
    %55 = vector.load %arg1[%c0_42, %c0_43, %c22] : memref<1x12x102xf32, #tpu.memory_space<vmem>>, vector<1x12x80xf32>
    %56 = vector.shape_cast %55 : vector<1x12x80xf32> to vector<12x80xf32>
    %57 = arith.truncf %56 : vector<12x80xf32> to vector<12x80xbf16>
    %c8 = arith.constant 8 : index
    %c0_44 = arith.constant 0 : index
    %c0_45 = arith.constant 0 : index
    %58 = vector.load %arg2[%c8, %c0_44, %c0_45] : memref<9x32x12xbf16, #tpu.memory_space<vmem>>, vector<1x32x12xbf16>
    %59 = vector.shape_cast %58 : vector<1x32x12xbf16> to vector<32x12xbf16>
    %cst_46 = arith.constant dense<0.000000e+00> : vector<32x80xf32>
    %60 = tpu.matmul %59, %57, %cst_46 {dimension_numbers = #tpu.dot_dimension_numbers<[1], [0], [0], [1], [0, 0, 1, 1], [], []>} : vector<32x12xbf16>, vector<12x80xbf16>, vector<32x80xf32> -> vector<32x80xf32>
    %61 = arith.addf %54, %60 : vector<32x80xf32>
    %c0_47 = arith.constant 0 : index
    %c0_48 = arith.constant 0 : index
    %62 = vector.load %arg3[%c0_47, %c0_48] : memref<32x1xf32, #tpu.memory_space<vmem>>, vector<32x1xf32>
    %63 = vector.broadcast %62 : vector<32x1xf32> to vector<32x80xf32>
    %64 = arith.addf %61, %63 : vector<32x80xf32>
    %c0_49 = arith.constant 0 : index
    %c0_50 = arith.constant 0 : index
    %65 = vector.load %arg4[%c0_49, %c0_50] : memref<8x8xbf16, #tpu.memory_space<vmem>>, vector<8x8xbf16>
    %c0_51 = arith.constant 0 : index
    %c0_52 = arith.constant 0 : index
    %66 = vector.load %arg5[%c0_51, %c0_52] : memref<8x1xf32, #tpu.memory_space<vmem>>, vector<8x1xf32>
    %67 = vector.extract_strided_slice %64 {offsets = [0, 0], sizes = [8, 80], strides = [1, 1]} : vector<32x80xf32> to vector<8x80xf32>
    %68 = arith.mulf %67, %67 : vector<8x80xf32>
    %69 = arith.truncf %68 : vector<8x80xf32> to vector<8x80xbf16>
    %cst_53 = arith.constant dense<0.000000e+00> : vector<8x80xf32>
    %70 = tpu.matmul %65, %69, %cst_53 {dimension_numbers = #tpu.dot_dimension_numbers<[1], [0], [0], [1], [0, 0, 1, 1], [], []>} : vector<8x8xbf16>, vector<8x80xbf16>, vector<8x80xf32> -> vector<8x80xf32>
    %71 = vector.broadcast %66 : vector<8x1xf32> to vector<8x80xf32>
    %72 = arith.addf %71, %70 : vector<8x80xf32>
    %73 = math.sqrt %72 : vector<8x80xf32>
    %74 = arith.mulf %67, %73 : vector<8x80xf32>
    %c0_54 = arith.constant 0 : index
    %c0_55 = arith.constant 0 : index
    %c0_56 = arith.constant 0 : index
    %75 = vector.load %arg6[%c0_54, %c0_55, %c0_56] : memref<1x32x80xf32, #tpu.memory_space<vmem>>, vector<1x8x80xf32>
    %76 = vector.shape_cast %75 : vector<1x8x80xf32> to vector<8x80xf32>
    %77 = vector.shape_cast %74 : vector<8x80xf32> to vector<1x8x80xf32>
    tpu.vector_store %arg6[%c0_54, %c0_55, %c0_56], %77 {strides = array<i32>} : memref<1x32x80xf32, #tpu.memory_space<vmem>>, vector<1x8x80xf32>,
    %78 = vector.extract_strided_slice %64 {offsets = [8, 0], sizes = [8, 80], strides = [1, 1]} : vector<32x80xf32> to vector<8x80xf32>
    %79 = arith.mulf %78, %78 : vector<8x80xf32>
    %80 = arith.truncf %79 : vector<8x80xf32> to vector<8x80xbf16>
    %cst_57 = arith.constant dense<0.000000e+00> : vector<8x80xf32>
    %81 = tpu.matmul %65, %80, %cst_57 {dimension_numbers = #tpu.dot_dimension_numbers<[1], [0], [0], [1], [0, 0, 1, 1], [], []>} : vector<8x8xbf16>, vector<8x80xbf16>, vector<8x80xf32> -> vector<8x80xf32>
    %82 = vector.broadcast %66 : vector<8x1xf32> to vector<8x80xf32>
    %83 = arith.addf %82, %81 : vector<8x80xf32>
    %84 = math.sqrt %83 : vector<8x80xf32>
    %85 = arith.mulf %78, %84 : vector<8x80xf32>
    %c0_58 = arith.constant 0 : index
    %c8_59 = arith.constant 8 : index
    %c0_60 = arith.constant 0 : index
    %86 = vector.load %arg6[%c0_58, %c8_59, %c0_60] : memref<1x32x80xf32, #tpu.memory_space<vmem>>, vector<1x8x80xf32>
    %87 = vector.shape_cast %86 : vector<1x8x80xf32> to vector<8x80xf32>
    %88 = vector.shape_cast %85 : vector<8x80xf32> to vector<1x8x80xf32>
    tpu.vector_store %arg6[%c0_58, %c8_59, %c0_60], %88 {strides = array<i32>} : memref<1x32x80xf32, #tpu.memory_space<vmem>>, vector<1x8x80xf32>,
    %89 = vector.extract_strided_slice %64 {offsets = [16, 0], sizes = [8, 80], strides = [1, 1]} : vector<32x80xf32> to vector<8x80xf32>
    %90 = arith.mulf %89, %89 : vector<8x80xf32>
    %91 = arith.truncf %90 : vector<8x80xf32> to vector<8x80xbf16>
    %cst_61 = arith.constant dense<0.000000e+00> : vector<8x80xf32>
    %92 = tpu.matmul %65, %91, %cst_61 {dimension_numbers = #tpu.dot_dimension_numbers<[1], [0], [0], [1], [0, 0, 1, 1], [], []>} : vector<8x8xbf16>, vector<8x80xbf16>, vector<8x80xf32> -> vector<8x80xf32>
    %93 = vector.broadcast %66 : vector<8x1xf32> to vector<8x80xf32>
    %94 = arith.addf %93, %92 : vector<8x80xf32>
    %95 = math.sqrt %94 : vector<8x80xf32>
    %96 = arith.mulf %89, %95 : vector<8x80xf32>
    %c0_62 = arith.constant 0 : index
    %c16 = arith.constant 16 : index
    %c0_63 = arith.constant 0 : index
    %97 = vector.load %arg6[%c0_62, %c16, %c0_63] : memref<1x32x80xf32, #tpu.memory_space<vmem>>, vector<1x8x80xf32>
    %98 = vector.shape_cast %97 : vector<1x8x80xf32> to vector<8x80xf32>
    %99 = vector.shape_cast %96 : vector<8x80xf32> to vector<1x8x80xf32>
    tpu.vector_store %arg6[%c0_62, %c16, %c0_63], %99 {strides = array<i32>} : memref<1x32x80xf32, #tpu.memory_space<vmem>>, vector<1x8x80xf32>,
    %100 = vector.extract_strided_slice %64 {offsets = [24, 0], sizes = [8, 80], strides = [1, 1]} : vector<32x80xf32> to vector<8x80xf32>
    %101 = arith.mulf %100, %100 : vector<8x80xf32>
    %102 = arith.truncf %101 : vector<8x80xf32> to vector<8x80xbf16>
    %cst_64 = arith.constant dense<0.000000e+00> : vector<8x80xf32>
    %103 = tpu.matmul %65, %102, %cst_64 {dimension_numbers = #tpu.dot_dimension_numbers<[1], [0], [0], [1], [0, 0, 1, 1], [], []>} : vector<8x8xbf16>, vector<8x80xbf16>, vector<8x80xf32> -> vector<8x80xf32>
    %104 = vector.broadcast %66 : vector<8x1xf32> to vector<8x80xf32>
    %105 = arith.addf %104, %103 : vector<8x80xf32>
    %106 = math.sqrt %105 : vector<8x80xf32>
    %107 = arith.mulf %100, %106 : vector<8x80xf32>
    %c0_65 = arith.constant 0 : index
    %c24 = arith.constant 24 : index
    %c0_66 = arith.constant 0 : index
    %108 = vector.load %arg6[%c0_65, %c24, %c0_66] : memref<1x32x80xf32, #tpu.memory_space<vmem>>, vector<1x8x80xf32>
    %109 = vector.shape_cast %108 : vector<1x8x80xf32> to vector<8x80xf32>
    %110 = vector.shape_cast %107 : vector<8x80xf32> to vector<1x8x80xf32>
    tpu.vector_store %arg6[%c0_65, %c24, %c0_66], %110 {strides = array<i32>} : memref<1x32x80xf32, #tpu.memory_space<vmem>>, vector<1x8x80xf32>,
    return
  }
  func.func @transform_0(%arg0: i32) -> (i32, i32, i32) {
    %c0_i32 = arith.constant 0 : i32
    %c0_i32_0 = arith.constant 0 : i32
    %c0_i32_1 = arith.constant 0 : i32
    return %arg0, %c0_i32, %c0_i32_0 : i32, i32, i32
  }
  func.func @transform_1(%arg0: i32) -> (i32, i32, i32) {
    %c0_i32 = arith.constant 0 : i32
    %c0_i32_0 = arith.constant 0 : i32
    %c0_i32_1 = arith.constant 0 : i32
    %c0_i32_2 = arith.constant 0 : i32
    return %c0_i32, %c0_i32_0, %c0_i32_1 : i32, i32, i32
  }
  func.func @transform_2(%arg0: i32) -> (i32, i32) {
    %c0_i32 = arith.constant 0 : i32
    %c0_i32_0 = arith.constant 0 : i32
    %c0_i32_1 = arith.constant 0 : i32
    return %c0_i32, %c0_i32_0 : i32, i32
  }
  func.func @transform_3(%arg0: i32) -> (i32, i32) {
    %c0_i32 = arith.constant 0 : i32
    %c0_i32_0 = arith.constant 0 : i32
    %c0_i32_1 = arith.constant 0 : i32
    return %c0_i32, %c0_i32_0 : i32, i32
  }
  func.func @transform_4(%arg0: i32) -> (i32, i32) {
    %c0_i32 = arith.constant 0 : i32
    %c0_i32_0 = arith.constant 0 : i32
    %c0_i32_1 = arith.constant 0 : i32
    return %c0_i32, %c0_i32_0 : i32, i32
  }
  func.func @transform_5(%arg0: i32) -> (i32, i32, i32) {
    %c0_i32 = arith.constant 0 : i32
    %c0_i32_0 = arith.constant 0 : i32
    %c0_i32_1 = arith.constant 0 : i32
    return %arg0, %c0_i32, %c0_i32_0 : i32, i32, i32
  }
}

module attributes {stable_mosaic.version = 11 : i64} {
  func.func @_deconv_igdn_kernel(%arg0: i32, %arg1: memref<1x8x326xf32, #tpu.memory_space<vmem>>, %arg2: memref<9x32x8xbf16, #tpu.memory_space<vmem>>, %arg3: memref<32x1xf32, #tpu.memory_space<vmem>>, %arg4: memref<8x8xbf16, #tpu.memory_space<vmem>>, %arg5: memref<8x1xf32, #tpu.memory_space<vmem>>, %arg6: memref<1x32x288xf32, #tpu.memory_space<vmem>>) attributes {dimension_semantics = [#tpu.dimension_semantics<parallel>], iteration_bounds = array<i64: 2>, scalar_prefetch = 0 : i64, scratch_operands = 0 : i64, tpu.core_type = #tpu.core_type<tc>, window_params = [{transform_indices = @transform_0, window_bounds = array<i64: 1, 8, 326>}, {pipeline_mode = #tpu.pipeline_mode<synchronous>, transform_indices = @transform_1, window_bounds = array<i64: 9, 32, 8>}, {pipeline_mode = #tpu.pipeline_mode<synchronous>, transform_indices = @transform_2, window_bounds = array<i64: 32, 1>}, {pipeline_mode = #tpu.pipeline_mode<synchronous>, transform_indices = @transform_3, window_bounds = array<i64: 8, 8>}, {pipeline_mode = #tpu.pipeline_mode<synchronous>, transform_indices = @transform_4, window_bounds = array<i64: 8, 1>}, {transform_indices = @transform_5, window_bounds = array<i64: 1, 32, 288>}]} {
    %c0 = arith.constant 0 : index
    %c0_0 = arith.constant 0 : index
    %c0_1 = arith.constant 0 : index
    %0 = vector.load %arg1[%c0, %c0_0, %c0_1] : memref<1x8x326xf32, #tpu.memory_space<vmem>>, vector<1x8x288xf32>
    %1 = vector.shape_cast %0 : vector<1x8x288xf32> to vector<8x288xf32>
    %2 = arith.truncf %1 : vector<8x288xf32> to vector<8x288xbf16>
    %c0_2 = arith.constant 0 : index
    %c0_3 = arith.constant 0 : index
    %c0_4 = arith.constant 0 : index
    %3 = vector.load %arg2[%c0_2, %c0_3, %c0_4] : memref<9x32x8xbf16, #tpu.memory_space<vmem>>, vector<1x32x8xbf16>
    %4 = vector.shape_cast %3 : vector<1x32x8xbf16> to vector<32x8xbf16>
    %cst = arith.constant dense<0.000000e+00> : vector<32x288xf32>
    %5 = tpu.matmul %4, %2, %cst {dimension_numbers = #tpu.dot_dimension_numbers<[1], [0], [0], [1], [0, 0, 1, 1], [], []>} : vector<32x8xbf16>, vector<8x288xbf16>, vector<32x288xf32> -> vector<32x288xf32>
    %c0_5 = arith.constant 0 : index
    %c0_6 = arith.constant 0 : index
    %c1 = arith.constant 1 : index
    %6 = vector.load %arg1[%c0_5, %c0_6, %c1] : memref<1x8x326xf32, #tpu.memory_space<vmem>>, vector<1x8x288xf32>
    %7 = vector.shape_cast %6 : vector<1x8x288xf32> to vector<8x288xf32>
    %8 = arith.truncf %7 : vector<8x288xf32> to vector<8x288xbf16>
    %c1_7 = arith.constant 1 : index
    %c0_8 = arith.constant 0 : index
    %c0_9 = arith.constant 0 : index
    %9 = vector.load %arg2[%c1_7, %c0_8, %c0_9] : memref<9x32x8xbf16, #tpu.memory_space<vmem>>, vector<1x32x8xbf16>
    %10 = vector.shape_cast %9 : vector<1x32x8xbf16> to vector<32x8xbf16>
    %cst_10 = arith.constant dense<0.000000e+00> : vector<32x288xf32>
    %11 = tpu.matmul %10, %8, %cst_10 {dimension_numbers = #tpu.dot_dimension_numbers<[1], [0], [0], [1], [0, 0, 1, 1], [], []>} : vector<32x8xbf16>, vector<8x288xbf16>, vector<32x288xf32> -> vector<32x288xf32>
    %12 = arith.addf %5, %11 : vector<32x288xf32>
    %c0_11 = arith.constant 0 : index
    %c0_12 = arith.constant 0 : index
    %c2 = arith.constant 2 : index
    %13 = vector.load %arg1[%c0_11, %c0_12, %c2] : memref<1x8x326xf32, #tpu.memory_space<vmem>>, vector<1x8x288xf32>
    %14 = vector.shape_cast %13 : vector<1x8x288xf32> to vector<8x288xf32>
    %15 = arith.truncf %14 : vector<8x288xf32> to vector<8x288xbf16>
    %c2_13 = arith.constant 2 : index
    %c0_14 = arith.constant 0 : index
    %c0_15 = arith.constant 0 : index
    %16 = vector.load %arg2[%c2_13, %c0_14, %c0_15] : memref<9x32x8xbf16, #tpu.memory_space<vmem>>, vector<1x32x8xbf16>
    %17 = vector.shape_cast %16 : vector<1x32x8xbf16> to vector<32x8xbf16>
    %cst_16 = arith.constant dense<0.000000e+00> : vector<32x288xf32>
    %18 = tpu.matmul %17, %15, %cst_16 {dimension_numbers = #tpu.dot_dimension_numbers<[1], [0], [0], [1], [0, 0, 1, 1], [], []>} : vector<32x8xbf16>, vector<8x288xbf16>, vector<32x288xf32> -> vector<32x288xf32>
    %19 = arith.addf %12, %18 : vector<32x288xf32>
    %c0_17 = arith.constant 0 : index
    %c0_18 = arith.constant 0 : index
    %c18 = arith.constant 18 : index
    %20 = vector.load %arg1[%c0_17, %c0_18, %c18] : memref<1x8x326xf32, #tpu.memory_space<vmem>>, vector<1x8x288xf32>
    %21 = vector.shape_cast %20 : vector<1x8x288xf32> to vector<8x288xf32>
    %22 = arith.truncf %21 : vector<8x288xf32> to vector<8x288xbf16>
    %c3 = arith.constant 3 : index
    %c0_19 = arith.constant 0 : index
    %c0_20 = arith.constant 0 : index
    %23 = vector.load %arg2[%c3, %c0_19, %c0_20] : memref<9x32x8xbf16, #tpu.memory_space<vmem>>, vector<1x32x8xbf16>
    %24 = vector.shape_cast %23 : vector<1x32x8xbf16> to vector<32x8xbf16>
    %cst_21 = arith.constant dense<0.000000e+00> : vector<32x288xf32>
    %25 = tpu.matmul %24, %22, %cst_21 {dimension_numbers = #tpu.dot_dimension_numbers<[1], [0], [0], [1], [0, 0, 1, 1], [], []>} : vector<32x8xbf16>, vector<8x288xbf16>, vector<32x288xf32> -> vector<32x288xf32>
    %26 = arith.addf %19, %25 : vector<32x288xf32>
    %c0_22 = arith.constant 0 : index
    %c0_23 = arith.constant 0 : index
    %c19 = arith.constant 19 : index
    %27 = vector.load %arg1[%c0_22, %c0_23, %c19] : memref<1x8x326xf32, #tpu.memory_space<vmem>>, vector<1x8x288xf32>
    %28 = vector.shape_cast %27 : vector<1x8x288xf32> to vector<8x288xf32>
    %29 = arith.truncf %28 : vector<8x288xf32> to vector<8x288xbf16>
    %c4 = arith.constant 4 : index
    %c0_24 = arith.constant 0 : index
    %c0_25 = arith.constant 0 : index
    %30 = vector.load %arg2[%c4, %c0_24, %c0_25] : memref<9x32x8xbf16, #tpu.memory_space<vmem>>, vector<1x32x8xbf16>
    %31 = vector.shape_cast %30 : vector<1x32x8xbf16> to vector<32x8xbf16>
    %cst_26 = arith.constant dense<0.000000e+00> : vector<32x288xf32>
    %32 = tpu.matmul %31, %29, %cst_26 {dimension_numbers = #tpu.dot_dimension_numbers<[1], [0], [0], [1], [0, 0, 1, 1], [], []>} : vector<32x8xbf16>, vector<8x288xbf16>, vector<32x288xf32> -> vector<32x288xf32>
    %33 = arith.addf %26, %32 : vector<32x288xf32>
    %c0_27 = arith.constant 0 : index
    %c0_28 = arith.constant 0 : index
    %c20 = arith.constant 20 : index
    %34 = vector.load %arg1[%c0_27, %c0_28, %c20] : memref<1x8x326xf32, #tpu.memory_space<vmem>>, vector<1x8x288xf32>
    %35 = vector.shape_cast %34 : vector<1x8x288xf32> to vector<8x288xf32>
    %36 = arith.truncf %35 : vector<8x288xf32> to vector<8x288xbf16>
    %c5 = arith.constant 5 : index
    %c0_29 = arith.constant 0 : index
    %c0_30 = arith.constant 0 : index
    %37 = vector.load %arg2[%c5, %c0_29, %c0_30] : memref<9x32x8xbf16, #tpu.memory_space<vmem>>, vector<1x32x8xbf16>
    %38 = vector.shape_cast %37 : vector<1x32x8xbf16> to vector<32x8xbf16>
    %cst_31 = arith.constant dense<0.000000e+00> : vector<32x288xf32>
    %39 = tpu.matmul %38, %36, %cst_31 {dimension_numbers = #tpu.dot_dimension_numbers<[1], [0], [0], [1], [0, 0, 1, 1], [], []>} : vector<32x8xbf16>, vector<8x288xbf16>, vector<32x288xf32> -> vector<32x288xf32>
    %40 = arith.addf %33, %39 : vector<32x288xf32>
    %c0_32 = arith.constant 0 : index
    %c0_33 = arith.constant 0 : index
    %c36 = arith.constant 36 : index
    %41 = vector.load %arg1[%c0_32, %c0_33, %c36] : memref<1x8x326xf32, #tpu.memory_space<vmem>>, vector<1x8x288xf32>
    %42 = vector.shape_cast %41 : vector<1x8x288xf32> to vector<8x288xf32>
    %43 = arith.truncf %42 : vector<8x288xf32> to vector<8x288xbf16>
    %c6 = arith.constant 6 : index
    %c0_34 = arith.constant 0 : index
    %c0_35 = arith.constant 0 : index
    %44 = vector.load %arg2[%c6, %c0_34, %c0_35] : memref<9x32x8xbf16, #tpu.memory_space<vmem>>, vector<1x32x8xbf16>
    %45 = vector.shape_cast %44 : vector<1x32x8xbf16> to vector<32x8xbf16>
    %cst_36 = arith.constant dense<0.000000e+00> : vector<32x288xf32>
    %46 = tpu.matmul %45, %43, %cst_36 {dimension_numbers = #tpu.dot_dimension_numbers<[1], [0], [0], [1], [0, 0, 1, 1], [], []>} : vector<32x8xbf16>, vector<8x288xbf16>, vector<32x288xf32> -> vector<32x288xf32>
    %47 = arith.addf %40, %46 : vector<32x288xf32>
    %c0_37 = arith.constant 0 : index
    %c0_38 = arith.constant 0 : index
    %c37 = arith.constant 37 : index
    %48 = vector.load %arg1[%c0_37, %c0_38, %c37] : memref<1x8x326xf32, #tpu.memory_space<vmem>>, vector<1x8x288xf32>
    %49 = vector.shape_cast %48 : vector<1x8x288xf32> to vector<8x288xf32>
    %50 = arith.truncf %49 : vector<8x288xf32> to vector<8x288xbf16>
    %c7 = arith.constant 7 : index
    %c0_39 = arith.constant 0 : index
    %c0_40 = arith.constant 0 : index
    %51 = vector.load %arg2[%c7, %c0_39, %c0_40] : memref<9x32x8xbf16, #tpu.memory_space<vmem>>, vector<1x32x8xbf16>
    %52 = vector.shape_cast %51 : vector<1x32x8xbf16> to vector<32x8xbf16>
    %cst_41 = arith.constant dense<0.000000e+00> : vector<32x288xf32>
    %53 = tpu.matmul %52, %50, %cst_41 {dimension_numbers = #tpu.dot_dimension_numbers<[1], [0], [0], [1], [0, 0, 1, 1], [], []>} : vector<32x8xbf16>, vector<8x288xbf16>, vector<32x288xf32> -> vector<32x288xf32>
    %54 = arith.addf %47, %53 : vector<32x288xf32>
    %c0_42 = arith.constant 0 : index
    %c0_43 = arith.constant 0 : index
    %c38 = arith.constant 38 : index
    %55 = vector.load %arg1[%c0_42, %c0_43, %c38] : memref<1x8x326xf32, #tpu.memory_space<vmem>>, vector<1x8x288xf32>
    %56 = vector.shape_cast %55 : vector<1x8x288xf32> to vector<8x288xf32>
    %57 = arith.truncf %56 : vector<8x288xf32> to vector<8x288xbf16>
    %c8 = arith.constant 8 : index
    %c0_44 = arith.constant 0 : index
    %c0_45 = arith.constant 0 : index
    %58 = vector.load %arg2[%c8, %c0_44, %c0_45] : memref<9x32x8xbf16, #tpu.memory_space<vmem>>, vector<1x32x8xbf16>
    %59 = vector.shape_cast %58 : vector<1x32x8xbf16> to vector<32x8xbf16>
    %cst_46 = arith.constant dense<0.000000e+00> : vector<32x288xf32>
    %60 = tpu.matmul %59, %57, %cst_46 {dimension_numbers = #tpu.dot_dimension_numbers<[1], [0], [0], [1], [0, 0, 1, 1], [], []>} : vector<32x8xbf16>, vector<8x288xbf16>, vector<32x288xf32> -> vector<32x288xf32>
    %61 = arith.addf %54, %60 : vector<32x288xf32>
    %c0_47 = arith.constant 0 : index
    %c0_48 = arith.constant 0 : index
    %62 = vector.load %arg3[%c0_47, %c0_48] : memref<32x1xf32, #tpu.memory_space<vmem>>, vector<32x1xf32>
    %63 = vector.broadcast %62 : vector<32x1xf32> to vector<32x288xf32>
    %64 = arith.addf %61, %63 : vector<32x288xf32>
    %c0_49 = arith.constant 0 : index
    %c0_50 = arith.constant 0 : index
    %65 = vector.load %arg4[%c0_49, %c0_50] : memref<8x8xbf16, #tpu.memory_space<vmem>>, vector<8x8xbf16>
    %c0_51 = arith.constant 0 : index
    %c0_52 = arith.constant 0 : index
    %66 = vector.load %arg5[%c0_51, %c0_52] : memref<8x1xf32, #tpu.memory_space<vmem>>, vector<8x1xf32>
    %67 = vector.extract_strided_slice %64 {offsets = [0, 0], sizes = [8, 288], strides = [1, 1]} : vector<32x288xf32> to vector<8x288xf32>
    %68 = arith.mulf %67, %67 : vector<8x288xf32>
    %69 = arith.truncf %68 : vector<8x288xf32> to vector<8x288xbf16>
    %cst_53 = arith.constant dense<0.000000e+00> : vector<8x288xf32>
    %70 = tpu.matmul %65, %69, %cst_53 {dimension_numbers = #tpu.dot_dimension_numbers<[1], [0], [0], [1], [0, 0, 1, 1], [], []>} : vector<8x8xbf16>, vector<8x288xbf16>, vector<8x288xf32> -> vector<8x288xf32>
    %71 = vector.broadcast %66 : vector<8x1xf32> to vector<8x288xf32>
    %72 = arith.addf %71, %70 : vector<8x288xf32>
    %73 = math.sqrt %72 : vector<8x288xf32>
    %74 = arith.mulf %67, %73 : vector<8x288xf32>
    %c0_54 = arith.constant 0 : index
    %c0_55 = arith.constant 0 : index
    %c0_56 = arith.constant 0 : index
    %75 = vector.load %arg6[%c0_54, %c0_55, %c0_56] : memref<1x32x288xf32, #tpu.memory_space<vmem>>, vector<1x8x288xf32>
    %76 = vector.shape_cast %75 : vector<1x8x288xf32> to vector<8x288xf32>
    %77 = vector.shape_cast %74 : vector<8x288xf32> to vector<1x8x288xf32>
    tpu.vector_store %arg6[%c0_54, %c0_55, %c0_56], %77 {strides = array<i32>} : memref<1x32x288xf32, #tpu.memory_space<vmem>>, vector<1x8x288xf32>,
    %78 = vector.extract_strided_slice %64 {offsets = [8, 0], sizes = [8, 288], strides = [1, 1]} : vector<32x288xf32> to vector<8x288xf32>
    %79 = arith.mulf %78, %78 : vector<8x288xf32>
    %80 = arith.truncf %79 : vector<8x288xf32> to vector<8x288xbf16>
    %cst_57 = arith.constant dense<0.000000e+00> : vector<8x288xf32>
    %81 = tpu.matmul %65, %80, %cst_57 {dimension_numbers = #tpu.dot_dimension_numbers<[1], [0], [0], [1], [0, 0, 1, 1], [], []>} : vector<8x8xbf16>, vector<8x288xbf16>, vector<8x288xf32> -> vector<8x288xf32>
    %82 = vector.broadcast %66 : vector<8x1xf32> to vector<8x288xf32>
    %83 = arith.addf %82, %81 : vector<8x288xf32>
    %84 = math.sqrt %83 : vector<8x288xf32>
    %85 = arith.mulf %78, %84 : vector<8x288xf32>
    %c0_58 = arith.constant 0 : index
    %c8_59 = arith.constant 8 : index
    %c0_60 = arith.constant 0 : index
    %86 = vector.load %arg6[%c0_58, %c8_59, %c0_60] : memref<1x32x288xf32, #tpu.memory_space<vmem>>, vector<1x8x288xf32>
    %87 = vector.shape_cast %86 : vector<1x8x288xf32> to vector<8x288xf32>
    %88 = vector.shape_cast %85 : vector<8x288xf32> to vector<1x8x288xf32>
    tpu.vector_store %arg6[%c0_58, %c8_59, %c0_60], %88 {strides = array<i32>} : memref<1x32x288xf32, #tpu.memory_space<vmem>>, vector<1x8x288xf32>,
    %89 = vector.extract_strided_slice %64 {offsets = [16, 0], sizes = [8, 288], strides = [1, 1]} : vector<32x288xf32> to vector<8x288xf32>
    %90 = arith.mulf %89, %89 : vector<8x288xf32>
    %91 = arith.truncf %90 : vector<8x288xf32> to vector<8x288xbf16>
    %cst_61 = arith.constant dense<0.000000e+00> : vector<8x288xf32>
    %92 = tpu.matmul %65, %91, %cst_61 {dimension_numbers = #tpu.dot_dimension_numbers<[1], [0], [0], [1], [0, 0, 1, 1], [], []>} : vector<8x8xbf16>, vector<8x288xbf16>, vector<8x288xf32> -> vector<8x288xf32>
    %93 = vector.broadcast %66 : vector<8x1xf32> to vector<8x288xf32>
    %94 = arith.addf %93, %92 : vector<8x288xf32>
    %95 = math.sqrt %94 : vector<8x288xf32>
    %96 = arith.mulf %89, %95 : vector<8x288xf32>
    %c0_62 = arith.constant 0 : index
    %c16 = arith.constant 16 : index
    %c0_63 = arith.constant 0 : index
    %97 = vector.load %arg6[%c0_62, %c16, %c0_63] : memref<1x32x288xf32, #tpu.memory_space<vmem>>, vector<1x8x288xf32>
    %98 = vector.shape_cast %97 : vector<1x8x288xf32> to vector<8x288xf32>
    %99 = vector.shape_cast %96 : vector<8x288xf32> to vector<1x8x288xf32>
    tpu.vector_store %arg6[%c0_62, %c16, %c0_63], %99 {strides = array<i32>} : memref<1x32x288xf32, #tpu.memory_space<vmem>>, vector<1x8x288xf32>,
    %100 = vector.extract_strided_slice %64 {offsets = [24, 0], sizes = [8, 288], strides = [1, 1]} : vector<32x288xf32> to vector<8x288xf32>
    %101 = arith.mulf %100, %100 : vector<8x288xf32>
    %102 = arith.truncf %101 : vector<8x288xf32> to vector<8x288xbf16>
    %cst_64 = arith.constant dense<0.000000e+00> : vector<8x288xf32>
    %103 = tpu.matmul %65, %102, %cst_64 {dimension_numbers = #tpu.dot_dimension_numbers<[1], [0], [0], [1], [0, 0, 1, 1], [], []>} : vector<8x8xbf16>, vector<8x288xbf16>, vector<8x288xf32> -> vector<8x288xf32>
    %104 = vector.broadcast %66 : vector<8x1xf32> to vector<8x288xf32>
    %105 = arith.addf %104, %103 : vector<8x288xf32>
    %106 = math.sqrt %105 : vector<8x288xf32>
    %107 = arith.mulf %100, %106 : vector<8x288xf32>
    %c0_65 = arith.constant 0 : index
    %c24 = arith.constant 24 : index
    %c0_66 = arith.constant 0 : index
    %108 = vector.load %arg6[%c0_65, %c24, %c0_66] : memref<1x32x288xf32, #tpu.memory_space<vmem>>, vector<1x8x288xf32>
    %109 = vector.shape_cast %108 : vector<1x8x288xf32> to vector<8x288xf32>
    %110 = vector.shape_cast %107 : vector<8x288xf32> to vector<1x8x288xf32>
    tpu.vector_store %arg6[%c0_65, %c24, %c0_66], %110 {strides = array<i32>} : memref<1x32x288xf32, #tpu.memory_space<vmem>>, vector<1x8x288xf32>,
    return
  }
  func.func @transform_0(%arg0: i32) -> (i32, i32, i32) {
    %c0_i32 = arith.constant 0 : i32
    %c0_i32_0 = arith.constant 0 : i32
    %c0_i32_1 = arith.constant 0 : i32
    return %arg0, %c0_i32, %c0_i32_0 : i32, i32, i32
  }
  func.func @transform_1(%arg0: i32) -> (i32, i32, i32) {
    %c0_i32 = arith.constant 0 : i32
    %c0_i32_0 = arith.constant 0 : i32
    %c0_i32_1 = arith.constant 0 : i32
    %c0_i32_2 = arith.constant 0 : i32
    return %c0_i32, %c0_i32_0, %c0_i32_1 : i32, i32, i32
  }
  func.func @transform_2(%arg0: i32) -> (i32, i32) {
    %c0_i32 = arith.constant 0 : i32
    %c0_i32_0 = arith.constant 0 : i32
    %c0_i32_1 = arith.constant 0 : i32
    return %c0_i32, %c0_i32_0 : i32, i32
  }
  func.func @transform_3(%arg0: i32) -> (i32, i32) {
    %c0_i32 = arith.constant 0 : i32
    %c0_i32_0 = arith.constant 0 : i32
    %c0_i32_1 = arith.constant 0 : i32
    return %c0_i32, %c0_i32_0 : i32, i32
  }
  func.func @transform_4(%arg0: i32) -> (i32, i32) {
    %c0_i32 = arith.constant 0 : i32
    %c0_i32_0 = arith.constant 0 : i32
    %c0_i32_1 = arith.constant 0 : i32
    return %c0_i32, %c0_i32_0 : i32, i32
  }
  func.func @transform_5(%arg0: i32) -> (i32, i32, i32) {
    %c0_i32 = arith.constant 0 : i32
    %c0_i32_0 = arith.constant 0 : i32
    %c0_i32_1 = arith.constant 0 : i32
    return %arg0, %c0_i32, %c0_i32_0 : i32, i32, i32
  }
}

module attributes {stable_mosaic.version = 11 : i64} {
  func.func @_deconv_igdn_kernel(%arg0: i32, %arg1: memref<1x8x1158xf32, #tpu.memory_space<vmem>>, %arg2: memref<9x32x8xbf16, #tpu.memory_space<vmem>>, %arg3: memref<32x1xf32, #tpu.memory_space<vmem>>, %arg4: memref<8x8xbf16, #tpu.memory_space<vmem>>, %arg5: memref<8x1xf32, #tpu.memory_space<vmem>>, %arg6: memref<1x32x1088xf32, #tpu.memory_space<vmem>>) attributes {dimension_semantics = [#tpu.dimension_semantics<parallel>], iteration_bounds = array<i64: 2>, scalar_prefetch = 0 : i64, scratch_operands = 0 : i64, tpu.core_type = #tpu.core_type<tc>, window_params = [{transform_indices = @transform_0, window_bounds = array<i64: 1, 8, 1158>}, {pipeline_mode = #tpu.pipeline_mode<synchronous>, transform_indices = @transform_1, window_bounds = array<i64: 9, 32, 8>}, {pipeline_mode = #tpu.pipeline_mode<synchronous>, transform_indices = @transform_2, window_bounds = array<i64: 32, 1>}, {pipeline_mode = #tpu.pipeline_mode<synchronous>, transform_indices = @transform_3, window_bounds = array<i64: 8, 8>}, {pipeline_mode = #tpu.pipeline_mode<synchronous>, transform_indices = @transform_4, window_bounds = array<i64: 8, 1>}, {transform_indices = @transform_5, window_bounds = array<i64: 1, 32, 1088>}]} {
    %c0 = arith.constant 0 : index
    %c0_0 = arith.constant 0 : index
    %c0_1 = arith.constant 0 : index
    %0 = vector.load %arg1[%c0, %c0_0, %c0_1] : memref<1x8x1158xf32, #tpu.memory_space<vmem>>, vector<1x8x1088xf32>
    %1 = vector.shape_cast %0 : vector<1x8x1088xf32> to vector<8x1088xf32>
    %2 = arith.truncf %1 : vector<8x1088xf32> to vector<8x1088xbf16>
    %c0_2 = arith.constant 0 : index
    %c0_3 = arith.constant 0 : index
    %c0_4 = arith.constant 0 : index
    %3 = vector.load %arg2[%c0_2, %c0_3, %c0_4] : memref<9x32x8xbf16, #tpu.memory_space<vmem>>, vector<1x32x8xbf16>
    %4 = vector.shape_cast %3 : vector<1x32x8xbf16> to vector<32x8xbf16>
    %cst = arith.constant dense<0.000000e+00> : vector<32x1088xf32>
    %5 = tpu.matmul %4, %2, %cst {dimension_numbers = #tpu.dot_dimension_numbers<[1], [0], [0], [1], [0, 0, 1, 1], [], []>} : vector<32x8xbf16>, vector<8x1088xbf16>, vector<32x1088xf32> -> vector<32x1088xf32>
    %c0_5 = arith.constant 0 : index
    %c0_6 = arith.constant 0 : index
    %c1 = arith.constant 1 : index
    %6 = vector.load %arg1[%c0_5, %c0_6, %c1] : memref<1x8x1158xf32, #tpu.memory_space<vmem>>, vector<1x8x1088xf32>
    %7 = vector.shape_cast %6 : vector<1x8x1088xf32> to vector<8x1088xf32>
    %8 = arith.truncf %7 : vector<8x1088xf32> to vector<8x1088xbf16>
    %c1_7 = arith.constant 1 : index
    %c0_8 = arith.constant 0 : index
    %c0_9 = arith.constant 0 : index
    %9 = vector.load %arg2[%c1_7, %c0_8, %c0_9] : memref<9x32x8xbf16, #tpu.memory_space<vmem>>, vector<1x32x8xbf16>
    %10 = vector.shape_cast %9 : vector<1x32x8xbf16> to vector<32x8xbf16>
    %cst_10 = arith.constant dense<0.000000e+00> : vector<32x1088xf32>
    %11 = tpu.matmul %10, %8, %cst_10 {dimension_numbers = #tpu.dot_dimension_numbers<[1], [0], [0], [1], [0, 0, 1, 1], [], []>} : vector<32x8xbf16>, vector<8x1088xbf16>, vector<32x1088xf32> -> vector<32x1088xf32>
    %12 = arith.addf %5, %11 : vector<32x1088xf32>
    %c0_11 = arith.constant 0 : index
    %c0_12 = arith.constant 0 : index
    %c2 = arith.constant 2 : index
    %13 = vector.load %arg1[%c0_11, %c0_12, %c2] : memref<1x8x1158xf32, #tpu.memory_space<vmem>>, vector<1x8x1088xf32>
    %14 = vector.shape_cast %13 : vector<1x8x1088xf32> to vector<8x1088xf32>
    %15 = arith.truncf %14 : vector<8x1088xf32> to vector<8x1088xbf16>
    %c2_13 = arith.constant 2 : index
    %c0_14 = arith.constant 0 : index
    %c0_15 = arith.constant 0 : index
    %16 = vector.load %arg2[%c2_13, %c0_14, %c0_15] : memref<9x32x8xbf16, #tpu.memory_space<vmem>>, vector<1x32x8xbf16>
    %17 = vector.shape_cast %16 : vector<1x32x8xbf16> to vector<32x8xbf16>
    %cst_16 = arith.constant dense<0.000000e+00> : vector<32x1088xf32>
    %18 = tpu.matmul %17, %15, %cst_16 {dimension_numbers = #tpu.dot_dimension_numbers<[1], [0], [0], [1], [0, 0, 1, 1], [], []>} : vector<32x8xbf16>, vector<8x1088xbf16>, vector<32x1088xf32> -> vector<32x1088xf32>
    %19 = arith.addf %12, %18 : vector<32x1088xf32>
    %c0_17 = arith.constant 0 : index
    %c0_18 = arith.constant 0 : index
    %c34 = arith.constant 34 : index
    %20 = vector.load %arg1[%c0_17, %c0_18, %c34] : memref<1x8x1158xf32, #tpu.memory_space<vmem>>, vector<1x8x1088xf32>
    %21 = vector.shape_cast %20 : vector<1x8x1088xf32> to vector<8x1088xf32>
    %22 = arith.truncf %21 : vector<8x1088xf32> to vector<8x1088xbf16>
    %c3 = arith.constant 3 : index
    %c0_19 = arith.constant 0 : index
    %c0_20 = arith.constant 0 : index
    %23 = vector.load %arg2[%c3, %c0_19, %c0_20] : memref<9x32x8xbf16, #tpu.memory_space<vmem>>, vector<1x32x8xbf16>
    %24 = vector.shape_cast %23 : vector<1x32x8xbf16> to vector<32x8xbf16>
    %cst_21 = arith.constant dense<0.000000e+00> : vector<32x1088xf32>
    %25 = tpu.matmul %24, %22, %cst_21 {dimension_numbers = #tpu.dot_dimension_numbers<[1], [0], [0], [1], [0, 0, 1, 1], [], []>} : vector<32x8xbf16>, vector<8x1088xbf16>, vector<32x1088xf32> -> vector<32x1088xf32>
    %26 = arith.addf %19, %25 : vector<32x1088xf32>
    %c0_22 = arith.constant 0 : index
    %c0_23 = arith.constant 0 : index
    %c35 = arith.constant 35 : index
    %27 = vector.load %arg1[%c0_22, %c0_23, %c35] : memref<1x8x1158xf32, #tpu.memory_space<vmem>>, vector<1x8x1088xf32>
    %28 = vector.shape_cast %27 : vector<1x8x1088xf32> to vector<8x1088xf32>
    %29 = arith.truncf %28 : vector<8x1088xf32> to vector<8x1088xbf16>
    %c4 = arith.constant 4 : index
    %c0_24 = arith.constant 0 : index
    %c0_25 = arith.constant 0 : index
    %30 = vector.load %arg2[%c4, %c0_24, %c0_25] : memref<9x32x8xbf16, #tpu.memory_space<vmem>>, vector<1x32x8xbf16>
    %31 = vector.shape_cast %30 : vector<1x32x8xbf16> to vector<32x8xbf16>
    %cst_26 = arith.constant dense<0.000000e+00> : vector<32x1088xf32>
    %32 = tpu.matmul %31, %29, %cst_26 {dimension_numbers = #tpu.dot_dimension_numbers<[1], [0], [0], [1], [0, 0, 1, 1], [], []>} : vector<32x8xbf16>, vector<8x1088xbf16>, vector<32x1088xf32> -> vector<32x1088xf32>
    %33 = arith.addf %26, %32 : vector<32x1088xf32>
    %c0_27 = arith.constant 0 : index
    %c0_28 = arith.constant 0 : index
    %c36 = arith.constant 36 : index
    %34 = vector.load %arg1[%c0_27, %c0_28, %c36] : memref<1x8x1158xf32, #tpu.memory_space<vmem>>, vector<1x8x1088xf32>
    %35 = vector.shape_cast %34 : vector<1x8x1088xf32> to vector<8x1088xf32>
    %36 = arith.truncf %35 : vector<8x1088xf32> to vector<8x1088xbf16>
    %c5 = arith.constant 5 : index
    %c0_29 = arith.constant 0 : index
    %c0_30 = arith.constant 0 : index
    %37 = vector.load %arg2[%c5, %c0_29, %c0_30] : memref<9x32x8xbf16, #tpu.memory_space<vmem>>, vector<1x32x8xbf16>
    %38 = vector.shape_cast %37 : vector<1x32x8xbf16> to vector<32x8xbf16>
    %cst_31 = arith.constant dense<0.000000e+00> : vector<32x1088xf32>
    %39 = tpu.matmul %38, %36, %cst_31 {dimension_numbers = #tpu.dot_dimension_numbers<[1], [0], [0], [1], [0, 0, 1, 1], [], []>} : vector<32x8xbf16>, vector<8x1088xbf16>, vector<32x1088xf32> -> vector<32x1088xf32>
    %40 = arith.addf %33, %39 : vector<32x1088xf32>
    %c0_32 = arith.constant 0 : index
    %c0_33 = arith.constant 0 : index
    %c68 = arith.constant 68 : index
    %41 = vector.load %arg1[%c0_32, %c0_33, %c68] : memref<1x8x1158xf32, #tpu.memory_space<vmem>>, vector<1x8x1088xf32>
    %42 = vector.shape_cast %41 : vector<1x8x1088xf32> to vector<8x1088xf32>
    %43 = arith.truncf %42 : vector<8x1088xf32> to vector<8x1088xbf16>
    %c6 = arith.constant 6 : index
    %c0_34 = arith.constant 0 : index
    %c0_35 = arith.constant 0 : index
    %44 = vector.load %arg2[%c6, %c0_34, %c0_35] : memref<9x32x8xbf16, #tpu.memory_space<vmem>>, vector<1x32x8xbf16>
    %45 = vector.shape_cast %44 : vector<1x32x8xbf16> to vector<32x8xbf16>
    %cst_36 = arith.constant dense<0.000000e+00> : vector<32x1088xf32>
    %46 = tpu.matmul %45, %43, %cst_36 {dimension_numbers = #tpu.dot_dimension_numbers<[1], [0], [0], [1], [0, 0, 1, 1], [], []>} : vector<32x8xbf16>, vector<8x1088xbf16>, vector<32x1088xf32> -> vector<32x1088xf32>
    %47 = arith.addf %40, %46 : vector<32x1088xf32>
    %c0_37 = arith.constant 0 : index
    %c0_38 = arith.constant 0 : index
    %c69 = arith.constant 69 : index
    %48 = vector.load %arg1[%c0_37, %c0_38, %c69] : memref<1x8x1158xf32, #tpu.memory_space<vmem>>, vector<1x8x1088xf32>
    %49 = vector.shape_cast %48 : vector<1x8x1088xf32> to vector<8x1088xf32>
    %50 = arith.truncf %49 : vector<8x1088xf32> to vector<8x1088xbf16>
    %c7 = arith.constant 7 : index
    %c0_39 = arith.constant 0 : index
    %c0_40 = arith.constant 0 : index
    %51 = vector.load %arg2[%c7, %c0_39, %c0_40] : memref<9x32x8xbf16, #tpu.memory_space<vmem>>, vector<1x32x8xbf16>
    %52 = vector.shape_cast %51 : vector<1x32x8xbf16> to vector<32x8xbf16>
    %cst_41 = arith.constant dense<0.000000e+00> : vector<32x1088xf32>
    %53 = tpu.matmul %52, %50, %cst_41 {dimension_numbers = #tpu.dot_dimension_numbers<[1], [0], [0], [1], [0, 0, 1, 1], [], []>} : vector<32x8xbf16>, vector<8x1088xbf16>, vector<32x1088xf32> -> vector<32x1088xf32>
    %54 = arith.addf %47, %53 : vector<32x1088xf32>
    %c0_42 = arith.constant 0 : index
    %c0_43 = arith.constant 0 : index
    %c70 = arith.constant 70 : index
    %55 = vector.load %arg1[%c0_42, %c0_43, %c70] : memref<1x8x1158xf32, #tpu.memory_space<vmem>>, vector<1x8x1088xf32>
    %56 = vector.shape_cast %55 : vector<1x8x1088xf32> to vector<8x1088xf32>
    %57 = arith.truncf %56 : vector<8x1088xf32> to vector<8x1088xbf16>
    %c8 = arith.constant 8 : index
    %c0_44 = arith.constant 0 : index
    %c0_45 = arith.constant 0 : index
    %58 = vector.load %arg2[%c8, %c0_44, %c0_45] : memref<9x32x8xbf16, #tpu.memory_space<vmem>>, vector<1x32x8xbf16>
    %59 = vector.shape_cast %58 : vector<1x32x8xbf16> to vector<32x8xbf16>
    %cst_46 = arith.constant dense<0.000000e+00> : vector<32x1088xf32>
    %60 = tpu.matmul %59, %57, %cst_46 {dimension_numbers = #tpu.dot_dimension_numbers<[1], [0], [0], [1], [0, 0, 1, 1], [], []>} : vector<32x8xbf16>, vector<8x1088xbf16>, vector<32x1088xf32> -> vector<32x1088xf32>
    %61 = arith.addf %54, %60 : vector<32x1088xf32>
    %c0_47 = arith.constant 0 : index
    %c0_48 = arith.constant 0 : index
    %62 = vector.load %arg3[%c0_47, %c0_48] : memref<32x1xf32, #tpu.memory_space<vmem>>, vector<32x1xf32>
    %63 = vector.broadcast %62 : vector<32x1xf32> to vector<32x1088xf32>
    %64 = arith.addf %61, %63 : vector<32x1088xf32>
    %c0_49 = arith.constant 0 : index
    %c0_50 = arith.constant 0 : index
    %65 = vector.load %arg4[%c0_49, %c0_50] : memref<8x8xbf16, #tpu.memory_space<vmem>>, vector<8x8xbf16>
    %c0_51 = arith.constant 0 : index
    %c0_52 = arith.constant 0 : index
    %66 = vector.load %arg5[%c0_51, %c0_52] : memref<8x1xf32, #tpu.memory_space<vmem>>, vector<8x1xf32>
    %67 = vector.extract_strided_slice %64 {offsets = [0, 0], sizes = [8, 1088], strides = [1, 1]} : vector<32x1088xf32> to vector<8x1088xf32>
    %68 = arith.mulf %67, %67 : vector<8x1088xf32>
    %69 = arith.truncf %68 : vector<8x1088xf32> to vector<8x1088xbf16>
    %cst_53 = arith.constant dense<0.000000e+00> : vector<8x1088xf32>
    %70 = tpu.matmul %65, %69, %cst_53 {dimension_numbers = #tpu.dot_dimension_numbers<[1], [0], [0], [1], [0, 0, 1, 1], [], []>} : vector<8x8xbf16>, vector<8x1088xbf16>, vector<8x1088xf32> -> vector<8x1088xf32>
    %71 = vector.broadcast %66 : vector<8x1xf32> to vector<8x1088xf32>
    %72 = arith.addf %71, %70 : vector<8x1088xf32>
    %73 = math.sqrt %72 : vector<8x1088xf32>
    %74 = arith.mulf %67, %73 : vector<8x1088xf32>
    %c0_54 = arith.constant 0 : index
    %c0_55 = arith.constant 0 : index
    %c0_56 = arith.constant 0 : index
    %75 = vector.load %arg6[%c0_54, %c0_55, %c0_56] : memref<1x32x1088xf32, #tpu.memory_space<vmem>>, vector<1x8x1088xf32>
    %76 = vector.shape_cast %75 : vector<1x8x1088xf32> to vector<8x1088xf32>
    %77 = vector.shape_cast %74 : vector<8x1088xf32> to vector<1x8x1088xf32>
    tpu.vector_store %arg6[%c0_54, %c0_55, %c0_56], %77 {strides = array<i32>} : memref<1x32x1088xf32, #tpu.memory_space<vmem>>, vector<1x8x1088xf32>,
    %78 = vector.extract_strided_slice %64 {offsets = [8, 0], sizes = [8, 1088], strides = [1, 1]} : vector<32x1088xf32> to vector<8x1088xf32>
    %79 = arith.mulf %78, %78 : vector<8x1088xf32>
    %80 = arith.truncf %79 : vector<8x1088xf32> to vector<8x1088xbf16>
    %cst_57 = arith.constant dense<0.000000e+00> : vector<8x1088xf32>
    %81 = tpu.matmul %65, %80, %cst_57 {dimension_numbers = #tpu.dot_dimension_numbers<[1], [0], [0], [1], [0, 0, 1, 1], [], []>} : vector<8x8xbf16>, vector<8x1088xbf16>, vector<8x1088xf32> -> vector<8x1088xf32>
    %82 = vector.broadcast %66 : vector<8x1xf32> to vector<8x1088xf32>
    %83 = arith.addf %82, %81 : vector<8x1088xf32>
    %84 = math.sqrt %83 : vector<8x1088xf32>
    %85 = arith.mulf %78, %84 : vector<8x1088xf32>
    %c0_58 = arith.constant 0 : index
    %c8_59 = arith.constant 8 : index
    %c0_60 = arith.constant 0 : index
    %86 = vector.load %arg6[%c0_58, %c8_59, %c0_60] : memref<1x32x1088xf32, #tpu.memory_space<vmem>>, vector<1x8x1088xf32>
    %87 = vector.shape_cast %86 : vector<1x8x1088xf32> to vector<8x1088xf32>
    %88 = vector.shape_cast %85 : vector<8x1088xf32> to vector<1x8x1088xf32>
    tpu.vector_store %arg6[%c0_58, %c8_59, %c0_60], %88 {strides = array<i32>} : memref<1x32x1088xf32, #tpu.memory_space<vmem>>, vector<1x8x1088xf32>,
    %89 = vector.extract_strided_slice %64 {offsets = [16, 0], sizes = [8, 1088], strides = [1, 1]} : vector<32x1088xf32> to vector<8x1088xf32>
    %90 = arith.mulf %89, %89 : vector<8x1088xf32>
    %91 = arith.truncf %90 : vector<8x1088xf32> to vector<8x1088xbf16>
    %cst_61 = arith.constant dense<0.000000e+00> : vector<8x1088xf32>
    %92 = tpu.matmul %65, %91, %cst_61 {dimension_numbers = #tpu.dot_dimension_numbers<[1], [0], [0], [1], [0, 0, 1, 1], [], []>} : vector<8x8xbf16>, vector<8x1088xbf16>, vector<8x1088xf32> -> vector<8x1088xf32>
    %93 = vector.broadcast %66 : vector<8x1xf32> to vector<8x1088xf32>
    %94 = arith.addf %93, %92 : vector<8x1088xf32>
    %95 = math.sqrt %94 : vector<8x1088xf32>
    %96 = arith.mulf %89, %95 : vector<8x1088xf32>
    %c0_62 = arith.constant 0 : index
    %c16 = arith.constant 16 : index
    %c0_63 = arith.constant 0 : index
    %97 = vector.load %arg6[%c0_62, %c16, %c0_63] : memref<1x32x1088xf32, #tpu.memory_space<vmem>>, vector<1x8x1088xf32>
    %98 = vector.shape_cast %97 : vector<1x8x1088xf32> to vector<8x1088xf32>
    %99 = vector.shape_cast %96 : vector<8x1088xf32> to vector<1x8x1088xf32>
    tpu.vector_store %arg6[%c0_62, %c16, %c0_63], %99 {strides = array<i32>} : memref<1x32x1088xf32, #tpu.memory_space<vmem>>, vector<1x8x1088xf32>,
    %100 = vector.extract_strided_slice %64 {offsets = [24, 0], sizes = [8, 1088], strides = [1, 1]} : vector<32x1088xf32> to vector<8x1088xf32>
    %101 = arith.mulf %100, %100 : vector<8x1088xf32>
    %102 = arith.truncf %101 : vector<8x1088xf32> to vector<8x1088xbf16>
    %cst_64 = arith.constant dense<0.000000e+00> : vector<8x1088xf32>
    %103 = tpu.matmul %65, %102, %cst_64 {dimension_numbers = #tpu.dot_dimension_numbers<[1], [0], [0], [1], [0, 0, 1, 1], [], []>} : vector<8x8xbf16>, vector<8x1088xbf16>, vector<8x1088xf32> -> vector<8x1088xf32>
    %104 = vector.broadcast %66 : vector<8x1xf32> to vector<8x1088xf32>
    %105 = arith.addf %104, %103 : vector<8x1088xf32>
    %106 = math.sqrt %105 : vector<8x1088xf32>
    %107 = arith.mulf %100, %106 : vector<8x1088xf32>
    %c0_65 = arith.constant 0 : index
    %c24 = arith.constant 24 : index
    %c0_66 = arith.constant 0 : index
    %108 = vector.load %arg6[%c0_65, %c24, %c0_66] : memref<1x32x1088xf32, #tpu.memory_space<vmem>>, vector<1x8x1088xf32>
    %109 = vector.shape_cast %108 : vector<1x8x1088xf32> to vector<8x1088xf32>
    %110 = vector.shape_cast %107 : vector<8x1088xf32> to vector<1x8x1088xf32>
    tpu.vector_store %arg6[%c0_65, %c24, %c0_66], %110 {strides = array<i32>} : memref<1x32x1088xf32, #tpu.memory_space<vmem>>, vector<1x8x1088xf32>,
    return
  }
  func.func @transform_0(%arg0: i32) -> (i32, i32, i32) {
    %c0_i32 = arith.constant 0 : i32
    %c0_i32_0 = arith.constant 0 : i32
    %c0_i32_1 = arith.constant 0 : i32
    return %arg0, %c0_i32, %c0_i32_0 : i32, i32, i32
  }
  func.func @transform_1(%arg0: i32) -> (i32, i32, i32) {
    %c0_i32 = arith.constant 0 : i32
    %c0_i32_0 = arith.constant 0 : i32
    %c0_i32_1 = arith.constant 0 : i32
    %c0_i32_2 = arith.constant 0 : i32
    return %c0_i32, %c0_i32_0, %c0_i32_1 : i32, i32, i32
  }
  func.func @transform_2(%arg0: i32) -> (i32, i32) {
    %c0_i32 = arith.constant 0 : i32
    %c0_i32_0 = arith.constant 0 : i32
    %c0_i32_1 = arith.constant 0 : i32
    return %c0_i32, %c0_i32_0 : i32, i32
  }
  func.func @transform_3(%arg0: i32) -> (i32, i32) {
    %c0_i32 = arith.constant 0 : i32
    %c0_i32_0 = arith.constant 0 : i32
    %c0_i32_1 = arith.constant 0 : i32
    return %c0_i32, %c0_i32_0 : i32, i32
  }
  func.func @transform_4(%arg0: i32) -> (i32, i32) {
    %c0_i32 = arith.constant 0 : i32
    %c0_i32_0 = arith.constant 0 : i32
    %c0_i32_1 = arith.constant 0 : i32
    return %c0_i32, %c0_i32_0 : i32, i32
  }
  func.func @transform_5(%arg0: i32) -> (i32, i32, i32) {
    %c0_i32 = arith.constant 0 : i32
    %c0_i32_0 = arith.constant 0 : i32
    %c0_i32_1 = arith.constant 0 : i32
    return %arg0, %c0_i32, %c0_i32_0 : i32, i32, i32
  }
}

module attributes {stable_mosaic.version = 11 : i64} {
  func.func @_deconv_bias_kernel(%arg0: i32, %arg1: memref<1x8x4358xf32, #tpu.memory_space<vmem>>, %arg2: memref<9x12x8xbf16, #tpu.memory_space<vmem>>, %arg3: memref<12x1xf32, #tpu.memory_space<vmem>>, %arg4: memref<1x12x4224xf32, #tpu.memory_space<vmem>>) attributes {dimension_semantics = [#tpu.dimension_semantics<parallel>], iteration_bounds = array<i64: 2>, scalar_prefetch = 0 : i64, scratch_operands = 0 : i64, tpu.core_type = #tpu.core_type<tc>, window_params = [{transform_indices = @transform_0, window_bounds = array<i64: 1, 8, 4358>}, {pipeline_mode = #tpu.pipeline_mode<synchronous>, transform_indices = @transform_1, window_bounds = array<i64: 9, 12, 8>}, {pipeline_mode = #tpu.pipeline_mode<synchronous>, transform_indices = @transform_2, window_bounds = array<i64: 12, 1>}, {transform_indices = @transform_3, window_bounds = array<i64: 1, 12, 4224>}]} {
    %c0 = arith.constant 0 : index
    %c0_0 = arith.constant 0 : index
    %c0_1 = arith.constant 0 : index
    %0 = vector.load %arg1[%c0, %c0_0, %c0_1] : memref<1x8x4358xf32, #tpu.memory_space<vmem>>, vector<1x8x4224xf32>
    %1 = vector.shape_cast %0 : vector<1x8x4224xf32> to vector<8x4224xf32>
    %2 = arith.truncf %1 : vector<8x4224xf32> to vector<8x4224xbf16>
    %c0_2 = arith.constant 0 : index
    %c0_3 = arith.constant 0 : index
    %c0_4 = arith.constant 0 : index
    %3 = vector.load %arg2[%c0_2, %c0_3, %c0_4] : memref<9x12x8xbf16, #tpu.memory_space<vmem>>, vector<1x12x8xbf16>
    %4 = vector.shape_cast %3 : vector<1x12x8xbf16> to vector<12x8xbf16>
    %cst = arith.constant dense<0.000000e+00> : vector<12x4224xf32>
    %5 = tpu.matmul %4, %2, %cst {dimension_numbers = #tpu.dot_dimension_numbers<[1], [0], [0], [1], [0, 0, 1, 1], [], []>} : vector<12x8xbf16>, vector<8x4224xbf16>, vector<12x4224xf32> -> vector<12x4224xf32>
    %c0_5 = arith.constant 0 : index
    %c0_6 = arith.constant 0 : index
    %c1 = arith.constant 1 : index
    %6 = vector.load %arg1[%c0_5, %c0_6, %c1] : memref<1x8x4358xf32, #tpu.memory_space<vmem>>, vector<1x8x4224xf32>
    %7 = vector.shape_cast %6 : vector<1x8x4224xf32> to vector<8x4224xf32>
    %8 = arith.truncf %7 : vector<8x4224xf32> to vector<8x4224xbf16>
    %c1_7 = arith.constant 1 : index
    %c0_8 = arith.constant 0 : index
    %c0_9 = arith.constant 0 : index
    %9 = vector.load %arg2[%c1_7, %c0_8, %c0_9] : memref<9x12x8xbf16, #tpu.memory_space<vmem>>, vector<1x12x8xbf16>
    %10 = vector.shape_cast %9 : vector<1x12x8xbf16> to vector<12x8xbf16>
    %cst_10 = arith.constant dense<0.000000e+00> : vector<12x4224xf32>
    %11 = tpu.matmul %10, %8, %cst_10 {dimension_numbers = #tpu.dot_dimension_numbers<[1], [0], [0], [1], [0, 0, 1, 1], [], []>} : vector<12x8xbf16>, vector<8x4224xbf16>, vector<12x4224xf32> -> vector<12x4224xf32>
    %12 = arith.addf %5, %11 : vector<12x4224xf32>
    %c0_11 = arith.constant 0 : index
    %c0_12 = arith.constant 0 : index
    %c2 = arith.constant 2 : index
    %13 = vector.load %arg1[%c0_11, %c0_12, %c2] : memref<1x8x4358xf32, #tpu.memory_space<vmem>>, vector<1x8x4224xf32>
    %14 = vector.shape_cast %13 : vector<1x8x4224xf32> to vector<8x4224xf32>
    %15 = arith.truncf %14 : vector<8x4224xf32> to vector<8x4224xbf16>
    %c2_13 = arith.constant 2 : index
    %c0_14 = arith.constant 0 : index
    %c0_15 = arith.constant 0 : index
    %16 = vector.load %arg2[%c2_13, %c0_14, %c0_15] : memref<9x12x8xbf16, #tpu.memory_space<vmem>>, vector<1x12x8xbf16>
    %17 = vector.shape_cast %16 : vector<1x12x8xbf16> to vector<12x8xbf16>
    %cst_16 = arith.constant dense<0.000000e+00> : vector<12x4224xf32>
    %18 = tpu.matmul %17, %15, %cst_16 {dimension_numbers = #tpu.dot_dimension_numbers<[1], [0], [0], [1], [0, 0, 1, 1], [], []>} : vector<12x8xbf16>, vector<8x4224xbf16>, vector<12x4224xf32> -> vector<12x4224xf32>
    %19 = arith.addf %12, %18 : vector<12x4224xf32>
    %c0_17 = arith.constant 0 : index
    %c0_18 = arith.constant 0 : index
    %c66 = arith.constant 66 : index
    %20 = vector.load %arg1[%c0_17, %c0_18, %c66] : memref<1x8x4358xf32, #tpu.memory_space<vmem>>, vector<1x8x4224xf32>
    %21 = vector.shape_cast %20 : vector<1x8x4224xf32> to vector<8x4224xf32>
    %22 = arith.truncf %21 : vector<8x4224xf32> to vector<8x4224xbf16>
    %c3 = arith.constant 3 : index
    %c0_19 = arith.constant 0 : index
    %c0_20 = arith.constant 0 : index
    %23 = vector.load %arg2[%c3, %c0_19, %c0_20] : memref<9x12x8xbf16, #tpu.memory_space<vmem>>, vector<1x12x8xbf16>
    %24 = vector.shape_cast %23 : vector<1x12x8xbf16> to vector<12x8xbf16>
    %cst_21 = arith.constant dense<0.000000e+00> : vector<12x4224xf32>
    %25 = tpu.matmul %24, %22, %cst_21 {dimension_numbers = #tpu.dot_dimension_numbers<[1], [0], [0], [1], [0, 0, 1, 1], [], []>} : vector<12x8xbf16>, vector<8x4224xbf16>, vector<12x4224xf32> -> vector<12x4224xf32>
    %26 = arith.addf %19, %25 : vector<12x4224xf32>
    %c0_22 = arith.constant 0 : index
    %c0_23 = arith.constant 0 : index
    %c67 = arith.constant 67 : index
    %27 = vector.load %arg1[%c0_22, %c0_23, %c67] : memref<1x8x4358xf32, #tpu.memory_space<vmem>>, vector<1x8x4224xf32>
    %28 = vector.shape_cast %27 : vector<1x8x4224xf32> to vector<8x4224xf32>
    %29 = arith.truncf %28 : vector<8x4224xf32> to vector<8x4224xbf16>
    %c4 = arith.constant 4 : index
    %c0_24 = arith.constant 0 : index
    %c0_25 = arith.constant 0 : index
    %30 = vector.load %arg2[%c4, %c0_24, %c0_25] : memref<9x12x8xbf16, #tpu.memory_space<vmem>>, vector<1x12x8xbf16>
    %31 = vector.shape_cast %30 : vector<1x12x8xbf16> to vector<12x8xbf16>
    %cst_26 = arith.constant dense<0.000000e+00> : vector<12x4224xf32>
    %32 = tpu.matmul %31, %29, %cst_26 {dimension_numbers = #tpu.dot_dimension_numbers<[1], [0], [0], [1], [0, 0, 1, 1], [], []>} : vector<12x8xbf16>, vector<8x4224xbf16>, vector<12x4224xf32> -> vector<12x4224xf32>
    %33 = arith.addf %26, %32 : vector<12x4224xf32>
    %c0_27 = arith.constant 0 : index
    %c0_28 = arith.constant 0 : index
    %c68 = arith.constant 68 : index
    %34 = vector.load %arg1[%c0_27, %c0_28, %c68] : memref<1x8x4358xf32, #tpu.memory_space<vmem>>, vector<1x8x4224xf32>
    %35 = vector.shape_cast %34 : vector<1x8x4224xf32> to vector<8x4224xf32>
    %36 = arith.truncf %35 : vector<8x4224xf32> to vector<8x4224xbf16>
    %c5 = arith.constant 5 : index
    %c0_29 = arith.constant 0 : index
    %c0_30 = arith.constant 0 : index
    %37 = vector.load %arg2[%c5, %c0_29, %c0_30] : memref<9x12x8xbf16, #tpu.memory_space<vmem>>, vector<1x12x8xbf16>
    %38 = vector.shape_cast %37 : vector<1x12x8xbf16> to vector<12x8xbf16>
    %cst_31 = arith.constant dense<0.000000e+00> : vector<12x4224xf32>
    %39 = tpu.matmul %38, %36, %cst_31 {dimension_numbers = #tpu.dot_dimension_numbers<[1], [0], [0], [1], [0, 0, 1, 1], [], []>} : vector<12x8xbf16>, vector<8x4224xbf16>, vector<12x4224xf32> -> vector<12x4224xf32>
    %40 = arith.addf %33, %39 : vector<12x4224xf32>
    %c0_32 = arith.constant 0 : index
    %c0_33 = arith.constant 0 : index
    %c132 = arith.constant 132 : index
    %41 = vector.load %arg1[%c0_32, %c0_33, %c132] : memref<1x8x4358xf32, #tpu.memory_space<vmem>>, vector<1x8x4224xf32>
    %42 = vector.shape_cast %41 : vector<1x8x4224xf32> to vector<8x4224xf32>
    %43 = arith.truncf %42 : vector<8x4224xf32> to vector<8x4224xbf16>
    %c6 = arith.constant 6 : index
    %c0_34 = arith.constant 0 : index
    %c0_35 = arith.constant 0 : index
    %44 = vector.load %arg2[%c6, %c0_34, %c0_35] : memref<9x12x8xbf16, #tpu.memory_space<vmem>>, vector<1x12x8xbf16>
    %45 = vector.shape_cast %44 : vector<1x12x8xbf16> to vector<12x8xbf16>
    %cst_36 = arith.constant dense<0.000000e+00> : vector<12x4224xf32>
    %46 = tpu.matmul %45, %43, %cst_36 {dimension_numbers = #tpu.dot_dimension_numbers<[1], [0], [0], [1], [0, 0, 1, 1], [], []>} : vector<12x8xbf16>, vector<8x4224xbf16>, vector<12x4224xf32> -> vector<12x4224xf32>
    %47 = arith.addf %40, %46 : vector<12x4224xf32>
    %c0_37 = arith.constant 0 : index
    %c0_38 = arith.constant 0 : index
    %c133 = arith.constant 133 : index
    %48 = vector.load %arg1[%c0_37, %c0_38, %c133] : memref<1x8x4358xf32, #tpu.memory_space<vmem>>, vector<1x8x4224xf32>
    %49 = vector.shape_cast %48 : vector<1x8x4224xf32> to vector<8x4224xf32>
    %50 = arith.truncf %49 : vector<8x4224xf32> to vector<8x4224xbf16>
    %c7 = arith.constant 7 : index
    %c0_39 = arith.constant 0 : index
    %c0_40 = arith.constant 0 : index
    %51 = vector.load %arg2[%c7, %c0_39, %c0_40] : memref<9x12x8xbf16, #tpu.memory_space<vmem>>, vector<1x12x8xbf16>
    %52 = vector.shape_cast %51 : vector<1x12x8xbf16> to vector<12x8xbf16>
    %cst_41 = arith.constant dense<0.000000e+00> : vector<12x4224xf32>
    %53 = tpu.matmul %52, %50, %cst_41 {dimension_numbers = #tpu.dot_dimension_numbers<[1], [0], [0], [1], [0, 0, 1, 1], [], []>} : vector<12x8xbf16>, vector<8x4224xbf16>, vector<12x4224xf32> -> vector<12x4224xf32>
    %54 = arith.addf %47, %53 : vector<12x4224xf32>
    %c0_42 = arith.constant 0 : index
    %c0_43 = arith.constant 0 : index
    %c134 = arith.constant 134 : index
    %55 = vector.load %arg1[%c0_42, %c0_43, %c134] : memref<1x8x4358xf32, #tpu.memory_space<vmem>>, vector<1x8x4224xf32>
    %56 = vector.shape_cast %55 : vector<1x8x4224xf32> to vector<8x4224xf32>
    %57 = arith.truncf %56 : vector<8x4224xf32> to vector<8x4224xbf16>
    %c8 = arith.constant 8 : index
    %c0_44 = arith.constant 0 : index
    %c0_45 = arith.constant 0 : index
    %58 = vector.load %arg2[%c8, %c0_44, %c0_45] : memref<9x12x8xbf16, #tpu.memory_space<vmem>>, vector<1x12x8xbf16>
    %59 = vector.shape_cast %58 : vector<1x12x8xbf16> to vector<12x8xbf16>
    %cst_46 = arith.constant dense<0.000000e+00> : vector<12x4224xf32>
    %60 = tpu.matmul %59, %57, %cst_46 {dimension_numbers = #tpu.dot_dimension_numbers<[1], [0], [0], [1], [0, 0, 1, 1], [], []>} : vector<12x8xbf16>, vector<8x4224xbf16>, vector<12x4224xf32> -> vector<12x4224xf32>
    %61 = arith.addf %54, %60 : vector<12x4224xf32>
    %c0_47 = arith.constant 0 : index
    %c0_48 = arith.constant 0 : index
    %62 = vector.load %arg3[%c0_47, %c0_48] : memref<12x1xf32, #tpu.memory_space<vmem>>, vector<12x1xf32>
    %63 = vector.broadcast %62 : vector<12x1xf32> to vector<12x4224xf32>
    %64 = arith.addf %61, %63 : vector<12x4224xf32>
    %c0_49 = arith.constant 0 : index
    %c0_50 = arith.constant 0 : index
    %c0_51 = arith.constant 0 : index
    %65 = vector.load %arg4[%c0_49, %c0_50, %c0_51] : memref<1x12x4224xf32, #tpu.memory_space<vmem>>, vector<1x12x4224xf32>
    %66 = vector.shape_cast %65 : vector<1x12x4224xf32> to vector<12x4224xf32>
    %67 = vector.shape_cast %64 : vector<12x4224xf32> to vector<1x12x4224xf32>
    tpu.vector_store %arg4[%c0_49, %c0_50, %c0_51], %67 {strides = array<i32>} : memref<1x12x4224xf32, #tpu.memory_space<vmem>>, vector<1x12x4224xf32>,
    return
  }
  func.func @transform_0(%arg0: i32) -> (i32, i32, i32) {
    %c0_i32 = arith.constant 0 : i32
    %c0_i32_0 = arith.constant 0 : i32
    %c0_i32_1 = arith.constant 0 : i32
    return %arg0, %c0_i32, %c0_i32_0 : i32, i32, i32
  }
  func.func @transform_1(%arg0: i32) -> (i32, i32, i32) {
    %c0_i32 = arith.constant 0 : i32
    %c0_i32_0 = arith.constant 0 : i32
    %c0_i32_1 = arith.constant 0 : i32
    %c0_i32_2 = arith.constant 0 : i32
    return %c0_i32, %c0_i32_0, %c0_i32_1 : i32, i32, i32
  }
  func.func @transform_2(%arg0: i32) -> (i32, i32) {
    %c0_i32 = arith.constant 0 : i32
    %c0_i32_0 = arith.constant 0 : i32
    %c0_i32_1 = arith.constant 0 : i32
    return %c0_i32, %c0_i32_0 : i32, i32
  }
  func.func @transform_3(%arg0: i32) -> (i32, i32, i32) {
    %c0_i32 = arith.constant 0 : i32
    %c0_i32_0 = arith.constant 0 : i32
    %c0_i32_1 = arith.constant 0 : i32
    return %arg0, %c0_i32, %c0_i32_0 : i32, i32, i32
  }
}

</mosaic_0001>

<bundles_post_ra>
// kernel: edic_decoder_forward.7
= control target key start
LH: loop header
LB: loop body
LE: loop exit
PB: predicated region body
PF: predicated region fallthrough
CT: control target
= control target key end

     0   :  { %s1240_s12 = smov 0   ;;  %s1367_s0 = inlined_call_operand.vmem [shape: f32[2,8,18], index: 0, kind: input, shape index: {}]   ;;  %s1368_s1 = inlined_call_operand.vmem [shape: bf16[9,32,8], index: 1, kind: input, shape index: {}]   ;;  %s1369_s2 = inlined_call_operand.vmem [shape: f32[32,1], index: 2, kind: input, shape index: {}]   ;;  %s1370_s3 = inlined_call_operand.vmem [shape: f32[2,32,8], index: 3, kind: output, shape index: {}]  }
   0x1 LB: > { %s965_s13 = sadd.s32 4294967295, %s1209_s12   ;;  %p969_p0 = scmp.ge.s32.totalorder %s1209_s12, 1  ;;  %s1209_s12 = sphi %s1240_s12, %s13_s12  }
   0x2   : > { %p136_p1 = scmp.lt.s32.totalorder %s1209_s12, 3 }
   0x4   : > { %p137_p2 = pnand %p969_p0, %p136_p1 }
   0x5   : > { %p159_p3 = scmp.lt.s32.totalorder (!%p137_p2), %s965_s13, 1  ;;  %vm193_vm0 = vcmask (!%p137_p2), 64512   ;;  %v1185_v0 = vld [vmem:[%s1368_s1 + $0x40] sm:$0xff] (!%p137_p2)   ;;  %v1187_v1 = vld [vmem:[%s1368_s1 + $0x10] sm:$0xff] (!%p137_p2)   ;;  %s1211_s22 = smov (!%p137_p2), 123   ;;  %v875_v4 = vld [vmem:[%s1369_s2 + $0x8] sm:$0xff] (!%p137_p2) }
   0x6   : > { %140 = sbr.rel (%p137_p2) target bundleno = 408 (0x198), region = 32  ;;  %1097 = vmatprep.mubr.msk.bf16.mxu0 (!%p137_p2), %vm193_vm0, %v1185_v0  ;;  %1073 = vmatprep.mubr.msk.bf16.mxu1 (!%p137_p2), %vm193_vm0, %v1187_v1  ;;  %s1212_s23 = smov (!%p137_p2), 122   ;;  %v874_v5 = vld [vmem:[%s1369_s2] sm:$0xff] (!%p137_p2)  ;;  %v1219_v6 = vmov (!%p137_p2), 0   ;;  %v876_v7 = vld [vmem:[%s1369_s2 + $0x10] sm:$0xff] (!%p137_p2)  ;;  %v877_v8 = vld [vmem:[%s1369_s2 + $0x18] sm:$0xff] (!%p137_p2) }
   0x7   : > { %s1213_s24 = smov (!%p137_p2), 127   ;;  %s1214_s25 = smov (!%p137_p2), 120   ;;  %1184 = vset.pattern.permute.xlu1 (!%p137_p2), %v1219_v6  ;;  %1183 = vset.pattern.permute.xlu0 (!%p137_p2), %v1219_v6  ;;  %vm200_vm1 = vcmask (!%p137_p2), 1043456   ;;  %v1186_v12 = vld [vmem:[%s1368_s1 + $0x48] sm:$0xff] (!%p137_p2)   ;;  %v1189_v14 = vld [vmem:[%s1368_s1 + $0x50] sm:$0xff] (!%p137_p2)   ;;  %v1188_v17 = vld [vmem:[%s1368_s1 + $0x18] sm:$0xff] (!%p137_p2)  }
   0x8   : > { %s1215_s26 = smov (!%p137_p2), 119   ;;  %s1216_s27 = smov (!%p137_p2), 126   ;;  %v1191_v19 = vld [vmem:[%s1368_s1] sm:$0xff] (!%p137_p2)   ;;  %v1190_v22 = vld [vmem:[%s1368_s1 + $0x58] sm:$0xff] (!%p137_p2)   ;;  %v1192_v26 = vld [vmem:[%s1368_s1 + $0x8] sm:$0xff] (!%p137_p2)  }
   0x9   : > { %s1217_s28 = smov (!%p137_p2), 118   ;;  %s1218_s29 = smov (!%p137_p2), 124   ;;  %v1193_v23 = vld [vmem:[%s1368_s1 + $0x60] sm:$0xff] (!%p137_p2)   ;;  %v1194_v30 = vld [vmem:[%s1368_s1 + $0x68] sm:$0xff] (!%p137_p2)   ;;  %v1197_v31 = vld [vmem:[%s1368_s1 + $0x70] sm:$0xff] (!%p137_p2)  }
   0xa   : > { %v1195_v27 = vld [vmem:[%s1368_s1 + $0x20] sm:$0xff] (!%p137_p2)   ;;  %v1196_v34 = vld [vmem:[%s1368_s1 + $0x28] sm:$0xff] (!%p137_p2)   ;;  %v1199_v35 = vld [vmem:[%s1368_s1 + $0x30] sm:$0xff] (!%p137_p2)  }
   0xb   : > { %v1198_v37 = vld [vmem:[%s1368_s1 + $0x78] sm:$0xff] (!%p137_p2)   ;;  %v1201_v38 = vld [vmem:[%s1368_s1 + $0x80] sm:$0xff] (!%p137_p2)   ;;  %v1202_v41 = vld [vmem:[%s1368_s1 + $0x88] sm:$0xff] (!%p137_p2)  }
   0xc   : > { %v1200_v40 = vld [vmem:[%s1368_s1 + $0x38] sm:$0xff] (!%p137_p2)  }
   0xd   : > { %s1372_s13 = smov (!%p159_p3, %s965_s13), 1 }
   0xe   : > { %s970_s18 = sshll.u32 %s1372_s13, 3  ;;  %s1043_s20 = sshll.u32 %s1372_s13, 5 }
   0xf   : > { %s162_s21 = scalar_lea.vmem %s1367_s0, %s970_s18 }
  0x10   : > { %v169_v2 = vld [vmem:[%s162_s21] sm:$0xff] }
  0x11   : > { %v170_v3 = vpack.c.bf16 %v169_v2, %v169_v2 }
  0x13   : > { %494 = vrot.lane.b32.xlu0 %v170_v3, %s1211_s22  ;;  %573 = vrot.lane.b32.xlu1 %v170_v3, %s1212_s23  ;;  %v270_v20 = vsel %vm200_vm1, %v170_v3, 0  ;;  %s167_s23 = scalar_lea.vmem %s1370_s3, %s1043_s20 }
  0x17   : > { %191 = vrot.lane.b32.xlu0 %v170_v3, %s1213_s24  ;;  %652 = vrot.lane.b32.xlu1 %v170_v3, %s1214_s25 }
  0x1b   : > { %731 = vrot.lane.b32.xlu1 %v170_v3, %s1215_s26  ;;  %336 = vrot.lane.b32.xlu0 %v170_v3, %s1216_s27 }
  0x1f   : > { %810 = vrot.lane.b32.xlu1 %v170_v3, %s1217_s28  ;;  %415 = vrot.lane.b32.xlu0 %v170_v3, %s1218_s29 }
  0x23   : > { %885 = vperm.xlu1 %1184, %v875_v4   ;;  %880 = vperm.xlu0 %1183, %v874_v5  }
  0x27   : > { %890 = vperm.xlu1 %1184, %v876_v7   ;;  %895 = vperm.xlu0 %1183, %v877_v8  }
  0x85   : > { %v495_v9 = vpop.permute.xlu0 %494  ;;  %v574_v10 = vpop.permute.xlu1 %573 }
  0x86   : > { %1161 = vmatprep.subr.msk.bf16.mxu0 %vm200_vm1, %v495_v9  ;;  %v503_v11 = vsel %vm200_vm1, %v495_v9, 0  ;;  %v582_v13 = vsel %vm200_vm1, %v574_v10, 0 }
  0x87   : > { %1096 = vmatpush3.bf16.msra.mxu0 %v503_v11 }
  0x88   : > { %1162 = vmatprep.subr.msk.bf16.mxu0 %vm200_vm1, %v574_v10 }
  0x89   : > { %v192_v15 = vpop.permute.xlu0 %191  ;;  %v653_v18 = vpop.permute.xlu1 %652 }
  0x8a   : > { %1157 = vmatprep.subr.msk.bf16.mxu1 %vm200_vm1, %v192_v15  ;;  %1098 = vmatmul.mubr.msk.bf16.vlgmr.msra.gmra.mrb[0].mxu0 %vm193_vm0, %v1186_v12  ;;  %v202_v16 = vsel %vm200_vm1, %v192_v15, 0  ;;  %v661_v24 = vsel %vm200_vm1, %v653_v18, 0 }
  0x8b   : > { %1072 = vmatpush3.bf16.msra.mxu1 %v202_v16  ;;  %1102 = vmatpush3.bf16.msra.mxu0 %v582_v13 }
  0x8c   : > { %1103 = vmatprep.mubr.msk.bf16.mxu0 %vm193_vm0, %v1189_v14  ;;  %1158 = vmatprep.subr.msk.bf16.mxu1 %vm200_vm1, %v170_v3 }
  0x8d   : > { %1163 = vmatprep.subr.msk.bf16.mxu0 %vm200_vm1, %v653_v18  ;;  %v337_v21 = vpop.permute.xlu0 %336  ;;  %v732_v25 = vpop.permute.xlu1 %731 }
  0x8e   : > { %1074 = vmatmul.mubr.msk.bf16.vlgmr.msra.gmra.mrb[0].mxu1 %vm193_vm0, %v1188_v17  ;;  %v345_v28 = vsel %vm200_vm1, %v337_v21, 0  ;;  %v740_v32 = vsel %vm200_vm1, %v732_v25, 0 }
  0x8f   : > { %1078 = vmatpush3.bf16.msra.mxu1 %v270_v20  ;;  %1079 = vmatprep.mubr.msk.bf16.mxu1 %vm193_vm0, %v1191_v19 }
  0x90   : > { %1159 = vmatprep.subr.msk.bf16.mxu1 %vm200_vm1, %v337_v21 }
  0x91   : > { %v416_v29 = vpop.permute.xlu0 %415  ;;  %v811_v33 = vpop.permute.xlu1 %810 }
  0x92   : > { %v424_v36 = vsel %vm200_vm1, %v416_v29, 0  ;;  %v819_v39 = vsel %vm200_vm1, %v811_v33, 0 }
  0x96   : > { %1104 = vmatmul.mubr.msk.bf16.vlgmr.msra.gmra.mrb[0].mxu0 %vm193_vm0, %v1190_v22 }
  0x97   : > { %1108 = vmatpush3.bf16.msra.mxu0 %v661_v24  ;;  %1109 = vmatprep.mubr.msk.bf16.mxu0 %vm193_vm0, %v1193_v23 }
  0x98   : > { %1164 = vmatprep.subr.msk.bf16.mxu0 %vm200_vm1, %v732_v25 }
  0x9a   : > { %1080 = vmatmul.mubr.msk.bf16.vlgmr.msra.gmra.mrb[0].mxu1 %vm193_vm0, %v1192_v26 }
  0x9b   : > { %1084 = vmatpush3.bf16.msra.mxu1 %v345_v28  ;;  %1085 = vmatprep.mubr.msk.bf16.mxu1 %vm193_vm0, %v1195_v27 }
  0x9c   : > { %1160 = vmatprep.subr.msk.bf16.mxu1 %vm200_vm1, %v416_v29 }
  0xa2   : > { %1110 = vmatmul.mubr.msk.bf16.vlgmr.msra.gmra.mrb[0].mxu0 %vm193_vm0, %v1194_v30  ;;  %v886_v45 = vpop.permute.xlu1 %885  ;;  %v881_v47 = vpop.permute.xlu0 %880 }
  0xa3   : > { %1114 = vmatpush3.bf16.msra.mxu0 %v740_v32  ;;  %1115 = vmatprep.mubr.msk.bf16.mxu0 %vm193_vm0, %v1197_v31 }
  0xa4   : > { %1165 = vmatprep.subr.msk.bf16.mxu0 %vm200_vm1, %v811_v33 }
  0xa6   : > { %1086 = vmatmul.mubr.msk.bf16.vlgmr.msra.gmra.mrb[0].mxu1 %vm193_vm0, %v1196_v34  ;;  %v891_v49 = vpop.permute.xlu1 %890  ;;  %v896_v58 = vpop.permute.xlu0 %895 }
  0xa7   : > { %1090 = vmatpush3.bf16.msra.mxu1 %v424_v36  ;;  %1091 = vmatprep.mubr.msk.bf16.mxu1 %vm193_vm0, %v1199_v35 }
  0xae   : > { %1116 = vmatmul.mubr.msk.bf16.vlgmr.msra.gmra.mrb[0].mxu0 %vm193_vm0, %v1198_v37 }
  0xaf   : > { %1120 = vmatpush3.bf16.msra.mxu0 %v819_v39  ;;  %1121 = vmatprep.mubr.msk.bf16.mxu0 %vm193_vm0, %v1201_v38 }
  0xb2   : > { %1092 = vmatmul.mubr.msk.bf16.vlgmr.msra.gmra.mrb[0].mxu1 %vm193_vm0, %v1200_v40 }
  0xba   : > { %1122 = vmatmul.mubr.msk.bf16.vlgmr.msra.gmra.mrb[0].mxu0 %vm193_vm0, %v1202_v41 }
 0x185   : > { %v1093_v42 = vpop.f32.mrb[0].mxu1 }
 0x186   : > { %v460_v43 = vpop.f32.mrb[1].mxu1 }
 0x187   : > { %v1094_v44 = vpop.f32.mrb[2].mxu1 }
 0x188   : > { %v463_v46 = vpop.f32.mrb[3].mxu1 }
 0x18d   : > { %v1123_v48 = vpop.f32.mrb[0].mxu0 }
 0x18e   : > { %v1125_v50 = vadd.f32 %v1123_v48, %v1093_v42  ;;  %v855_v51 = vpop.f32.mrb[1].mxu0 }
 0x18f   : > { %v1126_v52 = vadd.f32 %v855_v51, %v460_v43  ;;  %v1124_v53 = vpop.f32.mrb[2].mxu0 }
 0x190   : > { %v900_v54 = vadd.f32 %v1125_v50, %v891_v49  ;;  %v1127_v55 = vadd.f32 %v1124_v53, %v1094_v44  ;;  %v858_v56 = vpop.f32.mrb[3].mxu0 }
 0x191   : > { %v898_v57 = vadd.f32 %v1126_v52, %v881_v47  ;;  %v1128_v59 = vadd.f32 %v858_v56, %v463_v46 }
 0x192   : > { %v904_v60 = vmax.f32 %v900_v54, 0.0  ;;  %v901_v61 = vadd.f32 %v1127_v55, %v896_v58 }
 0x193   : > { %v902_v62 = vmax.f32 %v898_v57, 0.0  ;;  %v899_v63 = vadd.f32 %v1128_v59, %v886_v45 }
 0x194   : > { %908 = vst.msk [vmem:[%s167_s23 + $0x10] sm:$0xff] %vm193_vm0, %v904_v60  ;;  %v905_v0 = vmax.f32 %v901_v61, 0.0 }
 0x195   : > { %906 = vst.msk [vmem:[%s167_s23] sm:$0xff] %vm193_vm0, %v902_v62  ;;  %v903_v1 = vmax.f32 %v899_v63, 0.0 }
 0x196   : > { %909 = vst.msk [vmem:[%s167_s23 + $0x18] sm:$0xff] %vm193_vm0, %v905_v0 }
 0x197   : > { %907 = vst.msk [vmem:[%s167_s23 + $0x8] sm:$0xff] %vm193_vm0, %v903_v1 }
 0x198 PF: > { %s13_s12 = sadd.s32 1, %s1209_s12  }
 0x199   : > { %p10_p4 = scmp.ge.s32.totalorder %s13_s12, 4  }
 0x19b   :  { %12 = sbr.rel (!%p10_p4) target bundleno = 1 (0x1), region = 70 }

// kernel: edic_decoder_forward.8
= control target key start
LH: loop header
LB: loop body
LE: loop exit
PB: predicated region body
PF: predicated region fallthrough
CT: control target
= control target key end

     0   :  { %s1241_s12 = smov 0   ;;  %s1364_s0 = inlined_call_operand.vmem [shape: f32[2,8,38], index: 0, kind: input, shape index: {}]   ;;  %s1365_s1 = inlined_call_operand.vmem [shape: bf16[9,32,8], index: 1, kind: input, shape index: {}]   ;;  %s1366_s2 = inlined_call_operand.vmem [shape: f32[32,1], index: 2, kind: input, shape index: {}]   ;;  %s1367_s3 = inlined_call_operand.vmem [shape: f32[2,32,24], index: 3, kind: output, shape index: {}]  }
   0x1 LB: > { %s966_s13 = sadd.s32 4294967295, %s1210_s12   ;;  %p970_p0 = scmp.ge.s32.totalorder %s1210_s12, 1  ;;  %s1210_s12 = sphi %s1241_s12, %s13_s12  }
   0x2   : > { %p136_p1 = scmp.lt.s32.totalorder %s1210_s12, 3 }
   0x4   : > { %p137_p2 = pnand %p970_p0, %p136_p1 }
   0x5   : > { %p159_p3 = scmp.lt.s32.totalorder (!%p137_p2), %s966_s13, 1  ;;  %vm193_vm0 = vcmask (!%p137_p2), 64512   ;;  %v1186_v0 = vld [vmem:[%s1365_s1 + $0x40] sm:$0xff] (!%p137_p2)   ;;  %v1188_v1 = vld [vmem:[%s1365_s1 + $0x10] sm:$0xff] (!%p137_p2)   ;;  %s1212_s22 = smov (!%p137_p2), 121   ;;  %v875_v4 = vld [vmem:[%s1366_s2 + $0x8] sm:$0xff] (!%p137_p2) }
   0x6   : > { %140 = sbr.rel (%p137_p2) target bundleno = 408 (0x198), region = 32  ;;  %1098 = vmatprep.mubr.msk.bf16.mxu0 (!%p137_p2), %vm193_vm0, %v1186_v0  ;;  %1074 = vmatprep.mubr.msk.bf16.mxu1 (!%p137_p2), %vm193_vm0, %v1188_v1  ;;  %s1213_s23 = smov (!%p137_p2), 120   ;;  %v874_v5 = vld [vmem:[%s1366_s2] sm:$0xff] (!%p137_p2)  ;;  %v1220_v6 = vmov (!%p137_p2), 0   ;;  %v876_v7 = vld [vmem:[%s1366_s2 + $0x10] sm:$0xff] (!%p137_p2)  ;;  %v877_v8 = vld [vmem:[%s1366_s2 + $0x18] sm:$0xff] (!%p137_p2) }
   0x7   : > { %s1214_s24 = smov (!%p137_p2), 127   ;;  %s1215_s25 = smov (!%p137_p2), 116   ;;  %1185 = vset.pattern.permute.xlu1 (!%p137_p2), %v1220_v6  ;;  %1184 = vset.pattern.permute.xlu0 (!%p137_p2), %v1220_v6  ;;  %vm200_vm1 = vcmask (!%p137_p2), 1043456   ;;  %v1187_v12 = vld [vmem:[%s1365_s1 + $0x48] sm:$0xff] (!%p137_p2)   ;;  %v1190_v14 = vld [vmem:[%s1365_s1 + $0x50] sm:$0xff] (!%p137_p2)   ;;  %v1189_v17 = vld [vmem:[%s1365_s1 + $0x18] sm:$0xff] (!%p137_p2)  }
   0x8   : > { %s1216_s26 = smov (!%p137_p2), 115   ;;  %s1217_s27 = smov (!%p137_p2), 126   ;;  %v1192_v19 = vld [vmem:[%s1365_s1] sm:$0xff] (!%p137_p2)   ;;  %v1191_v22 = vld [vmem:[%s1365_s1 + $0x58] sm:$0xff] (!%p137_p2)   ;;  %v1193_v26 = vld [vmem:[%s1365_s1 + $0x8] sm:$0xff] (!%p137_p2)   ;;  %vm906_vm2 = vcmask (!%p137_p2), 195584  }
   0x9   : > { %s1218_s28 = smov (!%p137_p2), 114   ;;  %s1219_s29 = smov (!%p137_p2), 122   ;;  %v1194_v23 = vld [vmem:[%s1365_s1 + $0x60] sm:$0xff] (!%p137_p2)   ;;  %v1195_v30 = vld [vmem:[%s1365_s1 + $0x68] sm:$0xff] (!%p137_p2)   ;;  %v1198_v31 = vld [vmem:[%s1365_s1 + $0x70] sm:$0xff] (!%p137_p2)  }
   0xa   : > { %v1196_v27 = vld [vmem:[%s1365_s1 + $0x20] sm:$0xff] (!%p137_p2)   ;;  %v1197_v34 = vld [vmem:[%s1365_s1 + $0x28] sm:$0xff] (!%p137_p2)   ;;  %v1200_v35 = vld [vmem:[%s1365_s1 + $0x30] sm:$0xff] (!%p137_p2)  }
   0xb   : > { %v1199_v37 = vld [vmem:[%s1365_s1 + $0x78] sm:$0xff] (!%p137_p2)   ;;  %v1202_v38 = vld [vmem:[%s1365_s1 + $0x80] sm:$0xff] (!%p137_p2)   ;;  %v1203_v41 = vld [vmem:[%s1365_s1 + $0x88] sm:$0xff] (!%p137_p2)  }
   0xc   : > { %v1201_v40 = vld [vmem:[%s1365_s1 + $0x38] sm:$0xff] (!%p137_p2)  }
   0xd   : > { %s1369_s13 = smov (!%p159_p3, %s966_s13), 1 }
   0xe   : > { %s971_s18 = sshll.u32 %s1369_s13, 3  ;;  %s1044_s20 = sshll.u32 %s1369_s13, 5 }
   0xf   : > { %s162_s21 = scalar_lea.vmem %s1364_s0, %s971_s18 }
  0x10   : > { %v169_v2 = vld [vmem:[%s162_s21] sm:$0xff] }
  0x11   : > { %v170_v3 = vpack.c.bf16 %v169_v2, %v169_v2 }
  0x13   : > { %494 = vrot.lane.b32.xlu0 %v170_v3, %s1212_s22  ;;  %573 = vrot.lane.b32.xlu1 %v170_v3, %s1213_s23  ;;  %v270_v20 = vsel %vm200_vm1, %v170_v3, 0  ;;  %s167_s23 = scalar_lea.vmem %s1367_s3, %s1044_s20 }
  0x17   : > { %191 = vrot.lane.b32.xlu0 %v170_v3, %s1214_s24  ;;  %652 = vrot.lane.b32.xlu1 %v170_v3, %s1215_s25 }
  0x1b   : > { %731 = vrot.lane.b32.xlu1 %v170_v3, %s1216_s26  ;;  %336 = vrot.lane.b32.xlu0 %v170_v3, %s1217_s27 }
  0x1f   : > { %810 = vrot.lane.b32.xlu1 %v170_v3, %s1218_s28  ;;  %415 = vrot.lane.b32.xlu0 %v170_v3, %s1219_s29 }
  0x23   : > { %885 = vperm.xlu1 %1185, %v875_v4   ;;  %880 = vperm.xlu0 %1184, %v874_v5  }
  0x27   : > { %890 = vperm.xlu1 %1185, %v876_v7   ;;  %895 = vperm.xlu0 %1184, %v877_v8  }
  0x85   : > { %v495_v9 = vpop.permute.xlu0 %494  ;;  %v574_v10 = vpop.permute.xlu1 %573 }
  0x86   : > { %1162 = vmatprep.subr.msk.bf16.mxu0 %vm200_vm1, %v495_v9  ;;  %v503_v11 = vsel %vm200_vm1, %v495_v9, 0  ;;  %v582_v13 = vsel %vm200_vm1, %v574_v10, 0 }
  0x87   : > { %1097 = vmatpush3.bf16.msra.mxu0 %v503_v11 }
  0x88   : > { %1163 = vmatprep.subr.msk.bf16.mxu0 %vm200_vm1, %v574_v10 }
  0x89   : > { %v192_v15 = vpop.permute.xlu0 %191  ;;  %v653_v18 = vpop.permute.xlu1 %652 }
  0x8a   : > { %1158 = vmatprep.subr.msk.bf16.mxu1 %vm200_vm1, %v192_v15  ;;  %1099 = vmatmul.mubr.msk.bf16.vlgmr.msra.gmra.mrb[0].mxu0 %vm193_vm0, %v1187_v12  ;;  %v202_v16 = vsel %vm200_vm1, %v192_v15, 0  ;;  %v661_v24 = vsel %vm200_vm1, %v653_v18, 0 }
  0x8b   : > { %1073 = vmatpush3.bf16.msra.mxu1 %v202_v16  ;;  %1103 = vmatpush3.bf16.msra.mxu0 %v582_v13 }
  0x8c   : > { %1104 = vmatprep.mubr.msk.bf16.mxu0 %vm193_vm0, %v1190_v14  ;;  %1159 = vmatprep.subr.msk.bf16.mxu1 %vm200_vm1, %v170_v3 }
  0x8d   : > { %1164 = vmatprep.subr.msk.bf16.mxu0 %vm200_vm1, %v653_v18  ;;  %v337_v21 = vpop.permute.xlu0 %336  ;;  %v732_v25 = vpop.permute.xlu1 %731 }
  0x8e   : > { %1075 = vmatmul.mubr.msk.bf16.vlgmr.msra.gmra.mrb[0].mxu1 %vm193_vm0, %v1189_v17  ;;  %v345_v28 = vsel %vm200_vm1, %v337_v21, 0  ;;  %v740_v32 = vsel %vm200_vm1, %v732_v25, 0 }
  0x8f   : > { %1079 = vmatpush3.bf16.msra.mxu1 %v270_v20  ;;  %1080 = vmatprep.mubr.msk.bf16.mxu1 %vm193_vm0, %v1192_v19 }
  0x90   : > { %1160 = vmatprep.subr.msk.bf16.mxu1 %vm200_vm1, %v337_v21 }
  0x91   : > { %v416_v29 = vpop.permute.xlu0 %415  ;;  %v811_v33 = vpop.permute.xlu1 %810 }
  0x92   : > { %v424_v36 = vsel %vm200_vm1, %v416_v29, 0  ;;  %v819_v39 = vsel %vm200_vm1, %v811_v33, 0 }
  0x96   : > { %1105 = vmatmul.mubr.msk.bf16.vlgmr.msra.gmra.mrb[0].mxu0 %vm193_vm0, %v1191_v22 }
  0x97   : > { %1109 = vmatpush3.bf16.msra.mxu0 %v661_v24  ;;  %1110 = vmatprep.mubr.msk.bf16.mxu0 %vm193_vm0, %v1194_v23 }
  0x98   : > { %1165 = vmatprep.subr.msk.bf16.mxu0 %vm200_vm1, %v732_v25 }
  0x9a   : > { %1081 = vmatmul.mubr.msk.bf16.vlgmr.msra.gmra.mrb[0].mxu1 %vm193_vm0, %v1193_v26 }
  0x9b   : > { %1085 = vmatpush3.bf16.msra.mxu1 %v345_v28  ;;  %1086 = vmatprep.mubr.msk.bf16.mxu1 %vm193_vm0, %v1196_v27 }
  0x9c   : > { %1161 = vmatprep.subr.msk.bf16.mxu1 %vm200_vm1, %v416_v29 }
  0xa2   : > { %1111 = vmatmul.mubr.msk.bf16.vlgmr.msra.gmra.mrb[0].mxu0 %vm193_vm0, %v1195_v30  ;;  %v886_v45 = vpop.permute.xlu1 %885  ;;  %v881_v47 = vpop.permute.xlu0 %880 }
  0xa3   : > { %1115 = vmatpush3.bf16.msra.mxu0 %v740_v32  ;;  %1116 = vmatprep.mubr.msk.bf16.mxu0 %vm193_vm0, %v1198_v31 }
  0xa4   : > { %1166 = vmatprep.subr.msk.bf16.mxu0 %vm200_vm1, %v811_v33 }
  0xa6   : > { %1087 = vmatmul.mubr.msk.bf16.vlgmr.msra.gmra.mrb[0].mxu1 %vm193_vm0, %v1197_v34  ;;  %v891_v49 = vpop.permute.xlu1 %890  ;;  %v896_v58 = vpop.permute.xlu0 %895 }
  0xa7   : > { %1091 = vmatpush3.bf16.msra.mxu1 %v424_v36  ;;  %1092 = vmatprep.mubr.msk.bf16.mxu1 %vm193_vm0, %v1200_v35 }
  0xae   : > { %1117 = vmatmul.mubr.msk.bf16.vlgmr.msra.gmra.mrb[0].mxu0 %vm193_vm0, %v1199_v37 }
  0xaf   : > { %1121 = vmatpush3.bf16.msra.mxu0 %v819_v39  ;;  %1122 = vmatprep.mubr.msk.bf16.mxu0 %vm193_vm0, %v1202_v38 }
  0xb2   : > { %1093 = vmatmul.mubr.msk.bf16.vlgmr.msra.gmra.mrb[0].mxu1 %vm193_vm0, %v1201_v40 }
  0xba   : > { %1123 = vmatmul.mubr.msk.bf16.vlgmr.msra.gmra.mrb[0].mxu0 %vm193_vm0, %v1203_v41 }
 0x185   : > { %v1094_v42 = vpop.f32.mrb[0].mxu1 }
 0x186   : > { %v460_v43 = vpop.f32.mrb[1].mxu1 }
 0x187   : > { %v1095_v44 = vpop.f32.mrb[2].mxu1 }
 0x188   : > { %v463_v46 = vpop.f32.mrb[3].mxu1 }
 0x18d   : > { %v1124_v48 = vpop.f32.mrb[0].mxu0 }
 0x18e   : > { %v1126_v50 = vadd.f32 %v1124_v48, %v1094_v42  ;;  %v855_v51 = vpop.f32.mrb[1].mxu0 }
 0x18f   : > { %v1127_v52 = vadd.f32 %v855_v51, %v460_v43  ;;  %v1125_v53 = vpop.f32.mrb[2].mxu0 }
 0x190   : > { %v900_v54 = vadd.f32 %v1126_v50, %v891_v49  ;;  %v1128_v55 = vadd.f32 %v1125_v53, %v1095_v44  ;;  %v858_v56 = vpop.f32.mrb[3].mxu0 }
 0x191   : > { %v898_v57 = vadd.f32 %v1127_v52, %v881_v47  ;;  %v1129_v59 = vadd.f32 %v858_v56, %v463_v46 }
 0x192   : > { %v904_v60 = vmax.f32 %v900_v54, 0.0  ;;  %v901_v61 = vadd.f32 %v1128_v55, %v896_v58 }
 0x193   : > { %v902_v62 = vmax.f32 %v898_v57, 0.0  ;;  %v899_v63 = vadd.f32 %v1129_v59, %v886_v45 }
 0x194   : > { %909 = vst.msk [vmem:[%s167_s23 + $0x10] sm:$0xff] %vm906_vm2, %v904_v60  ;;  %v905_v0 = vmax.f32 %v901_v61, 0.0 }
 0x195   : > { %907 = vst.msk [vmem:[%s167_s23] sm:$0xff] %vm906_vm2, %v902_v62  ;;  %v903_v1 = vmax.f32 %v899_v63, 0.0 }
 0x196   : > { %910 = vst.msk [vmem:[%s167_s23 + $0x18] sm:$0xff] %vm906_vm2, %v905_v0 }
 0x197   : > { %908 = vst.msk [vmem:[%s167_s23 + $0x8] sm:$0xff] %vm906_vm2, %v903_v1 }
 0x198 PF: > { %s13_s12 = sadd.s32 1, %s1210_s12  }
 0x199   : > { %p10_p4 = scmp.ge.s32.totalorder %s13_s12, 4  }
 0x19b   :  { %12 = sbr.rel (!%p10_p4) target bundleno = 1 (0x1), region = 70 }

// kernel: edic_decoder_forward.9
= control target key start
LH: loop header
LB: loop body
LE: loop exit
PB: predicated region body
PF: predicated region fallthrough
CT: control target
= control target key end

     0   :  { %s1034_s15 = smov 0   ;;  %s1136_s0 = inlined_call_operand.vmem [shape: f32[2,8,102], index: 0, kind: input, shape index: {}]   ;;  %s1137_s1 = inlined_call_operand.vmem [shape: f32[2,12,80], index: 1, kind: input, shape index: {}]   ;;  %s1138_s2 = inlined_call_operand.vmem [shape: bf16[9,12,8], index: 2, kind: input, shape index: {}]   ;;  %s1139_s3 = inlined_call_operand.vmem [shape: f32[12,1], index: 3, kind: input, shape index: {}]   ;;  %s1140_s4 = inlined_call_operand.vmem [shape: f32[2,12,80], index: 4, kind: output, shape index: {}]  }
   0x1 LB: > { %s838_s16 = sadd.s32 4294967295, %s996_s15   ;;  %p842_p0 = scmp.ge.s32.totalorder %s996_s15, 1  ;;  %s996_s15 = sphi %s1034_s15, %s14_s15  }
   0x2   : > { %p171_p1 = scmp.lt.s32.totalorder %s996_s15, 3 }
   0x4   : > { %p172_p2 = pnand %p842_p0, %p171_p1 }
   0x5   : > { %p201_p3 = scmp.lt.s32.totalorder (!%p172_p2), %s838_s16, 1  ;;  %v998_v0 = vmov (!%p172_p2), 0.0   ;;  %vm999_vm0 = vmmov (!%p172_p2), 0   ;;  %vm235_vm1 = vcmask (!%p172_p2), 1043456   ;;  %s1000_s21 = smov (!%p172_p2), 127   ;;  %vm231_vm2 = vcmask (!%p172_p2), 64512  }
   0x6   : > { %175 = sbr.rel (%p172_p2) target bundleno = 395 (0x18b), region = 36  ;;  %904 = vmatprep.subr.bf16.mxu0 (!%p172_p2), %v998_v0  ;;  %910 = vmatprep.subr.bf16.mxu1 (!%p172_p2), %v998_v0  ;;  %s1001_s22 = smov (!%p172_p2), 118   ;;  %v982_v4 = vld [vmem:[%s1138_s2] sm:$0x3f] (!%p172_p2)   ;;  %v746_v6 = vld [vmem:[%s1139_s3 + $0x8] sm:$0xf] (!%p172_p2) }
   0x7   : > { %906 = vmatprep.mubr.msk.bf16.mxu0 (!%p172_p2), %vm999_vm0, %v998_v0  ;;  %912 = vmatprep.mubr.msk.bf16.mxu1 (!%p172_p2), %vm999_vm0, %v998_v0  ;;  %s1002_s25 = smov (!%p172_p2), 126   ;;  %s1003_s26 = smov (!%p172_p2), 117   ;;  %v745_v5 = vld [vmem:[%s1139_s3] sm:$0xff] (!%p172_p2)  ;;  %v1008_v7 = vmov (!%p172_p2), 0   ;;  %v981_v11 = vld [vmem:[%s1138_s2 + $0x8] sm:$0x3f] (!%p172_p2)  }
   0x8   : > { %s1004_s27 = smov (!%p172_p2), 116   ;;  %s1005_s28 = smov (!%p172_p2), 108   ;;  %979 = vset.pattern.permute.xlu0 (!%p172_p2), %v1008_v7  ;;  %980 = vset.pattern.permute.xlu1 (!%p172_p2), %v1008_v7  ;;  %v984_v13 = vld [vmem:[%s1138_s2 + $0x18] sm:$0x3f] (!%p172_p2)   ;;  %v983_v18 = vld [vmem:[%s1138_s2 + $0x10] sm:$0x3f] (!%p172_p2)  }
   0x9   : > { %s1006_s29 = smov (!%p172_p2), 107   ;;  %s1007_s30 = smov (!%p172_p2), 106   ;;  %v986_v20 = vld [vmem:[%s1138_s2 + $0x28] sm:$0x3f] (!%p172_p2)   ;;  %v985_v25 = vld [vmem:[%s1138_s2 + $0x20] sm:$0x3f] (!%p172_p2)  }
   0xa   : > { %v988_v26 = vld [vmem:[%s1138_s2 + $0x38] sm:$0x3f] (!%p172_p2)   ;;  %v987_v29 = vld [vmem:[%s1138_s2 + $0x30] sm:$0x3f] (!%p172_p2)   ;;  %v989_v31 = vld [vmem:[%s1138_s2 + $0x40] sm:$0x3f] (!%p172_p2)  }
   0xb   : > { %vm767_vm3 = vcmask (!%p172_p2), 654336   ;;  %vm769_vm4 = vcmask (!%p172_p2), 650240  }
   0xd   : > { %s1142_s16 = smov (!%p201_p3, %s838_s16), 1 }
   0xe   : > { %s843_s17 = sshll.u32 %s1142_s16, 3 }
   0xf   : > { %s204_s20 = scalar_lea.vmem %s1136_s0, %s843_s17 }
  0x10   : > { %v216_v1 = vld [vmem:[%s204_s20] sm:$0xff] }
  0x11   : > { %v217_v2 = vpack.c.bf16 %v216_v1, %v216_v1 }
  0x13   : > { %229 = vrot.lane.b32.xlu0 %v217_v2, %s1000_s21  ;;  %399 = vrot.lane.b32.xlu1 %v217_v2, %s1001_s22  ;;  %v289_v3 = vsel %vm235_vm1, %v217_v2, 0 }
  0x14   : > { %911 = vmatpush3.bf16.msra.mxu1 %v289_v3 }
  0x15   : > { %922 = vmatprep.subr.bf16.mxu1 %v998_v0 }
  0x17   : > { %340 = vrot.lane.b32.xlu0 %v217_v2, %s1002_s25  ;;  %458 = vrot.lane.b32.xlu1 %v217_v2, %s1003_s26 }
  0x18   : > { %913 = vmatmul.mubr.msk.bf16.vlgmr.msra.gmra.mrb[0].mxu1 %vm231_vm2, %v982_v4 }
  0x19   : > { %924 = vmatprep.mubr.msk.bf16.mxu1 %vm999_vm0, %v998_v0 }
  0x1b   : > { %517 = vrot.lane.b32.xlu0 %v217_v2, %s1004_s27  ;;  %576 = vrot.lane.b32.xlu1 %v217_v2, %s1005_s28  ;;  %s884_s27 = sshll.u32 %s1142_s16, 4 }
  0x1c   : > { %s214_s6 = scalar_lea.vmem %s1140_s4, %s884_s27 }
  0x1f   : > { %635 = vrot.lane.b32.xlu0 %v217_v2, %s1006_s29  ;;  %694 = vrot.lane.b32.xlu1 %v217_v2, %s1007_s30  ;;  %s209_s30 = scalar_lea.vmem %s1137_s1, %s884_s27 }
  0x23   : > { %749 = vperm.xlu0 %979, %v745_v5   ;;  %754 = vperm.xlu1 %980, %v746_v6  }
  0x85   : > { %v230_v8 = vpop.permute.xlu0 %229  ;;  %v400_v9 = vpop.permute.xlu1 %399 }
  0x86   : > { %v237_v10 = vsel %vm235_vm1, %v230_v8, 0  ;;  %v405_v12 = vsel %vm235_vm1, %v400_v9, 0 }
  0x87   : > { %905 = vmatpush3.bf16.msra.mxu0 %v237_v10  ;;  %923 = vmatpush3.bf16.msra.mxu1 %v405_v12 }
  0x88   : > { %916 = vmatprep.subr.bf16.mxu0 %v998_v0  ;;  %934 = vmatprep.subr.bf16.mxu1 %v998_v0 }
  0x89   : > { %v341_v14 = vpop.permute.xlu0 %340  ;;  %v459_v16 = vpop.permute.xlu1 %458 }
  0x8a   : > { %v346_v15 = vsel %vm235_vm1, %v341_v14, 0  ;;  %907 = vmatmul.mubr.msk.bf16.vlgmr.msra.gmra.mrb[0].mxu0 %vm231_vm2, %v981_v11  ;;  %925 = vmatmul.mubr.msk.bf16.vlgmr.msra.gmra.mrb[4].mxu1 %vm231_vm2, %v984_v13  ;;  %v464_v21 = vsel %vm235_vm1, %v459_v16, 0 }
  0x8b   : > { %917 = vmatpush3.bf16.msra.mxu0 %v346_v15  ;;  %918 = vmatprep.mubr.msk.bf16.mxu0 %vm999_vm0, %v998_v0 }
  0x8c   : > { %928 = vmatprep.subr.bf16.mxu0 %v998_v0  ;;  %936 = vmatprep.mubr.msk.bf16.mxu1 %vm999_vm0, %v998_v0 }
  0x8d   : > { %v518_v17 = vpop.permute.xlu0 %517  ;;  %v577_v24 = vpop.permute.xlu1 %576 }
  0x8e   : > { %v523_v19 = vsel %vm235_vm1, %v518_v17, 0  ;;  %v582_v27 = vsel %vm235_vm1, %v577_v24, 0  ;;  %v760_v24 = vld [vmem:[%s209_s30 + $0x8] sm:$0xf] }
  0x8f   : > { %935 = vmatpush3.bf16.msra.mxu1 %v523_v19  ;;  %v759_v19 = vld [vmem:[%s209_s30] sm:$0xff] }
  0x90   : > { %946 = vmatprep.subr.bf16.mxu1 %v998_v0 }
  0x91   : > { %v636_v22 = vpop.permute.xlu0 %635  ;;  %v695_v28 = vpop.permute.xlu1 %694 }
  0x92   : > { %919 = vmatmul.mubr.msk.bf16.vlgmr.msra.gmra.mrb[4].mxu0 %vm231_vm2, %v983_v18  ;;  %937 = vmatmul.mubr.msk.bf16.vlgmr.msra.gmra.mrb[8].mxu1 %vm231_vm2, %v986_v20  ;;  %v641_v23 = vsel %vm235_vm1, %v636_v22, 0  ;;  %v700_v30 = vsel %vm235_vm1, %v695_v28, 0 }
  0x93   : > { %929 = vmatpush3.bf16.msra.mxu0 %v464_v21  ;;  %930 = vmatprep.mubr.msk.bf16.mxu0 %vm999_vm0, %v998_v0 }
  0x94   : > { %940 = vmatprep.subr.bf16.mxu0 %v998_v0  ;;  %947 = vmatpush3.bf16.msra.mxu1 %v641_v23 }
  0x95   : > { %948 = vmatprep.mubr.msk.bf16.mxu1 %vm999_vm0, %v998_v0 }
  0x9a   : > { %931 = vmatmul.mubr.msk.bf16.vlgmr.msra.gmra.mrb[8].mxu0 %vm231_vm2, %v985_v25  ;;  %949 = vmatmul.mubr.msk.bf16.vlgmr.msra.gmra.mrb[12].mxu1 %vm231_vm2, %v988_v26 }
  0x9b   : > { %941 = vmatpush3.bf16.msra.mxu0 %v582_v27  ;;  %942 = vmatprep.mubr.msk.bf16.mxu0 %vm999_vm0, %v998_v0 }
  0x9c   : > { %952 = vmatprep.subr.bf16.mxu0 %v998_v0 }
  0xa2   : > { %943 = vmatmul.mubr.msk.bf16.vlgmr.msra.gmra.mrb[12].mxu0 %vm231_vm2, %v987_v29  ;;  %v750_v15 = vpop.permute.xlu0 %749  ;;  %v755_v20 = vpop.permute.xlu1 %754 }
  0xa3   : > { %953 = vmatpush3.bf16.msra.mxu0 %v700_v30  ;;  %954 = vmatprep.mubr.msk.bf16.mxu0 %vm999_vm0, %v998_v0 }
  0xaa   : > { %955 = vmatmul.mubr.msk.bf16.vlgmr.msra.gmra.mrb[16].mxu0 %vm231_vm2, %v989_v31 }
  0xeb   : > { %v325_v32 = vpop.f32.mrb[0].mxu1 }
  0xec   : > { %v914_v33 = vpop.f32.mrb[1].mxu1 }
  0xed   : > { %v328_v34 = vpop.f32.mrb[2].mxu1 }
  0xee   : > { %v915_v35 = vpop.f32.mrb[3].mxu1 }
 0x15d   : > { %v273_v36 = vpop.f32.mrb[0].mxu0  ;;  %v441_v37 = vpop.f32.mrb[4].mxu1 }
 0x15e   : > { %v326_v38 = vadd.f32 %v325_v32, %v273_v36  ;;  %v908_v39 = vpop.f32.mrb[1].mxu0  ;;  %v926_v40 = vpop.f32.mrb[5].mxu1 }
 0x15f   : > { %v276_v41 = vpop.f32.mrb[2].mxu0  ;;  %v444_v42 = vpop.f32.mrb[6].mxu1 }
 0x160   : > { %v329_v43 = vadd.f32 %v328_v34, %v276_v41  ;;  %v909_v44 = vpop.f32.mrb[3].mxu0  ;;  %v927_v45 = vpop.f32.mrb[7].mxu1 }
 0x165   : > { %v382_v46 = vpop.f32.mrb[4].mxu0  ;;  %v559_v47 = vpop.f32.mrb[8].mxu1 }
 0x166   : > { %v389_v48 = vadd.f32 %v382_v46, %v326_v38  ;;  %v920_v49 = vpop.f32.mrb[5].mxu0  ;;  %v938_v50 = vpop.f32.mrb[9].mxu1 }
 0x167   : > { %v385_v51 = vpop.f32.mrb[6].mxu0  ;;  %v562_v52 = vpop.f32.mrb[10].mxu1 }
 0x168   : > { %v390_v53 = vadd.f32 %v385_v51, %v329_v43  ;;  %v448_v54 = vadd.f32 %v441_v37, %v389_v48  ;;  %v921_v55 = vpop.f32.mrb[7].mxu0  ;;  %v939_v56 = vpop.f32.mrb[11].mxu1 }
 0x16a   : > { %v449_v57 = vadd.f32 %v444_v42, %v390_v53 }
 0x16d   : > { %v500_v58 = vpop.f32.mrb[8].mxu0  ;;  %v677_v59 = vpop.f32.mrb[12].mxu1 }
 0x16e   : > { %v507_v60 = vadd.f32 %v500_v58, %v448_v54  ;;  %v932_v61 = vpop.f32.mrb[9].mxu0  ;;  %v950_v62 = vpop.f32.mrb[13].mxu1 }
 0x16f   : > { %v503_v63 = vpop.f32.mrb[10].mxu0  ;;  %v680_v0 = vpop.f32.mrb[14].mxu1 }
 0x170   : > { %v508_v1 = vadd.f32 %v503_v63, %v449_v57  ;;  %v566_v2 = vadd.f32 %v559_v47, %v507_v60  ;;  %v933_v3 = vpop.f32.mrb[11].mxu0  ;;  %v951_v4 = vpop.f32.mrb[15].mxu1 }
 0x172   : > { %v567_v5 = vadd.f32 %v562_v52, %v508_v1 }
 0x175   : > { %v618_v6 = vpop.f32.mrb[12].mxu0 }
 0x176   : > { %v625_v7 = vadd.f32 %v618_v6, %v566_v2  ;;  %v944_v8 = vpop.f32.mrb[13].mxu0 }
 0x177   : > { %v621_v9 = vpop.f32.mrb[14].mxu0 }
 0x178   : > { %v626_v10 = vadd.f32 %v621_v9, %v567_v5  ;;  %v684_v11 = vadd.f32 %v677_v59, %v625_v7  ;;  %v945_v12 = vpop.f32.mrb[15].mxu0 }
 0x17a   : > { %v685_v13 = vadd.f32 %v680_v0, %v626_v10 }
 0x17d   : > { %v736_v14 = vpop.f32.mrb[16].mxu0 }
 0x17e   : > { %v743_v16 = vadd.f32 %v736_v14, %v684_v11  ;;  %v956_v17 = vpop.f32.mrb[17].mxu0 }
 0x17f   : > { %v739_v18 = vpop.f32.mrb[18].mxu0 }
 0x180   : > { %v744_v21 = vadd.f32 %v739_v18, %v685_v13  ;;  %v757_v22 = vadd.f32 %v750_v15, %v743_v16  ;;  %v957_v23 = vpop.f32.mrb[19].mxu0 }
 0x182   : > { %v761_v25 = vsub.f32 %v759_v19, %v757_v22  ;;  %v758_v26 = vadd.f32 %v755_v20, %v744_v21 }
 0x184   : > { %v958_v27 = vround.rtne.f32 %v761_v25  ;;  %v762_v28 = vsub.f32 %v760_v24, %v758_v26 }
 0x186   : > { %v765_v29 = vadd.f32 %v958_v27, %v757_v22  ;;  %v959_v30 = vround.rtne.f32 %v762_v28 }
 0x188   : > { %768 = vst.msk [vmem:[%s214_s6] sm:$0xff] %vm767_vm3, %v765_v29  ;;  %v766_v31 = vadd.f32 %v959_v30, %v758_v26 }
 0x18a   : > { %770 = vst.msk [vmem:[%s214_s6 + $0x8] sm:$0xf] %vm769_vm4, %v766_v31 }
 0x18b PF: > { %s14_s15 = sadd.s32 1, %s996_s15  }
 0x18c   : > { %p11_p4 = scmp.ge.s32.totalorder %s14_s15, 4  }
 0x18e   :  { %13 = sbr.rel (!%p11_p4) target bundleno = 1 (0x1), region = 77 }

// kernel: edic_decoder_forward.10
= control target key start
LH: loop header
LB: loop body
LE: loop exit
PB: predicated region body
PF: predicated region fallthrough
CT: control target
= control target key end

     0   :  { %10 = vsyncpa [#allocation3], 0  ;;  %s1654_s18 = smov 0   ;;  %s1856_s0 = inlined_call_operand.vmem [shape: f32[2,12,102], index: 0, kind: input, shape index: {}]   ;;  %s1857_s1 = inlined_call_operand.vmem [shape: bf16[9,32,12], index: 1, kind: input, shape index: {}]   ;;  %s1858_s2 = inlined_call_operand.vmem [shape: f32[32,1], index: 2, kind: input, shape index: {}]   ;;  %s1859_s3 = inlined_call_operand.hbm [shape: bf16[8,8], index: 3, kind: input, shape index: {}]   ;;  %s1860_s4 = inlined_call_operand.vmem [shape: f32[8,1], index: 4, kind: input, shape index: {}]   ;;  %s1861_s5 = inlined_call_operand.vmem [shape: f32[2,32,80], index: 5, kind: output, shape index: {}]  }
   0x1 LB: > { %s1660_s19 = sadd.s32 4294967295, %s1610_s18   ;;  %p1275_p0 = scmp.ge.s32.totalorder %s1610_s18, 1  ;;  %s1610_s18 = sphi %s1654_s18, %s16_s18  }
   0x2   : > { %p157_p1 = scmp.lt.s32.totalorder %s1610_s18, 3  ;;  %p1862_p3 = scmp.eq.s32.totalorder %s1660_s19, 0 }
   0x3   : > { %s1612_s21 = smov [#allocation2]   ;;  %s1572_s26 = scalar_lea.hbm %s1859_s3, 64 }
   0x4   : > { %p1664_p2 = pnand %p1275_p0, %p157_p1  ;;  %s176_s22 = sshll.u32 %s1612_s21, 4  ;;  %s177_s22 = int_to_ptr.vmem [resolvable:$true] %s176_s22 }
   0x5   : > { %p1573_p6 = scmp.ne.s32.totalorder %s1859_s3, %s1572_s26  ;;  %p1579_p10 = scmp.lt.u32.totalorder %s1572_s26, %s1859_s3 }
   0x6   : > { %s1864_s20 = scalar_select %p1664_p2, 1, 0 }
   0x7   : > { %p1518_p4 = pneg %p1664_p2 }
   0x9   : > { %p1673_p5 = pnand %p1862_p3, %p1518_p4 }
   0xb   : > { %p1574_p7 = pneg %p1673_p5 }
   0xd   : > { %p1575_p8 = pnand %p1574_p7, %p1573_p6 }
   0xf   : > { %p1576_p9 = pneg %p1575_p8 }
  0x11   : > { %p1581_p11 = pnand %p1579_p10, %p1576_p9 }
  0x13   : > { %1584 = shalt.err (!%p1581_p11)
}
  0x14   : > { %s1585_s6 = scalar_lea.vmem %s177_s22, 64  ;;  %p1593_p1 = scmp.lt.s32.totalorder %s177_s22, %s177_s22 }
  0x15   : > { %p1586_p12 = scmp.ne.s32.totalorder %s177_s22, %s1585_s6  ;;  %p1594_p4 = scmp.lt.s32.totalorder %s1585_s6, %s1585_s6 }
  0x17   : > { %p1588_p13 = pnand %p1586_p12, %p1574_p7  ;;  %p1595_p3 = por %p1594_p4, %p1593_p1 }
  0x19   : > { %p1589_p0 = pneg %p1588_p13 }
  0x1b   : > { %p1596_p2 = pnand %p1595_p3, %p1589_p0 }
  0x1d   : > { %1599 = shalt.err (!%p1596_p2)
}
  0x1e   : > { %1521 = dma.hbm_to_vmem [thread:$0]  (!%p1673_p5), %s1859_s3, 64, %s177_s22, [#allocation3]  }
  0x1f   : > { %p1866_p6 = scmp.ne.s32.totalorder %s1864_s20, 0 }
  0x20   : > { %p1867_p8 = scmp.eq.s32.totalorder (!%p1866_p6), %s1660_s19, 0 }
  0x21   : > { %200 = sbr.rel (%p1866_p6) target bundleno = 721 (0x2d1), region = 40 }
  0x28   : > { %1605 = dma.done.wait (%p1867_p8), [#allocation3], 64   ;;  %p1868_p7 = pmov %p1867_p8 }
  0x29   : > { %p228_p9 = scmp.lt.s32.totalorder %s1660_s19, 1  ;;  %vm264_vm0 = vcmask 97280   ;;  %v1546_v3 = vld [vmem:[%s1857_s1 + $0x20] sm:$0xff]   ;;  %s1613_s15 = smov 126   ;;  %v1554_v4 = vld [vmem:[%s1857_s1 + $0x10] sm:$0xff]   ;;  %v946_v5 = vld [vmem:[%s1858_s2 + $0x8] sm:$0xff] }
  0x2a   : > { %1607 = vsyncadd (%p1868_p7), [#allocation3], 4294967232  ;;  %s1614_s16 = smov 117   ;;  %1409 = vmatprep.mubr.msk.bf16.mxu0 %vm264_vm0, %v1546_v3  ;;  %s1615_s17 = smov 118   ;;  %1397 = vmatprep.mubr.msk.bf16.mxu1 %vm264_vm0, %v1554_v4  ;;  %v945_v6 = vld [vmem:[%s1858_s2] sm:$0xff]  ;;  %v1621_v7 = vmov 0  }
  0x2b   : > { %s1870_s19 = smov (!%p228_p9, %s1660_s19), 1  ;;  %s1616_s20 = smov 116   ;;  %1545 = vset.pattern.permute.xlu1 %v1621_v7  ;;  %1544 = vset.pattern.permute.xlu0 %v1621_v7  ;;  %v947_v8 = vld [vmem:[%s1858_s2 + $0x10] sm:$0xff]  ;;  %v948_v9 = vld [vmem:[%s1858_s2 + $0x18] sm:$0xff]  ;;  %v974_v10 = vld [vmem:[%s1860_s4] sm:$0xff]  ;;  %vm271_vm1 = vcmask 1045504  }
  0x2c   : > { %s1358_s9 = sshll.u32 %s1870_s19, 4  ;;  %s1617_s21 = smov 108   ;;  %v1547_v14 = vld [vmem:[%s1857_s1 + $0x28] sm:$0xff]   ;;  %v1548_v15 = vld [vmem:[%s1857_s1 + $0x30] sm:$0xff]   ;;  %v1555_v21 = vld [vmem:[%s1857_s1 + $0x18] sm:$0xff]   ;;  %v1622_v44 = vmov 0.0  }
  0x2d   : > { %s232_s12 = scalar_lea.vmem %s1856_s0, %s1358_s9  ;;  %s1618_s22 = smov 127   ;;  %v1558_v22 = vld [vmem:[%s1857_s1] sm:$0xff]   ;;  %v1549_v24 = vld [vmem:[%s1857_s1 + $0x38] sm:$0xff]   ;;  %v1559_v27 = vld [vmem:[%s1857_s1 + $0x8] sm:$0xff]   ;;  %vm1623_vm2 = vmmov 0   ;;  %vm981_vm3 = vcmask 1043456  }
  0x2e   : > { %v239_v0 = vld [vmem:[%s232_s12] sm:$0xff]  ;;  %v240_v1 = vld [vmem:[%s232_s12 + $0x8] sm:$0xf]  ;;  %s1619_s23 = smov 107   ;;  %s1620_s24 = smov 106   ;;  %v1552_v29 = vld [vmem:[%s1857_s1 + $0x50] sm:$0xff]  }
  0x2f   : > { %v241_v2 = vpack.c.bf16 %v240_v1, %v239_v0  ;;  %v1550_v25 = vld [vmem:[%s1857_s1 + $0x40] sm:$0xff]   ;;  %v1551_v28 = vld [vmem:[%s1857_s1 + $0x48] sm:$0xff]   ;;  %v1553_v32 = vld [vmem:[%s1857_s1 + $0x58] sm:$0xff]   ;;  %vm977_vm4 = vcmask 64512   ;;  %vm1039_vm7 = vcmask 654336  }
  0x30   : > { %v1556_v33 = vld [vmem:[%s1857_s1 + $0x60] sm:$0xff]   ;;  %v1557_v36 = vld [vmem:[%s1857_s1 + $0x68] sm:$0xff]   ;;  %v1560_v37 = vld [vmem:[%s1857_s1 + $0x70] sm:$0xff]  }
  0x31   : > { %407 = vrot.lane.b32.xlu0 %v241_v2, %s1613_s15  ;;  %565 = vrot.lane.b32.xlu1 %v241_v2, %s1614_s16  ;;  %v341_v23 = vsel %vm271_vm1, %v241_v2, 0  ;;  %v1561_v40 = vld [vmem:[%s1857_s1 + $0x78] sm:$0xff]   ;;  %v1562_v41 = vld [vmem:[%s1857_s1 + $0x80] sm:$0xff]  }
  0x32   : > { %v1563_v43 = vld [vmem:[%s1857_s1 + $0x88] sm:$0xff]   ;;  %v973_v4 = vld [vmem:[#allocation2] sm:$0xf] }
  0x35   : > { %486 = vrot.lane.b32.xlu0 %v241_v2, %s1615_s17  ;;  %644 = vrot.lane.b32.xlu1 %v241_v2, %s1616_s20 }
  0x39   : > { %723 = vrot.lane.b32.xlu0 %v241_v2, %s1617_s21  ;;  %262 = vrot.lane.b32.xlu1 %v241_v2, %s1618_s22 }
  0x3d   : > { %802 = vrot.lane.b32.xlu0 %v241_v2, %s1619_s23  ;;  %881 = vrot.lane.b32.xlu1 %v241_v2, %s1620_s24  ;;  %s1359_s23 = sshll.u32 %s1870_s19, 5 }
  0x3e   : > { %s1840_s26 = scalar_lea.vmem %s1861_s5, %s1359_s23 }
  0x41   : > { %956 = vperm.xlu1 %1545, %v946_v5   ;;  %951 = vperm.xlu0 %1544, %v945_v6  }
  0x45   : > { %961 = vperm.xlu1 %1545, %v947_v8   ;;  %966 = vperm.xlu0 %1544, %v948_v9  }
  0x49   : > { %1027 = vperm.xlu1 %1545, %v974_v10  }
  0xa3   : > { %v408_v11 = vpop.permute.xlu0 %407  ;;  %v566_v12 = vpop.permute.xlu1 %565 }
  0xa4   : > { %1507 = vmatprep.subr.msk.bf16.mxu0 %vm271_vm1, %v408_v11  ;;  %v416_v13 = vsel %vm271_vm1, %v408_v11, 0  ;;  %v574_v26 = vsel %vm271_vm1, %v566_v12, 0 }
  0xa5   : > { %1408 = vmatpush3.bf16.msra.mxu0 %v416_v13 }
  0xa7   : > { %v487_v16 = vpop.permute.xlu0 %486  ;;  %v645_v17 = vpop.permute.xlu1 %644 }
  0xa8   : > { %1410 = vmatmul.mubr.msk.bf16.vlgmr.msra.gmra.mrb[0].mxu0 %vm264_vm0, %v1547_v14  ;;  %v495_v18 = vsel %vm271_vm1, %v487_v16, 0  ;;  %1508 = vmatprep.subr.msk.bf16.mxu0 %vm271_vm1, %v487_v16  ;;  %v653_v30 = vsel %vm271_vm1, %v645_v17, 0 }
  0xa9   : > { %1414 = vmatpush3.bf16.msra.mxu0 %v495_v18  ;;  %1415 = vmatprep.mubr.msk.bf16.mxu0 %vm264_vm0, %v1548_v15 }
  0xaa   : > { %1509 = vmatprep.subr.msk.bf16.mxu0 %vm271_vm1, %v566_v12 }
  0xab   : > { %v263_v19 = vpop.permute.xlu1 %262  ;;  %v724_v31 = vpop.permute.xlu0 %723 }
  0xac   : > { %1505 = vmatprep.subr.msk.bf16.mxu1 %vm271_vm1, %v263_v19  ;;  %v273_v20 = vsel %vm271_vm1, %v263_v19, 0  ;;  %v732_v34 = vsel %vm271_vm1, %v724_v31, 0 }
  0xad   : > { %1396 = vmatpush3.bf16.msra.mxu1 %v273_v20 }
  0xae   : > { %1506 = vmatprep.subr.msk.bf16.mxu1 %vm271_vm1, %v241_v2 }
  0xaf   : > { %v803_v35 = vpop.permute.xlu0 %802  ;;  %v882_v39 = vpop.permute.xlu1 %881 }
  0xb0   : > { %1398 = vmatmul.mubr.msk.bf16.vlgmr.msra.gmra.mrb[0].mxu1 %vm264_vm0, %v1555_v21  ;;  %v811_v38 = vsel %vm271_vm1, %v803_v35, 0  ;;  %v890_v42 = vsel %vm271_vm1, %v882_v39, 0 }
  0xb1   : > { %1402 = vmatpush3.bf16.msra.mxu1 %v341_v23  ;;  %1403 = vmatprep.mubr.msk.bf16.mxu1 %vm264_vm0, %v1558_v22 }
  0xb2   : > { %1449 = vmatprep.subr.bf16.mxu1 %v1622_v44 }
  0xb4   : > { %1416 = vmatmul.mubr.msk.bf16.vlgmr.msra.gmra.mrb[0].mxu0 %vm264_vm0, %v1549_v24 }
  0xb5   : > { %1420 = vmatpush3.bf16.msra.mxu0 %v574_v26  ;;  %1421 = vmatprep.mubr.msk.bf16.mxu0 %vm264_vm0, %v1550_v25 }
  0xb6   : > { %1510 = vmatprep.subr.msk.bf16.mxu0 %vm271_vm1, %v645_v17 }
  0xbc   : > { %1404 = vmatmul.mubr.msk.bf16.vlgmr.msra.gmra.mrb[0].mxu1 %vm264_vm0, %v1559_v27 }
  0xbd   : > { %1451 = vmatprep.mubr.msk.bf16.mxu1 %vm1623_vm2, %v1622_v44 }
  0xc0   : > { %1422 = vmatmul.mubr.msk.bf16.vlgmr.msra.gmra.mrb[0].mxu0 %vm264_vm0, %v1551_v28  ;;  %v957_v50 = vpop.permute.xlu1 %956  ;;  %v952_v55 = vpop.permute.xlu0 %951 }
  0xc1   : > { %1426 = vmatpush3.bf16.msra.mxu0 %v653_v30  ;;  %1427 = vmatprep.mubr.msk.bf16.mxu0 %vm264_vm0, %v1552_v29 }
  0xc2   : > { %1511 = vmatprep.subr.msk.bf16.mxu0 %vm271_vm1, %v724_v31 }
  0xc4   : > { %v962_v62 = vpop.permute.xlu1 %961  ;;  %v967_v7 = vpop.permute.xlu0 %966 }
  0xc8   : > { %v1028_v14 = vpop.permute.xlu1 %1027 }
  0xcc   : > { %1428 = vmatmul.mubr.msk.bf16.vlgmr.msra.gmra.mrb[0].mxu0 %vm264_vm0, %v1553_v32 }
  0xcd   : > { %1432 = vmatpush3.bf16.msra.mxu0 %v732_v34  ;;  %1433 = vmatprep.mubr.msk.bf16.mxu0 %vm264_vm0, %v1556_v33 }
  0xce   : > { %1512 = vmatprep.subr.msk.bf16.mxu0 %vm271_vm1, %v803_v35 }
  0xd8   : > { %1434 = vmatmul.mubr.msk.bf16.vlgmr.msra.gmra.mrb[0].mxu0 %vm264_vm0, %v1557_v36 }
  0xd9   : > { %1438 = vmatpush3.bf16.msra.mxu0 %v811_v38  ;;  %1439 = vmatprep.mubr.msk.bf16.mxu0 %vm264_vm0, %v1560_v37 }
  0xda   : > { %1513 = vmatprep.subr.msk.bf16.mxu0 %vm271_vm1, %v882_v39 }
  0xe4   : > { %1440 = vmatmul.mubr.msk.bf16.vlgmr.msra.gmra.mrb[0].mxu0 %vm264_vm0, %v1561_v40 }
  0xe5   : > { %1444 = vmatpush3.bf16.msra.mxu0 %v890_v42  ;;  %1445 = vmatprep.mubr.msk.bf16.mxu0 %vm264_vm0, %v1562_v41 }
  0xf0   : > { %1446 = vmatmul.mubr.msk.bf16.vlgmr.msra.gmra.mrb[0].mxu0 %vm264_vm0, %v1563_v43 }
 0x18f   : > { %v1405_v45 = vpop.f32.mrb[0].mxu1 }
 0x190   : > { %v377_v46 = vpop.f32.mrb[1].mxu1 }
 0x191   : > { %v1406_v47 = vpop.f32.mrb[2].mxu1 }
 0x192   : > { %v380_v48 = vpop.f32.mrb[3].mxu1 }
 0x1c3   : > { %v1447_v49 = vpop.f32.mrb[0].mxu0 }
 0x1c4   : > { %v1473_v51 = vadd.f32 %v1447_v49, %v1405_v45  ;;  %v926_v52 = vpop.f32.mrb[1].mxu0 }
 0x1c5   : > { %v1474_v53 = vadd.f32 %v926_v52, %v377_v46  ;;  %v1448_v54 = vpop.f32.mrb[2].mxu0 }
 0x1c6   : > { %v1475_v56 = vadd.f32 %v1448_v54, %v1406_v47  ;;  %v929_v57 = vpop.f32.mrb[3].mxu0  ;;  %v1817_v1 = vadd.f32 %v1473_v51, %v962_v62 }
 0x1c7   : > { %v969_v58 = vadd.f32 %v1474_v53, %v952_v55  ;;  %v1476_v59 = vadd.f32 %v929_v57, %v380_v48 }
 0x1c8   : > { %v1096_v5 = vmul.f32 %v1817_v1, %v1817_v1  ;;  %v1825_v9 = vadd.f32 %v1475_v56, %v967_v7 }
 0x1c9   : > { %v975_v60 = vmul.f32 %v969_v58, %v969_v58  ;;  %v1813_v61 = vadd.f32 %v1476_v59, %v957_v50 }
 0x1ca   : > { %v1097_v8 = vpack.c.bf16 %v1096_v5, %v1096_v5  ;;  %v1151_v10 = vmul.f32 %v1825_v9, %v1825_v9 }
 0x1cb   : > { %v976_v63 = vpack.c.bf16 %v975_v60, %v975_v60  ;;  %v1041_v0 = vmul.f32 %v1813_v61, %v1813_v61 }
 0x1cc   : > { %v1099_v11 = vsel %vm981_vm3, %v1097_v8, 0  ;;  %v1152_v12 = vpack.c.bf16 %v1151_v10, %v1151_v10 }
 0x1cd   : > { %v1042_v2 = vpack.c.bf16 %v1041_v0, %v1041_v0  ;;  %v983_v3 = vsel %vm981_vm3, %v976_v63, 0 }
 0x1ce   : > { %1450 = vmatpush3.bf16.msra.mxu1 %v983_v3  ;;  %v1154_v13 = vsel %vm981_vm3, %v1152_v12, 0 }
 0x1cf   : > { %1455 = vmatprep.subr.bf16.mxu1 %v1622_v44  ;;  %v1044_v6 = vsel %vm981_vm3, %v1042_v2, 0 }
 0x1d1   : > { %1452 = vmatmul.mubr.msk.bf16.vlgmr.msra.gmra.mrb[4].mxu1 %vm977_vm4, %v973_v4 }
 0x1d2   : > { %1456 = vmatpush3.bf16.msra.mxu1 %v1044_v6  ;;  %1457 = vmatprep.mubr.msk.bf16.mxu1 %vm1623_vm2, %v1622_v44 }
 0x1d3   : > { %1461 = vmatprep.subr.bf16.mxu1 %v1622_v44 }
 0x1d9   : > { %1458 = vmatmul.mubr.msk.bf16.vlgmr.msra.gmra.mrb[8].mxu1 %vm977_vm4, %v973_v4 }
 0x1da   : > { %1462 = vmatpush3.bf16.msra.mxu1 %v1099_v11  ;;  %1463 = vmatprep.mubr.msk.bf16.mxu1 %vm1623_vm2, %v1622_v44 }
 0x1db   : > { %1467 = vmatprep.subr.bf16.mxu1 %v1622_v44 }
 0x1e1   : > { %1464 = vmatmul.mubr.msk.bf16.vlgmr.msra.gmra.mrb[12].mxu1 %vm977_vm4, %v973_v4 }
 0x1e2   : > { %1468 = vmatpush3.bf16.msra.mxu1 %v1154_v13  ;;  %1469 = vmatprep.mubr.msk.bf16.mxu1 %vm1623_vm2, %v1622_v44 }
 0x1e9   : > { %1470 = vmatmul.mubr.msk.bf16.vlgmr.msra.gmra.mrb[16].mxu1 %vm977_vm4, %v973_v4 }
 0x2a4   : > { %v1019_v15 = vpop.f32.mrb[4].mxu1 }
 0x2a5   : > { %v1030_v16 = vadd.f32 %v1028_v14, %v1019_v15  ;;  %v1453_v17 = vpop.f32.mrb[5].mxu1 }
 0x2a6   : > { %v1022_v18 = vpop.f32.mrb[6].mxu1 }
 0x2a7   : > { %1564 = vrsqrt.f32 %v1030_v16  ;;  %v1454_v19 = vpop.f32.mrb[7].mxu1  ;;  %vm1033_vm5 = vcmp.eq.f32.partialorder %v1030_v16, inf  ;;  %v1036_v27 = vand.u32 2147483648, %v1030_v16  ;;  %vm1035_vm6 = vcmp.eq.f32.partialorder %v1030_v16, 0.0 }
 0x2ac   : > { %v1080_v20 = vpop.f32.mrb[8].mxu1 }
 0x2ad   : > { %v1086_v21 = vadd.f32 %v1080_v20, %v1028_v14  ;;  %v1459_v22 = vpop.f32.mrb[9].mxu1 }
 0x2ae   : > { %v1083_v23 = vpop.f32.mrb[10].mxu1 }
 0x2af   : > { %1566 = vrsqrt.f32 %v1086_v21  ;;  %v1460_v24 = vpop.f32.mrb[11].mxu1  ;;  %vm1089_vm8 = vcmp.eq.f32.partialorder %v1086_v21, inf  ;;  %v1092_v38 = vand.u32 2147483648, %v1086_v21  ;;  %vm1091_vm9 = vcmp.eq.f32.partialorder %v1086_v21, 0.0 }
 0x2b1   : > { %v1565_v25 = vpop.eup %1564 }
 0x2b2   : > { %v1032_v26 = vmul.f32 %v1565_v25, %v1030_v16 }
 0x2b4   : > { %v1034_v28 = vsel %vm1033_vm5, %v1030_v16, %v1032_v26  ;;  %v1135_v29 = vpop.f32.mrb[12].mxu1 }
 0x2b5   : > { %v1037_v30 = vsel %vm1035_vm6, %v1036_v27, %v1034_v28  ;;  %v1141_v31 = vadd.f32 %v1135_v29, %v1028_v14  ;;  %v1465_v32 = vpop.f32.mrb[13].mxu1 }
 0x2b6   : > { %v1038_v33 = vmul.f32 %v1037_v30, %v969_v58  ;;  %v1138_v34 = vpop.f32.mrb[14].mxu1 }
 0x2b7   : > { %1568 = vrsqrt.f32 %v1141_v31  ;;  %v1466_v35 = vpop.f32.mrb[15].mxu1  ;;  %vm1144_vm10 = vcmp.eq.f32.partialorder %v1141_v31, inf  ;;  %v1147_v49 = vand.u32 2147483648, %v1141_v31  ;;  %vm1146_vm11 = vcmp.eq.f32.partialorder %v1141_v31, 0.0 }
 0x2b8   : > { %1040 = vst.msk [vmem:[%s1840_s26] sm:$0xff] %vm1039_vm7, %v1038_v33 }
 0x2b9   : > { %v1567_v36 = vpop.eup %1566 }
 0x2ba   : > { %v1088_v37 = vmul.f32 %v1567_v36, %v1086_v21 }
 0x2bc   : > { %v1090_v39 = vsel %vm1089_vm8, %v1086_v21, %v1088_v37  ;;  %v1190_v40 = vpop.f32.mrb[16].mxu1 }
 0x2bd   : > { %v1093_v41 = vsel %vm1091_vm9, %v1092_v38, %v1090_v39  ;;  %v1196_v42 = vadd.f32 %v1190_v40, %v1028_v14  ;;  %v1471_v43 = vpop.f32.mrb[17].mxu1 }
 0x2be   : > { %v1094_v44 = vmul.f32 %v1093_v41, %v1813_v61  ;;  %v1193_v45 = vpop.f32.mrb[18].mxu1 }
 0x2bf   : > { %1570 = vrsqrt.f32 %v1196_v42  ;;  %v1472_v46 = vpop.f32.mrb[19].mxu1  ;;  %vm1199_vm12 = vcmp.eq.f32.partialorder %v1196_v42, inf  ;;  %v1202_v55 = vand.u32 2147483648, %v1196_v42  ;;  %vm1201_vm13 = vcmp.eq.f32.partialorder %v1196_v42, 0.0 }
 0x2c0   : > { %1095 = vst.msk [vmem:[%s1840_s26 + $0x8] sm:$0xff] %vm1039_vm7, %v1094_v44 }
 0x2c1   : > { %v1569_v47 = vpop.eup %1568 }
 0x2c2   : > { %v1143_v48 = vmul.f32 %v1569_v47, %v1141_v31 }
 0x2c4   : > { %v1145_v50 = vsel %vm1144_vm10, %v1141_v31, %v1143_v48 }
 0x2c5   : > { %v1148_v51 = vsel %vm1146_vm11, %v1147_v49, %v1145_v50 }
 0x2c6   : > { %v1149_v52 = vmul.f32 %v1148_v51, %v1817_v1 }
 0x2c8   : > { %1150 = vst.msk [vmem:[%s1840_s26 + $0x10] sm:$0xff] %vm1039_vm7, %v1149_v52 }
 0x2c9   : > { %v1571_v53 = vpop.eup %1570 }
 0x2ca   : > { %v1198_v54 = vmul.f32 %v1571_v53, %v1196_v42 }
 0x2cc   : > { %v1200_v56 = vsel %vm1199_vm12, %v1196_v42, %v1198_v54 }
 0x2cd   : > { %v1203_v57 = vsel %vm1201_vm13, %v1202_v55, %v1200_v56 }
 0x2ce   : > { %v1204_v58 = vmul.f32 %v1203_v57, %v1825_v9 }
 0x2d0   : > { %1205 = vst.msk [vmem:[%s1840_s26 + $0x18] sm:$0xff] %vm1039_vm7, %v1204_v58 }
 0x2d1 PF: > { %s16_s18 = sadd.s32 1, %s1610_s18  }
 0x2d2   : > { %p13_p2 = scmp.ge.s32.totalorder %s16_s18, 4  }
 0x2d4   :  { %15 = sbr.rel (!%p13_p2) target bundleno = 1 (0x1), region = 83 }
 0x2db   :  { %1227 = vsyncpa [#allocation3], 1 }
 0x2dc   :  { %1229 = vsyncpa [#allocation3 + $0x1], 1 }

// kernel: edic_decoder_forward.11
= control target key start
LH: loop header
LB: loop body
LE: loop exit
PB: predicated region body
PF: predicated region fallthrough
CT: control target
= control target key end

     0   :  { %10 = vsyncpa [#allocation3], 0  ;;  %s2705_s18 = smov 0   ;;  %s3081_s0 = inlined_call_operand.vmem [shape: f32[2,8,326], index: 0, kind: input, shape index: {}]   ;;  %s3082_s1 = inlined_call_operand.vmem [shape: bf16[9,32,8], index: 1, kind: input, shape index: {}]   ;;  %s3083_s2 = inlined_call_operand.vmem [shape: f32[32,1], index: 2, kind: input, shape index: {}]   ;;  %s3084_s3 = inlined_call_operand.hbm [shape: bf16[8,8], index: 3, kind: input, shape index: {}]   ;;  %s3085_s4 = inlined_call_operand.vmem [shape: f32[8,1], index: 4, kind: input, shape index: {}]   ;;  %s3086_s5 = inlined_call_operand.vmem [shape: f32[2,32,288], index: 5, kind: output, shape index: {}]  }
   0x1 LB: > { %s2711_s19 = sadd.s32 4294967295, %s2661_s18   ;;  %p2213_p0 = scmp.ge.s32.totalorder %s2661_s18, 1  ;;  %s2661_s18 = sphi %s2705_s18, %s16_s18  }
   0x2   : > { %p157_p1 = scmp.lt.s32.totalorder %s2661_s18, 3  ;;  %p3087_p3 = scmp.eq.s32.totalorder %s2711_s19, 0 }
   0x3   : > { %s2663_s21 = smov [#allocation2]   ;;  %s2623_s26 = scalar_lea.hbm %s3084_s3, 64 }
   0x4   : > { %p2715_p2 = pnand %p2213_p0, %p157_p1  ;;  %s176_s22 = sshll.u32 %s2663_s21, 4  ;;  %s177_s22 = int_to_ptr.vmem [resolvable:$true] %s176_s22 }
   0x5   : > { %p2624_p6 = scmp.ne.s32.totalorder %s3084_s3, %s2623_s26  ;;  %p2630_p10 = scmp.lt.u32.totalorder %s2623_s26, %s3084_s3 }
   0x6   : > { %s3089_s20 = scalar_select %p2715_p2, 1, 0 }
   0x7   : > { %p2553_p4 = pneg %p2715_p2 }
   0x9   : > { %p2724_p5 = pnand %p3087_p3, %p2553_p4 }
   0xb   : > { %p2625_p7 = pneg %p2724_p5 }
   0xd   : > { %p2626_p8 = pnand %p2625_p7, %p2624_p6 }
   0xf   : > { %p2627_p9 = pneg %p2626_p8 }
  0x11   : > { %p2632_p11 = pnand %p2630_p10, %p2627_p9 }
  0x13   : > { %2635 = shalt.err (!%p2632_p11)
}
  0x14   : > { %s2636_s6 = scalar_lea.vmem %s177_s22, 64  ;;  %p2644_p1 = scmp.lt.s32.totalorder %s177_s22, %s177_s22 }
  0x15   : > { %p2637_p12 = scmp.ne.s32.totalorder %s177_s22, %s2636_s6  ;;  %p2645_p4 = scmp.lt.s32.totalorder %s2636_s6, %s2636_s6 }
  0x17   : > { %p2639_p13 = pnand %p2637_p12, %p2625_p7  ;;  %p2646_p3 = por %p2645_p4, %p2644_p1 }
  0x19   : > { %p2640_p0 = pneg %p2639_p13 }
  0x1b   : > { %p2647_p2 = pnand %p2646_p3, %p2640_p0 }
  0x1d   : > { %2650 = shalt.err (!%p2647_p2)
}
  0x1e   : > { %2556 = dma.hbm_to_vmem [thread:$0]  (!%p2724_p5), %s3084_s3, 64, %s177_s22, [#allocation3]  }
  0x1f   : > { %p3091_p6 = scmp.ne.s32.totalorder %s3089_s20, 0 }
  0x20   : > { %p3092_p8 = scmp.eq.s32.totalorder (!%p3091_p6), %s2711_s19, 0 }
  0x21   : > { %200 = sbr.rel (%p3091_p6) target bundleno = 813 (0x32d), region = 40 }
  0x28   : > { %2656 = dma.done.wait (%p3092_p8), [#allocation3], 64   ;;  %p3093_p7 = pmov %p3092_p8 }
  0x29   : > { %p228_p9 = scmp.lt.s32.totalorder %s2711_s19, 1  ;;  %v2664_v0 = vmov 0   ;;  %v2764_v6 = vld [vmem:[%s3082_s1 + $0x10] sm:$0xff]   ;;  %vm276_vm0 = vcmask 64512   ;;  %s2665_s15 = smov 127   ;;  %vm283_vm1 = vcmask 1043456  }
  0x2a   : > { %2658 = vsyncadd (%p3093_p7), [#allocation3], 4294967232  ;;  %325 = vmatprep.mubr.bf16.mxu0 %v2664_v0  ;;  %2580 = vset.pattern.permute.xlu1 %v2664_v0  ;;  %s2666_s16 = smov 126   ;;  %s2667_s17 = smov 110   ;;  %v2582_v11 = vld [vmem:[%s3082_s1 + $0x18] sm:$0xff]   ;;  %vm273_vm2 = vcmask 1039360  }
  0x2b   : > { %s3095_s19 = smov (!%p228_p9, %s2711_s19), 1  ;;  %2579 = vset.pattern.permute.xlu0 %v2664_v0  ;;  %2366 = vmatprep.mubr.msk.bf16.mxu1 %vm276_vm0, %v2764_v6  ;;  %s2668_s20 = smov 109   ;;  %v2583_v13 = vld [vmem:[%s3082_s1] sm:$0xff]   ;;  %vm543_vm3 = vcmask 1031168   ;;  %v2584_v24 = vld [vmem:[%s3082_s1 + $0x8] sm:$0xff]   ;;  %v1595_v32 = vld [vmem:[%s3083_s2 + $0x10] sm:$0xff] }
  0x2c   : > { %s2547_s9 = smul.u32 24, %s3095_s19  ;;  %s2669_s21 = smov 108   ;;  %v2585_v26 = vld [vmem:[%s3082_s1 + $0x20] sm:$0xff]   ;;  %v1594_v29 = vld [vmem:[%s3083_s2 + $0x8] sm:$0xff]  ;;  %vm696_vm4 = vcmask 900096   ;;  %v1596_v34 = vld [vmem:[%s3083_s2 + $0x18] sm:$0xff] }
  0x2d   : > { %s2670_s22 = smov 92   ;;  %s2671_s23 = smov 91   ;;  %v1593_v30 = vld [vmem:[%s3083_s2] sm:$0xff]  ;;  %v2586_v36 = vld [vmem:[%s3082_s1 + $0x28] sm:$0xff]   ;;  %v2587_v39 = vld [vmem:[%s3082_s1 + $0x30] sm:$0xff]   ;;  %vm849_vm5 = vcmask 891904  }
  0x2e   : > { %s232_s12 = scalar_lea.vmem %s3081_s0, %s2547_s9  ;;  %s2672_s24 = smov 90   ;;  %v1630_v38 = vld [vmem:[%s3085_s4] sm:$0xff]  ;;  %v2588_v45 = vld [vmem:[%s3082_s1 + $0x38] sm:$0xff]   ;;  %v2590_v53 = vld [vmem:[%s3082_s1 + $0x48] sm:$0xff]   ;;  %vm1002_vm6 = vcmask 883712   ;;  %vm1155_vm7 = vcmask 752640  }
  0x2f   : > { %v241_v1 = vld [vmem:[%s232_s12 + $0x10] sm:$0xff]  ;;  %v239_v2 = vld [vmem:[%s232_s12] sm:$0xff]  ;;  %v240_v3 = vld [vmem:[%s232_s12 + $0x8] sm:$0xff]  ;;  %vm1308_vm8 = vcmask 744448   ;;  %vm1461_vm9 = vcmask 736256   ;;  %vm2674_vm10 = vmmov 0  }
  0x30   : > { %v244_v4 = vpack.c.bf16 %v241_v1, %v241_v1  ;;  %v242_v5 = vpack.c.bf16 %v239_v2, %v239_v2  ;;  %v243_v7 = vpack.c.bf16 %v240_v3, %v240_v3  ;;  %v2589_v48 = vld [vmem:[%s3082_s1 + $0x40] sm:$0xff]   ;;  %v2591_v54 = vld [vmem:[%s3082_s1 + $0x50] sm:$0xff]   ;;  %v2592_v62 = vld [vmem:[%s3082_s1 + $0x58] sm:$0xff]  }
  0x31   : > { %v2593_v1 = vld [vmem:[%s3082_s1 + $0x60] sm:$0xff]  }
  0x32   : > { %271 = vrot.lane.b32.xlu1 %v244_v4, %s2665_s15  ;;  %267 = vrot.lane.b32.xlu0 %v242_v5, %s2665_s15  ;;  %v418_v12 = vsel %vm283_vm1, %v244_v4, 0  ;;  %v412_v19 = vsel %vm283_vm1, %v242_v5, 0 }
  0x36   : > { %269 = vrot.lane.b32.xlu0 %v243_v7, %s2665_s15  ;;  %537 = vrot.lane.b32.xlu1 %v242_v5, %s2666_s16 }
  0x3a   : > { %541 = vrot.lane.b32.xlu1 %v244_v4, %s2666_s16  ;;  %539 = vrot.lane.b32.xlu0 %v243_v7, %s2666_s16 }
  0x3e   : > { %690 = vrot.lane.b32.xlu0 %v242_v5, %s2667_s17  ;;  %692 = vrot.lane.b32.xlu1 %v243_v7, %s2667_s17 }
  0x42   : > { %694 = vrot.lane.b32.xlu0 %v244_v4, %s2667_s17  ;;  %843 = vrot.lane.b32.xlu1 %v242_v5, %s2668_s20 }
  0x46   : > { %847 = vrot.lane.b32.xlu1 %v244_v4, %s2668_s20  ;;  %845 = vrot.lane.b32.xlu0 %v243_v7, %s2668_s20 }
  0x4a   : > { %996 = vrot.lane.b32.xlu0 %v242_v5, %s2669_s21  ;;  %998 = vrot.lane.b32.xlu1 %v243_v7, %s2669_s21 }
  0x4e   : > { %1000 = vrot.lane.b32.xlu0 %v244_v4, %s2669_s21  ;;  %1149 = vrot.lane.b32.xlu1 %v242_v5, %s2670_s22 }
  0x52   : > { %1153 = vrot.lane.b32.xlu1 %v244_v4, %s2670_s22  ;;  %1151 = vrot.lane.b32.xlu0 %v243_v7, %s2670_s22 }
  0x56   : > { %1302 = vrot.lane.b32.xlu0 %v242_v5, %s2671_s23  ;;  %1304 = vrot.lane.b32.xlu1 %v243_v7, %s2671_s23 }
  0x5a   : > { %1306 = vrot.lane.b32.xlu0 %v244_v4, %s2671_s23  ;;  %1455 = vrot.lane.b32.xlu1 %v242_v5, %s2672_s24  ;;  %s2548_s23 = smul.u32 96, %s3095_s19 }
  0x5c   : > { %s3039_s26 = scalar_lea.vmem %s3086_s5, %s2548_s23 }
  0x5e   : > { %1459 = vrot.lane.b32.xlu1 %v244_v4, %s2672_s24  ;;  %1457 = vrot.lane.b32.xlu0 %v243_v7, %s2672_s24 }
  0x62   : > { %1604 = vperm.xlu1 %2580, %v1594_v29   ;;  %1599 = vperm.xlu0 %2579, %v1593_v30  }
  0x66   : > { %1609 = vperm.xlu1 %2580, %v1595_v32   ;;  %1614 = vperm.xlu0 %2579, %v1596_v34  }
  0x6a   : > { %1732 = vperm.xlu1 %2580, %v1630_v38  }
  0xa4   : > { %v272_v8 = vpop.permute.xlu1 %271  ;;  %v268_v9 = vpop.permute.xlu0 %267 }
  0xa5   : > { %2538 = vmatprep.subr.msk.bf16.mxu1 %vm283_vm1, %v272_v8  ;;  %v291_v10 = vsel %vm283_vm1, %v272_v8, 0 }
  0xa6   : > { %2365 = vmatpush3.bf16.msra.mxu1 %v291_v10 }
  0xa7   : > { %2539 = vmatprep.subr.msk.bf16.mxu1 %vm283_vm1, %v244_v4 }
  0xa8   : > { %v270_v14 = vpop.permute.xlu0 %269  ;;  %v538_v15 = vpop.permute.xlu1 %537 }
  0xa9   : > { %2367 = vmatmul.mubr.msk.bf16.vlgmr.msra.gmra.mrb[0].mxu1 %vm276_vm0, %v2582_v11  ;;  %v275_v16 = vsel %vm273_vm2, %v270_v14, %v272_v8  ;;  %v274_v17 = vsel %vm273_vm2, %v268_v9, %v270_v14  ;;  %v2594_v8 = vld [vmem:[%s3082_s1 + $0x68] sm:$0xff]   ;;  %v2595_v9 = vld [vmem:[%s3082_s1 + $0x70] sm:$0xff]  }
  0xaa   : > { %2226 = vmatprep.subr.msk.bf16.mxu0 %vm283_vm1, %v275_v16  ;;  %v285_v18 = vsel %vm283_vm1, %v274_v17, 0  ;;  %2371 = vmatpush3.bf16.msra.mxu1 %v418_v12  ;;  %v2597_v16 = vld [vmem:[%s3082_s1 + $0x80] sm:$0xff]  }
  0xab   : > { %294 = vmatpush1.bf16.msra.mxu0 %v285_v18  ;;  %2372 = vmatprep.mubr.msk.bf16.mxu1 %vm276_vm0, %v2583_v13  ;;  %v2598_v18 = vld [vmem:[%s3082_s1 + $0x88] sm:$0xff]  }
  0xac   : > { %2233 = vmatprep.subr.msk.bf16.mxu0 %vm283_vm1, %v243_v7  ;;  %v542_v20 = vpop.permute.xlu1 %541  ;;  %v540_v21 = vpop.permute.xlu0 %539 }
  0xad   : > { %v545_v22 = vsel %vm543_vm3, %v540_v21, %v542_v20  ;;  %2540 = vmatprep.subr.msk.bf16.mxu1 %vm283_vm1, %v542_v20  ;;  %v559_v25 = vsel %vm283_vm1, %v542_v20, 0  ;;  %v544_v31 = vsel %vm543_vm3, %v538_v15, %v540_v21 }
  0xae   : > { %2227 = vmatmul.mubr.msk.bf16.vlgmr.msra.gmra.mrb[0].mxu0 %vm276_vm0, %v2764_v6  ;;  %v553_v35 = vsel %vm283_vm1, %v544_v31, 0 }
  0xaf   : > { %421 = vmatpush1.bf16.msra.mxu0 %v412_v19  ;;  %335 = vmatprep.mubr.bf16.mxu0 %v2664_v0 }
  0xb0   : > { %2244 = vmatprep.subr.msk.bf16.mxu0 %vm283_vm1, %v545_v22  ;;  %v691_v23 = vpop.permute.xlu0 %690  ;;  %v693_v27 = vpop.permute.xlu1 %692 }
  0xb1   : > { %v697_v44 = vsel %vm696_vm4, %v691_v23, %v693_v27 }
  0xb2   : > { %v706_v47 = vsel %vm283_vm1, %v697_v44, 0 }
  0xb4   : > { %v695_v28 = vpop.permute.xlu0 %694  ;;  %v844_v33 = vpop.permute.xlu1 %843 }
  0xb5   : > { %2373 = vmatmul.mubr.msk.bf16.vlgmr.msra.gmra.mrb[0].mxu1 %vm276_vm0, %v2584_v24  ;;  %v698_v37 = vsel %vm696_vm4, %v693_v27, %v695_v28  ;;  %v712_v40 = vsel %vm283_vm1, %v695_v28, 0 }
  0xb6   : > { %2228 = vmatmul.mubr.msk.bf16.gmra.mrb[4].mxu0 %vm276_vm0, %v2582_v11  ;;  %2377 = vmatpush3.bf16.msra.mxu1 %v559_v25 }
  0xb7   : > { %452 = vmatprep.mubr.bf16.mxu0 %v2664_v0  ;;  %2378 = vmatprep.mubr.msk.bf16.mxu1 %vm276_vm0, %v2585_v26 }
  0xb8   : > { %2541 = vmatprep.subr.msk.bf16.mxu1 %vm283_vm1, %v695_v28  ;;  %v848_v41 = vpop.permute.xlu1 %847  ;;  %v846_v42 = vpop.permute.xlu0 %845 }
  0xb9   : > { %v865_v46 = vsel %vm283_vm1, %v848_v41, 0  ;;  %v851_v50 = vsel %vm849_vm5, %v846_v42, %v848_v41  ;;  %v850_v57 = vsel %vm849_vm5, %v844_v33, %v846_v42 }
  0xba   : > { %v859_v59 = vsel %vm283_vm1, %v850_v57, 0 }
  0xbc   : > { %v997_v43 = vpop.permute.xlu0 %996  ;;  %v999_v49 = vpop.permute.xlu1 %998 }
  0xbd   : > { %v1003_v4 = vsel %vm1002_vm6, %v997_v43, %v999_v49 }
  0xbe   : > { %2234 = vmatmul.mubr.msk.bf16.vlgmr.msra.gmra.mrb[0].mxu0 %vm276_vm0, %v2583_v13  ;;  %v1012_v6 = vsel %vm283_vm1, %v1003_v4, 0  ;;  %v2596_v13 = vld [vmem:[%s3082_s1 + $0x78] sm:$0xff]  }
  0xbf   : > { %562 = vmatpush1.bf16.msra.mxu0 %v553_v35  ;;  %462 = vmatprep.mubr.bf16.mxu0 %v2664_v0 }
  0xc0   : > { %2255 = vmatprep.subr.msk.bf16.mxu0 %vm283_vm1, %v698_v37  ;;  %v1001_v51 = vpop.permute.xlu0 %1000  ;;  %v1150_v52 = vpop.permute.xlu1 %1149 }
  0xc1   : > { %2379 = vmatmul.mubr.msk.bf16.vlgmr.msra.gmra.mrb[0].mxu1 %vm276_vm0, %v2586_v36  ;;  %v1018_v55 = vsel %vm283_vm1, %v1001_v51, 0  ;;  %v1004_v60 = vsel %vm1002_vm6, %v999_v49, %v1001_v51 }
  0xc2   : > { %2383 = vmatpush3.bf16.msra.mxu1 %v712_v40  ;;  %2384 = vmatprep.mubr.msk.bf16.mxu1 %vm276_vm0, %v2587_v39 }
  0xc3   : > { %2542 = vmatprep.subr.msk.bf16.mxu1 %vm283_vm1, %v848_v41 }
  0xc4   : > { %v1154_v56 = vpop.permute.xlu1 %1153  ;;  %v1152_v58 = vpop.permute.xlu0 %1151 }
  0xc5   : > { %v1171_v63 = vsel %vm283_vm1, %v1154_v56, 0  ;;  %v1157_v7 = vsel %vm1155_vm7, %v1152_v58, %v1154_v56  ;;  %v1156_v12 = vsel %vm1155_vm7, %v1150_v52, %v1152_v58  ;;  %v2673_v52 = vmov 0.0  }
  0xc6   : > { %2235 = vmatmul.mubr.msk.bf16.gmra.mrb[4].mxu0 %vm276_vm0, %v2584_v24  ;;  %v1165_v15 = vsel %vm283_vm1, %v1156_v12, 0 }
  0xc7   : > { %593 = vmatprep.mubr.bf16.mxu0 %v2664_v0 }
  0xc8   : > { %v1303_v61 = vpop.permute.xlu0 %1302  ;;  %v1305_v2 = vpop.permute.xlu1 %1304 }
  0xc9   : > { %v1309_v19 = vsel %vm1308_vm8, %v1303_v61, %v1305_v2 }
  0xca   : > { %v1318_v21 = vsel %vm283_vm1, %v1309_v19, 0 }
  0xcc   : > { %v1307_v3 = vpop.permute.xlu0 %1306  ;;  %v1456_v5 = vpop.permute.xlu1 %1455 }
  0xcd   : > { %2385 = vmatmul.mubr.msk.bf16.vlgmr.msra.gmra.mrb[0].mxu1 %vm276_vm0, %v2588_v45  ;;  %v1324_v10 = vsel %vm283_vm1, %v1307_v3, 0  ;;  %v1310_v17 = vsel %vm1308_vm8, %v1305_v2, %v1307_v3 }
  0xce   : > { %2245 = vmatmul.mubr.msk.bf16.vlgmr.msra.gmra.mrb[0].mxu0 %vm276_vm0, %v2585_v26  ;;  %2389 = vmatpush3.bf16.msra.mxu1 %v865_v46 }
  0xcf   : > { %715 = vmatpush1.bf16.msra.mxu0 %v706_v47  ;;  %603 = vmatprep.mubr.bf16.mxu0 %v2664_v0 }
  0xd0   : > { %2390 = vmatprep.mubr.msk.bf16.mxu1 %vm276_vm0, %v2589_v48  ;;  %2266 = vmatprep.subr.msk.bf16.mxu0 %vm283_vm1, %v851_v50  ;;  %v1460_v11 = vpop.permute.xlu1 %1459  ;;  %v1458_v20 = vpop.permute.xlu0 %1457  ;;  %v2956_v50 = vld [vmem:[#allocation2] sm:$0xf] }
  0xd1   : > { %2543 = vmatprep.subr.msk.bf16.mxu1 %vm283_vm1, %v1001_v51  ;;  %v1477_v14 = vsel %vm283_vm1, %v1460_v11, 0  ;;  %v1463_v22 = vsel %vm1461_vm9, %v1458_v20, %v1460_v11  ;;  %v1462_v23 = vsel %vm1461_vm9, %v1456_v5, %v1458_v20 }
  0xd2   : > { %v1471_v24 = vsel %vm283_vm1, %v1462_v23, 0 }
  0xd6   : > { %2246 = vmatmul.mubr.msk.bf16.gmra.mrb[4].mxu0 %vm276_vm0, %v2586_v36 }
  0xd7   : > { %746 = vmatprep.mubr.bf16.mxu0 %v2664_v0 }
  0xd9   : > { %2391 = vmatmul.mubr.msk.bf16.vlgmr.msra.gmra.mrb[0].mxu1 %vm276_vm0, %v2590_v53 }
  0xda   : > { %2395 = vmatpush3.bf16.msra.mxu1 %v1018_v55  ;;  %2396 = vmatprep.mubr.msk.bf16.mxu1 %vm276_vm0, %v2591_v54 }
  0xdb   : > { %2544 = vmatprep.subr.msk.bf16.mxu1 %vm283_vm1, %v1154_v56 }
  0xde   : > { %2256 = vmatmul.mubr.msk.bf16.vlgmr.msra.gmra.mrb[0].mxu0 %vm276_vm0, %v2587_v39 }
  0xdf   : > { %868 = vmatpush1.bf16.msra.mxu0 %v859_v59  ;;  %756 = vmatprep.mubr.bf16.mxu0 %v2664_v0 }
  0xe0   : > { %2277 = vmatprep.subr.msk.bf16.mxu0 %vm283_vm1, %v1004_v60 }
  0xe1   : > { %v1600_v29 = vpop.permute.xlu0 %1599  ;;  %v1605_v36 = vpop.permute.xlu1 %1604 }
  0xe5   : > { %2397 = vmatmul.mubr.msk.bf16.vlgmr.msra.gmra.mrb[0].mxu1 %vm276_vm0, %v2592_v62  ;;  %v1610_v59 = vpop.permute.xlu1 %1609 }
  0xe6   : > { %2257 = vmatmul.mubr.msk.bf16.gmra.mrb[4].mxu0 %vm276_vm0, %v2588_v45  ;;  %2401 = vmatpush3.bf16.msra.mxu1 %v1171_v63 }
  0xe7   : > { %899 = vmatprep.mubr.bf16.mxu0 %v2664_v0  ;;  %2402 = vmatprep.mubr.msk.bf16.mxu1 %vm276_vm0, %v2593_v1 }
  0xe8   : > { %2545 = vmatprep.subr.msk.bf16.mxu1 %vm283_vm1, %v1307_v3 }
  0xee   : > { %2267 = vmatmul.mubr.msk.bf16.vlgmr.msra.gmra.mrb[0].mxu0 %vm276_vm0, %v2589_v48 }
  0xef   : > { %1021 = vmatpush1.bf16.msra.mxu0 %v1012_v6  ;;  %909 = vmatprep.mubr.bf16.mxu0 %v2664_v0 }
  0xf0   : > { %2288 = vmatprep.subr.msk.bf16.mxu0 %vm283_vm1, %v1157_v7 }
  0xf1   : > { %2403 = vmatmul.mubr.msk.bf16.vlgmr.msra.gmra.mrb[0].mxu1 %vm276_vm0, %v2594_v8 }
  0xf2   : > { %2407 = vmatpush3.bf16.msra.mxu1 %v1324_v10  ;;  %2408 = vmatprep.mubr.msk.bf16.mxu1 %vm276_vm0, %v2595_v9 }
  0xf3   : > { %2546 = vmatprep.subr.msk.bf16.mxu1 %vm283_vm1, %v1460_v11 }
  0xf6   : > { %2268 = vmatmul.mubr.msk.bf16.gmra.mrb[4].mxu0 %vm276_vm0, %v2590_v53 }
  0xf7   : > { %1052 = vmatprep.mubr.bf16.mxu0 %v2664_v0 }
  0xfd   : > { %2409 = vmatmul.mubr.msk.bf16.vlgmr.msra.gmra.mrb[0].mxu1 %vm276_vm0, %v2596_v13 }
  0xfe   : > { %2278 = vmatmul.mubr.msk.bf16.vlgmr.msra.gmra.mrb[0].mxu0 %vm276_vm0, %v2591_v54  ;;  %2413 = vmatpush3.bf16.msra.mxu1 %v1477_v14 }
  0xff   : > { %1174 = vmatpush1.bf16.msra.mxu0 %v1165_v15  ;;  %1062 = vmatprep.mubr.bf16.mxu0 %v2664_v0 }
 0x100   : > { %2414 = vmatprep.mubr.msk.bf16.mxu1 %vm276_vm0, %v2597_v16  ;;  %2299 = vmatprep.subr.msk.bf16.mxu0 %vm283_vm1, %v1310_v17 }
 0x106   : > { %2279 = vmatmul.mubr.msk.bf16.gmra.mrb[4].mxu0 %vm276_vm0, %v2592_v62 }
 0x107   : > { %1205 = vmatprep.mubr.bf16.mxu0 %v2664_v0 }
 0x109   : > { %2415 = vmatmul.mubr.msk.bf16.vlgmr.msra.gmra.mrb[0].mxu1 %vm276_vm0, %v2598_v18 }
 0x10a   : > { %1681 = vmatprep.mubr.bf16.mxu1 %v2664_v0 }
 0x10e   : > { %2289 = vmatmul.mubr.msk.bf16.vlgmr.msra.gmra.mrb[0].mxu0 %vm276_vm0, %v2593_v1 }
 0x10f   : > { %1327 = vmatpush1.bf16.msra.mxu0 %v1318_v21  ;;  %1215 = vmatprep.mubr.bf16.mxu0 %v2664_v0 }
 0x110   : > { %2310 = vmatprep.subr.msk.bf16.mxu0 %vm283_vm1, %v1463_v22 }
 0x116   : > { %2290 = vmatmul.mubr.msk.bf16.gmra.mrb[4].mxu0 %vm276_vm0, %v2594_v8  ;;  %v1615_v8 = vpop.permute.xlu0 %1614 }
 0x117   : > { %1358 = vmatprep.mubr.bf16.mxu0 %v2664_v0 }
 0x11e   : > { %2300 = vmatmul.mubr.msk.bf16.vlgmr.msra.gmra.mrb[0].mxu0 %vm276_vm0, %v2595_v9 }
 0x11f   : > { %1480 = vmatpush1.bf16.msra.mxu0 %v1471_v24  ;;  %1368 = vmatprep.mubr.bf16.mxu0 %v2664_v0  ;;  %v3030_v24 = vpop.permute.xlu1 %1732 }
 0x126   : > { %2301 = vmatmul.mubr.msk.bf16.gmra.mrb[4].mxu0 %vm276_vm0, %v2596_v13 }
 0x127   : > { %1511 = vmatprep.mubr.bf16.mxu0 %v2664_v0 }
 0x12e   : > { %2311 = vmatmul.mubr.msk.bf16.vlgmr.msra.gmra.mrb[0].mxu0 %vm276_vm0, %v2597_v16 }
 0x12f   : > { %1521 = vmatprep.mubr.bf16.mxu0 %v2664_v0 }
 0x136   : > { %2312 = vmatmul.mubr.msk.bf16.gmra.mrb[4].mxu0 %vm276_vm0, %v2598_v18 }
 0x1dc   : > { %v2416_v25 = vpop.f32.mrb[0].mxu1 }
 0x1dd   : > { %v1566_v26 = vpop.f32.mrb[1].mxu1  ;;  %v2990_v6 = vadd.f32 %v2416_v25, %v1610_v59 }
 0x1de   : > { %v2934_v27 = vpop.f32.mrb[2].mxu1  ;;  %v2936_v30 = vadd.f32 %v1600_v29, %v1566_v26 }
 0x1df   : > { %v1569_v28 = vpop.f32.mrb[3].mxu1  ;;  %v1894_v9 = vmul.f32 %v2990_v6, %v2990_v6  ;;  %v3014_v18 = vadd.f32 %v2934_v27, %v1615_v8 }
 0x1e0   : > { %v1633_v39 = vmul.f32 %v2936_v30, %v2936_v30  ;;  %v2967_v57 = vadd.f32 %v1605_v36, %v1569_v28 }
 0x1e1   : > { %v1897_v12 = vpack.c.bf16 %v1894_v9, %v1894_v9  ;;  %v2020_v20 = vmul.f32 %v3014_v18, %v3014_v18 }
 0x1e2   : > { %v1636_v45 = vpack.c.bf16 %v1633_v39, %v1633_v39  ;;  %v1768_v60 = vmul.f32 %v2967_v57, %v2967_v57 }
 0x1e3   : > { %v1905_v17 = vsel %vm283_vm1, %v1897_v12, 0  ;;  %v2023_v22 = vpack.c.bf16 %v2020_v20, %v2020_v20 }
 0x1e4   : > { %v1647_v56 = vsel %vm283_vm1, %v1636_v45, 0  ;;  %v1771_v63 = vpack.c.bf16 %v1768_v60, %v1768_v60 }
 0x1e5   : > { %v2031_v23 = vsel %vm283_vm1, %v2023_v22, 0 }
 0x1e6   : > { %v1779_v5 = vsel %vm283_vm1, %v1771_v63, 0 }
 0x201   : > { %v1513_v31 = vpop.f32.mrb[0].mxu0 }
 0x202   : > { %v2938_v32 = vadd.f32 %v1600_v29, %v1513_v31  ;;  %v1515_v33 = vpop.f32.mrb[1].mxu0 }
 0x203   : > { %v2940_v34 = vadd.f32 %v1600_v29, %v1515_v33  ;;  %v1517_v35 = vpop.f32.mrb[2].mxu0 }
 0x204   : > { %v1631_v37 = vmul.f32 %v2938_v32, %v2938_v32  ;;  %v1519_v38 = vpop.f32.mrb[3].mxu0  ;;  %v2951_v46 = vadd.f32 %v1605_v36, %v1517_v35 }
 0x205   : > { %v1632_v40 = vmul.f32 %v2940_v34, %v2940_v34  ;;  %v2948_v41 = vadd.f32 %v1605_v36, %v1519_v38 }
 0x206   : > { %v1634_v42 = vpack.c.bf16 %v1631_v37, %v1631_v37  ;;  %v1766_v54 = vmul.f32 %v2951_v46, %v2951_v46 }
 0x207   : > { %v1635_v43 = vpack.c.bf16 %v1632_v40, %v1632_v40  ;;  %v1767_v47 = vmul.f32 %v2948_v41, %v2948_v41 }
 0x208   : > { %v1641_v44 = vsel %vm283_vm1, %v1634_v42, 0  ;;  %v1769_v58 = vpack.c.bf16 %v1766_v54, %v1766_v54 }
 0x209   : > { %v1523_v48 = vpop.f32.mrb[4].mxu0  ;;  %2315 = vmatprep.subr.msk.bf16.mxu1 %vm283_vm1, %v1635_v43  ;;  %v1770_v55 = vpack.c.bf16 %v1767_v47, %v1767_v47 }
 0x20a   : > { %v1525_v49 = vpop.f32.mrb[5].mxu0  ;;  %1650 = vmatpush1.bf16.msra.mxu1 %v1641_v44  ;;  %v1773_v62 = vsel %vm283_vm1, %v1769_v58, 0  ;;  %v2978_v1 = vadd.f32 %v1610_v59, %v1523_v48 }
 0x20b   : > { %v1527_v51 = vpop.f32.mrb[6].mxu0  ;;  %2418 = vmatprep.subr.bf16.mxu1 %v2673_v52  ;;  %v2971_v61 = vadd.f32 %v1610_v59, %v1525_v49 }
 0x20c   : > { %v1529_v53 = vpop.f32.mrb[7].mxu0  ;;  %v1892_v3 = vmul.f32 %v2978_v1, %v2978_v1  ;;  %v3001_v13 = vadd.f32 %v1615_v8, %v1527_v51 }
 0x20d   : > { %2316 = vmatmul.mubr.msk.bf16.vlgmr.msra.gmra.mrb[4].mxu1 %vm276_vm0, %v2956_v50  ;;  %v1893_v2 = vmul.f32 %v2971_v61, %v2971_v61  ;;  %v2994_v10 = vadd.f32 %v1615_v8, %v1529_v53 }
 0x20e   : > { %2419 = vmatpush3.bf16.msra.mxu1 %v1647_v56  ;;  %2420 = vmatprep.mubr.msk.bf16.mxu1 %vm2674_vm10, %v2673_v52  ;;  %v1895_v7 = vpack.c.bf16 %v1892_v3, %v1892_v3  ;;  %v2018_v15 = vmul.f32 %v3001_v13, %v3001_v13 }
 0x20f   : > { %2318 = vmatprep.subr.msk.bf16.mxu1 %vm283_vm1, %v1770_v55  ;;  %v1896_v4 = vpack.c.bf16 %v1893_v2, %v1893_v2  ;;  %v2019_v14 = vmul.f32 %v2994_v10, %v2994_v10 }
 0x210   : > { %v1899_v11 = vsel %vm283_vm1, %v1895_v7, 0  ;;  %v2021_v19 = vpack.c.bf16 %v2018_v15, %v2018_v15 }
 0x211   : > { %v2022_v16 = vpack.c.bf16 %v2019_v14, %v2019_v14 }
 0x212   : > { %v2025_v21 = vsel %vm283_vm1, %v2021_v19, 0 }
 0x215   : > { %2421 = vmatmul.mubr.msk.bf16.vlgmr.msra.gmra.mrb[8].mxu1 %vm276_vm0, %v2956_v50 }
 0x216   : > { %1782 = vmatpush1.bf16.msra.mxu1 %v1773_v62  ;;  %1813 = vmatprep.mubr.bf16.mxu1 %v2664_v0 }
 0x217   : > { %2424 = vmatprep.subr.bf16.mxu1 %v2673_v52 }
 0x21d   : > { %2319 = vmatmul.mubr.msk.bf16.vlgmr.msra.gmra.mrb[12].mxu1 %vm276_vm0, %v2956_v50 }
 0x21e   : > { %2425 = vmatpush3.bf16.msra.mxu1 %v1779_v5  ;;  %2426 = vmatprep.mubr.msk.bf16.mxu1 %vm2674_vm10, %v2673_v52 }
 0x21f   : > { %2321 = vmatprep.subr.msk.bf16.mxu1 %vm283_vm1, %v1896_v4 }
 0x225   : > { %2427 = vmatmul.mubr.msk.bf16.vlgmr.msra.gmra.mrb[16].mxu1 %vm276_vm0, %v2956_v50 }
 0x226   : > { %1908 = vmatpush1.bf16.msra.mxu1 %v1899_v11  ;;  %1939 = vmatprep.mubr.bf16.mxu1 %v2664_v0 }
 0x227   : > { %2430 = vmatprep.subr.bf16.mxu1 %v2673_v52 }
 0x22d   : > { %2322 = vmatmul.mubr.msk.bf16.vlgmr.msra.gmra.mrb[20].mxu1 %vm276_vm0, %v2956_v50 }
 0x22e   : > { %2431 = vmatpush3.bf16.msra.mxu1 %v1905_v17  ;;  %2432 = vmatprep.mubr.msk.bf16.mxu1 %vm2674_vm10, %v2673_v52 }
 0x22f   : > { %2324 = vmatprep.subr.msk.bf16.mxu1 %vm283_vm1, %v2022_v16  ;;  %vm1764_vm1 = vcmask 261120  }
 0x235   : > { %2433 = vmatmul.mubr.msk.bf16.vlgmr.msra.gmra.mrb[24].mxu1 %vm276_vm0, %v2956_v50 }
 0x236   : > { %2034 = vmatpush1.bf16.msra.mxu1 %v2025_v21  ;;  %2065 = vmatprep.mubr.bf16.mxu1 %v2664_v0 }
 0x237   : > { %2436 = vmatprep.subr.bf16.mxu1 %v2673_v52 }
 0x23d   : > { %2325 = vmatmul.mubr.msk.bf16.vlgmr.msra.gmra.mrb[28].mxu1 %vm276_vm0, %v2956_v50 }
 0x23e   : > { %2437 = vmatpush3.bf16.msra.mxu1 %v2031_v23  ;;  %2438 = vmatprep.mubr.msk.bf16.mxu1 %vm2674_vm10, %v2673_v52 }
 0x245   : > { %2439 = vmatmul.mubr.msk.bf16.vlgmr.msra.gmra.mrb[32].mxu1 %vm276_vm0, %v2956_v50 }
 0x2e0   : > { %v1683_v25 = vpop.f32.mrb[4].mxu1 }
 0x2e1   : > { %v1735_v0 = vadd.f32 %v3030_v24, %v1683_v25  ;;  %v1685_v26 = vpop.f32.mrb[5].mxu1 }
 0x2e2   : > { %v1736_v27 = vadd.f32 %v3030_v24, %v1685_v26  ;;  %v1687_v28 = vpop.f32.mrb[6].mxu1 }
 0x2e3   : > { %2599 = vrsqrt.f32 %v1735_v0  ;;  %v1688_v29 = vpop.f32.mrb[7].mxu1  ;;  %vm1740_vm11 = vcmp.eq.f32.partialorder %v1735_v0, inf  ;;  %v1743_v42 = vand.u32 2147483648, %v1735_v0  ;;  %vm1742_vm12 = vcmp.eq.f32.partialorder %v1735_v0, 0.0 }
 0x2e4   : > { %2601 = vrsqrt.f32 %v1736_v27  ;;  %vm1747_vm13 = vcmp.eq.f32.partialorder %v1736_v27, inf  ;;  %v1750_v45 = vand.u32 2147483648, %v1736_v27  ;;  %vm1749_vm14 = vcmp.eq.f32.partialorder %v1736_v27, 0.0 }
 0x2e8   : > { %v1724_v31 = vpop.f32.mrb[8].mxu1 }
 0x2e9   : > { %v1737_v33 = vadd.f32 %v3030_v24, %v1724_v31  ;;  %v2422_v35 = vpop.f32.mrb[9].mxu1 }
 0x2ea   : > { %v1727_v36 = vpop.f32.mrb[10].mxu1 }
 0x2eb   : > { %2603 = vrsqrt.f32 %v1737_v33  ;;  %v2423_v37 = vpop.f32.mrb[11].mxu1  ;;  %vm1754_vm15 = vcmp.eq.f32.partialorder %v1737_v33, inf  ;;  %v1757_v62 = vand.u32 2147483648, %v1737_v33  ;;  %vm1756_vm0 = vcmp.eq.f32.partialorder %v1737_v33, 0.0 }
 0x2ed   : > { %v2600_v38 = vpop.eup %2599 }
 0x2ee   : > { %v2602_v39 = vpop.eup %2601  ;;  %v1739_v40 = vmul.f32 %v2600_v38, %v1735_v0 }
 0x2ef   : > { %v1746_v43 = vmul.f32 %v2602_v39, %v1736_v27 }
 0x2f0   : > { %v1741_v44 = vsel %vm1740_vm11, %v1735_v0, %v1739_v40  ;;  %v1815_v47 = vpop.f32.mrb[12].mxu1 }
 0x2f1   : > { %v1744_v48 = vsel %vm1742_vm12, %v1743_v42, %v1741_v44  ;;  %v1748_v49 = vsel %vm1747_vm13, %v1736_v27, %v1746_v43  ;;  %v1862_v50 = vadd.f32 %v1815_v47, %v3030_v24  ;;  %v1817_v51 = vpop.f32.mrb[13].mxu1 }
 0x2f2   : > { %v1759_v52 = vmul.f32 %v1744_v48, %v2938_v32  ;;  %v1751_v53 = vsel %vm1749_vm14, %v1750_v45, %v1748_v49  ;;  %v1863_v54 = vadd.f32 %v1817_v51, %v3030_v24  ;;  %v1819_v55 = vpop.f32.mrb[14].mxu1 }
 0x2f3   : > { %v1760_v56 = vmul.f32 %v1751_v53, %v2940_v34  ;;  %2605 = vrsqrt.f32 %v1862_v50  ;;  %v1820_v58 = vpop.f32.mrb[15].mxu1  ;;  %vm1867_vm2 = vcmp.eq.f32.partialorder %v1862_v50, inf  ;;  %v1870_v12 = vand.u32 2147483648, %v1862_v50 }
 0x2f4   : > { %1762 = vst [vmem:[%s3039_s26] sm:$0xff] %v1759_v52  ;;  %2607 = vrsqrt.f32 %v1863_v54  ;;  %vm1869_vm3 = vcmp.eq.f32.partialorder %v1862_v50, 0.0  ;;  %vm1874_vm4 = vcmp.eq.f32.partialorder %v1863_v54, inf  ;;  %v1877_v16 = vand.u32 2147483648, %v1863_v54 }
 0x2f5   : > { %v2604_v59 = vpop.eup %2603  ;;  %1763 = vst [vmem:[%s3039_s26 + $0x8] sm:$0xff] %v1760_v56  ;;  %vm1876_vm5 = vcmp.eq.f32.partialorder %v1863_v54, 0.0 }
 0x2f6   : > { %v1753_v60 = vmul.f32 %v2604_v59, %v1737_v33 }
 0x2f8   : > { %v1755_v63 = vsel %vm1754_vm15, %v1737_v33, %v1753_v60  ;;  %v1856_v2 = vpop.f32.mrb[16].mxu1 }
 0x2f9   : > { %v1758_v32 = vsel %vm1756_vm0, %v1757_v62, %v1755_v63  ;;  %v1864_v3 = vadd.f32 %v1856_v2, %v3030_v24  ;;  %v2428_v4 = vpop.f32.mrb[17].mxu1 }
 0x2fa   : > { %v1761_v34 = vmul.f32 %v1758_v32, %v2936_v30  ;;  %v1859_v5 = vpop.f32.mrb[18].mxu1 }
 0x2fb   : > { %2609 = vrsqrt.f32 %v1864_v3  ;;  %v2429_v7 = vpop.f32.mrb[19].mxu1  ;;  %vm1881_vm6 = vcmp.eq.f32.partialorder %v1864_v3, inf  ;;  %v1884_v31 = vand.u32 2147483648, %v1864_v3  ;;  %vm1883_vm7 = vcmp.eq.f32.partialorder %v1864_v3, 0.0 }
 0x2fc   : > { %1765 = vst.msk [vmem:[%s3039_s26 + $0x10] sm:$0xff] %vm1764_vm1, %v1761_v34 }
 0x2fd   : > { %v2606_v8 = vpop.eup %2605 }
 0x2fe   : > { %v2608_v9 = vpop.eup %2607  ;;  %v1866_v11 = vmul.f32 %v2606_v8, %v1862_v50 }
 0x2ff   : > { %v1873_v14 = vmul.f32 %v2608_v9, %v1863_v54 }
 0x300   : > { %v1868_v15 = vsel %vm1867_vm2, %v1862_v50, %v1866_v11  ;;  %v1941_v17 = vpop.f32.mrb[20].mxu1 }
 0x301   : > { %v1871_v19 = vsel %vm1869_vm3, %v1870_v12, %v1868_v15  ;;  %v1875_v30 = vsel %vm1874_vm4, %v1863_v54, %v1873_v14  ;;  %v1988_v20 = vadd.f32 %v1941_v17, %v3030_v24  ;;  %v1943_v21 = vpop.f32.mrb[21].mxu1 }
 0x302   : > { %v1886_v22 = vmul.f32 %v1871_v19, %v2951_v46  ;;  %v1878_v23 = vsel %vm1876_vm5, %v1877_v16, %v1875_v30  ;;  %v1989_v25 = vadd.f32 %v1943_v21, %v3030_v24  ;;  %v1945_v0 = vpop.f32.mrb[22].mxu1 }
 0x303   : > { %v1887_v26 = vmul.f32 %v1878_v23, %v2948_v41  ;;  %2611 = vrsqrt.f32 %v1988_v20  ;;  %v1946_v27 = vpop.f32.mrb[23].mxu1  ;;  %vm1993_vm8 = vcmp.eq.f32.partialorder %v1988_v20, inf  ;;  %v1996_v44 = vand.u32 2147483648, %v1988_v20 }
 0x304   : > { %1889 = vst [vmem:[%s3039_s26 + $0x18] sm:$0xff] %v1886_v22  ;;  %2613 = vrsqrt.f32 %v1989_v25  ;;  %vm1995_vm9 = vcmp.eq.f32.partialorder %v1988_v20, 0.0  ;;  %vm2000_vm10 = vcmp.eq.f32.partialorder %v1989_v25, inf  ;;  %v2003_v48 = vand.u32 2147483648, %v1989_v25 }
 0x305   : > { %v2610_v28 = vpop.eup %2609  ;;  %1890 = vst [vmem:[%s3039_s26 + $0x20] sm:$0xff] %v1887_v26  ;;  %vm2002_vm11 = vcmp.eq.f32.partialorder %v1989_v25, 0.0 }
 0x306   : > { %v1880_v29 = vmul.f32 %v2610_v28, %v1864_v3 }
 0x308   : > { %v1882_v33 = vsel %vm1881_vm6, %v1864_v3, %v1880_v29  ;;  %v1982_v35 = vpop.f32.mrb[24].mxu1 }
 0x309   : > { %v1885_v46 = vsel %vm1883_vm7, %v1884_v31, %v1882_v33  ;;  %v1990_v36 = vadd.f32 %v1982_v35, %v3030_v24  ;;  %v2434_v37 = vpop.f32.mrb[25].mxu1 }
 0x30a   : > { %v1888_v38 = vmul.f32 %v1885_v46, %v2967_v57  ;;  %v1985_v41 = vpop.f32.mrb[26].mxu1 }
 0x30b   : > { %2615 = vrsqrt.f32 %v1990_v36  ;;  %v2435_v39 = vpop.f32.mrb[27].mxu1  ;;  %vm2007_vm12 = vcmp.eq.f32.partialorder %v1990_v36, inf  ;;  %v2010_v63 = vand.u32 2147483648, %v1990_v36  ;;  %vm2009_vm13 = vcmp.eq.f32.partialorder %v1990_v36, 0.0 }
 0x30c   : > { %1891 = vst.msk [vmem:[%s3039_s26 + $0x28] sm:$0xff] %vm1764_vm1, %v1888_v38 }
 0x30d   : > { %v2612_v40 = vpop.eup %2611 }
 0x30e   : > { %v2614_v42 = vpop.eup %2613  ;;  %v1992_v43 = vmul.f32 %v2612_v40, %v1988_v20 }
 0x30f   : > { %v1999_v45 = vmul.f32 %v2614_v42, %v1989_v25 }
 0x310   : > { %v1994_v47 = vsel %vm1993_vm8, %v1988_v20, %v1992_v43  ;;  %v2067_v49 = vpop.f32.mrb[28].mxu1 }
 0x311   : > { %v1997_v50 = vsel %vm1995_vm9, %v1996_v44, %v1994_v47  ;;  %v2001_v57 = vsel %vm2000_vm10, %v1989_v25, %v1999_v45  ;;  %v2114_v51 = vadd.f32 %v2067_v49, %v3030_v24  ;;  %v2069_v52 = vpop.f32.mrb[29].mxu1 }
 0x312   : > { %v2012_v53 = vmul.f32 %v1997_v50, %v2978_v1  ;;  %v2004_v54 = vsel %vm2002_vm11, %v2003_v48, %v2001_v57  ;;  %v2115_v55 = vadd.f32 %v2069_v52, %v3030_v24  ;;  %v2071_v56 = vpop.f32.mrb[30].mxu1 }
 0x313   : > { %v2013_v58 = vmul.f32 %v2004_v54, %v2971_v61  ;;  %2617 = vrsqrt.f32 %v2114_v51  ;;  %v2072_v59 = vpop.f32.mrb[31].mxu1  ;;  %vm2119_vm14 = vcmp.eq.f32.partialorder %v2114_v51, inf  ;;  %v2122_v11 = vand.u32 2147483648, %v2114_v51 }
 0x314   : > { %2015 = vst [vmem:[%s3039_s26 + $0x30] sm:$0xff] %v2012_v53  ;;  %2619 = vrsqrt.f32 %v2115_v55  ;;  %vm2121_vm15 = vcmp.eq.f32.partialorder %v2114_v51, 0.0  ;;  %vm2126_vm0 = vcmp.eq.f32.partialorder %v2115_v55, inf  ;;  %vm2128_vm2 = vcmp.eq.f32.partialorder %v2115_v55, 0.0 }
 0x315   : > { %v2616_v60 = vpop.eup %2615  ;;  %2016 = vst [vmem:[%s3039_s26 + $0x38] sm:$0xff] %v2013_v58 }
 0x316   : > { %v2006_v62 = vmul.f32 %v2616_v60, %v1990_v36 }
 0x318   : > { %v2008_v2 = vsel %vm2007_vm12, %v1990_v36, %v2006_v62  ;;  %v2108_v32 = vpop.f32.mrb[32].mxu1 }
 0x319   : > { %v2011_v1 = vsel %vm2009_vm13, %v2010_v63, %v2008_v2  ;;  %v2116_v3 = vadd.f32 %v2108_v32, %v3030_v24  ;;  %v2440_v4 = vpop.f32.mrb[33].mxu1  ;;  %v2129_v24 = vand.u32 2147483648, %v2115_v55 }
 0x31a   : > { %v2014_v34 = vmul.f32 %v2011_v1, %v2990_v6  ;;  %v2111_v61 = vpop.f32.mrb[34].mxu1 }
 0x31b   : > { %2621 = vrsqrt.f32 %v2116_v3  ;;  %v2441_v5 = vpop.f32.mrb[35].mxu1  ;;  %vm2133_vm3 = vcmp.eq.f32.partialorder %v2116_v3, inf  ;;  %v2136_v21 = vand.u32 2147483648, %v2116_v3  ;;  %vm2135_vm4 = vcmp.eq.f32.partialorder %v2116_v3, 0.0 }
 0x31c   : > { %2017 = vst.msk [vmem:[%s3039_s26 + $0x40] sm:$0xff] %vm1764_vm1, %v2014_v34 }
 0x31d   : > { %v2618_v7 = vpop.eup %2617 }
 0x31e   : > { %v2620_v8 = vpop.eup %2619  ;;  %v2118_v9 = vmul.f32 %v2618_v7, %v2114_v51 }
 0x31f   : > { %v2125_v12 = vmul.f32 %v2620_v8, %v2115_v55 }
 0x320   : > { %v2120_v14 = vsel %vm2119_vm14, %v2114_v51, %v2118_v9 }
 0x321   : > { %v2123_v15 = vsel %vm2121_vm15, %v2122_v11, %v2120_v14  ;;  %v2127_v6 = vsel %vm2126_vm0, %v2115_v55, %v2125_v12 }
 0x322   : > { %v2138_v16 = vmul.f32 %v2123_v15, %v3001_v13  ;;  %v2130_v17 = vsel %vm2128_vm2, %v2129_v24, %v2127_v6 }
 0x323   : > { %v2139_v19 = vmul.f32 %v2130_v17, %v2994_v10 }
 0x324   : > { %2141 = vst [vmem:[%s3039_s26 + $0x48] sm:$0xff] %v2138_v16 }
 0x325   : > { %v2622_v30 = vpop.eup %2621  ;;  %2142 = vst [vmem:[%s3039_s26 + $0x50] sm:$0xff] %v2139_v19 }
 0x326   : > { %v2132_v20 = vmul.f32 %v2622_v30, %v2116_v3 }
 0x328   : > { %v2134_v22 = vsel %vm2133_vm3, %v2116_v3, %v2132_v20 }
 0x329   : > { %v2137_v23 = vsel %vm2135_vm4, %v2136_v21, %v2134_v22 }
 0x32a   : > { %v2140_v25 = vmul.f32 %v2137_v23, %v3014_v18 }
 0x32c   : > { %2143 = vst.msk [vmem:[%s3039_s26 + $0x58] sm:$0xff] %vm1764_vm1, %v2140_v25 }
 0x32d PF: > { %s16_s18 = sadd.s32 1, %s2661_s18  }
 0x32e   : > { %p13_p2 = scmp.ge.s32.totalorder %s16_s18, 4  }
 0x330   :  { %15 = sbr.rel (!%p13_p2) target bundleno = 1 (0x1), region = 83 }
 0x337   :  { %2165 = vsyncpa [#allocation3], 1 }
 0x338   :  { %2167 = vsyncpa [#allocation3 + $0x1], 1 }

// kernel: edic_decoder_forward.12
= control target key start
LH: loop header
LB: loop body
LE: loop exit
PB: predicated region body
PF: predicated region fallthrough
CT: control target
= control target key end

     0   :  { %10 = vsyncpa [#allocation3], 0  ;;  %s5888_s18 = smov 0   ;;  %s7492_s0 = inlined_call_operand.vmem [shape: f32[2,8,1158], index: 0, kind: input, shape index: {}]   ;;  %s7493_s1 = inlined_call_operand.vmem [shape: bf16[9,32,8], index: 1, kind: input, shape index: {}]   ;;  %s7494_s2 = inlined_call_operand.vmem [shape: f32[32,1], index: 2, kind: input, shape index: {}]   ;;  %s7495_s3 = inlined_call_operand.hbm [shape: bf16[8,8], index: 3, kind: input, shape index: {}]   ;;  %s7496_s4 = inlined_call_operand.vmem [shape: f32[8,1], index: 4, kind: input, shape index: {}]   ;;  %s7497_s5 = inlined_call_operand.vmem [shape: f32[2,32,1088], index: 5, kind: output, shape index: {}]  }
   0x1 LB: > { %s5894_s19 = sadd.s32 4294967295, %s5844_s18   ;;  %p5051_p0 = scmp.ge.s32.totalorder %s5844_s18, 1  ;;  %s5844_s18 = sphi %s5888_s18, %s16_s18  }
   0x2   : > { %p157_p1 = scmp.lt.s32.totalorder %s5844_s18, 3  ;;  %p7498_p3 = scmp.eq.s32.totalorder %s5894_s19, 0 }
   0x3   : > { %s5846_s21 = smov [#allocation2]   ;;  %s5806_s26 = scalar_lea.hbm %s7495_s3, 64 }
   0x4   : > { %p5898_p2 = pnand %p5051_p0, %p157_p1  ;;  %s176_s22 = sshll.u32 %s5846_s21, 4  ;;  %s177_s22 = int_to_ptr.vmem [resolvable:$true] %s176_s22 }
   0x5   : > { %p5807_p6 = scmp.ne.s32.totalorder %s7495_s3, %s5806_s26  ;;  %p5813_p10 = scmp.lt.u32.totalorder %s5806_s26, %s7495_s3 }
   0x6   : > { %s7500_s20 = scalar_select %p5898_p2, 1, 0 }
   0x7   : > { %p5688_p4 = pneg %p5898_p2 }
   0x9   : > { %p5907_p5 = pnand %p7498_p3, %p5688_p4 }
   0xb   : > { %p5808_p7 = pneg %p5907_p5 }
   0xd   : > { %p5809_p8 = pnand %p5808_p7, %p5807_p6 }
   0xf   : > { %p5810_p9 = pneg %p5809_p8 }
  0x11   : > { %p5815_p11 = pnand %p5813_p10, %p5810_p9 }
  0x13   : > { %5818 = shalt.err (!%p5815_p11)
}
  0x14   : > { %s5819_s6 = scalar_lea.vmem %s177_s22, 64  ;;  %p5827_p1 = scmp.lt.s32.totalorder %s177_s22, %s177_s22 }
  0x15   : > { %p5820_p12 = scmp.ne.s32.totalorder %s177_s22, %s5819_s6  ;;  %p5828_p4 = scmp.lt.s32.totalorder %s5819_s6, %s5819_s6 }
  0x17   : > { %p5822_p13 = pnand %p5820_p12, %p5808_p7  ;;  %p5829_p3 = por %p5828_p4, %p5827_p1 }
  0x19   : > { %p5823_p0 = pneg %p5822_p13 }
  0x1b   : > { %p5830_p2 = pnand %p5829_p3, %p5823_p0 }
  0x1d   : > { %5833 = shalt.err (!%p5830_p2)
}
  0x1e   : > { %5691 = dma.hbm_to_vmem [thread:$0]  (!%p5907_p5), %s7495_s3, 64, %s177_s22, [#allocation3]  }
  0x1f   : > { %p7502_p6 = scmp.ne.s32.totalorder %s7500_s20, 0 }
  0x20   : > { %p7503_p8 = scmp.eq.s32.totalorder (!%p7502_p6), %s5894_s19, 0 }
  0x21   : > { %200 = sbr.rel (%p7502_p6) target bundleno = 1054 (0x41e), region = 40 }
  0x28   : > { %5839 = dma.done.wait (%p7503_p8), [#allocation3], 64   ;;  %p7504_p7 = pmov %p7503_p8 }
  0x29   : > { %p228_p9 = scmp.lt.s32.totalorder %s5894_s19, 1  ;;  %v5847_v0 = vmov 0   ;;  %s5848_s13 = smov 127   ;;  %vm303_vm0 = vcmask 1039360   ;;  %vm319_vm1 = vcmask 1043456   ;;  %v6049_v28 = vld [vmem:[%s7493_s1 + $0x10] sm:$0xff]  }
  0x2a   : > { %5841 = vsyncadd (%p7504_p7), [#allocation3], 4294967232  ;;  %379 = vmatprep.mubr.bf16.mxu0 %v5847_v0  ;;  %432 = vmatprep.mubr.bf16.mxu1 %v5847_v0  ;;  %s5849_s14 = smov 126   ;;  %s5850_s15 = smov 94   ;;  %vm312_vm2 = vcmask 64512   ;;  %v5717_v39 = vld [vmem:[%s7493_s1 + $0x18] sm:$0xff]  }
  0x2b   : > { %s7506_s19 = smov (!%p228_p9, %s5894_s19), 1  ;;  %5714 = vset.pattern.permute.xlu1 %v5847_v0  ;;  %5715 = vset.pattern.permute.xlu0 %v5847_v0  ;;  %s5851_s16 = smov 93   ;;  %v5718_v62 = vld [vmem:[%s7493_s1] sm:$0xff]   ;;  %vm945_vm3 = vcmask 1031168   ;;  %vm1317_vm4 = vcmask 769024   ;;  %vm2465_vm5 = vcmask 490496  }
  0x2c   : > { %s5682_s9 = smul.u32 80, %s7506_s19  ;;  %s5852_s17 = smov 92   ;;  %vm1689_vm6 = vcmask 760832   ;;  %vm2840_vm7 = vcmask 482304   ;;  %vm3215_vm8 = vcmask 474112   ;;  %vm2061_vm9 = vcmask 752640  }
  0x2d   : > { %s5853_s20 = smov 60   ;;  %s5854_s21 = smov 59   ;;  %vm5857_vm10 = vmmov 0  }
  0x2e   : > { %s5943_s12 = scalar_lea.vmem %s7492_s0, %s5682_s9  ;;  %s5855_s26 = smov 58  }
  0x2f   : > { %v241_v1 = vld [vmem:[%s5943_s12 + $0x10] sm:$0xff]  ;;  %v239_v2 = vld [vmem:[%s5943_s12] sm:$0xff]  ;;  %v240_v6 = vld [vmem:[%s5943_s12 + $0x8] sm:$0xff]  ;;  %s5683_s23 = smul.u32 288, %s7506_s19 }
  0x30   : > { %v243_v3 = vld [vmem:[%s5943_s12 + $0x20] sm:$0xff]  ;;  %v5950_v4 = vpack.c.bf16 %v241_v1, %v241_v1  ;;  %v5952_v5 = vpack.c.bf16 %v239_v2, %v239_v2  ;;  %v245_v7 = vld [vmem:[%s5943_s12 + $0x30] sm:$0xff]  ;;  %v5960_v9 = vpack.c.bf16 %v240_v6, %v240_v6  ;;  %v244_v10 = vld [vmem:[%s5943_s12 + $0x28] sm:$0xff] }
  0x31   : > { %v5958_v8 = vpack.c.bf16 %v243_v3, %v243_v3  ;;  %v242_v11 = vld [vmem:[%s5943_s12 + $0x18] sm:$0xff]  ;;  %v247_v12 = vld [vmem:[%s5943_s12 + $0x40] sm:$0xff]  ;;  %v5967_v13 = vpack.c.bf16 %v245_v7, %v245_v7  ;;  %v5969_v14 = vpack.c.bf16 %v244_v10, %v244_v10  ;;  %v2409_v19 = vld [vmem:[%s5943_s12 + $0x48] sm:$0xff] }
  0x32   : > { %289 = vrot.lane.b32.xlu1 %v5950_v4, %s5848_s13  ;;  %285 = vrot.lane.b32.xlu0 %v5952_v5, %s5848_s13  ;;  %v5972_v15 = vpack.c.bf16 %v242_v11, %v242_v11  ;;  %v5975_v16 = vpack.c.bf16 %v247_v12, %v247_v12  ;;  %v246_v17 = vld [vmem:[%s5943_s12 + $0x38] sm:$0xff]  ;;  %v6027_v20 = vpack.c.bf16 %v2409_v19, %v2409_v19  ;;  %v631_v54 = vsel %vm319_vm1, %v5950_v4, 0  ;;  %v5719_v7 = vld [vmem:[%s7493_s1 + $0x8] sm:$0xff]  }
  0x33   : > { %v5981_v18 = vpack.c.bf16 %v246_v17, %v246_v17  ;;  %v625_v57 = vsel %vm319_vm1, %v5952_v5, 0  ;;  %v637_v2 = vsel %vm319_vm1, %v5958_v8, 0  ;;  %v643_v3 = vsel %vm319_vm1, %v5967_v13, 0 }
  0x34   : > { %v649_v17 = vsel %vm319_vm1, %v5975_v16, 0 }
  0x36   : > { %293 = vrot.lane.b32.xlu1 %v5958_v8, %s5848_s13  ;;  %287 = vrot.lane.b32.xlu0 %v5960_v9, %s5848_s13 }
  0x3a   : > { %297 = vrot.lane.b32.xlu1 %v5967_v13, %s5848_s13  ;;  %295 = vrot.lane.b32.xlu0 %v5969_v14, %s5848_s13 }
  0x3e   : > { %291 = vrot.lane.b32.xlu1 %v5972_v15, %s5848_s13  ;;  %301 = vrot.lane.b32.xlu0 %v5975_v16, %s5848_s13 }
  0x42   : > { %929 = vrot.lane.b32.xlu1 %v5960_v9, %s5849_s14  ;;  %927 = vrot.lane.b32.xlu0 %v5952_v5, %s5849_s14 }
  0x46   : > { %299 = vrot.lane.b32.xlu1 %v5981_v18, %s5848_s13  ;;  %931 = vrot.lane.b32.xlu0 %v5950_v4, %s5849_s14 }
  0x4a   : > { %937 = vrot.lane.b32.xlu1 %v5969_v14, %s5849_s14  ;;  %935 = vrot.lane.b32.xlu0 %v5958_v8, %s5849_s14 }
  0x4e   : > { %943 = vrot.lane.b32.xlu1 %v5975_v16, %s5849_s14  ;;  %939 = vrot.lane.b32.xlu0 %v5967_v13, %s5849_s14 }
  0x52   : > { %1301 = vrot.lane.b32.xlu1 %v5960_v9, %s5850_s15  ;;  %1299 = vrot.lane.b32.xlu0 %v5952_v5, %s5850_s15 }
  0x56   : > { %933 = vrot.lane.b32.xlu1 %v5972_v15, %s5849_s14  ;;  %1303 = vrot.lane.b32.xlu0 %v5950_v4, %s5850_s15 }
  0x5a   : > { %1309 = vrot.lane.b32.xlu1 %v5969_v14, %s5850_s15  ;;  %1307 = vrot.lane.b32.xlu0 %v5958_v8, %s5850_s15 }
  0x5e   : > { %941 = vrot.lane.b32.xlu1 %v5981_v18, %s5849_s14  ;;  %1311 = vrot.lane.b32.xlu0 %v5967_v13, %s5850_s15 }
  0x62   : > { %1315 = vrot.lane.b32.xlu0 %v5975_v16, %s5850_s15  ;;  %1671 = vrot.lane.b32.xlu1 %v5952_v5, %s5851_s16 }
  0x66   : > { %1673 = vrot.lane.b32.xlu0 %v5960_v9, %s5851_s16  ;;  %1675 = vrot.lane.b32.xlu1 %v5950_v4, %s5851_s16 }
  0x6a   : > { %1305 = vrot.lane.b32.xlu0 %v5972_v15, %s5850_s15  ;;  %1679 = vrot.lane.b32.xlu1 %v5958_v8, %s5851_s16 }
  0x6e   : > { %1681 = vrot.lane.b32.xlu0 %v5969_v14, %s5851_s16  ;;  %1683 = vrot.lane.b32.xlu1 %v5967_v13, %s5851_s16 }
  0x72   : > { %1313 = vrot.lane.b32.xlu0 %v5981_v18, %s5850_s15  ;;  %1687 = vrot.lane.b32.xlu1 %v5975_v16, %s5851_s16 }
  0x76   : > { %1677 = vrot.lane.b32.xlu0 %v5972_v15, %s5851_s16  ;;  %2043 = vrot.lane.b32.xlu1 %v5952_v5, %s5852_s17 }
  0x7a   : > { %2045 = vrot.lane.b32.xlu0 %v5960_v9, %s5852_s17  ;;  %2047 = vrot.lane.b32.xlu1 %v5950_v4, %s5852_s17 }
  0x7e   : > { %1685 = vrot.lane.b32.xlu0 %v5981_v18, %s5851_s16  ;;  %2051 = vrot.lane.b32.xlu1 %v5958_v8, %s5852_s17 }
  0x82   : > { %2053 = vrot.lane.b32.xlu0 %v5969_v14, %s5852_s17  ;;  %2055 = vrot.lane.b32.xlu1 %v5967_v13, %s5852_s17 }
  0x86   : > { %2049 = vrot.lane.b32.xlu0 %v5972_v15, %s5852_s17  ;;  %2059 = vrot.lane.b32.xlu1 %v5975_v16, %s5852_s17 }
  0x8a   : > { %2447 = vrot.lane.b32.xlu1 %v5960_v9, %s5853_s20  ;;  %2445 = vrot.lane.b32.xlu0 %v5952_v5, %s5853_s20 }
  0x8e   : > { %2057 = vrot.lane.b32.xlu1 %v5981_v18, %s5852_s17  ;;  %2449 = vrot.lane.b32.xlu0 %v5950_v4, %s5853_s20 }
  0x92   : > { %2455 = vrot.lane.b32.xlu1 %v5969_v14, %s5853_s20  ;;  %2453 = vrot.lane.b32.xlu0 %v5958_v8, %s5853_s20 }
  0x96   : > { %2451 = vrot.lane.b32.xlu1 %v5972_v15, %s5853_s20  ;;  %2457 = vrot.lane.b32.xlu0 %v5967_v13, %s5853_s20 }
  0x9a   : > { %2461 = vrot.lane.b32.xlu0 %v5975_v16, %s5853_s20  ;;  %2463 = vrot.lane.b32.xlu1 %v6027_v20, %s5853_s20 }
  0x9e   : > { %2459 = vrot.lane.b32.xlu0 %v5981_v18, %s5853_s20  ;;  %2820 = vrot.lane.b32.xlu1 %v5952_v5, %s5854_s21 }
  0xa2   : > { %2824 = vrot.lane.b32.xlu1 %v5950_v4, %s5854_s21  ;;  %2822 = vrot.lane.b32.xlu0 %v5960_v9, %s5854_s21 }
  0xa4   : > { %v290_v21 = vpop.permute.xlu1 %289  ;;  %v286_v22 = vpop.permute.xlu0 %285 }
  0xa6   : > { %2828 = vrot.lane.b32.xlu1 %v5958_v8, %s5854_s21  ;;  %2826 = vrot.lane.b32.xlu0 %v5972_v15, %s5854_s21 }
  0xa8   : > { %v294_v23 = vpop.permute.xlu1 %293  ;;  %v288_v24 = vpop.permute.xlu0 %287 }
  0xa9   : > { %v305_v25 = vsel %vm303_vm0, %v288_v24, %v290_v21  ;;  %v304_v26 = vsel %vm303_vm0, %v286_v22, %v288_v24 }
  0xaa   : > { %5064 = vmatprep.subr.msk.bf16.mxu0 %vm319_vm1, %v305_v25  ;;  %v321_v27 = vsel %vm319_vm1, %v304_v26, 0  ;;  %2832 = vrot.lane.b32.xlu1 %v5967_v13, %s5854_s21  ;;  %v6240_v26 = vld [vmem:[%s7493_s1 + $0x20] sm:$0xff]  }
  0xab   : > { %348 = vmatpush1.bf16.msra.mxu0 %v321_v27  ;;  %2830 = vrot.lane.b32.xlu0 %v5969_v14, %s5854_s21 }
  0xac   : > { %v298_v29 = vpop.permute.xlu1 %297  ;;  %v296_v30 = vpop.permute.xlu0 %295 }
  0xad   : > { %v308_v31 = vsel %vm303_vm0, %v294_v23, %v296_v30  ;;  %v309_v32 = vsel %vm303_vm0, %v296_v30, %v298_v29 }
  0xae   : > { %5065 = vmatmul.mubr.msk.bf16.vlgmr.msra.gmra.mrb[0].mxu0 %vm312_vm2, %v6049_v28  ;;  %v333_v33 = vsel %vm319_vm1, %v308_v31, 0  ;;  %5070 = vmatprep.subr.msk.bf16.mxu0 %vm319_vm1, %v309_v32 }
  0xaf   : > { %389 = vmatprep.mubr.bf16.mxu0 %v5847_v0  ;;  %454 = vmatpush1.bf16.msra.mxu0 %v333_v33 }
  0xb0   : > { %v292_v34 = vpop.permute.xlu1 %291  ;;  %v302_v35 = vpop.permute.xlu0 %301  ;;  %2836 = vrot.lane.b32.xlu1 %v5975_v16, %s5854_s21  ;;  %2834 = vrot.lane.b32.xlu0 %v5981_v18, %s5854_s21 }
  0xb1   : > { %v307_v36 = vsel %vm303_vm0, %v292_v34, %v294_v23  ;;  %v306_v37 = vsel %vm303_vm0, %v290_v21, %v292_v34  ;;  %5673 = vmatprep.subr.msk.bf16.mxu0 %vm319_vm1, %v302_v35  ;;  %v345_v49 = vsel %vm319_vm1, %v302_v35, 0 }
  0xb2   : > { %5067 = vmatprep.subr.msk.bf16.mxu1 %vm319_vm1, %v307_v36  ;;  %v327_v38 = vsel %vm319_vm1, %v306_v37, 0  ;;  %v6273_v37 = vld [vmem:[%s7493_s1 + $0x28] sm:$0xff]  }
  0xb3   : > { %401 = vmatpush1.bf16.msra.mxu1 %v327_v38 }
  0xb4   : > { %v6074_v40 = vpop.permute.xlu1 %929  ;;  %v6076_v41 = vpop.permute.xlu0 %927  ;;  %3195 = vrot.lane.b32.xlu1 %v5952_v5, %s5855_s26  ;;  %2838 = vrot.lane.b32.xlu0 %v6027_v20, %s5854_s21 }
  0xb5   : > { %v946_v25 = vsel %vm945_vm3, %v6076_v41, %v6074_v40 }
  0xb6   : > { %5068 = vmatmul.mubr.msk.bf16.vlgmr.msra.gmra.mrb[0].mxu1 %vm312_vm2, %v6049_v28  ;;  %5066 = vmatmul.mubr.msk.bf16.gmra.mrb[4].mxu0 %vm312_vm2, %v5717_v39 }
  0xb7   : > { %442 = vmatprep.mubr.bf16.mxu1 %v5847_v0  ;;  %485 = vmatprep.mubr.bf16.mxu0 %v5847_v0 }
  0xb8   : > { %v300_v42 = vpop.permute.xlu1 %299  ;;  %v6087_v43 = vpop.permute.xlu0 %931  ;;  %3199 = vrot.lane.b32.xlu1 %v5950_v4, %s5855_s26  ;;  %3197 = vrot.lane.b32.xlu0 %v5960_v9, %s5855_s26 }
  0xb9   : > { %v310_v44 = vsel %vm303_vm0, %v298_v29, %v300_v42  ;;  %v311_v45 = vsel %vm303_vm0, %v300_v42, %v302_v35 }
  0xba   : > { %v339_v46 = vsel %vm319_vm1, %v310_v44, 0  ;;  %5073 = vmatprep.subr.msk.bf16.mxu1 %vm319_vm1, %v311_v45 }
  0xbb   : > { %507 = vmatpush1.bf16.msra.mxu1 %v339_v46 }
  0xbc   : > { %5083 = vmatprep.subr.msk.bf16.mxu1 %vm319_vm1, %v5972_v15  ;;  %v6099_v47 = vpop.permute.xlu1 %937  ;;  %v6101_v48 = vpop.permute.xlu0 %935  ;;  %3203 = vrot.lane.b32.xlu1 %v5958_v8, %s5855_s26 }
  0xbd   : > { %3201 = vrot.lane.b32.xlu0 %v5972_v15, %s5855_s26  ;;  %v950_v36 = vsel %vm945_vm3, %v6101_v48, %v6099_v47 }
  0xbe   : > { %5069 = vmatmul.mubr.msk.bf16.gmra.mrb[4].mxu1 %vm312_vm2, %v5717_v39  ;;  %5071 = vmatmul.mubr.msk.bf16.vlgmr.msra.gmra.mrb[8].mxu0 %vm312_vm2, %v6049_v28 }
  0xbf   : > { %495 = vmatprep.mubr.bf16.mxu0 %v5847_v0  ;;  %538 = vmatprep.mubr.bf16.mxu1 %v5847_v0 }
  0xc0   : > { %5308 = vmatpush3.bf16.msra.mxu0 %v345_v49  ;;  %v6113_v50 = vpop.permute.xlu1 %943  ;;  %v6115_v51 = vpop.permute.xlu0 %939  ;;  %3207 = vrot.lane.b32.xlu1 %v5967_v13, %s5855_s26 }
  0xc1   : > { %5080 = vmatprep.subr.msk.bf16.mxu0 %vm319_vm1, %v5960_v9  ;;  %3205 = vrot.lane.b32.xlu0 %v5969_v14, %s5855_s26  ;;  %v951_v32 = vsel %vm945_vm3, %v6099_v47, %v6115_v51 }
  0xc4   : > { %v6123_v52 = vpop.permute.xlu1 %1301  ;;  %v6125_v53 = vpop.permute.xlu0 %1299  ;;  %3211 = vrot.lane.b32.xlu1 %v5975_v16, %s5855_s26 }
  0xc5   : > { %3209 = vrot.lane.b32.xlu0 %v5981_v18, %s5855_s26 }
  0xc6   : > { %5072 = vmatmul.mubr.msk.bf16.gmra.mrb[12].mxu0 %vm312_vm2, %v5717_v39  ;;  %5074 = vmatmul.mubr.msk.bf16.vlgmr.msra.gmra.mrb[8].mxu1 %vm312_vm2, %v6049_v28 }
  0xc7   : > { %548 = vmatprep.mubr.bf16.mxu1 %v5847_v0  ;;  %5309 = vmatprep.mubr.msk.bf16.mxu0 %vm312_vm2, %v6049_v28  ;;  %v961_v28 = vsel %vm319_vm1, %v946_v25, 0  ;;  %v6378_v25 = vld [vmem:[%s7493_s1 + $0x38] sm:$0xff]  }
  0xc8   : > { %705 = vmatpush1.bf16.msra.mxu1 %v631_v54  ;;  %v934_v55 = vpop.permute.xlu1 %933  ;;  %v6139_v56 = vpop.permute.xlu0 %1303 }
  0xc9   : > { %5089 = vmatprep.subr.msk.bf16.mxu1 %vm319_vm1, %v5981_v18  ;;  %3213 = vrot.lane.b32.xlu0 %v6027_v20, %s5855_s26  ;;  %v949_v4 = vsel %vm945_vm3, %v934_v55, %v6101_v48  ;;  %v948_v12 = vsel %vm945_vm3, %v6087_v43, %v934_v55  ;;  %v947_v18 = vsel %vm945_vm3, %v6074_v40, %v6087_v43  ;;  %v973_v40 = vsel %vm319_vm1, %v950_v36, 0  ;;  %s7171_s26 = scalar_lea.vmem %s7497_s5, %s5683_s23 }
  0xca   : > { %v967_v15 = vsel %vm319_vm1, %v948_v12, 0 }
  0xcc   : > { %v6147_v58 = vpop.permute.xlu1 %1309  ;;  %v6149_v59 = vpop.permute.xlu0 %1307 }
  0xce   : > { %5075 = vmatmul.mubr.msk.bf16.gmra.mrb[12].mxu1 %vm312_vm2, %v5717_v39  ;;  %5310 = vmatmul.mubr.msk.bf16.vlgmr.msra.gmra.mrb[16].mxu0 %vm312_vm2, %v5717_v39 }
  0xcf   : > { %652 = vmatpush1.bf16.msra.mxu0 %v625_v57  ;;  %683 = vmatprep.mubr.bf16.mxu0 %v5847_v0 }
  0xd0   : > { %736 = vmatprep.mubr.bf16.mxu1 %v5847_v0  ;;  %5086 = vmatprep.subr.msk.bf16.mxu0 %vm319_vm1, %v5969_v14  ;;  %v942_v60 = vpop.permute.xlu1 %941  ;;  %v6157_v61 = vpop.permute.xlu0 %1311 }
  0xd1   : > { %v953_v19 = vsel %vm945_vm3, %v942_v60, %v6113_v50  ;;  %v952_v27 = vsel %vm945_vm3, %v6115_v51, %v942_v60 }
  0xd2   : > { %v979_v31 = vsel %vm319_vm1, %v952_v27, 0 }
  0xd4   : > { %v6162_v63 = vpop.permute.xlu0 %1315  ;;  %v6164_v1 = vpop.permute.xlu1 %1671 }
  0xd6   : > { %5081 = vmatmul.mubr.msk.bf16.vlgmr.msra.gmra.mrb[0].mxu0 %vm312_vm2, %v5718_v62  ;;  %5084 = vmatmul.mubr.msk.bf16.vlgmr.msra.gmra.mrb[0].mxu1 %vm312_vm2, %v5718_v62 }
  0xd7   : > { %693 = vmatprep.mubr.bf16.mxu0 %v5847_v0  ;;  %746 = vmatprep.mubr.bf16.mxu1 %v5847_v0 }
  0xd8   : > { %758 = vmatpush1.bf16.msra.mxu0 %v637_v2  ;;  %811 = vmatpush1.bf16.msra.mxu1 %v643_v3  ;;  %v6176_v5 = vpop.permute.xlu0 %1673  ;;  %v6178_v6 = vpop.permute.xlu1 %1675  ;;  %v1319_v2 = vsel %vm1317_vm4, %v6123_v52, %v6139_v56 }
  0xd9   : > { %5674 = vmatprep.subr.msk.bf16.mxu0 %vm319_vm1, %v5975_v16  ;;  %5103 = vmatprep.subr.msk.bf16.mxu1 %vm319_vm1, %v949_v4 }
  0xdc   : > { %v6186_v8 = vpop.permute.xlu0 %1305  ;;  %v6188_v9 = vpop.permute.xlu1 %1679 }
  0xdd   : > { %v1321_v33 = vsel %vm1317_vm4, %v6186_v8, %v6149_v59  ;;  %v1320_v44 = vsel %vm1317_vm4, %v6139_v56, %v6186_v8 }
  0xde   : > { %5082 = vmatmul.mubr.msk.bf16.gmra.mrb[4].mxu0 %vm312_vm2, %v5719_v7  ;;  %5085 = vmatmul.mubr.msk.bf16.gmra.mrb[4].mxu1 %vm312_vm2, %v5719_v7  ;;  %v1339_v47 = vsel %vm319_vm1, %v1320_v44, 0 }
  0xdf   : > { %789 = vmatprep.mubr.bf16.mxu0 %v5847_v0  ;;  %842 = vmatprep.mubr.bf16.mxu1 %v5847_v0 }
  0xe0   : > { %v6194_v10 = vpop.permute.xlu0 %1681  ;;  %v6196_v11 = vpop.permute.xlu1 %1683 }
  0xe4   : > { %v6200_v13 = vpop.permute.xlu0 %1313  ;;  %v6202_v14 = vpop.permute.xlu1 %1687 }
  0xe5   : > { %v1325_v49 = vsel %vm1317_vm4, %v6200_v13, %v6162_v63  ;;  %v1324_v56 = vsel %vm1317_vm4, %v6157_v61, %v6200_v13 }
  0xe6   : > { %5087 = vmatmul.mubr.msk.bf16.vlgmr.msra.gmra.mrb[8].mxu0 %vm312_vm2, %v5718_v62  ;;  %5090 = vmatmul.mubr.msk.bf16.vlgmr.msra.gmra.mrb[8].mxu1 %vm312_vm2, %v5718_v62  ;;  %v1351_v12 = vsel %vm319_vm1, %v1324_v56, 0 }
  0xe7   : > { %799 = vmatprep.mubr.bf16.mxu0 %v5847_v0  ;;  %852 = vmatprep.mubr.bf16.mxu1 %v5847_v0 }
  0xe8   : > { %5314 = vmatpush3.bf16.msra.mxu0 %v649_v17  ;;  %1041 = vmatpush1.bf16.msra.mxu1 %v967_v15  ;;  %v6216_v20 = vpop.permute.xlu0 %1677  ;;  %v6218_v16 = vpop.permute.xlu1 %2043 }
  0xe9   : > { %5100 = vmatprep.subr.msk.bf16.mxu0 %vm319_vm1, %v947_v18  ;;  %5109 = vmatprep.subr.msk.bf16.mxu1 %vm319_vm1, %v953_v19  ;;  %v1693_v13 = vsel %vm1689_vm6, %v6216_v20, %v6188_v9  ;;  %v1318_v18 = vsel %vm1317_vm4, %v6125_v53, %v6123_v52  ;;  %v1322_v53 = vsel %vm1317_vm4, %v6149_v59, %v6147_v58 }
  0xea   : > { %v1345_v36 = vsel %vm319_vm1, %v1322_v53, 0  ;;  %v1690_v53 = vsel %vm1689_vm6, %v6164_v1, %v6176_v5 }
  0xec   : > { %v6222_v21 = vpop.permute.xlu0 %2045  ;;  %v6224_v22 = vpop.permute.xlu1 %2047 }
  0xee   : > { %5088 = vmatmul.mubr.msk.bf16.gmra.mrb[12].mxu0 %vm312_vm2, %v5719_v7  ;;  %5091 = vmatmul.mubr.msk.bf16.gmra.mrb[12].mxu1 %vm312_vm2, %v5719_v7 }
  0xef   : > { %5315 = vmatprep.mubr.msk.bf16.mxu0 %vm312_vm2, %v5718_v62  ;;  %1072 = vmatprep.mubr.bf16.mxu1 %v5847_v0  ;;  %v985_v62 = vsel %vm319_vm1, %v6113_v50, 0 }
  0xf0   : > { %v6230_v23 = vpop.permute.xlu0 %1685  ;;  %v6232_v24 = vpop.permute.xlu1 %2051 }
  0xf4   : > { %v6245_v29 = vpop.permute.xlu0 %2053  ;;  %v6247_v30 = vpop.permute.xlu1 %2055 }
  0xf6   : > { %5316 = vmatmul.mubr.msk.bf16.vlgmr.msra.gmra.mrb[16].mxu0 %vm312_vm2, %v5719_v7  ;;  %5104 = vmatmul.mubr.msk.bf16.vlgmr.msra.gmra.mrb[0].mxu1 %vm312_vm2, %v6240_v26 }
  0xf7   : > { %988 = vmatpush1.bf16.msra.mxu0 %v961_v28  ;;  %1019 = vmatprep.mubr.bf16.mxu0 %v5847_v0  ;;  %v1323_v28 = vsel %vm1317_vm4, %v6147_v58, %v6157_v61  ;;  %v1692_v61 = vsel %vm1689_vm6, %v6178_v6, %v6216_v20  ;;  %v1697_v58 = vsel %vm1689_vm6, %v6230_v23, %v6202_v14 }
  0xf8   : > { %1082 = vmatprep.mubr.bf16.mxu1 %v5847_v0  ;;  %1147 = vmatpush1.bf16.msra.mxu1 %v979_v31  ;;  %v6261_v34 = vpop.permute.xlu0 %2049  ;;  %v6263_v35 = vpop.permute.xlu1 %2059 }
  0xf9   : > { %5106 = vmatprep.subr.msk.bf16.mxu0 %vm319_vm1, %v951_v32  ;;  %5123 = vmatprep.subr.msk.bf16.mxu1 %vm319_vm1, %v1321_v33 }
  0xfc   : > { %v6275_v38 = vpop.permute.xlu1 %2447  ;;  %v2446_v39 = vpop.permute.xlu0 %2445 }
  0xfd   : > { %v6280_v41 = vsel %vm2465_vm5, %v2446_v39, %v6275_v38 }
  0xfe   : > { %5101 = vmatmul.mubr.msk.bf16.vlgmr.msra.gmra.mrb[0].mxu0 %vm312_vm2, %v6240_v26  ;;  %5105 = vmatmul.mubr.msk.bf16.gmra.mrb[4].mxu1 %vm312_vm2, %v6273_v37 }
  0xff   : > { %1029 = vmatprep.mubr.bf16.mxu0 %v5847_v0  ;;  %1178 = vmatprep.mubr.bf16.mxu1 %v5847_v0 }
 0x100   : > { %1094 = vmatpush1.bf16.msra.mxu0 %v973_v40  ;;  %v6288_v42 = vpop.permute.xlu1 %2057  ;;  %v6290_v43 = vpop.permute.xlu0 %2449 }
 0x101   : > { %5675 = vmatprep.subr.msk.bf16.mxu0 %vm319_vm1, %v6113_v50  ;;  %v6343_v50 = vld [vmem:[%s7493_s1 + $0x30] sm:$0xff]   ;;  %v2069_v1 = vsel %vm2061_vm9, %v6288_v42, %v6263_v35 }
 0x104   : > { %v2456_v45 = vpop.permute.xlu1 %2455  ;;  %v6297_v46 = vpop.permute.xlu0 %2453 }
 0x105   : > { %v6302_v48 = vsel %vm2465_vm5, %v6297_v46, %v2456_v45 }
 0x106   : > { %5102 = vmatmul.mubr.msk.bf16.gmra.mrb[4].mxu0 %vm312_vm2, %v6273_v37  ;;  %5110 = vmatmul.mubr.msk.bf16.vlgmr.msra.gmra.mrb[8].mxu1 %vm312_vm2, %v6240_v26 }
 0x107   : > { %1125 = vmatprep.mubr.bf16.mxu0 %v5847_v0  ;;  %1188 = vmatprep.mubr.bf16.mxu1 %v5847_v0 }
 0x108   : > { %1413 = vmatpush1.bf16.msra.mxu1 %v1339_v47  ;;  %v6313_v51 = vpop.permute.xlu1 %2451  ;;  %v6315_v54 = vpop.permute.xlu0 %2457 }
 0x109   : > { %5129 = vmatprep.subr.msk.bf16.mxu1 %vm319_vm1, %v1325_v49  ;;  %v6320_v55 = vsel %vm2465_vm5, %v2456_v45, %v6315_v54  ;;  %v6446_v49 = vld [vmem:[%s7493_s1 + $0x40] sm:$0xff]  }
 0x10c   : > { %v6322_v57 = vpop.permute.xlu0 %2461  ;;  %v6324_v60 = vpop.permute.xlu1 %2463 }
 0x10e   : > { %5107 = vmatmul.mubr.msk.bf16.vlgmr.msra.gmra.mrb[8].mxu0 %vm312_vm2, %v6240_v26  ;;  %5111 = vmatmul.mubr.msk.bf16.gmra.mrb[12].mxu1 %vm312_vm2, %v6273_v37 }
 0x10f   : > { %1135 = vmatprep.mubr.bf16.mxu0 %v5847_v0  ;;  %1444 = vmatprep.mubr.bf16.mxu1 %v5847_v0 }
 0x110   : > { %5320 = vmatpush3.bf16.msra.mxu0 %v985_v62  ;;  %v6337_v3 = vpop.permute.xlu0 %2459  ;;  %v2821_v4 = vpop.permute.xlu1 %2820  ;;  %v1696_v62 = vsel %vm1689_vm6, %v6196_v11, %v6230_v23  ;;  %v2065_v23 = vsel %vm2061_vm9, %v6261_v34, %v6232_v24 }
 0x111   : > { %5120 = vmatprep.subr.msk.bf16.mxu0 %vm319_vm1, %v1319_v2  ;;  %v1723_v56 = vsel %vm319_vm1, %v1696_v62, 0 }
 0x114   : > { %v6348_v7 = vpop.permute.xlu1 %2824  ;;  %v6350_v8 = vpop.permute.xlu0 %2822 }
 0x115   : > { %v6355_v15 = vsel %vm2840_vm7, %v2821_v4, %v6350_v8 }
 0x116   : > { %5108 = vmatmul.mubr.msk.bf16.gmra.mrb[12].mxu0 %vm312_vm2, %v6273_v37  ;;  %5124 = vmatmul.mubr.msk.bf16.vlgmr.msra.gmra.mrb[0].mxu1 %vm312_vm2, %v6343_v50 }
 0x117   : > { %5321 = vmatprep.mubr.msk.bf16.mxu0 %vm312_vm2, %v6240_v26  ;;  %1454 = vmatprep.mubr.bf16.mxu1 %v5847_v0  ;;  %v1333_v26 = vsel %vm319_vm1, %v1318_v18, 0 }
 0x118   : > { %1519 = vmatpush1.bf16.msra.mxu1 %v1351_v12  ;;  %v6367_v17 = vpop.permute.xlu1 %2828  ;;  %v6373_v19 = vpop.permute.xlu0 %2826  ;;  %v1357_v12 = vsel %vm319_vm1, %v6162_v63, 0 }
 0x119   : > { %5143 = vmatprep.subr.msk.bf16.mxu1 %vm319_vm1, %v1693_v13  ;;  %v1691_v13 = vsel %vm1689_vm6, %v6176_v5, %v6178_v6  ;;  %v1694_v5 = vsel %vm1689_vm6, %v6188_v9, %v6194_v10  ;;  %v2068_v9 = vsel %vm2061_vm9, %v6247_v30, %v6288_v42  ;;  %v6545_v42 = vld [vmem:[%s7493_s1 + $0x58] sm:$0xff]  }
 0x11c   : > { %v6381_v27 = vpop.permute.xlu1 %2832 }
 0x11d   : > { %v6386_v31 = vpop.permute.xlu0 %2830 }
 0x11e   : > { %5322 = vmatmul.mubr.msk.bf16.vlgmr.msra.gmra.mrb[16].mxu0 %vm312_vm2, %v6273_v37  ;;  %5125 = vmatmul.mubr.msk.bf16.gmra.mrb[4].mxu1 %vm312_vm2, %v6378_v25  ;;  %v6395_v52 = vsel %vm2840_vm7, %v6367_v17, %v6386_v31  ;;  %v1711_v37 = vsel %vm319_vm1, %v1692_v61, 0  ;;  %v2064_v61 = vsel %vm2061_vm9, %v6224_v22, %v6261_v34  ;;  %v6527_v34 = vld [vmem:[%s7493_s1 + $0x50] sm:$0xff]  }
 0x11f   : > { %1360 = vmatpush1.bf16.msra.mxu0 %v1333_v26  ;;  %1391 = vmatprep.mubr.bf16.mxu0 %v5847_v0 }
 0x120   : > { %1550 = vmatprep.mubr.bf16.mxu1 %v5847_v0  ;;  %5126 = vmatprep.subr.msk.bf16.mxu0 %vm319_vm1, %v1323_v28  ;;  %v5725_v28 = vld [vmem:[%s7493_s1 + $0x48] sm:$0xff]  }
 0x122   : > { %v6406_v32 = vpop.permute.xlu1 %2836  ;;  %v6408_v33 = vpop.permute.xlu0 %2834 }
 0x126   : > { %5121 = vmatmul.mubr.msk.bf16.vlgmr.msra.gmra.mrb[0].mxu0 %vm312_vm2, %v6343_v50  ;;  %5130 = vmatmul.mubr.msk.bf16.vlgmr.msra.gmra.mrb[8].mxu1 %vm312_vm2, %v6343_v50  ;;  %v3196_v59 = vpop.permute.xlu1 %3195  ;;  %v2839_v20 = vpop.permute.xlu0 %2838 }
 0x127   : > { %1401 = vmatprep.mubr.bf16.mxu0 %v5847_v0  ;;  %1560 = vmatprep.mubr.bf16.mxu1 %v5847_v0  ;;  %v6423_v39 = vsel %vm2840_vm7, %v6406_v32, %v2839_v20 }
 0x128   : > { %1466 = vmatpush1.bf16.msra.mxu0 %v1345_v36  ;;  %1785 = vmatpush1.bf16.msra.mxu1 %v1711_v37  ;;  %v1705_v36 = vsel %vm319_vm1, %v1690_v53, 0  ;;  %v2083_v37 = vsel %vm319_vm1, %v2064_v61, 0 }
 0x129   : > { %5676 = vmatprep.subr.msk.bf16.mxu0 %vm319_vm1, %v6162_v63  ;;  %5149 = vmatprep.subr.msk.bf16.mxu1 %vm319_vm1, %v1697_v58  ;;  %v1695_v58 = vsel %vm1689_vm6, %v6194_v10, %v6196_v11  ;;  %v1717_v11 = vsel %vm319_vm1, %v1694_v5, 0  ;;  %v2095_v10 = vsel %vm319_vm1, %v2068_v9, 0 }
 0x12a   : > { %v6428_v40 = vpop.permute.xlu1 %3199  ;;  %v3198_v44 = vpop.permute.xlu0 %3197 }
 0x12b   : > { %v6431_v45 = vsel %vm3215_vm8, %v3196_v59, %v3198_v44  ;;  %v6435_v47 = vsel %vm3215_vm8, %v3198_v44, %v6428_v40  ;;  %v2063_v59 = vsel %vm2061_vm9, %v6222_v21, %v6224_v22  ;;  %v2473_v22 = vsel %vm2465_vm5, %v6337_v3, %v6322_v57 }
 0x12c   : > { %v2067_v44 = vsel %vm2061_vm9, %v6245_v29, %v6247_v30  ;;  %v2472_v30 = vsel %vm2465_vm5, %v6315_v54, %v6337_v3  ;;  %v2843_v54 = vsel %vm2840_vm7, %v6348_v7, %v6373_v19 }
 0x12d   : > { %v2500_v62 = vsel %vm319_vm1, %v2472_v30, 0  ;;  %v2863_v3 = vsel %vm319_vm1, %v2843_v54, 0 }
 0x12e   : > { %5122 = vmatmul.mubr.msk.bf16.gmra.mrb[4].mxu0 %vm312_vm2, %v6378_v25  ;;  %5131 = vmatmul.mubr.msk.bf16.gmra.mrb[12].mxu1 %vm312_vm2, %v6378_v25  ;;  %v6451_v2 = vpop.permute.xlu1 %3203 }
 0x12f   : > { %1497 = vmatprep.mubr.bf16.mxu0 %v5847_v0  ;;  %1816 = vmatprep.mubr.bf16.mxu1 %v5847_v0  ;;  %v6453_v4 = vpop.permute.xlu0 %3201 }
 0x130   : > { %v3219_v53 = vsel %vm3215_vm8, %v6453_v4, %v6451_v2 }
 0x132   : > { %v6468_v18 = vpop.permute.xlu1 %3207 }
 0x133   : > { %v3206_v26 = vpop.permute.xlu0 %3205 }
 0x134   : > { %v6474_v63 = vsel %vm3215_vm8, %v6451_v2, %v3206_v26  ;;  %v6478_v6 = vsel %vm3215_vm8, %v3206_v26, %v6468_v18  ;;  %v2482_v26 = vsel %vm319_vm1, %v6280_v41, 0  ;;  %v6690_v41 = vld [vmem:[%s7493_s1 + $0x78] sm:$0xff]   ;;  %v2474_v2 = vsel %vm2465_vm5, %v6322_v57, %v6324_v60 }
 0x136   : > { %5127 = vmatmul.mubr.msk.bf16.vlgmr.msra.gmra.mrb[8].mxu0 %vm312_vm2, %v6343_v50  ;;  %5144 = vmatmul.mubr.msk.bf16.vlgmr.msra.gmra.mrb[0].mxu1 %vm312_vm2, %v6446_v49 }
 0x137   : > { %1507 = vmatprep.mubr.bf16.mxu0 %v5847_v0  ;;  %1826 = vmatprep.mubr.bf16.mxu1 %v5847_v0  ;;  %v3210_v61 = vpop.permute.xlu0 %3209 }
 0x138   : > { %5326 = vmatpush3.bf16.msra.mxu0 %v1357_v12  ;;  %1891 = vmatpush1.bf16.msra.mxu1 %v1723_v56  ;;  %v2467_v56 = vsel %vm2465_vm5, %v6275_v38, %v6290_v43  ;;  %v2848_v12 = vsel %vm2840_vm7, %v6408_v33, %v6406_v32  ;;  %v3556_v38 = vld [vmem:[%s7494_s2 + $0x8] sm:$0xff]  ;;  %v3558_v32 = vld [vmem:[%s7494_s2 + $0x18] sm:$0xff] }
 0x139   : > { %5140 = vmatprep.subr.msk.bf16.mxu0 %vm319_vm1, %v1691_v13  ;;  %5163 = vmatprep.subr.msk.bf16.mxu1 %vm319_vm1, %v2065_v23  ;;  %v6667_v13 = vld [vmem:[%s7493_s1 + $0x70] sm:$0xff]   ;;  %v2847_v23 = vsel %vm2840_vm7, %v6381_v27, %v6408_v33  ;;  %v2494_v33 = vsel %vm319_vm1, %v6302_v48, 0  ;;  %v3218_v48 = vsel %vm3215_vm8, %v6428_v40, %v6453_v4  ;;  %v2506_v40 = vsel %vm319_vm1, %v2474_v2, 0 }
 0x13a   : > { %3566 = vperm.xlu0 %5715, %v3556_v38   ;;  %v3238_v57 = vsel %vm319_vm1, %v3218_v48, 0  ;;  %v2842_v4 = vsel %vm2840_vm7, %v6350_v8, %v6348_v7  ;;  %v3222_v7 = vsel %vm3215_vm8, %v6468_v18, %v3210_v61  ;;  %v2857_v18 = vsel %vm319_vm1, %v6355_v15, 0 }
 0x13b   : > { %v3250_v8 = vsel %vm319_vm1, %v3222_v7, 0  ;;  %v2881_v15 = vsel %vm319_vm1, %v6423_v39, 0 }
 0x13e   : > { %5128 = vmatmul.mubr.msk.bf16.gmra.mrb[12].mxu0 %vm312_vm2, %v6378_v25  ;;  %5145 = vmatmul.mubr.msk.bf16.gmra.mrb[4].mxu1 %vm312_vm2, %v5725_v28 }
 0x13f   : > { %5327 = vmatprep.mubr.msk.bf16.mxu0 %vm312_vm2, %v6343_v50  ;;  %1922 = vmatprep.mubr.bf16.mxu1 %v5847_v0  ;;  %v2469_v50 = vsel %vm2465_vm5, %v6313_v51, %v6297_v46 }
 0x146   : > { %5328 = vmatmul.mubr.msk.bf16.vlgmr.msra.gmra.mrb[16].mxu0 %vm312_vm2, %v6378_v25  ;;  %5150 = vmatmul.mubr.msk.bf16.vlgmr.msra.gmra.mrb[8].mxu1 %vm312_vm2, %v6446_v49  ;;  %v1729_v25 = vsel %vm319_vm1, %v6202_v14, 0 }
 0x147   : > { %1732 = vmatpush1.bf16.msra.mxu0 %v1705_v36  ;;  %1763 = vmatprep.mubr.bf16.mxu0 %v5847_v0  ;;  %v5732_v36 = vld [vmem:[%s7493_s1 + $0x80] sm:$0xff]  }
 0x148   : > { %1932 = vmatprep.mubr.bf16.mxu1 %v5847_v0  ;;  %2157 = vmatpush1.bf16.msra.mxu1 %v2083_v37  ;;  %v5733_v37 = vld [vmem:[%s7493_s1 + $0x88] sm:$0xff]  }
 0x149   : > { %5146 = vmatprep.subr.msk.bf16.mxu0 %vm319_vm1, %v1695_v58  ;;  %5169 = vmatprep.subr.msk.bf16.mxu1 %vm319_vm1, %v2069_v1  ;;  %v2846_v58 = vsel %vm2840_vm7, %v6386_v31, %v6381_v27  ;;  %v2869_v1 = vsel %vm319_vm1, %v6395_v52, 0  ;;  %v3232_v27 = vsel %vm319_vm1, %v6431_v45, 0  ;;  %v3214_v31 = vpop.permute.xlu0 %3213  ;;  %v3244_v52 = vsel %vm319_vm1, %v6474_v63, 0 }
 0x14e   : > { %5141 = vmatmul.mubr.msk.bf16.vlgmr.msra.gmra.mrb[0].mxu0 %vm312_vm2, %v6446_v49  ;;  %5151 = vmatmul.mubr.msk.bf16.gmra.mrb[12].mxu1 %vm312_vm2, %v5725_v28 }
 0x14f   : > { %1773 = vmatprep.mubr.bf16.mxu0 %v5847_v0  ;;  %2188 = vmatprep.mubr.bf16.mxu1 %v5847_v0 }
 0x150   : > { %1838 = vmatpush1.bf16.msra.mxu0 %v1717_v11 }
 0x151   : > { %5677 = vmatprep.subr.msk.bf16.mxu0 %vm319_vm1, %v6202_v14  ;;  %v2468_v14 = vsel %vm2465_vm5, %v6290_v43, %v6313_v51  ;;  %v2062_v51 = vsel %vm2061_vm9, %v6218_v16, %v6222_v21  ;;  %v2066_v16 = vsel %vm2061_vm9, %v6232_v24, %v6245_v29  ;;  %v6592_v21 = vld [vmem:[%s7493_s1 + $0x60] sm:$0xff]   ;;  %v2844_v24 = vsel %vm2840_vm7, %v6373_v19, %v6367_v17  ;;  %v6614_v29 = vld [vmem:[%s7493_s1 + $0x68] sm:$0xff]   ;;  %v3557_v43 = vld [vmem:[%s7494_s2 + $0x10] sm:$0xff] }
 0x152   : > { %v2488_v46 = vsel %vm319_vm1, %v2468_v14, 0  ;;  %v2077_v20 = vsel %vm319_vm1, %v2062_v51, 0  ;;  %v2101_v17 = vsel %vm319_vm1, %v6263_v35, 0  ;;  %v3616_v19 = vld [vmem:[%s7496_s4] sm:$0xff] }
 0x153   : > { %3871 = vperm.xlu0 %5715, %v3616_v19  }
 0x156   : > { %5142 = vmatmul.mubr.msk.bf16.gmra.mrb[4].mxu0 %vm312_vm2, %v5725_v28  ;;  %5164 = vmatmul.mubr.msk.bf16.vlgmr.msra.gmra.mrb[0].mxu1 %vm312_vm2, %v6527_v34 }
 0x157   : > { %1869 = vmatprep.mubr.bf16.mxu0 %v5847_v0  ;;  %2198 = vmatprep.mubr.bf16.mxu1 %v5847_v0 }
 0x158   : > { %2263 = vmatpush1.bf16.msra.mxu1 %v2095_v10 }
 0x159   : > { %5183 = vmatprep.subr.msk.bf16.mxu1 %vm319_vm1, %v2469_v50 }
 0x15e   : > { %5147 = vmatmul.mubr.msk.bf16.vlgmr.msra.gmra.mrb[8].mxu0 %vm312_vm2, %v6446_v49  ;;  %5165 = vmatmul.mubr.msk.bf16.gmra.mrb[4].mxu1 %vm312_vm2, %v6545_v42 }
 0x15f   : > { %1879 = vmatprep.mubr.bf16.mxu0 %v5847_v0  ;;  %2294 = vmatprep.mubr.bf16.mxu1 %v5847_v0 }
 0x160   : > { %5332 = vmatpush3.bf16.msra.mxu0 %v1729_v25 }
 0x161   : > { %5160 = vmatprep.subr.msk.bf16.mxu0 %vm319_vm1, %v2063_v59 }
 0x166   : > { %5148 = vmatmul.mubr.msk.bf16.gmra.mrb[12].mxu0 %vm312_vm2, %v5725_v28  ;;  %5170 = vmatmul.mubr.msk.bf16.vlgmr.msra.gmra.mrb[8].mxu1 %vm312_vm2, %v6527_v34 }
 0x167   : > { %5333 = vmatprep.mubr.msk.bf16.mxu0 %vm312_vm2, %v6446_v49  ;;  %2304 = vmatprep.mubr.bf16.mxu1 %v5847_v0  ;;  %v2089_v49 = vsel %vm319_vm1, %v2066_v16, 0 }
 0x168   : > { %2562 = vmatpush1.bf16.msra.mxu1 %v2488_v46 }
 0x169   : > { %5189 = vmatprep.subr.msk.bf16.mxu1 %vm319_vm1, %v2473_v22 }
 0x16e   : > { %5334 = vmatmul.mubr.msk.bf16.vlgmr.msra.gmra.mrb[16].mxu0 %vm312_vm2, %v5725_v28  ;;  %5171 = vmatmul.mubr.msk.bf16.gmra.mrb[12].mxu1 %vm312_vm2, %v6545_v42  ;;  %v2875_v28 = vsel %vm319_vm1, %v2847_v23, 0 }
 0x16f   : > { %2104 = vmatpush1.bf16.msra.mxu0 %v2077_v20  ;;  %2135 = vmatprep.mubr.bf16.mxu0 %v5847_v0 }
 0x170   : > { %2593 = vmatprep.mubr.bf16.mxu1 %v5847_v0  ;;  %5166 = vmatprep.subr.msk.bf16.mxu0 %vm319_vm1, %v2067_v44 }
 0x176   : > { %5161 = vmatmul.mubr.msk.bf16.vlgmr.msra.gmra.mrb[0].mxu0 %vm312_vm2, %v6527_v34  ;;  %5184 = vmatmul.mubr.msk.bf16.vlgmr.msra.gmra.mrb[0].mxu1 %vm312_vm2, %v6592_v21 }
 0x177   : > { %2145 = vmatprep.mubr.bf16.mxu0 %v5847_v0  ;;  %2603 = vmatprep.mubr.bf16.mxu1 %v5847_v0 }
 0x178   : > { %2210 = vmatpush1.bf16.msra.mxu0 %v2089_v49  ;;  %2668 = vmatpush1.bf16.msra.mxu1 %v2500_v62 }
 0x179   : > { %5678 = vmatprep.subr.msk.bf16.mxu0 %vm319_vm1, %v6263_v35  ;;  %5203 = vmatprep.subr.msk.bf16.mxu1 %vm319_vm1, %v2844_v24  ;;  %v3555_v35 = vld [vmem:[%s7494_s2] sm:$0xff] }
 0x17a   : > { %3561 = vperm.xlu1 %5714, %v3555_v35  }
 0x17e   : > { %5162 = vmatmul.mubr.msk.bf16.gmra.mrb[4].mxu0 %vm312_vm2, %v6545_v42  ;;  %5185 = vmatmul.mubr.msk.bf16.gmra.mrb[4].mxu1 %vm312_vm2, %v6614_v29 }
 0x17f   : > { %2241 = vmatprep.mubr.bf16.mxu0 %v5847_v0  ;;  %2699 = vmatprep.mubr.bf16.mxu1 %v5847_v0 }
 0x180   : > { %3571 = vperm.xlu1 %5714, %v3557_v43  }
 0x184   : > { %3576 = vperm.xlu1 %5714, %v3558_v32  }
 0x186   : > { %5167 = vmatmul.mubr.msk.bf16.vlgmr.msra.gmra.mrb[8].mxu0 %vm312_vm2, %v6527_v34  ;;  %5190 = vmatmul.mubr.msk.bf16.vlgmr.msra.gmra.mrb[8].mxu1 %vm312_vm2, %v6592_v21 }
 0x187   : > { %2251 = vmatprep.mubr.bf16.mxu0 %v5847_v0  ;;  %2709 = vmatprep.mubr.bf16.mxu1 %v5847_v0 }
 0x188   : > { %5338 = vmatpush3.bf16.msra.mxu0 %v2101_v17  ;;  %2937 = vmatpush1.bf16.msra.mxu1 %v2863_v3 }
 0x189   : > { %5180 = vmatprep.subr.msk.bf16.mxu0 %vm319_vm1, %v2467_v56  ;;  %5209 = vmatprep.subr.msk.bf16.mxu1 %vm319_vm1, %v2848_v12 }
 0x18e   : > { %5168 = vmatmul.mubr.msk.bf16.gmra.mrb[12].mxu0 %vm312_vm2, %v6545_v42  ;;  %5191 = vmatmul.mubr.msk.bf16.gmra.mrb[12].mxu1 %vm312_vm2, %v6614_v29 }
 0x18f   : > { %5339 = vmatprep.mubr.msk.bf16.mxu0 %vm312_vm2, %v6527_v34  ;;  %2968 = vmatprep.mubr.bf16.mxu1 %v5847_v0 }
 0x196   : > { %5340 = vmatmul.mubr.msk.bf16.vlgmr.msra.gmra.mrb[16].mxu0 %vm312_vm2, %v6545_v42  ;;  %5204 = vmatmul.mubr.msk.bf16.vlgmr.msra.gmra.mrb[0].mxu1 %vm312_vm2, %v6667_v13 }
 0x197   : > { %2509 = vmatpush1.bf16.msra.mxu0 %v2482_v26  ;;  %2540 = vmatprep.mubr.bf16.mxu0 %v5847_v0  ;;  %v6854_v26 = vld [vmem:[#allocation2] sm:$0xf] }
 0x198   : > { %2978 = vmatprep.mubr.bf16.mxu1 %v5847_v0  ;;  %3043 = vmatpush1.bf16.msra.mxu1 %v2875_v28 }
 0x199   : > { %5186 = vmatprep.subr.msk.bf16.mxu0 %vm319_vm1, %v6320_v55  ;;  %5223 = vmatprep.subr.msk.bf16.mxu1 %vm319_vm1, %v3219_v53  ;;  %v3212_v55 = vpop.permute.xlu1 %3211 }
 0x19a   : > { %v3223_v60 = vsel %vm3215_vm8, %v3210_v61, %v3212_v55 }
 0x19e   : > { %5181 = vmatmul.mubr.msk.bf16.vlgmr.msra.gmra.mrb[0].mxu0 %vm312_vm2, %v6592_v21  ;;  %5205 = vmatmul.mubr.msk.bf16.gmra.mrb[4].mxu1 %vm312_vm2, %v6690_v41 }
 0x19f   : > { %2550 = vmatprep.mubr.bf16.mxu0 %v5847_v0  ;;  %3074 = vmatprep.mubr.bf16.mxu1 %v5847_v0 }
 0x1a0   : > { %2615 = vmatpush1.bf16.msra.mxu0 %v2494_v33 }
 0x1a1   : > { %5679 = vmatprep.subr.msk.bf16.mxu0 %vm319_vm1, %v2474_v2 }
 0x1a6   : > { %5182 = vmatmul.mubr.msk.bf16.gmra.mrb[4].mxu0 %vm312_vm2, %v6614_v29  ;;  %5210 = vmatmul.mubr.msk.bf16.vlgmr.msra.gmra.mrb[8].mxu1 %vm312_vm2, %v6667_v13 }
 0x1a7   : > { %2646 = vmatprep.mubr.bf16.mxu0 %v5847_v0  ;;  %3084 = vmatprep.mubr.bf16.mxu1 %v5847_v0 }
 0x1a8   : > { %3312 = vmatpush1.bf16.msra.mxu1 %v3238_v57 }
 0x1a9   : > { %5229 = vmatprep.subr.msk.bf16.mxu1 %vm319_vm1, %v3223_v60 }
 0x1ae   : > { %5187 = vmatmul.mubr.msk.bf16.vlgmr.msra.gmra.mrb[8].mxu0 %vm312_vm2, %v6592_v21  ;;  %5211 = vmatmul.mubr.msk.bf16.gmra.mrb[12].mxu1 %vm312_vm2, %v6690_v41 }
 0x1af   : > { %2656 = vmatprep.mubr.bf16.mxu0 %v5847_v0  ;;  %3343 = vmatprep.mubr.bf16.mxu1 %v5847_v0 }
 0x1b0   : > { %5344 = vmatpush3.bf16.msra.mxu0 %v2506_v40 }
 0x1b1   : > { %5200 = vmatprep.subr.msk.bf16.mxu0 %vm319_vm1, %v2842_v4 }
 0x1b6   : > { %5188 = vmatmul.mubr.msk.bf16.gmra.mrb[12].mxu0 %vm312_vm2, %v6614_v29  ;;  %5224 = vmatmul.mubr.msk.bf16.vlgmr.msra.gmra.mrb[0].mxu1 %vm312_vm2, %v5732_v36 }
 0x1b7   : > { %5345 = vmatprep.mubr.msk.bf16.mxu0 %vm312_vm2, %v6592_v21  ;;  %3353 = vmatprep.mubr.bf16.mxu1 %v5847_v0 }
 0x1b8   : > { %3418 = vmatpush1.bf16.msra.mxu1 %v3250_v8 }
 0x1be   : > { %5346 = vmatmul.mubr.msk.bf16.vlgmr.msra.gmra.mrb[16].mxu0 %vm312_vm2, %v6614_v29  ;;  %5225 = vmatmul.mubr.msk.bf16.gmra.mrb[4].mxu1 %vm312_vm2, %v5733_v37 }
 0x1bf   : > { %2884 = vmatpush1.bf16.msra.mxu0 %v2857_v18  ;;  %2915 = vmatprep.mubr.bf16.mxu0 %v5847_v0 }
 0x1c0   : > { %3449 = vmatprep.mubr.bf16.mxu1 %v5847_v0  ;;  %5206 = vmatprep.subr.msk.bf16.mxu0 %vm319_vm1, %v2846_v58 }
 0x1c6   : > { %5201 = vmatmul.mubr.msk.bf16.vlgmr.msra.gmra.mrb[0].mxu0 %vm312_vm2, %v6667_v13  ;;  %5230 = vmatmul.mubr.msk.bf16.vlgmr.msra.gmra.mrb[8].mxu1 %vm312_vm2, %v5732_v36 }
 0x1c7   : > { %2925 = vmatprep.mubr.bf16.mxu0 %v5847_v0  ;;  %3459 = vmatprep.mubr.bf16.mxu1 %v5847_v0 }
 0x1c8   : > { %2990 = vmatpush1.bf16.msra.mxu0 %v2869_v1 }
 0x1c9   : > { %5680 = vmatprep.subr.msk.bf16.mxu0 %vm319_vm1, %v6423_v39  ;;  %v3224_v39 = vsel %vm3215_vm8, %v3212_v55, %v3214_v31 }
 0x1ca   : > { %v3256_v45 = vsel %vm319_vm1, %v3224_v39, 0 }
 0x1ce   : > { %5202 = vmatmul.mubr.msk.bf16.gmra.mrb[4].mxu0 %vm312_vm2, %v6690_v41  ;;  %5231 = vmatmul.mubr.msk.bf16.gmra.mrb[12].mxu1 %vm312_vm2, %v5733_v37 }
 0x1cf   : > { %3021 = vmatprep.mubr.bf16.mxu0 %v5847_v0  ;;  %3697 = vmatprep.mubr.bf16.mxu1 %v5847_v0 }
 0x1d6   : > { %5207 = vmatmul.mubr.msk.bf16.vlgmr.msra.gmra.mrb[8].mxu0 %vm312_vm2, %v6667_v13 }
 0x1d7   : > { %3031 = vmatprep.mubr.bf16.mxu0 %v5847_v0  ;;  %5350 = vmatpush3.bf16.msra.mxu0 %v2881_v15 }
 0x1d8   : > { %5220 = vmatprep.subr.msk.bf16.mxu0 %vm319_vm1, %v6435_v47  ;;  %v5856_v47 = vmov 0.0  }
 0x1de   : > { %5208 = vmatmul.mubr.msk.bf16.gmra.mrb[12].mxu0 %vm312_vm2, %v6690_v41 }
 0x1df   : > { %5351 = vmatprep.mubr.msk.bf16.mxu0 %vm312_vm2, %v6667_v13 }
 0x1e6   : > { %5352 = vmatmul.mubr.msk.bf16.vlgmr.msra.gmra.mrb[16].mxu0 %vm312_vm2, %v6690_v41 }
 0x1e7   : > { %3259 = vmatpush1.bf16.msra.mxu0 %v3232_v27  ;;  %3290 = vmatprep.mubr.bf16.mxu0 %v5847_v0 }
 0x1e8   : > { %5226 = vmatprep.subr.msk.bf16.mxu0 %vm319_vm1, %v6478_v6 }
 0x1ee   : > { %5221 = vmatmul.mubr.msk.bf16.vlgmr.msra.gmra.mrb[0].mxu0 %vm312_vm2, %v5732_v36 }
 0x1ef   : > { %3365 = vmatpush1.bf16.msra.mxu0 %v3244_v52  ;;  %3300 = vmatprep.mubr.bf16.mxu0 %v5847_v0 }
 0x1f0   : > { %5681 = vmatprep.subr.msk.bf16.mxu0 %vm319_vm1, %v3224_v39 }
 0x1f6   : > { %5222 = vmatmul.mubr.msk.bf16.gmra.mrb[4].mxu0 %vm312_vm2, %v5733_v37 }
 0x1f7   : > { %3396 = vmatprep.mubr.bf16.mxu0 %v5847_v0 }
 0x1f9   : > { %v6826_v44 = vpop.permute.xlu1 %3561 }
 0x1fe   : > { %5227 = vmatmul.mubr.msk.bf16.vlgmr.msra.gmra.mrb[8].mxu0 %vm312_vm2, %v5732_v36 }
 0x1ff   : > { %5356 = vmatpush3.bf16.msra.mxu0 %v3256_v45  ;;  %3406 = vmatprep.mubr.bf16.mxu0 %v5847_v0 }
 0x200   : > { %5367 = vmatprep.subr.bf16.mxu0 %v5856_v47 }
 0x206   : > { %5228 = vmatmul.mubr.msk.bf16.gmra.mrb[12].mxu0 %vm312_vm2, %v5733_v37 }
 0x207   : > { %5357 = vmatprep.mubr.msk.bf16.mxu0 %vm312_vm2, %v5732_v36 }
 0x20e   : > { %5358 = vmatmul.mubr.msk.bf16.vlgmr.msra.gmra.mrb[16].mxu0 %vm312_vm2, %v5733_v37 }
 0x20f   : > { %5369 = vmatprep.mubr.msk.bf16.mxu0 %vm5857_vm10, %v5856_v47 }
 0x289   : > { %v3345_v63 = vpop.f32.mrb[0].mxu1 }
 0x28a   : > { %v3347_v6 = vpop.f32.mrb[1].mxu1  ;;  %v6829_v16 = vadd.f32 %v6826_v44, %v3345_v63  ;;  %v6906_v63 = vpop.permute.xlu0 %3566 }
 0x28b   : > { %v6802_v5 = vpop.f32.mrb[2].mxu1  ;;  %v6832_v21 = vadd.f32 %v6826_v44, %v3347_v6  ;;  %v6908_v6 = vpop.permute.xlu1 %3571 }
 0x28c   : > { %v6804_v11 = vpop.f32.mrb[3].mxu1  ;;  %v3619_v17 = vmul.f32 %v6829_v16, %v6829_v16 }
 0x28d   : > { %v3620_v56 = vmul.f32 %v6832_v21, %v6832_v21 }
 0x28e   : > { %v3628_v19 = vpack.c.bf16 %v3619_v17, %v3619_v17 }
 0x28f   : > { %v3629_v32 = vpack.c.bf16 %v3620_v56, %v3620_v56 }
 0x290   : > { %v3645_v41 = vsel %vm319_vm1, %v3628_v19, 0 }
 0x291   : > { %v6806_v34 = vpop.f32.mrb[4].mxu1 }
 0x292   : > { %v6808_v9 = vpop.f32.mrb[5].mxu1 }
 0x293   : > { %v6810_v10 = vpop.f32.mrb[6].mxu1  ;;  %v6924_v17 = vadd.f32 %v6908_v6, %v6808_v9 }
 0x294   : > { %v6812_v50 = vpop.f32.mrb[7].mxu1 }
 0x299   : > { %v3451_v42 = vpop.f32.mrb[8].mxu1 }
 0x29a   : > { %v3453_v25 = vpop.f32.mrb[9].mxu1  ;;  %v6866_v33 = vadd.f32 %v6826_v44, %v3451_v42 }
 0x29b   : > { %v6814_v59 = vpop.f32.mrb[10].mxu1  ;;  %v6869_v2 = vadd.f32 %v6826_v44, %v3453_v25 }
 0x29c   : > { %v6816_v14 = vpop.f32.mrb[11].mxu1  ;;  %v3623_v36 = vmul.f32 %v6866_v33, %v6866_v33 }
 0x29d   : > { %v3624_v7 = vmul.f32 %v6869_v2, %v6869_v2 }
 0x29e   : > { %v3632_v1 = vpack.c.bf16 %v3623_v36, %v3623_v36 }
 0x29f   : > { %v3633_v15 = vpack.c.bf16 %v3624_v7, %v3624_v7 }
 0x2a0   : > { %v3657_v45 = vsel %vm319_vm1, %v3632_v1, 0 }
 0x2a1   : > { %v6818_v46 = vpop.f32.mrb[12].mxu1 }
 0x2a2   : > { %v6820_v22 = vpop.f32.mrb[13].mxu1 }
 0x2a3   : > { %v6822_v51 = vpop.f32.mrb[14].mxu1 }
 0x2a4   : > { %v6824_v20 = vpop.f32.mrb[15].mxu1 }
 0x2c1   : > { %v3292_v30 = vpop.f32.mrb[0].mxu0 }
 0x2c2   : > { %v6835_v49 = vadd.f32 %v6826_v44, %v3292_v30  ;;  %v3294_v62 = vpop.f32.mrb[1].mxu0 }
 0x2c3   : > { %v6838_v24 = vadd.f32 %v6826_v44, %v3294_v62  ;;  %v3296_v29 = vpop.f32.mrb[2].mxu0  ;;  %v6920_v62 = vadd.f32 %v6908_v6, %v6806_v34 }
 0x2c4   : > { %v3617_v54 = vmul.f32 %v6835_v49, %v6835_v49  ;;  %v3298_v3 = vpop.f32.mrb[3].mxu0  ;;  %v6911_v42 = vadd.f32 %v6906_v63, %v3296_v29  ;;  %v6933_v29 = vadd.f32 %v6906_v63, %v6804_v11 }
 0x2c5   : > { %v3618_v12 = vmul.f32 %v6838_v24, %v6838_v24  ;;  %v6914_v25 = vadd.f32 %v6906_v63, %v3298_v3  ;;  %v4306_v11 = vmul.f32 %v6920_v62, %v6920_v62 }
 0x2c6   : > { %v3626_v35 = vpack.c.bf16 %v3617_v54, %v3617_v54 }
 0x2c7   : > { %v3627_v38 = vpack.c.bf16 %v3618_v12, %v3618_v12  ;;  %v3966_v34 = vmul.f32 %v6914_v25, %v6914_v25 }
 0x2c8   : > { %v3639_v43 = vsel %vm319_vm1, %v3626_v35, 0  ;;  %v3965_v35 = vmul.f32 %v6911_v42, %v6911_v42 }
 0x2c9   : > { %v6849_v13 = vpop.f32.mrb[4].mxu0  ;;  %5234 = vmatprep.subr.msk.bf16.mxu1 %vm319_vm1, %v3627_v38 }
 0x2ca   : > { %v6852_v23 = vpop.f32.mrb[5].mxu0  ;;  %3666 = vmatpush1.bf16.msra.mxu1 %v3639_v43  ;;  %v6954_v43 = vadd.f32 %v6908_v6, %v6820_v22 }
 0x2cb   : > { %v6856_v28 = vpop.f32.mrb[6].mxu0  ;;  %5236 = vmatprep.subr.msk.bf16.mxu1 %vm319_vm1, %v3629_v32 }
 0x2cc   : > { %v6859_v53 = vpop.f32.mrb[7].mxu0 }
 0x2cd   : > { %5235 = vmatmul.mubr.msk.bf16.vlgmr.msra.gmra.mrb[16].mxu1 %vm312_vm2, %v6854_v26 }
 0x2ce   : > { %3707 = vmatpush1.bf16.msra.mxu1 %v3645_v41  ;;  %3738 = vmatprep.mubr.bf16.mxu1 %v5847_v0  ;;  %v3968_v41 = vmul.f32 %v6933_v29, %v6933_v29 }
 0x2d1   : > { %v3398_v48 = vpop.f32.mrb[8].mxu0 }
 0x2d2   : > { %v6872_v55 = vadd.f32 %v6826_v44, %v3398_v48  ;;  %v3400_v61 = vpop.f32.mrb[9].mxu0  ;;  %v6962_v48 = vadd.f32 %v6906_v63, %v6802_v5 }
 0x2d3   : > { %v6875_v57 = vadd.f32 %v6826_v44, %v3400_v61  ;;  %v6877_v60 = vpop.f32.mrb[10].mxu0  ;;  %v3974_v61 = vpack.c.bf16 %v3965_v35, %v3965_v35 }
 0x2d4   : > { %v3621_v40 = vmul.f32 %v6872_v55, %v6872_v55  ;;  %v3404_v4 = vpop.f32.mrb[11].mxu0 }
 0x2d5   : > { %v3622_v8 = vmul.f32 %v6875_v57, %v6875_v57  ;;  %5237 = vmatmul.mubr.msk.bf16.vlgmr.msra.gmra.mrb[20].mxu1 %vm312_vm2, %v6854_v26  ;;  %v6974_v1 = vadd.f32 %v6906_v63, %v3404_v4 }
 0x2d6   : > { %v3630_v37 = vpack.c.bf16 %v3621_v40, %v3621_v40  ;;  %3779 = vmatprep.mubr.bf16.mxu1 %v5847_v0  ;;  %v3975_v40 = vpack.c.bf16 %v3966_v34, %v3966_v34  ;;  %v6998_v34 = vadd.f32 %v6906_v63, %v6877_v60 }
 0x2d7   : > { %v3631_v18 = vpack.c.bf16 %v3622_v8, %v3622_v8  ;;  %v4315_v8 = vpack.c.bf16 %v4306_v11, %v4306_v11 }
 0x2d8   : > { %v3651_v58 = vsel %vm319_vm1, %v3630_v37, 0  ;;  %v6967_v37 = vadd.f32 %v6908_v6, %v6818_v46  ;;  %v3984_v46 = vsel %vm319_vm1, %v3974_v61, 0  ;;  %v3969_v60 = vmul.f32 %v6998_v34, %v6998_v34 }
 0x2d9   : > { %v6891_v27 = vpop.f32.mrb[12].mxu0  ;;  %5238 = vmatprep.subr.msk.bf16.mxu1 %vm319_vm1, %v3631_v18  ;;  %v4311_v18 = vmul.f32 %v6954_v43, %v6954_v43  ;;  %v4329_v35 = vsel %vm319_vm1, %v4315_v8, 0 }
 0x2da   : > { %v6894_v31 = vpop.f32.mrb[13].mxu0  ;;  %3748 = vmatpush1.bf16.msra.mxu1 %v3651_v58  ;;  %v3977_v58 = vpack.c.bf16 %v3968_v41, %v3968_v41 }
 0x2db   : > { %v6896_v52 = vpop.f32.mrb[14].mxu0  ;;  %5240 = vmatprep.subr.msk.bf16.mxu1 %vm319_vm1, %v3633_v15  ;;  %v3967_v15 = vmul.f32 %v6962_v48, %v6962_v48  ;;  %v4320_v4 = vpack.c.bf16 %v4311_v18, %v4311_v18 }
 0x2dc   : > { %v6899_v39 = vpop.f32.mrb[15].mxu0 }
 0x2dd   : > { %5239 = vmatmul.mubr.msk.bf16.vlgmr.msra.gmra.mrb[24].mxu1 %vm312_vm2, %v6854_v26 }
 0x2de   : > { %3789 = vmatpush1.bf16.msra.mxu1 %v3657_v45  ;;  %3820 = vmatprep.mubr.bf16.mxu1 %v5847_v0  ;;  %v6982_v45 = vpop.permute.xlu1 %3576 }
 0x2df   : > { %5361 = vmatprep.subr.bf16.mxu1 %v5856_v47  ;;  %v7039_v18 = vadd.f32 %v6982_v45, %v6896_v52 }
 0x2e1   : > { %v6916_v30 = vpop.f32.mrb[16].mxu0  ;;  %v4647_v52 = vmul.f32 %v7039_v18, %v7039_v18 }
 0x2e2   : > { %v3504_v54 = vpop.f32.mrb[17].mxu0 }
 0x2e3   : > { %v6927_v56 = vadd.f32 %v6826_v44, %v3504_v54  ;;  %v6929_v12 = vpop.f32.mrb[18].mxu0  ;;  %v4307_v44 = vmul.f32 %v6924_v17, %v6924_v17  ;;  %v4310_v54 = vmul.f32 %v6967_v37, %v6967_v37 }
 0x2e4   : > { %v3507_v3 = vpop.f32.mrb[19].mxu0 }
 0x2e5   : > { %v3625_v9 = vmul.f32 %v6927_v56, %v6927_v56  ;;  %v6942_v38 = vadd.f32 %v6906_v63, %v3507_v3  ;;  %5241 = vmatmul.mubr.msk.bf16.vlgmr.msra.gmra.mrb[28].mxu1 %vm312_vm2, %v6854_v26  ;;  %v4316_v22 = vpack.c.bf16 %v4307_v44, %v4307_v44  ;;  %v6989_v3 = vadd.f32 %v6982_v45, %v6859_v53 }
 0x2e6   : > { %5363 = vmatprep.mubr.msk.bf16.mxu1 %vm5857_vm10, %v5856_v47  ;;  %v3976_v53 = vpack.c.bf16 %v3967_v15, %v3967_v15  ;;  %v4319_v11 = vpack.c.bf16 %v4310_v54, %v4310_v54  ;;  %v7005_v44 = vadd.f32 %v6982_v45, %v6856_v28 }
 0x2e7   : > { %v3634_v19 = vpack.c.bf16 %v3625_v9, %v3625_v9  ;;  %v3973_v32 = vmul.f32 %v6942_v38, %v6942_v38  ;;  %v3970_v9 = vmul.f32 %v6974_v1, %v6974_v1 }
 0x2e8   : > { %v3990_v61 = vsel %vm319_vm1, %v3976_v53, 0  ;;  %v4643_v28 = vmul.f32 %v7005_v44, %v7005_v44  ;;  %v7069_v53 = vadd.f32 %v6929_v12, %v6982_v45 }
 0x2e9   : > { %v3982_v36 = vpack.c.bf16 %v3973_v32, %v3973_v32  ;;  %v3663_v7 = vsel %vm319_vm1, %v3634_v19, 0  ;;  %v4644_v19 = vmul.f32 %v6989_v3, %v6989_v3  ;;  %v7011_v32 = vadd.f32 %v6906_v63, %v6816_v14 }
 0x2ea   : > { %5362 = vmatpush3.bf16.msra.mxu1 %v3663_v7  ;;  %v3979_v41 = vpack.c.bf16 %v3970_v9, %v3970_v9  ;;  %v7023_v14 = vadd.f32 %v6982_v45, %v6899_v39  ;;  %v7032_v7 = vadd.f32 %v6906_v63, %v6814_v59  ;;  %v4652_v39 = vpack.c.bf16 %v4643_v28, %v4643_v28 }
 0x2eb   : > { %5243 = vmatprep.subr.msk.bf16.mxu1 %vm319_vm1, %v3975_v40  ;;  %v4008_v5 = vsel %vm319_vm1, %v3982_v36, 0  ;;  %v4653_v40 = vpack.c.bf16 %v4644_v19, %v4644_v19  ;;  %v4341_v36 = vsel %vm319_vm1, %v4319_v11, 0  ;;  %v3972_v8 = vmul.f32 %v7011_v32, %v7011_v32 }
 0x2ec   : > { %5368 = vmatpush3.bf16.msra.mxu0 %v4008_v5  ;;  %v4648_v5 = vmul.f32 %v7023_v14, %v7023_v14  ;;  %v7047_v59 = vadd.f32 %v6908_v6, %v6852_v23  ;;  %v4662_v23 = vsel %vm319_vm1, %v4652_v39, 0  ;;  %v4656_v9 = vpack.c.bf16 %v4647_v52, %v4647_v52 }
 0x2ed   : > { %5364 = vmatmul.mubr.msk.bf16.vlgmr.msra.gmra.mrb[32].mxu1 %vm312_vm2, %v6854_v26  ;;  %5254 = vmatprep.subr.msk.bf16.mxu0 %vm319_vm1, %v4316_v22  ;;  %v3978_v22 = vpack.c.bf16 %v3969_v60, %v3969_v60  ;;  %v7075_v60 = vadd.f32 %v6908_v6, %v6894_v31  ;;  %v4651_v12 = vmul.f32 %v7069_v53, %v7069_v53 }
 0x2ee   : > { %4011 = vmatpush1.bf16.msra.mxu1 %v3984_v46  ;;  %4042 = vmatprep.mubr.bf16.mxu1 %v5847_v0  ;;  %v3981_v46 = vpack.c.bf16 %v3972_v8, %v3972_v8  ;;  %v4657_v15 = vpack.c.bf16 %v4648_v5, %v4648_v5  ;;  %v7109_v5 = vadd.f32 %v6916_v30, %v6908_v6 }
 0x2ef   : > { %5245 = vmatprep.subr.msk.bf16.mxu1 %vm319_vm1, %v3977_v58  ;;  %5370 = vmatmul.mubr.msk.bf16.vlgmr.msra.gmra.mrb[20].mxu0 %vm312_vm2, %v6854_v26  ;;  %v3971_v58 = vmul.f32 %v7032_v7, %v7032_v7  ;;  %v3996_v63 = vsel %vm319_vm1, %v3978_v22, 0  ;;  %v4309_v28 = vmul.f32 %v7075_v60, %v7075_v60 }
 0x2f0   : > { %4391 = vmatpush1.bf16.msra.mxu0 %v4329_v35  ;;  %4422 = vmatprep.mubr.bf16.mxu0 %v5847_v0  ;;  %v4305_v35 = vmul.f32 %v7047_v59, %v7047_v59 }
 0x2f1   : > { %5258 = vmatprep.subr.msk.bf16.mxu0 %vm319_vm1, %v4320_v4  ;;  %v3980_v54 = vpack.c.bf16 %v3971_v58, %v3971_v58  ;;  %v7062_v4 = vadd.f32 %v6908_v6, %v6849_v13  ;;  %v4318_v8 = vpack.c.bf16 %v4309_v28, %v4309_v28  ;;  %v7113_v58 = vadd.f32 %v6982_v45, %v6812_v50 }
 0x2f2   : > { %v4314_v19 = vpack.c.bf16 %v4305_v35, %v4305_v35  ;;  %v7126_v50 = vadd.f32 %v6982_v45, %v6810_v10  ;;  %v7144_v35 = vadd.f32 %v6982_v45, %v6822_v51 }
 0x2f3   : > { %v4304_v11 = vmul.f32 %v7062_v4, %v7062_v4  ;;  %v4002_v13 = vsel %vm319_vm1, %v3980_v54, 0 }
 0x2f4   : > { %v4645_v52 = vmul.f32 %v7126_v50, %v7126_v50 }
 0x2f5   : > { %5244 = vmatmul.mubr.msk.bf16.vlgmr.msra.gmra.mrb[36].mxu1 %vm312_vm2, %v6854_v26  ;;  %v4313_v31 = vpack.c.bf16 %v4304_v11, %v4304_v11 }
 0x2f6   : > { %4052 = vmatpush1.bf16.msra.mxu1 %v3990_v61  ;;  %4083 = vmatprep.mubr.bf16.mxu1 %v5847_v0  ;;  %v7090_v61 = vadd.f32 %v6908_v6, %v6891_v27  ;;  %v4646_v6 = vmul.f32 %v7113_v58, %v7113_v58  ;;  %v4654_v10 = vpack.c.bf16 %v4645_v52, %v4645_v52 }
 0x2f7   : > { %5247 = vmatprep.subr.msk.bf16.mxu1 %vm319_vm1, %v3979_v41  ;;  %5255 = vmatmul.mubr.msk.bf16.vlgmr.msra.gmra.mrb[24].mxu0 %vm312_vm2, %v6854_v26  ;;  %v4674_v41 = vsel %vm319_vm1, %v4656_v9, 0  ;;  %v4323_v22 = vsel %vm319_vm1, %v4313_v31, 0  ;;  %v4649_v9 = vmul.f32 %v7144_v35, %v7144_v35 }
 0x2f8   : > { %4473 = vmatpush1.bf16.msra.mxu0 %v4341_v36  ;;  %4504 = vmatprep.mubr.bf16.mxu0 %v5847_v0  ;;  %v4308_v36 = vmul.f32 %v7090_v61, %v7090_v61 }
 0x2f9   : > { %5261 = vmatprep.subr.msk.bf16.mxu0 %vm319_vm1, %v4653_v40  ;;  %v4660_v40 = vpack.c.bf16 %v4651_v12, %v4651_v12 }
 0x2fa   : > { %v4317_v39 = vpack.c.bf16 %v4308_v36, %v4308_v36 }
 0x2fb   : > { %v4686_v27 = vsel %vm319_vm1, %v4660_v40, 0 }
 0x2fd   : > { %5246 = vmatmul.mubr.msk.bf16.vlgmr.msra.gmra.mrb[40].mxu1 %vm312_vm2, %v6854_v26 }
 0x2fe   : > { %4093 = vmatpush1.bf16.msra.mxu1 %v3996_v63  ;;  %4124 = vmatprep.mubr.bf16.mxu1 %v5847_v0  ;;  %v4335_v63 = vsel %vm319_vm1, %v4317_v39, 0 }
 0x2ff   : > { %5249 = vmatprep.subr.msk.bf16.mxu1 %vm319_vm1, %v3981_v46  ;;  %5259 = vmatmul.mubr.msk.bf16.vlgmr.msra.gmra.mrb[28].mxu0 %vm312_vm2, %v6854_v26  ;;  %v4312_v46 = vmul.f32 %v7109_v5, %v7109_v5 }
 0x300   : > { %4689 = vmatpush1.bf16.msra.mxu0 %v4662_v23  ;;  %4720 = vmatprep.mubr.bf16.mxu0 %v5847_v0  ;;  %v7134_v23 = vadd.f32 %v6982_v45, %v6824_v20  ;;  %v7161_v45 = vpop.permute.xlu0 %3871 }
 0x301   : > { %5265 = vmatprep.subr.msk.bf16.mxu0 %vm319_vm1, %v4657_v15  ;;  %v4321_v30 = vpack.c.bf16 %v4312_v46, %v4312_v46  ;;  %v4655_v15 = vpack.c.bf16 %v4646_v6, %v4646_v6 }
 0x302   : > { %v4650_v20 = vmul.f32 %v7134_v23, %v7134_v23 }
 0x303   : > { %v4347_v54 = vsel %vm319_vm1, %v4321_v30, 0 }
 0x304   : > { %v4659_v11 = vpack.c.bf16 %v4650_v20, %v4650_v20 }
 0x305   : > { %5248 = vmatmul.mubr.msk.bf16.vlgmr.msra.gmra.mrb[44].mxu1 %vm312_vm2, %v6854_v26 }
 0x306   : > { %4134 = vmatpush1.bf16.msra.mxu1 %v4002_v13  ;;  %4165 = vmatprep.mubr.bf16.mxu1 %v5847_v0 }
 0x307   : > { %5252 = vmatprep.subr.msk.bf16.mxu1 %vm319_vm1, %v4314_v19  ;;  %5262 = vmatmul.mubr.msk.bf16.vlgmr.msra.gmra.mrb[32].mxu0 %vm312_vm2, %v6854_v26  ;;  %v4668_v19 = vsel %vm319_vm1, %v4654_v10, 0 }
 0x308   : > { %4771 = vmatpush1.bf16.msra.mxu0 %v4674_v41  ;;  %4802 = vmatprep.mubr.bf16.mxu0 %v5847_v0 }
 0x309   : > { %5379 = vmatprep.subr.bf16.mxu0 %v5856_v47 }
 0x30d   : > { %5250 = vmatmul.mubr.msk.bf16.vlgmr.msra.gmra.mrb[48].mxu1 %vm312_vm2, %v6854_v26 }
 0x30e   : > { %4350 = vmatpush1.bf16.msra.mxu1 %v4323_v22  ;;  %4381 = vmatprep.mubr.bf16.mxu1 %v5847_v0 }
 0x30f   : > { %5256 = vmatprep.subr.msk.bf16.mxu1 %vm319_vm1, %v4318_v8  ;;  %5266 = vmatmul.mubr.msk.bf16.vlgmr.msra.gmra.mrb[36].mxu0 %vm312_vm2, %v6854_v26 }
 0x310   : > { %5380 = vmatpush3.bf16.msra.mxu0 %v4686_v27  ;;  %5381 = vmatprep.mubr.msk.bf16.mxu0 %vm5857_vm10, %v5856_v47 }
 0x315   : > { %5253 = vmatmul.mubr.msk.bf16.vlgmr.msra.gmra.mrb[52].mxu1 %vm312_vm2, %v6854_v26 }
 0x316   : > { %4432 = vmatpush1.bf16.msra.mxu1 %v4335_v63  ;;  %4463 = vmatprep.mubr.bf16.mxu1 %v5847_v0 }
 0x317   : > { %5382 = vmatmul.mubr.msk.bf16.vlgmr.msra.gmra.mrb[40].mxu0 %vm312_vm2, %v6854_v26  ;;  %5373 = vmatprep.subr.bf16.mxu1 %v5856_v47 }
 0x31d   : > { %5257 = vmatmul.mubr.msk.bf16.vlgmr.msra.gmra.mrb[56].mxu1 %vm312_vm2, %v6854_v26 }
 0x31e   : > { %5374 = vmatpush3.bf16.msra.mxu1 %v4347_v54  ;;  %5375 = vmatprep.mubr.msk.bf16.mxu1 %vm5857_vm10, %v5856_v47  ;;  %v4658_v47 = vpack.c.bf16 %v4649_v9, %v4649_v9 }
 0x31f   : > { %5263 = vmatprep.subr.msk.bf16.mxu1 %vm319_vm1, %v4655_v15 }
 0x320   : > { %v4680_v51 = vsel %vm319_vm1, %v4658_v47, 0 }
 0x325   : > { %5376 = vmatmul.mubr.msk.bf16.vlgmr.msra.gmra.mrb[60].mxu1 %vm312_vm2, %v6854_v26 }
 0x326   : > { %4730 = vmatpush1.bf16.msra.mxu1 %v4668_v19  ;;  %4761 = vmatprep.mubr.bf16.mxu1 %v5847_v0 }
 0x327   : > { %5267 = vmatprep.subr.msk.bf16.mxu1 %vm319_vm1, %v4659_v11 }
 0x32d   : > { %5264 = vmatmul.mubr.msk.bf16.vlgmr.msra.gmra.mrb[64].mxu1 %vm312_vm2, %v6854_v26 }
 0x32e   : > { %4812 = vmatpush1.bf16.msra.mxu1 %v4680_v51  ;;  %4843 = vmatprep.mubr.bf16.mxu1 %v5847_v0 }
 0x335   : > { %5268 = vmatmul.mubr.msk.bf16.vlgmr.msra.gmra.mrb[68].mxu1 %vm312_vm2, %v6854_v26 }
 0x3a0   : > { %v3699_v13 = vpop.f32.mrb[16].mxu1 }
 0x3a1   : > { %v3874_v12 = vadd.f32 %v7161_v45, %v3699_v13  ;;  %v3701_v41 = vpop.f32.mrb[17].mxu1 }
 0x3a2   : > { %v3875_v31 = vadd.f32 %v7161_v45, %v3701_v41  ;;  %v3703_v28 = vpop.f32.mrb[18].mxu1 }
 0x3a3   : > { %5734 = vrsqrt.f32 %v3874_v12  ;;  %v3704_v40 = vpop.f32.mrb[19].mxu1  ;;  %vm3885_vm11 = vcmp.eq.f32.partialorder %v3874_v12, inf  ;;  %v3888_v6 = vand.u32 2147483648, %v3874_v12  ;;  %vm3887_vm12 = vcmp.eq.f32.partialorder %v3874_v12, 0.0 }
 0x3a4   : > { %5736 = vrsqrt.f32 %v3875_v31  ;;  %vm3892_vm13 = vcmp.eq.f32.partialorder %v3875_v31, inf  ;;  %v3895_v15 = vand.u32 2147483648, %v3875_v31  ;;  %vm3894_vm14 = vcmp.eq.f32.partialorder %v3875_v31, 0.0 }
 0x3a8   : > { %v3740_v36 = vpop.f32.mrb[20].mxu1 }
 0x3a9   : > { %v3876_v8 = vadd.f32 %v7161_v45, %v3740_v36  ;;  %v3742_v0 = vpop.f32.mrb[21].mxu1 }
 0x3aa   : > { %v3877_v22 = vadd.f32 %v7161_v45, %v3742_v0  ;;  %v3744_v26 = vpop.f32.mrb[22].mxu1 }
 0x3ab   : > { %5738 = vrsqrt.f32 %v3876_v8  ;;  %v3745_v27 = vpop.f32.mrb[23].mxu1  ;;  %vm3899_vm15 = vcmp.eq.f32.partialorder %v3876_v8, inf  ;;  %vm3901_vm0 = vcmp.eq.f32.partialorder %v3876_v8, 0.0 }
 0x3ac   : > { %5740 = vrsqrt.f32 %v3877_v22  ;;  %vm3906_vm1 = vcmp.eq.f32.partialorder %v3877_v22, inf  ;;  %vm3908_vm2 = vcmp.eq.f32.partialorder %v3877_v22, 0.0 }
 0x3ad   : > { %v5735_v39 = vpop.eup %5734 }
 0x3ae   : > { %v5737_v46 = vpop.eup %5736  ;;  %v3884_v63 = vmul.f32 %v5735_v39, %v3874_v12 }
 0x3af   : > { %v3891_v30 = vmul.f32 %v5737_v46, %v3875_v31 }
 0x3b0   : > { %v3886_v52 = vsel %vm3885_vm11, %v3874_v12, %v3884_v63  ;;  %v3781_v54 = vpop.f32.mrb[24].mxu1 }
 0x3b1   : > { %v3889_v10 = vsel %vm3887_vm12, %v3888_v6, %v3886_v52  ;;  %v3893_v20 = vsel %vm3892_vm13, %v3875_v31, %v3891_v30  ;;  %v3878_v9 = vadd.f32 %v7161_v45, %v3781_v54  ;;  %v3783_v11 = vpop.f32.mrb[25].mxu1  ;;  %v3902_v31 = vand.u32 2147483648, %v3876_v8 }
 0x3b2   : > { %v3946_v19 = vmul.f32 %v3889_v10, %v6835_v49  ;;  %v3896_v47 = vsel %vm3894_vm14, %v3895_v15, %v3893_v20  ;;  %v3879_v51 = vadd.f32 %v7161_v45, %v3783_v11  ;;  %v3785_v13 = vpop.f32.mrb[26].mxu1  ;;  %v3909_v49 = vand.u32 2147483648, %v3877_v22 }
 0x3b3   : > { %v3947_v12 = vmul.f32 %v3896_v47, %v6838_v24  ;;  %5742 = vrsqrt.f32 %v3878_v9  ;;  %v3786_v41 = vpop.f32.mrb[27].mxu1  ;;  %vm3913_vm3 = vcmp.eq.f32.partialorder %v3878_v9, inf  ;;  %vm3915_vm4 = vcmp.eq.f32.partialorder %v3878_v9, 0.0 }
 0x3b4   : > { %3955 = vst [vmem:[%s7171_s26] sm:$0xff] %v3946_v19  ;;  %5744 = vrsqrt.f32 %v3879_v51  ;;  %vm3920_vm5 = vcmp.eq.f32.partialorder %v3879_v51, inf  ;;  %vm3922_vm6 = vcmp.eq.f32.partialorder %v3879_v51, 0.0  ;;  %vm3963_vm13 = vcmask 523264  }
 0x3b5   : > { %v5739_v28 = vpop.eup %5738  ;;  %3956 = vst [vmem:[%s7171_s26 + $0x8] sm:$0xff] %v3947_v12 }
 0x3b6   : > { %v5741_v40 = vpop.eup %5740  ;;  %v3898_v36 = vmul.f32 %v5739_v28, %v3876_v8 }
 0x3b7   : > { %v3905_v0 = vmul.f32 %v5741_v40, %v3877_v22 }
 0x3b8   : > { %v3900_v26 = vsel %vm3899_vm15, %v3876_v8, %v3898_v36  ;;  %v3822_v27 = vpop.f32.mrb[28].mxu1 }
 0x3b9   : > { %v3903_v39 = vsel %vm3901_vm0, %v3902_v31, %v3900_v26  ;;  %v3907_v24 = vsel %vm3906_vm1, %v3877_v22, %v3905_v0  ;;  %v3880_v46 = vadd.f32 %v7161_v45, %v3822_v27  ;;  %v3824_v63 = vpop.f32.mrb[29].mxu1  ;;  %v3916_v22 = vand.u32 2147483648, %v3878_v9 }
 0x3ba   : > { %v3948_v6 = vmul.f32 %v3903_v39, %v6829_v16  ;;  %v3910_v30 = vsel %vm3908_vm2, %v3909_v49, %v3907_v24  ;;  %v3881_v52 = vadd.f32 %v7161_v45, %v3824_v63  ;;  %v3826_v15 = vpop.f32.mrb[30].mxu1  ;;  %v3923_v16 = vand.u32 2147483648, %v3879_v51 }
 0x3bb   : > { %v3949_v54 = vmul.f32 %v3910_v30, %v6832_v21  ;;  %5746 = vrsqrt.f32 %v3880_v46  ;;  %v3827_v8 = vpop.f32.mrb[31].mxu1  ;;  %vm3927_vm7 = vcmp.eq.f32.partialorder %v3880_v46, inf  ;;  %vm3929_vm8 = vcmp.eq.f32.partialorder %v3880_v46, 0.0 }
 0x3bc   : > { %3957 = vst [vmem:[%s7171_s26 + $0x10] sm:$0xff] %v3948_v6  ;;  %5748 = vrsqrt.f32 %v3881_v52  ;;  %vm3934_vm9 = vcmp.eq.f32.partialorder %v3881_v52, inf  ;;  %vm3936_vm10 = vcmp.eq.f32.partialorder %v3881_v52, 0.0 }
 0x3bd   : > { %v5743_v10 = vpop.eup %5742  ;;  %3958 = vst [vmem:[%s7171_s26 + $0x18] sm:$0xff] %v3949_v54 }
 0x3be   : > { %v5745_v20 = vpop.eup %5744  ;;  %v3912_v11 = vmul.f32 %v5743_v10, %v3878_v9 }
 0x3bf   : > { %v3919_v19 = vmul.f32 %v5745_v20, %v3879_v51 }
 0x3c0   : > { %v3914_v47 = vsel %vm3913_vm3, %v3878_v9, %v3912_v11  ;;  %v3863_v13 = vpop.f32.mrb[32].mxu1 }
 0x3c1   : > { %v3917_v12 = vsel %vm3915_vm4, %v3916_v22, %v3914_v47  ;;  %v3921_v41 = vsel %vm3920_vm5, %v3879_v51, %v3919_v19  ;;  %v3882_v21 = vadd.f32 %v7161_v45, %v3863_v13  ;;  %v5365_v28 = vpop.f32.mrb[33].mxu1 }
 0x3c2   : > { %v3950_v40 = vmul.f32 %v3917_v12, %v6872_v55  ;;  %v3924_v36 = vsel %vm3922_vm6, %v3923_v16, %v3921_v41  ;;  %v4208_v31 = vpop.f32.mrb[20].mxu0  ;;  %v3866_v0 = vpop.f32.mrb[34].mxu1  ;;  %v3930_v55 = vand.u32 2147483648, %v3880_v46 }
 0x3c3   : > { %v3951_v26 = vmul.f32 %v3924_v36, %v6875_v57  ;;  %5750 = vrsqrt.f32 %v3882_v21  ;;  %v5366_v9 = vpop.f32.mrb[35].mxu1  ;;  %v5371_v49 = vpop.f32.mrb[21].mxu0  ;;  %v7190_v27 = vadd.f32 %v4208_v31, %v7161_v45  ;;  %v3937_v57 = vand.u32 2147483648, %v3881_v52 }
 0x3c4   : > { %3959 = vst [vmem:[%s7171_s26 + $0x20] sm:$0xff] %v3950_v40  ;;  %v4211_v39 = vpop.f32.mrb[22].mxu0  ;;  %vm3941_vm11 = vcmp.eq.f32.partialorder %v3882_v21, inf  ;;  %vm3943_vm12 = vcmp.eq.f32.partialorder %v3882_v21, 0.0 }
 0x3c5   : > { %v5747_v24 = vpop.eup %5746  ;;  %3960 = vst [vmem:[%s7171_s26 + $0x28] sm:$0xff] %v3951_v26  ;;  %v5372_v51 = vpop.f32.mrb[23].mxu0  ;;  %5752 = vrsqrt.f32 %v7190_v27  ;;  %vm4281_vm14 = vcmp.eq.f32.partialorder %v7190_v27, inf  ;;  %vm4283_vm15 = vcmp.eq.f32.partialorder %v7190_v27, 0.0 }
 0x3c6   : > { %v5749_v63 = vpop.eup %5748  ;;  %v3926_v6 = vmul.f32 %v5747_v24, %v3880_v46 }
 0x3c7   : > { %v3933_v30 = vmul.f32 %v5749_v63, %v3881_v52 }
 0x3c8   : > { %v3928_v15 = vsel %vm3927_vm7, %v3880_v46, %v3926_v6  ;;  %v4044_v54 = vpop.f32.mrb[36].mxu1  ;;  %v4284_v6 = vand.u32 2147483648, %v7190_v27 }
 0x3c9   : > { %v3931_v8 = vsel %vm3929_vm8, %v3930_v55, %v3928_v15  ;;  %v3935_v10 = vsel %vm3934_vm9, %v3881_v52, %v3933_v30  ;;  %v7195_v20 = vadd.f32 %v4044_v54, %v7161_v45  ;;  %v4046_v11 = vpop.f32.mrb[37].mxu1 }
 0x3ca   : > { %v3952_v22 = vmul.f32 %v3931_v8, %v6866_v33  ;;  %v3938_v19 = vsel %vm3936_vm10, %v3937_v57, %v3935_v10  ;;  %v7199_v47 = vadd.f32 %v4046_v11, %v7161_v45  ;;  %v4424_v16 = vpop.f32.mrb[24].mxu0  ;;  %v4048_v46 = vpop.f32.mrb[38].mxu1 }
 0x3cb   : > { %v3953_v13 = vmul.f32 %v3938_v19, %v6869_v2  ;;  %5754 = vrsqrt.f32 %v7195_v20  ;;  %v4426_v12 = vpop.f32.mrb[25].mxu0  ;;  %v4049_v41 = vpop.f32.mrb[39].mxu1  ;;  %v7207_v33 = vadd.f32 %v4424_v16, %v7161_v45  ;;  %v3944_v2 = vand.u32 2147483648, %v3882_v21 }
 0x3cc   : > { %3961 = vst [vmem:[%s7171_s26 + $0x30] sm:$0xff] %v3952_v22  ;;  %5756 = vrsqrt.f32 %v7199_v47  ;;  %v4428_v52 = vpop.f32.mrb[26].mxu0  ;;  %v7210_v40 = vadd.f32 %v4426_v12, %v7161_v45  ;;  %vm4225_vm0 = vcmp.eq.f32.partialorder %v7195_v20, inf  ;;  %vm4227_vm1 = vcmp.eq.f32.partialorder %v7195_v20, 0.0 }
 0x3cd   : > { %v5751_v28 = vpop.eup %5750  ;;  %3962 = vst [vmem:[%s7171_s26 + $0x38] sm:$0xff] %v3953_v13  ;;  %v4429_v36 = vpop.f32.mrb[27].mxu0  ;;  %5758 = vrsqrt.f32 %v7207_v33  ;;  %vm4232_vm2 = vcmp.eq.f32.partialorder %v7199_v47, inf  ;;  %vm4234_vm3 = vcmp.eq.f32.partialorder %v7199_v47, 0.0  ;;  %v4235_v12 = vand.u32 2147483648, %v7199_v47 }
 0x3ce   : > { %v3940_v31 = vmul.f32 %v5751_v28, %v3882_v21  ;;  %5760 = vrsqrt.f32 %v7210_v40  ;;  %vm4578_vm4 = vcmp.eq.f32.partialorder %v7207_v33, inf  ;;  %vm4580_vm5 = vcmp.eq.f32.partialorder %v7207_v33, 0.0 }
 0x3cf   : > { %v5753_v0 = vpop.eup %5752  ;;  %v4581_v52 = vand.u32 2147483648, %v7207_v33  ;;  %vm4585_vm6 = vcmp.eq.f32.partialorder %v7210_v40, inf  ;;  %vm4587_vm7 = vcmp.eq.f32.partialorder %v7210_v40, 0.0 }
 0x3d0   : > { %v3942_v26 = vsel %vm3941_vm11, %v3882_v21, %v3940_v31  ;;  %v4085_v9 = vpop.f32.mrb[40].mxu1  ;;  %v4280_v39 = vmul.f32 %v5753_v0, %v7190_v27 }
 0x3d1   : > { %v3945_v49 = vsel %vm3943_vm12, %v3944_v2, %v3942_v26  ;;  %v7216_v24 = vadd.f32 %v4085_v9, %v7161_v45  ;;  %v4087_v51 = vpop.f32.mrb[41].mxu1 }
 0x3d2   : > { %v3954_v63 = vmul.f32 %v3945_v49, %v6927_v56  ;;  %v7222_v21 = vadd.f32 %v4087_v51, %v7161_v45  ;;  %v4506_v55 = vpop.f32.mrb[28].mxu0  ;;  %v4089_v30 = vpop.f32.mrb[42].mxu1  ;;  %v4282_v15 = vsel %vm4281_vm14, %v7190_v27, %v4280_v39  ;;  %v4228_v27 = vand.u32 2147483648, %v7195_v20 }
 0x3d3   : > { %5762 = vrsqrt.f32 %v7216_v24  ;;  %v4508_v57 = vpop.f32.mrb[29].mxu0  ;;  %v4090_v54 = vpop.f32.mrb[43].mxu1  ;;  %v4285_v56 = vsel %vm4283_vm15, %v4284_v6, %v4282_v15  ;;  %v7235_v22 = vadd.f32 %v4506_v55, %v7161_v45  ;;  %v4588_v30 = vand.u32 2147483648, %v7210_v40 }
 0x3d4   : > { %3964 = vst.msk [vmem:[%s7171_s26 + $0x40] sm:$0xff] %vm3963_vm13, %v3954_v63  ;;  %5764 = vrsqrt.f32 %v7222_v21  ;;  %v4510_v8 = vpop.f32.mrb[30].mxu0  ;;  %v4294_v11 = vmul.f32 %v4285_v56, %v6942_v38  ;;  %v7241_v13 = vadd.f32 %v4508_v57, %v7161_v45  ;;  %vm4239_vm8 = vcmp.eq.f32.partialorder %v7216_v24, inf }
 0x3d5   : > { %v5755_v10 = vpop.eup %5754  ;;  %v4511_v19 = vpop.f32.mrb[31].mxu0  ;;  %5766 = vrsqrt.f32 %v7235_v22  ;;  %vm4241_vm9 = vcmp.eq.f32.partialorder %v7216_v24, 0.0  ;;  %vm4246_vm10 = vcmp.eq.f32.partialorder %v7222_v21, inf  ;;  %vm4248_vm11 = vcmp.eq.f32.partialorder %v7222_v21, 0.0 }
 0x3d6   : > { %v5757_v16 = vpop.eup %5756  ;;  %v4224_v46 = vmul.f32 %v5755_v10, %v7195_v20  ;;  %4303 = vst.msk [vmem:[%s7171_s26 + $0x88] sm:$0xff] %vm3963_vm13, %v4294_v11  ;;  %5768 = vrsqrt.f32 %v7241_v13  ;;  %vm4606_vm12 = vcmp.eq.f32.partialorder %v7235_v22, inf  ;;  %vm4608_vm14 = vcmp.eq.f32.partialorder %v7235_v22, 0.0 }
 0x3d7   : > { %v4231_v38 = vmul.f32 %v5757_v16, %v7199_v47  ;;  %v5759_v36 = vpop.eup %5758  ;;  %vm4613_vm15 = vcmp.eq.f32.partialorder %v7241_v13, inf }
 0x3d8   : > { %v4226_v41 = vsel %vm4225_vm0, %v7195_v20, %v4224_v46  ;;  %v4126_v28 = vpop.f32.mrb[44].mxu1  ;;  %v5761_v26 = vpop.eup %5760  ;;  %v4577_v39 = vmul.f32 %v5759_v36, %v7207_v33  ;;  %vm4615_vm0 = vcmp.eq.f32.partialorder %v7241_v13, 0.0 }
 0x3d9   : > { %v4229_v31 = vsel %vm4227_vm1, %v4228_v27, %v4226_v41  ;;  %v4233_v2 = vsel %vm4232_vm2, %v7199_v47, %v4231_v38  ;;  %v4128_v0 = vpop.f32.mrb[45].mxu1  ;;  %v7265_v51 = vadd.f32 %v4126_v28, %v7161_v45  ;;  %v4584_v55 = vmul.f32 %v5761_v26, %v7210_v40 }
 0x3da   : > { %v4286_v9 = vmul.f32 %v4229_v31, %v6911_v42  ;;  %v4236_v49 = vsel %vm4234_vm3, %v4235_v12, %v4233_v2  ;;  %v4722_v20 = vpop.f32.mrb[32].mxu0  ;;  %v4130_v63 = vpop.f32.mrb[46].mxu1  ;;  %v7271_v15 = vadd.f32 %v4128_v0, %v7161_v45  ;;  %v4579_v57 = vsel %vm4578_vm4, %v7207_v33, %v4577_v39 }
 0x3db   : > { %v4287_v6 = vmul.f32 %v4236_v49, %v6914_v25  ;;  %v4724_v42 = vpop.f32.mrb[33].mxu0  ;;  %v4131_v47 = vpop.f32.mrb[47].mxu1  ;;  %5770 = vrsqrt.f32 %v7265_v51  ;;  %v7280_v25 = vadd.f32 %v4722_v20, %v7161_v45  ;;  %v4582_v8 = vsel %vm4580_vm5, %v4581_v52, %v4579_v57 }
 0x3dc   : > { %4295 = vst [vmem:[%s7171_s26 + $0x48] sm:$0xff] %v4286_v9  ;;  %v4726_v54 = vpop.f32.mrb[34].mxu0  ;;  %v4586_v10 = vsel %vm4585_vm6, %v7210_v40, %v4584_v55  ;;  %5772 = vrsqrt.f32 %v7271_v15  ;;  %v4627_v19 = vmul.f32 %v4582_v8, %v6920_v62  ;;  %v4242_v33 = vand.u32 2147483648, %v7216_v24 }
 0x3dd   : > { %v5763_v56 = vpop.eup %5762  ;;  %4296 = vst [vmem:[%s7171_s26 + $0x50] sm:$0xff] %v4287_v6  ;;  %v4727_v11 = vpop.f32.mrb[35].mxu0  ;;  %v4589_v16 = vsel %vm4587_vm7, %v4588_v30, %v4586_v10  ;;  %v4249_v40 = vand.u32 2147483648, %v7222_v21  ;;  %5774 = vrsqrt.f32 %v7280_v25  ;;  %v7312_v36 = vadd.f32 %v4724_v42, %v7161_v45 }
 0x3de   : > { %v5765_v27 = vpop.eup %5764  ;;  %v4238_v46 = vmul.f32 %v5763_v56, %v7216_v24  ;;  %v4628_v38 = vmul.f32 %v4589_v16, %v6924_v17  ;;  %4636 = vst [vmem:[%s7171_s26 + $0xa0] sm:$0xff] %v4627_v19  ;;  %v4609_v63 = vand.u32 2147483648, %v7235_v22  ;;  %v4616_v30 = vand.u32 2147483648, %v7241_v13 }
 0x3df   : > { %v4245_v12 = vmul.f32 %v5765_v27, %v7222_v21  ;;  %v5767_v52 = vpop.eup %5766  ;;  %5776 = vrsqrt.f32 %v7312_v36  ;;  %vm4253_vm1 = vcmp.eq.f32.partialorder %v7265_v51, inf  ;;  %vm4255_vm2 = vcmp.eq.f32.partialorder %v7265_v51, 0.0 }
 0x3e0   : > { %v4240_v62 = vsel %vm4239_vm8, %v7216_v24, %v4238_v46  ;;  %v4167_v41 = vpop.f32.mrb[48].mxu1  ;;  %4637 = vst [vmem:[%s7171_s26 + $0xa8] sm:$0xff] %v4628_v38  ;;  %v5769_v2 = vpop.eup %5768  ;;  %v4605_v9 = vmul.f32 %v5767_v52, %v7235_v22  ;;  %vm4260_vm3 = vcmp.eq.f32.partialorder %v7271_v15, inf  ;;  %vm4262_vm4 = vcmp.eq.f32.partialorder %v7271_v15, 0.0 }
 0x3e1   : > { %v4243_v17 = vsel %vm4241_vm9, %v4242_v33, %v4240_v62  ;;  %v4247_v28 = vsel %vm4246_vm10, %v7222_v21, %v4245_v12  ;;  %v4169_v31 = vpop.f32.mrb[49].mxu1  ;;  %v7319_v24 = vadd.f32 %v4167_v41, %v7161_v45  ;;  %v4612_v6 = vmul.f32 %v5769_v2, %v7241_v13 }
 0x3e2   : > { %v4288_v0 = vmul.f32 %v4243_v17, %v6962_v48  ;;  %v4250_v26 = vsel %vm4248_vm11, %v4249_v40, %v4247_v28  ;;  %v4804_v49 = vpop.f32.mrb[36].mxu0  ;;  %v4171_v39 = vpop.f32.mrb[50].mxu1  ;;  %v4607_v21 = vsel %vm4606_vm12, %v7235_v22, %v4605_v9  ;;  %v7340_v10 = vadd.f32 %v4169_v31, %v7161_v45 }
 0x3e3   : > { %v4289_v20 = vmul.f32 %v4250_v26, %v6933_v29  ;;  %v4806_v48 = vpop.f32.mrb[37].mxu0  ;;  %v4172_v55 = vpop.f32.mrb[51].mxu1  ;;  %5778 = vrsqrt.f32 %v7319_v24  ;;  %v4610_v42 = vsel %vm4608_vm14, %v4609_v63, %v4607_v21  ;;  %v4614_v47 = vsel %vm4613_vm15, %v7241_v13, %v4612_v6 }
 0x3e4   : > { %4297 = vst [vmem:[%s7171_s26 + $0x58] sm:$0xff] %v4288_v0  ;;  %v4808_v29 = vpop.f32.mrb[38].mxu0  ;;  %v4631_v56 = vmul.f32 %v4610_v42, %v6967_v37  ;;  %v4617_v8 = vsel %vm4615_vm0, %v4616_v30, %v4614_v47  ;;  %v7345_v19 = vadd.f32 %v4804_v49, %v7161_v45  ;;  %v7348_v13 = vadd.f32 %v4806_v48, %v7161_v45 }
 0x3e5   : > { %4298 = vst [vmem:[%s7171_s26 + $0x60] sm:$0xff] %v4289_v20  ;;  %v4809_v57 = vpop.f32.mrb[39].mxu0  ;;  %v5771_v54 = vpop.eup %5770  ;;  %v4632_v27 = vmul.f32 %v4617_v8, %v6954_v43  ;;  %v4256_v37 = vand.u32 2147483648, %v7265_v51  ;;  %5780 = vrsqrt.f32 %v7340_v10  ;;  %v4263_v33 = vand.u32 2147483648, %v7271_v15 }
 0x3e6   : > { %v5773_v11 = vpop.eup %5772  ;;  %v4252_v22 = vmul.f32 %v5771_v54, %v7265_v51  ;;  %4640 = vst [vmem:[%s7171_s26 + $0xc0] sm:$0xff] %v4631_v56  ;;  %5782 = vrsqrt.f32 %v7345_v19  ;;  %vm4903_vm5 = vcmp.eq.f32.partialorder %v7280_v25, inf  ;;  %vm4905_vm6 = vcmp.eq.f32.partialorder %v7280_v25, 0.0 }
 0x3e7   : > { %v4259_v16 = vmul.f32 %v5773_v11, %v7271_v15  ;;  %4641 = vst [vmem:[%s7171_s26 + $0xc8] sm:$0xff] %v4632_v27  ;;  %v5775_v12 = vpop.eup %5774  ;;  %5784 = vrsqrt.f32 %v7348_v13  ;;  %vm4910_vm7 = vcmp.eq.f32.partialorder %v7312_v36, inf  ;;  %vm4912_vm8 = vcmp.eq.f32.partialorder %v7312_v36, 0.0 }
 0x3e8   : > { %v4383_v46 = vpop.f32.mrb[52].mxu1  ;;  %v4254_v43 = vsel %vm4253_vm1, %v7265_v51, %v4252_v22  ;;  %v4902_v51 = vmul.f32 %v5775_v12, %v7280_v25  ;;  %v4913_v55 = vand.u32 2147483648, %v7312_v36  ;;  %vm4267_vm9 = vcmp.eq.f32.partialorder %v7319_v24, inf }
 0x3e9   : > { %v4385_v38 = vpop.f32.mrb[53].mxu1  ;;  %v4257_v62 = vsel %vm4255_vm2, %v4256_v37, %v4254_v43  ;;  %v4261_v40 = vsel %vm4260_vm3, %v7271_v15, %v4259_v16  ;;  %v4906_v15 = vand.u32 2147483648, %v7280_v25  ;;  %v5777_v9 = vpop.eup %5776  ;;  %v7373_v49 = vadd.f32 %v4383_v46, %v7161_v45 }
 0x3ea   : > { %v4886_v41 = vpop.f32.mrb[40].mxu0  ;;  %v4387_v52 = vpop.f32.mrb[54].mxu1  ;;  %v4290_v17 = vmul.f32 %v4257_v62, %v6998_v34  ;;  %v4264_v28 = vsel %vm4262_vm4, %v4263_v33, %v4261_v40  ;;  %v4904_v34 = vsel %vm4903_vm5, %v7280_v25, %v4902_v51  ;;  %v7376_v39 = vadd.f32 %v4385_v38, %v7161_v45 }
 0x3eb   : > { %v4388_v31 = vpop.f32.mrb[55].mxu1  ;;  %v5383_v2 = vpop.f32.mrb[41].mxu0  ;;  %v4291_v0 = vmul.f32 %v4264_v28, %v6974_v1  ;;  %v4907_v63 = vsel %vm4905_vm6, %v4906_v15, %v4904_v34  ;;  %v4909_v6 = vmul.f32 %v5777_v9, %v7312_v36  ;;  %v7382_v48 = vadd.f32 %v4886_v41, %v7161_v45 }
 0x3ec   : > { %v4889_v26 = vpop.f32.mrb[42].mxu0  ;;  %4299 = vst [vmem:[%s7171_s26 + $0x68] sm:$0xff] %v4290_v17  ;;  %v4964_v25 = vmul.f32 %v4907_v63, %v7005_v44  ;;  %5786 = vrsqrt.f32 %v7373_v49  ;;  %v4270_v29 = vand.u32 2147483648, %v7319_v24  ;;  %vm4269_vm10 = vcmp.eq.f32.partialorder %v7319_v24, 0.0 }
 0x3ed   : > { %v5384_v1 = vpop.f32.mrb[43].mxu0  ;;  %v5779_v20 = vpop.eup %5778  ;;  %4300 = vst [vmem:[%s7171_s26 + $0x70] sm:$0xff] %v4291_v0  ;;  %v4911_v30 = vsel %vm4910_vm7, %v7312_v36, %v4909_v6  ;;  %5788 = vrsqrt.f32 %v7376_v39  ;;  %vm4274_vm11 = vcmp.eq.f32.partialorder %v7340_v10, inf  ;;  %vm4276_vm12 = vcmp.eq.f32.partialorder %v7340_v10, 0.0 }
 0x3ee   : > { %v4266_v21 = vmul.f32 %v5779_v20, %v7319_v24  ;;  %4973 = vst [vmem:[%s7171_s26 + $0xd8] sm:$0xff] %v4964_v25  ;;  %v4914_v47 = vsel %vm4912_vm8, %v4913_v55, %v4911_v30  ;;  %5790 = vrsqrt.f32 %v7382_v48  ;;  %vm4931_vm14 = vcmp.eq.f32.partialorder %v7345_v19, inf }
 0x3ef   : > { %v5781_v54 = vpop.eup %5780  ;;  %v4965_v56 = vmul.f32 %v4914_v47, %v6989_v3  ;;  %vm4933_vm15 = vcmp.eq.f32.partialorder %v7345_v19, 0.0  ;;  %v4934_v33 = vand.u32 2147483648, %v7345_v19  ;;  %vm4938_vm0 = vcmp.eq.f32.partialorder %v7348_v13, inf }
 0x3f0   : > { %v4465_v42 = vpop.f32.mrb[56].mxu1  ;;  %v4268_v44 = vsel %vm4267_vm9, %v7319_v24, %v4266_v21  ;;  %v5783_v11 = vpop.eup %5782  ;;  %v4273_v22 = vmul.f32 %v5781_v54, %v7340_v10  ;;  %v4277_v24 = vand.u32 2147483648, %v7340_v10  ;;  %vm4940_vm1 = vcmp.eq.f32.partialorder %v7348_v13, 0.0 }
 0x3f1   : > { %v4467_v57 = vpop.f32.mrb[57].mxu1  ;;  %v4271_v36 = vsel %vm4269_vm10, %v4270_v29, %v4268_v44  ;;  %4974 = vst [vmem:[%s7171_s26 + $0xe0] sm:$0xff] %v4965_v56  ;;  %v4930_v3 = vmul.f32 %v5783_v11, %v7345_v19  ;;  %v7405_v16 = vadd.f32 %v4465_v42, %v7161_v45  ;;  %v5785_v43 = vpop.eup %5784  ;;  %vm4564_vm2 = vcmp.eq.f32.partialorder %v7373_v49, inf }
 0x3f2   : > { %v4469_v8 = vpop.f32.mrb[58].mxu1  ;;  %v4292_v27 = vmul.f32 %v4271_v36, %v7032_v7  ;;  %v7408_v46 = vadd.f32 %v4467_v57, %v7161_v45  ;;  %v4275_v7 = vsel %vm4274_vm11, %v7340_v10, %v4273_v22  ;;  %v4937_v62 = vmul.f32 %v5785_v43, %v7348_v13 }
 0x3f3   : > { %v4470_v37 = vpop.f32.mrb[59].mxu1  ;;  %v4278_v38 = vsel %vm4276_vm12, %v4277_v24, %v4275_v7  ;;  %v4932_v12 = vsel %vm4931_vm14, %v7345_v19, %v4930_v3  ;;  %5792 = vrsqrt.f32 %v7405_v16  ;;  %v4941_v10 = vand.u32 2147483648, %v7348_v13 }
 0x3f4   : > { %4301 = vst [vmem:[%s7171_s26 + $0x78] sm:$0xff] %v4292_v27  ;;  %v4293_v40 = vmul.f32 %v4278_v38, %v7011_v32  ;;  %v4935_v41 = vsel %vm4933_vm15, %v4934_v33, %v4932_v12  ;;  %v4939_v17 = vsel %vm4938_vm0, %v7348_v13, %v4937_v62  ;;  %5794 = vrsqrt.f32 %v7408_v46 }
 0x3f5   : > { %v4968_v52 = vmul.f32 %v4935_v41, %v7039_v18  ;;  %v4942_v51 = vsel %vm4940_vm1, %v4941_v10, %v4939_v17  ;;  %vm4566_vm3 = vcmp.eq.f32.partialorder %v7373_v49, 0.0  ;;  %v4567_v13 = vand.u32 2147483648, %v7373_v49 }
 0x3f6   : > { %v5787_v28 = vpop.eup %5786  ;;  %4302 = vst [vmem:[%s7171_s26 + $0x80] sm:$0xff] %v4293_v40  ;;  %v4969_v2 = vmul.f32 %v4942_v51, %v7023_v14  ;;  %vm4571_vm4 = vcmp.eq.f32.partialorder %v7376_v39, inf  ;;  %v4574_v14 = vand.u32 2147483648, %v7376_v39  ;;  %vm4573_vm5 = vcmp.eq.f32.partialorder %v7376_v39, 0.0 }
 0x3f7   : > { %v5789_v32 = vpop.eup %5788  ;;  %4977 = vst [vmem:[%s7171_s26 + $0xf8] sm:$0xff] %v4968_v52  ;;  %v4563_v0 = vmul.f32 %v5787_v28, %v7373_v49  ;;  %vm4959_vm6 = vcmp.eq.f32.partialorder %v7382_v48, inf  ;;  %vm4961_vm7 = vcmp.eq.f32.partialorder %v7382_v48, 0.0  ;;  %vm4592_vm8 = vcmp.eq.f32.partialorder %v7405_v16, inf }
 0x3f8   : > { %v4547_v19 = vpop.f32.mrb[60].mxu1  ;;  %v4570_v26 = vmul.f32 %v5789_v32, %v7376_v39  ;;  %v5791_v34 = vpop.eup %5790  ;;  %4978 = vst [vmem:[%s7171_s26 + $0x100] sm:$0xff] %v4969_v2  ;;  %vm4594_vm9 = vcmp.eq.f32.partialorder %v7405_v16, 0.0  ;;  %vm4599_vm10 = vcmp.eq.f32.partialorder %v7408_v46, inf  ;;  %v4602_v27 = vand.u32 2147483648, %v7408_v46 }
 0x3f9   : > { %v5377_v31 = vpop.f32.mrb[61].mxu1  ;;  %v7430_v18 = vadd.f32 %v4547_v19, %v7161_v45  ;;  %v4565_v1 = vsel %vm4564_vm2, %v7373_v49, %v4563_v0  ;;  %v4958_v6 = vmul.f32 %v5791_v34, %v7382_v48  ;;  %v4962_v49 = vand.u32 2147483648, %v7382_v48 }
 0x3fa   : > { %v4550_v15 = vpop.f32.mrb[62].mxu1  ;;  %v4568_v20 = vsel %vm4566_vm3, %v4567_v13, %v4565_v1  ;;  %v4572_v63 = vsel %vm4571_vm4, %v7376_v39, %v4570_v26  ;;  %vm4601_vm11 = vcmp.eq.f32.partialorder %v7408_v46, 0.0 }
 0x3fb   : > { %v5378_v9 = vpop.f32.mrb[63].mxu1  ;;  %5796 = vrsqrt.f32 %v7430_v18  ;;  %v4625_v25 = vmul.f32 %v4568_v20, %v7062_v4  ;;  %v4575_v55 = vsel %vm4573_vm5, %v4574_v14, %v4572_v63  ;;  %v4960_v30 = vsel %vm4959_vm6, %v7382_v48, %v4958_v6 }
 0x3fc   : > { %v4626_v21 = vmul.f32 %v4575_v55, %v7047_v59  ;;  %v4963_v42 = vsel %vm4961_vm7, %v4962_v49, %v4960_v30  ;;  %v4595_v59 = vand.u32 2147483648, %v7405_v16  ;;  %vm4620_vm12 = vcmp.eq.f32.partialorder %v7430_v18, inf }
 0x3fd   : > { %v5793_v29 = vpop.eup %5792  ;;  %4634 = vst [vmem:[%s7171_s26 + $0x90] sm:$0xff] %v4625_v25  ;;  %v4972_v47 = vmul.f32 %v4963_v42, %v7069_v53  ;;  %v4623_v7 = vand.u32 2147483648, %v7430_v18  ;;  %vm4622_vm14 = vcmp.eq.f32.partialorder %v7430_v18, 0.0 }
 0x3fe   : > { %4635 = vst [vmem:[%s7171_s26 + $0x98] sm:$0xff] %v4626_v21  ;;  %v4591_v4 = vmul.f32 %v5793_v29, %v7405_v16  ;;  %v5795_v54 = vpop.eup %5794 }
 0x3ff   : > { %4981 = vst.msk [vmem:[%s7171_s26 + $0x118] sm:$0xff] %vm3963_vm13, %v4972_v47  ;;  %v4598_v53 = vmul.f32 %v5795_v54, %v7408_v46 }
 0x400   : > { %v4763_v39 = vpop.f32.mrb[64].mxu1  ;;  %v4593_v36 = vsel %vm4592_vm8, %v7405_v16, %v4591_v4 }
 0x401   : > { %v4894_v44 = vadd.f32 %v4763_v39, %v7161_v45  ;;  %v4765_v57 = vpop.f32.mrb[65].mxu1  ;;  %v4596_v11 = vsel %vm4594_vm9, %v4595_v59, %v4593_v36  ;;  %v4600_v37 = vsel %vm4599_vm10, %v7408_v46, %v4598_v53 }
 0x402   : > { %v4895_v56 = vadd.f32 %v4765_v57, %v7161_v45  ;;  %v4767_v48 = vpop.f32.mrb[66].mxu1  ;;  %v4629_v22 = vmul.f32 %v4596_v11, %v7090_v61  ;;  %v4603_v3 = vsel %vm4601_vm11, %v4602_v27, %v4600_v37 }
 0x403   : > { %5798 = vrsqrt.f32 %v4894_v44  ;;  %v4768_v8 = vpop.f32.mrb[67].mxu1  ;;  %v4630_v16 = vmul.f32 %v4603_v3, %v7075_v60  ;;  %vm4917_vm15 = vcmp.eq.f32.partialorder %v4894_v44, inf  ;;  %v4920_v19 = vand.u32 2147483648, %v4894_v44 }
 0x404   : > { %5800 = vrsqrt.f32 %v4895_v56  ;;  %4638 = vst [vmem:[%s7171_s26 + $0xb0] sm:$0xff] %v4629_v22  ;;  %vm4919_vm0 = vcmp.eq.f32.partialorder %v4894_v44, 0.0  ;;  %vm4924_vm1 = vcmp.eq.f32.partialorder %v4895_v56, inf  ;;  %vm4926_vm2 = vcmp.eq.f32.partialorder %v4895_v56, 0.0 }
 0x405   : > { %v5797_v24 = vpop.eup %5796  ;;  %4639 = vst [vmem:[%s7171_s26 + $0xb8] sm:$0xff] %v4630_v16 }
 0x406   : > { %v4619_v43 = vmul.f32 %v5797_v24, %v7430_v18 }
 0x408   : > { %v4845_v33 = vpop.f32.mrb[68].mxu1  ;;  %v4621_v61 = vsel %vm4620_vm12, %v7430_v18, %v4619_v43 }
 0x409   : > { %v4898_v46 = vadd.f32 %v4845_v33, %v7161_v45  ;;  %v4847_v38 = vpop.f32.mrb[69].mxu1  ;;  %v4624_v12 = vsel %vm4622_vm14, %v4623_v7, %v4621_v61 }
 0x40a   : > { %v4899_v62 = vadd.f32 %v4847_v38, %v7161_v45  ;;  %v4849_v60 = vpop.f32.mrb[70].mxu1  ;;  %v4633_v40 = vmul.f32 %v4624_v12, %v7109_v5  ;;  %v4927_v45 = vand.u32 2147483648, %v4895_v56 }
 0x40b   : > { %5802 = vrsqrt.f32 %v4898_v46  ;;  %v4850_v41 = vpop.f32.mrb[71].mxu1  ;;  %v4948_v26 = vand.u32 2147483648, %v4898_v46  ;;  %vm4947_vm3 = vcmp.eq.f32.partialorder %v4898_v46, 0.0 }
 0x40c   : > { %5804 = vrsqrt.f32 %v4899_v62  ;;  %4642 = vst.msk [vmem:[%s7171_s26 + $0xd0] sm:$0xff] %vm3963_vm13, %v4633_v40  ;;  %vm4945_vm13 = vcmp.eq.f32.partialorder %v4898_v46, inf  ;;  %vm4952_vm4 = vcmp.eq.f32.partialorder %v4899_v62, inf  ;;  %v4955_v1 = vand.u32 2147483648, %v4899_v62 }
 0x40d   : > { %v5799_v10 = vpop.eup %5798  ;;  %vm4954_vm5 = vcmp.eq.f32.partialorder %v4899_v62, 0.0 }
 0x40e   : > { %v5801_v52 = vpop.eup %5800  ;;  %v4916_v17 = vmul.f32 %v5799_v10, %v4894_v44 }
 0x40f   : > { %v4923_v28 = vmul.f32 %v5801_v52, %v4895_v56 }
 0x410   : > { %v4918_v51 = vsel %vm4917_vm15, %v4894_v44, %v4916_v17 }
 0x411   : > { %v4921_v31 = vsel %vm4919_vm0, %v4920_v19, %v4918_v51  ;;  %v4925_v32 = vsel %vm4924_vm1, %v4895_v56, %v4923_v28 }
 0x412   : > { %v4966_v5 = vmul.f32 %v4921_v31, %v7126_v50  ;;  %v4928_v2 = vsel %vm4926_vm2, %v4927_v45, %v4925_v32 }
 0x413   : > { %v4967_v0 = vmul.f32 %v4928_v2, %v7113_v58 }
 0x414   : > { %4975 = vst [vmem:[%s7171_s26 + $0xe8] sm:$0xff] %v4966_v5 }
 0x415   : > { %v5803_v18 = vpop.eup %5802  ;;  %4976 = vst [vmem:[%s7171_s26 + $0xf0] sm:$0xff] %v4967_v0 }
 0x416   : > { %v5805_v15 = vpop.eup %5804  ;;  %v4944_v13 = vmul.f32 %v5803_v18, %v4898_v46 }
 0x417   : > { %v4951_v9 = vmul.f32 %v5805_v15, %v4899_v62 }
 0x418   : > { %v4946_v34 = vsel %vm4945_vm13, %v4898_v46, %v4944_v13 }
 0x419   : > { %v4949_v14 = vsel %vm4947_vm3, %v4948_v26, %v4946_v34  ;;  %v4953_v20 = vsel %vm4952_vm4, %v4899_v62, %v4951_v9 }
 0x41a   : > { %v4970_v50 = vmul.f32 %v4949_v14, %v7144_v35  ;;  %v4956_v58 = vsel %vm4954_vm5, %v4955_v1, %v4953_v20 }
 0x41b   : > { %v4971_v63 = vmul.f32 %v4956_v58, %v7134_v23 }
 0x41c   : > { %4979 = vst [vmem:[%s7171_s26 + $0x108] sm:$0xff] %v4970_v50 }
 0x41d   : > { %4980 = vst [vmem:[%s7171_s26 + $0x110] sm:$0xff] %v4971_v63 }
 0x41e PF: > { %s16_s18 = sadd.s32 1, %s5844_s18  }
 0x41f   : > { %p13_p2 = scmp.ge.s32.totalorder %s16_s18, 4  }
 0x421   :  { %15 = sbr.rel (!%p13_p2) target bundleno = 1 (0x1), region = 83 }
 0x428   :  { %5003 = vsyncpa [#allocation3], 1 }
 0x429   :  { %5005 = vsyncpa [#allocation3 + $0x1], 1 }

// kernel: edic_decoder_forward.13
= control target key start
LH: loop header
LB: loop body
LE: loop exit
PB: predicated region body
PF: predicated region fallthrough
CT: control target
= control target key end

     0   :  { %s10391_s12 = smov 0   ;;  %s12740_s0 = inlined_call_operand.vmem [shape: f32[2,8,4358], index: 0, kind: input, shape index: {}]   ;;  %s12741_s1 = inlined_call_operand.vmem [shape: bf16[9,12,8], index: 1, kind: input, shape index: {}]   ;;  %s12742_s2 = inlined_call_operand.vmem [shape: f32[12,1], index: 2, kind: input, shape index: {}]   ;;  %s12743_s3 = inlined_call_operand.vmem [shape: f32[2,12,4224], index: 3, kind: output, shape index: {}]  }
   0x1 LB: > { %s9405_s13 = sadd.s32 4294967295, %s10358_s12   ;;  %p9409_p0 = scmp.ge.s32.totalorder %s10358_s12, 1  ;;  %s10358_s12 = sphi %s10391_s12, %s13_s12  }
   0x2   : > { %p137_p1 = scmp.lt.s32.totalorder %s10358_s12, 3 }
   0x4   : > { %p138_p2 = pnand %p9409_p0, %p137_p1 }
   0x6   : > { %141 = sbr.rel (%p138_p2) target bundleno = 973 (0x3cd), region = 32 }
   0xd   : > { %p161_p3 = scmp.lt.s32.totalorder %s9405_s13, 1  ;;  %v12746_v0 = vmov 0   ;;  %s10361_s18 = smov 127   ;;  %vm352_vm0 = vcmask 1039360   ;;  %vm390_vm1 = vcmask 1043456   ;;  %vm386_vm2 = vcmask 64512  }
   0xe   : > { %522 = vmatprep.mubr.bf16.mxu0 %v12746_v0  ;;  %565 = vmatprep.mubr.bf16.mxu1 %v12746_v0  ;;  %s10362_s19 = smov 126   ;;  %s10363_s22 = smov 62   ;;  %vm10365_vm3 = vmmov 0   ;;  %vm2131_vm4 = vcmask 1031168   ;;  %vm3138_vm5 = vcmask 506880   ;;  %vm4145_vm6 = vcmask 498688  }
   0xf   : > { %s12788_s13 = smov (!%p161_p3, %s9405_s13), 1  ;;  %10341 = vset.pattern.permute.xlu0 %v12746_v0  ;;  %10342 = vset.pattern.permute.xlu1 %v12746_v0  ;;  %s10366_s25 = smov 61   ;;  %vm5152_vm7 = vcmask 490496   ;;  %vm6261_vm8 = vcmask 1014784   ;;  %vm7268_vm9 = vcmask 1006592   ;;  %vm8275_vm10 = vcmask 998400  }
  0x10   : > { %s10320_s14 = smul.u32 280, %s12788_s13  ;;  %s10367_s28 = smov 60  }
  0x11   : > { %s10368_s6 = smov 124   ;;  %s10369_s7 = smov 123  }
  0x12   : > { %s10407_s17 = scalar_lea.vmem %s12740_s0, %s10320_s14  ;;  %s10370_s14 = smov 122  }
  0x13   : > { %v174_v1 = vld [vmem:[%s10407_s17 + $0x10] sm:$0xff]  ;;  %v172_v2 = vld [vmem:[%s10407_s17] sm:$0xff]  ;;  %v173_v6 = vld [vmem:[%s10407_s17 + $0x8] sm:$0xff]  ;;  %s10321_s23 = smul.u32 528, %s12788_s13 }
  0x14   : > { %v176_v3 = vld [vmem:[%s10407_s17 + $0x20] sm:$0xff]  ;;  %v10414_v4 = vpack.c.bf16 %v174_v1, %v174_v1  ;;  %v10416_v5 = vpack.c.bf16 %v172_v2, %v172_v2  ;;  %v10425_v8 = vpack.c.bf16 %v173_v6, %v173_v6  ;;  %v178_v9 = vld [vmem:[%s10407_s17 + $0x30] sm:$0xff]  ;;  %v177_v10 = vld [vmem:[%s10407_s17 + $0x28] sm:$0xff] }
  0x15   : > { %v10423_v7 = vpack.c.bf16 %v176_v3, %v176_v3  ;;  %v10433_v11 = vpack.c.bf16 %v178_v9, %v178_v9  ;;  %v10435_v12 = vpack.c.bf16 %v177_v10, %v177_v10  ;;  %v180_v13 = vld [vmem:[%s10407_s17 + $0x40] sm:$0xff]  ;;  %v175_v14 = vld [vmem:[%s10407_s17 + $0x18] sm:$0xff]  ;;  %v182_v17 = vld [vmem:[%s10407_s17 + $0x50] sm:$0xff]  ;;  %s12597_s26 = scalar_lea.vmem %s12743_s3, %s10321_s23 }
  0x16   : > { %12765 = vst [vmem:[#allocation2_spill] sm:$0xff] %v10414_v4  ;;  %12766 = vst [vmem:[#allocation3_spill] sm:$0xff] %v10416_v5  ;;  %288 = vrot.lane.b32.xlu1 %v10414_v4, %s10361_s18  ;;  %284 = vrot.lane.b32.xlu0 %v10416_v5, %s10361_s18  ;;  %v10443_v15 = vpack.c.bf16 %v180_v13, %v180_v13  ;;  %v10445_v16 = vpack.c.bf16 %v175_v14, %v175_v14  ;;  %v181_v18 = vld [vmem:[%s10407_s17 + $0x48] sm:$0xff]  ;;  %v184_v21 = vld [vmem:[%s10407_s17 + $0x60] sm:$0xff] }
  0x17   : > { %12767 = vst [vmem:[#allocation4_spill] sm:$0xff] %v10425_v8  ;;  %v10453_v19 = vpack.c.bf16 %v182_v17, %v182_v17  ;;  %v10455_v20 = vpack.c.bf16 %v181_v18, %v181_v18  ;;  %v179_v22 = vld [vmem:[%s10407_s17 + $0x38] sm:$0xff]  ;;  %v10463_v23 = vpack.c.bf16 %v184_v21, %v184_v21  ;;  %v186_v25 = vld [vmem:[%s10407_s17 + $0x70] sm:$0xff]  ;;  %v185_v26 = vld [vmem:[%s10407_s17 + $0x68] sm:$0xff] }
  0x18   : > { %v10465_v24 = vpack.c.bf16 %v179_v22, %v179_v22  ;;  %v10473_v27 = vpack.c.bf16 %v186_v25, %v186_v25  ;;  %v10475_v28 = vpack.c.bf16 %v185_v26, %v185_v26  ;;  %v188_v29 = vld [vmem:[%s10407_s17 + $0x80] sm:$0xff]  ;;  %v183_v30 = vld [vmem:[%s10407_s17 + $0x58] sm:$0xff]  ;;  %v190_v33 = vld [vmem:[%s10407_s17 + $0x90] sm:$0xff] }
  0x19   : > { %v10483_v31 = vpack.c.bf16 %v188_v29, %v188_v29  ;;  %v10485_v32 = vpack.c.bf16 %v183_v30, %v183_v30  ;;  %v189_v34 = vld [vmem:[%s10407_s17 + $0x88] sm:$0xff]  ;;  %v10493_v35 = vpack.c.bf16 %v190_v33, %v190_v33  ;;  %v192_v37 = vld [vmem:[%s10407_s17 + $0xa0] sm:$0xff]  ;;  %v187_v38 = vld [vmem:[%s10407_s17 + $0x78] sm:$0xff] }
  0x1a   : > { %292 = vrot.lane.b32.xlu1 %v10423_v7, %s10361_s18  ;;  %286 = vrot.lane.b32.xlu0 %v10425_v8, %s10361_s18  ;;  %v10495_v36 = vpack.c.bf16 %v189_v34, %v189_v34  ;;  %v10503_v39 = vpack.c.bf16 %v192_v37, %v192_v37  ;;  %v10505_v40 = vpack.c.bf16 %v187_v38, %v187_v38  ;;  %v194_v41 = vld [vmem:[%s10407_s17 + $0xb0] sm:$0xff]  ;;  %v193_v42 = vld [vmem:[%s10407_s17 + $0xa8] sm:$0xff] }
  0x1b   : > { %v10513_v43 = vpack.c.bf16 %v194_v41, %v194_v41  ;;  %v10515_v44 = vpack.c.bf16 %v193_v42, %v193_v42  ;;  %v196_v45 = vld [vmem:[%s10407_s17 + $0xc0] sm:$0xff]  ;;  %v191_v46 = vld [vmem:[%s10407_s17 + $0x98] sm:$0xff]  ;;  %v198_v49 = vld [vmem:[%s10407_s17 + $0xd0] sm:$0xff] }
  0x1c   : > { %v10523_v47 = vpack.c.bf16 %v196_v45, %v196_v45  ;;  %v10525_v48 = vpack.c.bf16 %v191_v46, %v191_v46  ;;  %v197_v50 = vld [vmem:[%s10407_s17 + $0xc8] sm:$0xff]  ;;  %v10533_v51 = vpack.c.bf16 %v198_v49, %v198_v49  ;;  %v200_v53 = vld [vmem:[%s10407_s17 + $0xe0] sm:$0xff]  ;;  %v195_v54 = vld [vmem:[%s10407_s17 + $0xb8] sm:$0xff] }
  0x1d   : > { %v10535_v52 = vpack.c.bf16 %v197_v50, %v197_v50  ;;  %v10543_v55 = vpack.c.bf16 %v200_v53, %v200_v53  ;;  %v10545_v56 = vpack.c.bf16 %v195_v54, %v195_v54  ;;  %v202_v57 = vld [vmem:[%s10407_s17 + $0xf0] sm:$0xff]  ;;  %v201_v58 = vld [vmem:[%s10407_s17 + $0xe8] sm:$0xff]  ;;  %v204_v61 = vld [vmem:[%s10407_s17 + $0x100] sm:$0xff] }
  0x1e   : > { %296 = vrot.lane.b32.xlu1 %v10433_v11, %s10361_s18  ;;  %294 = vrot.lane.b32.xlu0 %v10435_v12, %s10361_s18  ;;  %v10553_v59 = vpack.c.bf16 %v202_v57, %v202_v57  ;;  %v10555_v60 = vpack.c.bf16 %v201_v58, %v201_v58  ;;  %v199_v62 = vld [vmem:[%s10407_s17 + $0xd8] sm:$0xff]  ;;  %v10563_v63 = vpack.c.bf16 %v204_v61, %v204_v61  ;;  %v240_v3 = vld [vmem:[%s10407_s17 + $0x108] sm:$0xff] }
  0x1f   : > { %12768 = vst [vmem:[#allocation5_spill] sm:$0xff] %v10543_v55  ;;  %12769 = vst [vmem:[#allocation6_spill] sm:$0xff] %v10545_v56  ;;  %v10565_v1 = vpack.c.bf16 %v199_v62, %v199_v62  ;;  %v203_v2 = vld [vmem:[%s10407_s17 + $0xf8] sm:$0xff]  ;;  %v10575_v9 = vpack.c.bf16 %v240_v3, %v240_v3  ;;  %v10640_v25 = vld [vmem:[%s12741_s1 + $0x8] sm:$0x3f]  }
  0x20   : > { %12770 = vst [vmem:[#allocation7_spill] sm:$0xff] %v10553_v59  ;;  %12771 = vst [vmem:[#allocation8_spill] sm:$0xff] %v10555_v60  ;;  %v10573_v6 = vpack.c.bf16 %v203_v2, %v203_v2 }
  0x21   : > { %12772 = vst [vmem:[#allocation9_spill] sm:$0xff] %v10565_v1  ;;  %12774 = vst [vmem:[#allocation11_spill] sm:$0xff] %v10575_v9 }
  0x22   : > { %300 = vrot.lane.b32.xlu1 %v10443_v15, %s10361_s18  ;;  %290 = vrot.lane.b32.xlu0 %v10445_v16, %s10361_s18  ;;  %12773 = vst [vmem:[#allocation10_spill] sm:$0xff] %v10573_v6 }
  0x26   : > { %304 = vrot.lane.b32.xlu1 %v10453_v19, %s10361_s18  ;;  %302 = vrot.lane.b32.xlu0 %v10455_v20, %s10361_s18 }
  0x2a   : > { %308 = vrot.lane.b32.xlu1 %v10463_v23, %s10361_s18  ;;  %298 = vrot.lane.b32.xlu0 %v10465_v24, %s10361_s18 }
  0x2e   : > { %312 = vrot.lane.b32.xlu1 %v10473_v27, %s10361_s18  ;;  %310 = vrot.lane.b32.xlu0 %v10475_v28, %s10361_s18 }
  0x32   : > { %316 = vrot.lane.b32.xlu1 %v10483_v31, %s10361_s18  ;;  %306 = vrot.lane.b32.xlu0 %v10485_v32, %s10361_s18 }
  0x36   : > { %320 = vrot.lane.b32.xlu1 %v10493_v35, %s10361_s18  ;;  %318 = vrot.lane.b32.xlu0 %v10495_v36, %s10361_s18 }
  0x3a   : > { %324 = vrot.lane.b32.xlu1 %v10503_v39, %s10361_s18  ;;  %314 = vrot.lane.b32.xlu0 %v10505_v40, %s10361_s18 }
  0x3e   : > { %328 = vrot.lane.b32.xlu1 %v10513_v43, %s10361_s18  ;;  %326 = vrot.lane.b32.xlu0 %v10515_v44, %s10361_s18 }
  0x42   : > { %332 = vrot.lane.b32.xlu1 %v10523_v47, %s10361_s18  ;;  %322 = vrot.lane.b32.xlu0 %v10525_v48, %s10361_s18 }
  0x46   : > { %336 = vrot.lane.b32.xlu1 %v10533_v51, %s10361_s18  ;;  %334 = vrot.lane.b32.xlu0 %v10535_v52, %s10361_s18 }
  0x4a   : > { %340 = vrot.lane.b32.xlu1 %v10543_v55, %s10361_s18  ;;  %330 = vrot.lane.b32.xlu0 %v10545_v56, %s10361_s18 }
  0x4e   : > { %344 = vrot.lane.b32.xlu1 %v10553_v59, %s10361_s18  ;;  %342 = vrot.lane.b32.xlu0 %v10555_v60, %s10361_s18 }
  0x52   : > { %348 = vrot.lane.b32.xlu1 %v10563_v63, %s10361_s18  ;;  %338 = vrot.lane.b32.xlu0 %v10565_v1, %s10361_s18 }
  0x56   : > { %346 = vrot.lane.b32.xlu1 %v10573_v6, %s10361_s18  ;;  %350 = vrot.lane.b32.xlu0 %v10575_v9, %s10361_s18 }
  0x5a   : > { %2063 = vrot.lane.b32.xlu0 %v10416_v5, %s10362_s19  ;;  %2065 = vrot.lane.b32.xlu1 %v10425_v8, %s10362_s19 }
  0x5e   : > { %2067 = vrot.lane.b32.xlu0 %v10414_v4, %s10362_s19  ;;  %2071 = vrot.lane.b32.xlu1 %v10423_v7, %s10362_s19 }
  0x62   : > { %2073 = vrot.lane.b32.xlu0 %v10435_v12, %s10362_s19  ;;  %2075 = vrot.lane.b32.xlu1 %v10433_v11, %s10362_s19 }
  0x66   : > { %2069 = vrot.lane.b32.xlu0 %v10445_v16, %s10362_s19  ;;  %2079 = vrot.lane.b32.xlu1 %v10443_v15, %s10362_s19 }
  0x6a   : > { %2081 = vrot.lane.b32.xlu0 %v10455_v20, %s10362_s19  ;;  %2083 = vrot.lane.b32.xlu1 %v10453_v19, %s10362_s19 }
  0x6e   : > { %2077 = vrot.lane.b32.xlu0 %v10465_v24, %s10362_s19  ;;  %2087 = vrot.lane.b32.xlu1 %v10463_v23, %s10362_s19 }
  0x72   : > { %2089 = vrot.lane.b32.xlu0 %v10475_v28, %s10362_s19  ;;  %2091 = vrot.lane.b32.xlu1 %v10473_v27, %s10362_s19 }
  0x76   : > { %2085 = vrot.lane.b32.xlu0 %v10485_v32, %s10362_s19  ;;  %2095 = vrot.lane.b32.xlu1 %v10483_v31, %s10362_s19 }
  0x7a   : > { %2097 = vrot.lane.b32.xlu0 %v10495_v36, %s10362_s19  ;;  %2099 = vrot.lane.b32.xlu1 %v10493_v35, %s10362_s19 }
  0x7e   : > { %2093 = vrot.lane.b32.xlu0 %v10505_v40, %s10362_s19  ;;  %2103 = vrot.lane.b32.xlu1 %v10503_v39, %s10362_s19 }
  0x82   : > { %2105 = vrot.lane.b32.xlu0 %v10515_v44, %s10362_s19  ;;  %2107 = vrot.lane.b32.xlu1 %v10513_v43, %s10362_s19 }
  0x86   : > { %2101 = vrot.lane.b32.xlu0 %v10525_v48, %s10362_s19  ;;  %2111 = vrot.lane.b32.xlu1 %v10523_v47, %s10362_s19 }
  0x88   : > { %v289_v10 = vpop.permute.xlu1 %288  ;;  %v285_v13 = vpop.permute.xlu0 %284 }
  0x8a   : > { %2113 = vrot.lane.b32.xlu0 %v10535_v52, %s10362_s19  ;;  %2115 = vrot.lane.b32.xlu1 %v10533_v51, %s10362_s19 }
  0x8c   : > { %v293_v14 = vpop.permute.xlu1 %292  ;;  %v287_v17 = vpop.permute.xlu0 %286 }
  0x8d   : > { %v354_v18 = vsel %vm352_vm0, %v287_v17, %v289_v10  ;;  %v353_v21 = vsel %vm352_vm0, %v285_v13, %v287_v17 }
  0x8e   : > { %9415 = vmatprep.subr.msk.bf16.mxu0 %vm390_vm1, %v354_v18  ;;  %v392_v22 = vsel %vm390_vm1, %v353_v21, 0  ;;  %2109 = vrot.lane.b32.xlu0 %v10545_v56, %s10362_s19 }
  0x8f   : > { %491 = vmatpush1.bf16.msra.mxu0 %v392_v22  ;;  %2119 = vrot.lane.b32.xlu1 %v10543_v55, %s10362_s19 }
  0x90   : > { %v297_v26 = vpop.permute.xlu1 %296  ;;  %v295_v29 = vpop.permute.xlu0 %294 }
  0x91   : > { %v357_v30 = vsel %vm352_vm0, %v293_v14, %v295_v29  ;;  %v358_v33 = vsel %vm352_vm0, %v295_v29, %v297_v26 }
  0x92   : > { %9416 = vmatmul.mubr.msk.bf16.vlgmr.msra.gmra.mrb[0].mxu0 %vm386_vm2, %v10640_v25  ;;  %9419 = vmatprep.subr.msk.bf16.mxu0 %vm390_vm1, %v358_v33  ;;  %v404_v34 = vsel %vm390_vm1, %v357_v30, 0 }
  0x93   : > { %577 = vmatpush1.bf16.msra.mxu0 %v404_v34  ;;  %608 = vmatprep.mubr.bf16.mxu0 %v12746_v0 }
  0x94   : > { %v301_v37 = vpop.permute.xlu1 %300  ;;  %v291_v38 = vpop.permute.xlu0 %290  ;;  %2121 = vrot.lane.b32.xlu0 %v10555_v60, %s10362_s19  ;;  %2123 = vrot.lane.b32.xlu1 %v10553_v59, %s10362_s19 }
  0x95   : > { %v356_v41 = vsel %vm352_vm0, %v291_v38, %v293_v14  ;;  %v355_v42 = vsel %vm352_vm0, %v289_v10, %v291_v38 }
  0x96   : > { %9417 = vmatprep.subr.msk.bf16.mxu1 %vm390_vm1, %v356_v41  ;;  %v398_v45 = vsel %vm390_vm1, %v355_v42, 0 }
  0x97   : > { %534 = vmatpush1.bf16.msra.mxu1 %v398_v45 }
  0x98   : > { %v305_v46 = vpop.permute.xlu1 %304  ;;  %v303_v49 = vpop.permute.xlu0 %302  ;;  %2117 = vrot.lane.b32.xlu0 %v10565_v1, %s10362_s19  ;;  %2127 = vrot.lane.b32.xlu1 %v10563_v63, %s10362_s19 }
  0x99   : > { %v361_v50 = vsel %vm352_vm0, %v301_v37, %v303_v49  ;;  %v362_v53 = vsel %vm352_vm0, %v303_v49, %v305_v46 }
  0x9a   : > { %9418 = vmatmul.mubr.msk.bf16.vlgmr.msra.gmra.mrb[0].mxu1 %vm386_vm2, %v10640_v25  ;;  %9420 = vmatmul.mubr.msk.bf16.vlgmr.msra.gmra.mrb[4].mxu0 %vm386_vm2, %v10640_v25  ;;  %v416_v54 = vsel %vm390_vm1, %v361_v50, 0 }
  0x9b   : > { %9423 = vmatprep.subr.msk.bf16.mxu0 %vm390_vm1, %v362_v53  ;;  %651 = vmatprep.mubr.bf16.mxu1 %v12746_v0 }
  0x9c   : > { %663 = vmatpush1.bf16.msra.mxu0 %v416_v54  ;;  %v309_v57 = vpop.permute.xlu1 %308  ;;  %v299_v58 = vpop.permute.xlu0 %298  ;;  %694 = vmatprep.mubr.bf16.mxu0 %v12746_v0 }
  0x9d   : > { %v359_v61 = vsel %vm352_vm0, %v297_v26, %v299_v58  ;;  %v360_v62 = vsel %vm352_vm0, %v299_v58, %v301_v37  ;;  %2129 = vrot.lane.b32.xlu0 %v10575_v9, %s10362_s19  ;;  %2125 = vrot.lane.b32.xlu1 %v10573_v6, %s10362_s19 }
  0x9e   : > { %9421 = vmatprep.subr.msk.bf16.mxu1 %vm390_vm1, %v360_v62  ;;  %v410_v2 = vsel %vm390_vm1, %v359_v61, 0 }
  0x9f   : > { %620 = vmatpush1.bf16.msra.mxu1 %v410_v2 }
  0xa0   : > { %v313_v3 = vpop.permute.xlu1 %312  ;;  %v311_v10 = vpop.permute.xlu0 %310 }
  0xa1   : > { %v365_v13 = vsel %vm352_vm0, %v309_v57, %v311_v10  ;;  %v366_v14 = vsel %vm352_vm0, %v311_v10, %v313_v3  ;;  %3070 = vrot.lane.b32.xlu0 %v10416_v5, %s10363_s22  ;;  %3072 = vrot.lane.b32.xlu1 %v10425_v8, %s10363_s22 }
  0xa2   : > { %9422 = vmatmul.mubr.msk.bf16.vlgmr.msra.gmra.mrb[4].mxu1 %vm386_vm2, %v10640_v25  ;;  %9424 = vmatmul.mubr.msk.bf16.vlgmr.msra.gmra.mrb[8].mxu0 %vm386_vm2, %v10640_v25  ;;  %v428_v17 = vsel %vm390_vm1, %v365_v13, 0 }
  0xa3   : > { %9427 = vmatprep.subr.msk.bf16.mxu0 %vm390_vm1, %v366_v14  ;;  %737 = vmatprep.mubr.bf16.mxu1 %v12746_v0 }
  0xa4   : > { %749 = vmatpush1.bf16.msra.mxu0 %v428_v17  ;;  %v317_v18 = vpop.permute.xlu1 %316  ;;  %v307_v21 = vpop.permute.xlu0 %306  ;;  %780 = vmatprep.mubr.bf16.mxu0 %v12746_v0 }
  0xa5   : > { %v363_v22 = vsel %vm352_vm0, %v305_v46, %v307_v21  ;;  %v364_v26 = vsel %vm352_vm0, %v307_v21, %v309_v57  ;;  %3074 = vrot.lane.b32.xlu0 %v10414_v4, %s10363_s22  ;;  %3076 = vrot.lane.b32.xlu1 %v10445_v16, %s10363_s22 }
  0xa6   : > { %9425 = vmatprep.subr.msk.bf16.mxu1 %vm390_vm1, %v364_v26  ;;  %v422_v29 = vsel %vm390_vm1, %v363_v22, 0 }
  0xa7   : > { %706 = vmatpush1.bf16.msra.mxu1 %v422_v29 }
  0xa8   : > { %v321_v30 = vpop.permute.xlu1 %320  ;;  %v319_v33 = vpop.permute.xlu0 %318 }
  0xa9   : > { %v369_v34 = vsel %vm352_vm0, %v317_v18, %v319_v33  ;;  %v370_v37 = vsel %vm352_vm0, %v319_v33, %v321_v30  ;;  %3078 = vrot.lane.b32.xlu0 %v10423_v7, %s10363_s22  ;;  %3080 = vrot.lane.b32.xlu1 %v10435_v12, %s10363_s22 }
  0xaa   : > { %9426 = vmatmul.mubr.msk.bf16.vlgmr.msra.gmra.mrb[8].mxu1 %vm386_vm2, %v10640_v25  ;;  %9428 = vmatmul.mubr.msk.bf16.vlgmr.msra.gmra.mrb[12].mxu0 %vm386_vm2, %v10640_v25  ;;  %v440_v38 = vsel %vm390_vm1, %v369_v34, 0 }
  0xab   : > { %9431 = vmatprep.subr.msk.bf16.mxu0 %vm390_vm1, %v370_v37  ;;  %823 = vmatprep.mubr.bf16.mxu1 %v12746_v0 }
  0xac   : > { %835 = vmatpush1.bf16.msra.mxu0 %v440_v38  ;;  %v325_v41 = vpop.permute.xlu1 %324  ;;  %v315_v42 = vpop.permute.xlu0 %314  ;;  %866 = vmatprep.mubr.bf16.mxu0 %v12746_v0 }
  0xad   : > { %v367_v45 = vsel %vm352_vm0, %v313_v3, %v315_v42  ;;  %v368_v46 = vsel %vm352_vm0, %v315_v42, %v317_v18  ;;  %3082 = vrot.lane.b32.xlu0 %v10433_v11, %s10363_s22  ;;  %3084 = vrot.lane.b32.xlu1 %v10465_v24, %s10363_s22 }
  0xae   : > { %9429 = vmatprep.subr.msk.bf16.mxu1 %vm390_vm1, %v368_v46  ;;  %v434_v49 = vsel %vm390_vm1, %v367_v45, 0 }
  0xaf   : > { %792 = vmatpush1.bf16.msra.mxu1 %v434_v49 }
  0xb0   : > { %v329_v50 = vpop.permute.xlu1 %328  ;;  %v327_v53 = vpop.permute.xlu0 %326 }
  0xb1   : > { %v373_v54 = vsel %vm352_vm0, %v325_v41, %v327_v53  ;;  %v374_v57 = vsel %vm352_vm0, %v327_v53, %v329_v50  ;;  %3086 = vrot.lane.b32.xlu0 %v10443_v15, %s10363_s22  ;;  %3088 = vrot.lane.b32.xlu1 %v10455_v20, %s10363_s22  ;;  %v12744_v53 = vmov 0.0  }
  0xb2   : > { %9430 = vmatmul.mubr.msk.bf16.vlgmr.msra.gmra.mrb[12].mxu1 %vm386_vm2, %v10640_v25  ;;  %9432 = vmatmul.mubr.msk.bf16.vlgmr.msra.gmra.mrb[16].mxu0 %vm386_vm2, %v10640_v25  ;;  %v452_v58 = vsel %vm390_vm1, %v373_v54, 0 }
  0xb3   : > { %9435 = vmatprep.subr.msk.bf16.mxu0 %vm390_vm1, %v374_v57  ;;  %909 = vmatprep.mubr.bf16.mxu1 %v12746_v0 }
  0xb4   : > { %921 = vmatpush1.bf16.msra.mxu0 %v452_v58  ;;  %v333_v61 = vpop.permute.xlu1 %332  ;;  %v323_v62 = vpop.permute.xlu0 %322  ;;  %952 = vmatprep.mubr.bf16.mxu0 %v12746_v0 }
  0xb5   : > { %v371_v2 = vsel %vm352_vm0, %v321_v30, %v323_v62  ;;  %v372_v3 = vsel %vm352_vm0, %v323_v62, %v325_v41  ;;  %3090 = vrot.lane.b32.xlu0 %v10453_v19, %s10363_s22  ;;  %3092 = vrot.lane.b32.xlu1 %v10485_v32, %s10363_s22 }
  0xb6   : > { %9433 = vmatprep.subr.msk.bf16.mxu1 %vm390_vm1, %v372_v3  ;;  %v446_v10 = vsel %vm390_vm1, %v371_v2, 0 }
  0xb7   : > { %878 = vmatpush1.bf16.msra.mxu1 %v446_v10 }
  0xb8   : > { %v337_v13 = vpop.permute.xlu1 %336  ;;  %v335_v14 = vpop.permute.xlu0 %334 }
  0xb9   : > { %v377_v17 = vsel %vm352_vm0, %v333_v61, %v335_v14  ;;  %v378_v18 = vsel %vm352_vm0, %v335_v14, %v337_v13  ;;  %3094 = vrot.lane.b32.xlu0 %v10463_v23, %s10363_s22  ;;  %3096 = vrot.lane.b32.xlu1 %v10475_v28, %s10363_s22 }
  0xba   : > { %9434 = vmatmul.mubr.msk.bf16.vlgmr.msra.gmra.mrb[16].mxu1 %vm386_vm2, %v10640_v25  ;;  %9436 = vmatmul.mubr.msk.bf16.vlgmr.msra.gmra.mrb[20].mxu0 %vm386_vm2, %v10640_v25  ;;  %v464_v21 = vsel %vm390_vm1, %v377_v17, 0  ;;  %v1228_v17 = vsel %vm390_vm1, %v10416_v5, 0 }
  0xbb   : > { %9439 = vmatprep.subr.msk.bf16.mxu0 %vm390_vm1, %v378_v18  ;;  %995 = vmatprep.mubr.bf16.mxu1 %v12746_v0  ;;  %v1234_v18 = vsel %vm390_vm1, %v10414_v4, 0 }
  0xbc   : > { %1007 = vmatpush1.bf16.msra.mxu0 %v464_v21  ;;  %v341_v22 = vpop.permute.xlu1 %340  ;;  %v331_v26 = vpop.permute.xlu0 %330  ;;  %1038 = vmatprep.mubr.bf16.mxu0 %v12746_v0 }
  0xbd   : > { %v375_v29 = vsel %vm352_vm0, %v329_v50, %v331_v26  ;;  %v376_v30 = vsel %vm352_vm0, %v331_v26, %v333_v61  ;;  %3098 = vrot.lane.b32.xlu0 %v10473_v27, %s10363_s22  ;;  %3100 = vrot.lane.b32.xlu1 %v10505_v40, %s10363_s22 }
  0xbe   : > { %9437 = vmatprep.subr.msk.bf16.mxu1 %vm390_vm1, %v376_v30  ;;  %v458_v33 = vsel %vm390_vm1, %v375_v29, 0  ;;  %v1240_v30 = vsel %vm390_vm1, %v10423_v7, 0 }
  0xbf   : > { %964 = vmatpush1.bf16.msra.mxu1 %v458_v33  ;;  %v1246_v33 = vsel %vm390_vm1, %v10433_v11, 0 }
  0xc0   : > { %v345_v34 = vpop.permute.xlu1 %344  ;;  %v343_v37 = vpop.permute.xlu0 %342 }
  0xc1   : > { %v381_v38 = vsel %vm352_vm0, %v341_v22, %v343_v37  ;;  %v382_v41 = vsel %vm352_vm0, %v343_v37, %v345_v34  ;;  %3102 = vrot.lane.b32.xlu0 %v10483_v31, %s10363_s22  ;;  %3104 = vrot.lane.b32.xlu1 %v10495_v36, %s10363_s22 }
  0xc2   : > { %9438 = vmatmul.mubr.msk.bf16.vlgmr.msra.gmra.mrb[20].mxu1 %vm386_vm2, %v10640_v25  ;;  %9440 = vmatmul.mubr.msk.bf16.vlgmr.msra.gmra.mrb[24].mxu0 %vm386_vm2, %v10640_v25  ;;  %v476_v42 = vsel %vm390_vm1, %v381_v38, 0 }
  0xc3   : > { %9443 = vmatprep.subr.msk.bf16.mxu0 %vm390_vm1, %v382_v41  ;;  %1081 = vmatprep.mubr.bf16.mxu1 %v12746_v0 }
  0xc4   : > { %1093 = vmatpush1.bf16.msra.mxu0 %v476_v42  ;;  %v349_v45 = vpop.permute.xlu1 %348  ;;  %v339_v46 = vpop.permute.xlu0 %338  ;;  %1124 = vmatprep.mubr.bf16.mxu0 %v12746_v0  ;;  %v1252_v42 = vsel %vm390_vm1, %v10443_v15, 0 }
  0xc5   : > { %v379_v49 = vsel %vm352_vm0, %v337_v13, %v339_v46  ;;  %v380_v50 = vsel %vm352_vm0, %v339_v46, %v341_v22  ;;  %9754 = vmatprep.subr.bf16.mxu0 %v12744_v53  ;;  %3106 = vrot.lane.b32.xlu0 %v10493_v35, %s10363_s22 }
  0xc6   : > { %9441 = vmatprep.subr.msk.bf16.mxu1 %vm390_vm1, %v380_v50  ;;  %v470_v54 = vsel %vm390_vm1, %v379_v49, 0  ;;  %3108 = vrot.lane.b32.xlu1 %v10525_v48, %s10363_s22 }
  0xc7   : > { %1050 = vmatpush1.bf16.msra.mxu1 %v470_v54 }
  0xc8   : > { %v347_v57 = vpop.permute.xlu1 %346  ;;  %v351_v58 = vpop.permute.xlu0 %350 }
  0xc9   : > { %v383_v61 = vsel %vm352_vm0, %v345_v34, %v347_v57  ;;  %v385_v62 = vsel %vm352_vm0, %v349_v45, %v351_v58  ;;  %v384_v2 = vsel %vm352_vm0, %v347_v57, %v349_v45  ;;  %3110 = vrot.lane.b32.xlu0 %v10503_v39, %s10363_s22  ;;  %v1258_v45 = vsel %vm390_vm1, %v10453_v19, 0 }
  0xca   : > { %v488_v3 = vsel %vm390_vm1, %v385_v62, 0  ;;  %9442 = vmatmul.mubr.msk.bf16.vlgmr.msra.gmra.mrb[24].mxu1 %vm386_vm2, %v10640_v25  ;;  %9444 = vmatmul.mubr.msk.bf16.vlgmr.msra.gmra.mrb[28].mxu0 %vm386_vm2, %v10640_v25  ;;  %v482_v10 = vsel %vm390_vm1, %v383_v61, 0  ;;  %v1264_v57 = vsel %vm390_vm1, %v10463_v23, 0  ;;  %v1270_v58 = vsel %vm390_vm1, %v10473_v27, 0 }
  0xcb   : > { %9445 = vmatprep.subr.msk.bf16.mxu1 %vm390_vm1, %v384_v2  ;;  %9755 = vmatpush3.bf16.msra.mxu0 %v488_v3 }
  0xcc   : > { %1136 = vmatpush1.bf16.msra.mxu1 %v482_v10  ;;  %1167 = vmatprep.mubr.bf16.mxu1 %v12746_v0  ;;  %v10807_v13 = vpop.permute.xlu0 %2063  ;;  %v10809_v14 = vpop.permute.xlu1 %2065  ;;  %v1276_v10 = vsel %vm390_vm1, %v10483_v31, 0 }
  0xcd   : > { %9756 = vmatprep.mubr.msk.bf16.mxu0 %vm10365_vm3, %v12744_v53  ;;  %9449 = vmatprep.subr.msk.bf16.mxu0 %vm390_vm1, %v10425_v8  ;;  %v1306_v53 = vsel %vm390_vm1, %v10533_v51, 0 }
  0xce   : > { %9451 = vmatprep.subr.msk.bf16.mxu1 %vm390_vm1, %v10445_v16  ;;  %3112 = vrot.lane.b32.xlu1 %v10515_v44, %s10363_s22 }
  0xcf   : > { %3114 = vrot.lane.b32.xlu0 %v10513_v43, %s10363_s22 }
  0xd0   : > { %v10825_v21 = vpop.permute.xlu0 %2067  ;;  %v10827_v22 = vpop.permute.xlu1 %2071 }
  0xd2   : > { %9446 = vmatmul.mubr.msk.bf16.vlgmr.msra.gmra.mrb[28].mxu1 %vm386_vm2, %v10640_v25  ;;  %9757 = vmatmul.mubr.msk.bf16.vlgmr.msra.gmra.mrb[32].mxu0 %vm386_vm2, %v10640_v25  ;;  %v10846_v25 = vld [vmem:[%s12741_s1] sm:$0x3f]  }
  0xd3   : > { %1327 = vmatpush1.bf16.msra.mxu0 %v1228_v17  ;;  %1370 = vmatpush1.bf16.msra.mxu1 %v1234_v18  ;;  %v1282_v17 = vsel %vm390_vm1, %v10493_v35, 0 }
  0xd4   : > { %1358 = vmatprep.mubr.bf16.mxu0 %v12746_v0  ;;  %1401 = vmatprep.mubr.bf16.mxu1 %v12746_v0  ;;  %v10835_v26 = vpop.permute.xlu0 %2073  ;;  %v10837_v29 = vpop.permute.xlu1 %2075 }
  0xd5   : > { %9453 = vmatprep.subr.msk.bf16.mxu0 %vm390_vm1, %v10435_v12  ;;  %9455 = vmatprep.subr.msk.bf16.mxu1 %vm390_vm1, %v10465_v24 }
  0xd6   : > { %3116 = vrot.lane.b32.xlu1 %v10545_v56, %s10363_s22  ;;  %3118 = vrot.lane.b32.xlu0 %v10523_v47, %s10363_s22 }
  0xd8   : > { %v10856_v34 = vpop.permute.xlu0 %2069  ;;  %v10858_v37 = vpop.permute.xlu1 %2079 }
  0xda   : > { %9450 = vmatmul.mubr.msk.bf16.vlgmr.msra.gmra.mrb[0].mxu0 %vm386_vm2, %v10846_v25  ;;  %9452 = vmatmul.mubr.msk.bf16.vlgmr.msra.gmra.mrb[0].mxu1 %vm386_vm2, %v10846_v25 }
  0xdb   : > { %1413 = vmatpush1.bf16.msra.mxu0 %v1240_v30  ;;  %1456 = vmatpush1.bf16.msra.mxu1 %v1246_v33 }
  0xdc   : > { %1444 = vmatprep.mubr.bf16.mxu0 %v12746_v0  ;;  %1487 = vmatprep.mubr.bf16.mxu1 %v12746_v0  ;;  %v10866_v38 = vpop.permute.xlu0 %2081  ;;  %v10868_v41 = vpop.permute.xlu1 %2083 }
  0xdd   : > { %9457 = vmatprep.subr.msk.bf16.mxu0 %vm390_vm1, %v10455_v20  ;;  %9459 = vmatprep.subr.msk.bf16.mxu1 %vm390_vm1, %v10485_v32 }
  0xde   : > { %3120 = vrot.lane.b32.xlu1 %v10535_v52, %s10363_s22  ;;  %3122 = vrot.lane.b32.xlu0 %v10533_v51, %s10363_s22 }
  0xe0   : > { %v10882_v46 = vpop.permute.xlu0 %2077  ;;  %v10884_v49 = vpop.permute.xlu1 %2087 }
  0xe2   : > { %9454 = vmatmul.mubr.msk.bf16.vlgmr.msra.gmra.mrb[4].mxu0 %vm386_vm2, %v10846_v25  ;;  %9456 = vmatmul.mubr.msk.bf16.vlgmr.msra.gmra.mrb[4].mxu1 %vm386_vm2, %v10846_v25 }
  0xe3   : > { %1499 = vmatpush1.bf16.msra.mxu0 %v1252_v42  ;;  %1542 = vmatpush1.bf16.msra.mxu1 %v1258_v45  ;;  %v1288_v45 = vsel %vm390_vm1, %v10503_v39, 0 }
  0xe4   : > { %1530 = vmatprep.mubr.bf16.mxu0 %v12746_v0  ;;  %1573 = vmatprep.mubr.bf16.mxu1 %v12746_v0  ;;  %v10892_v50 = vpop.permute.xlu0 %2089  ;;  %v10894_v54 = vpop.permute.xlu1 %2091 }
  0xe5   : > { %9461 = vmatprep.subr.msk.bf16.mxu0 %vm390_vm1, %v10475_v28  ;;  %9463 = vmatprep.subr.msk.bf16.mxu1 %vm390_vm1, %v10505_v40 }
  0xe6   : > { %3124 = vrot.lane.b32.xlu1 %v10565_v1, %s10363_s22  ;;  %3126 = vrot.lane.b32.xlu0 %v10543_v55, %s10363_s22 }
  0xe8   : > { %v10908_v61 = vpop.permute.xlu0 %2085  ;;  %v10910_v62 = vpop.permute.xlu1 %2095 }
  0xea   : > { %9458 = vmatmul.mubr.msk.bf16.vlgmr.msra.gmra.mrb[8].mxu0 %vm386_vm2, %v10846_v25  ;;  %9460 = vmatmul.mubr.msk.bf16.vlgmr.msra.gmra.mrb[8].mxu1 %vm386_vm2, %v10846_v25 }
  0xeb   : > { %1585 = vmatpush1.bf16.msra.mxu0 %v1264_v57  ;;  %1628 = vmatpush1.bf16.msra.mxu1 %v1270_v58  ;;  %v1294_v57 = vsel %vm390_vm1, %v10513_v43, 0 }
  0xec   : > { %1616 = vmatprep.mubr.bf16.mxu0 %v12746_v0  ;;  %1659 = vmatprep.mubr.bf16.mxu1 %v12746_v0  ;;  %v10918_v2 = vpop.permute.xlu0 %2097  ;;  %v10920_v3 = vpop.permute.xlu1 %2099 }
  0xed   : > { %9465 = vmatprep.subr.msk.bf16.mxu0 %vm390_vm1, %v10495_v36  ;;  %9467 = vmatprep.subr.msk.bf16.mxu1 %vm390_vm1, %v10525_v48 }
  0xee   : > { %3128 = vrot.lane.b32.xlu1 %v10555_v60, %s10363_s22  ;;  %3130 = vrot.lane.b32.xlu0 %v10553_v59, %s10363_s22 }
  0xf0   : > { %v10934_v18 = vpop.permute.xlu0 %2093  ;;  %v10936_v30 = vpop.permute.xlu1 %2103 }
  0xf2   : > { %9462 = vmatmul.mubr.msk.bf16.vlgmr.msra.gmra.mrb[12].mxu0 %vm386_vm2, %v10846_v25  ;;  %9464 = vmatmul.mubr.msk.bf16.vlgmr.msra.gmra.mrb[12].mxu1 %vm386_vm2, %v10846_v25 }
  0xf3   : > { %1671 = vmatpush1.bf16.msra.mxu0 %v1276_v10  ;;  %1714 = vmatpush1.bf16.msra.mxu1 %v1282_v17 }
  0xf4   : > { %1702 = vmatprep.mubr.bf16.mxu0 %v12746_v0  ;;  %1745 = vmatprep.mubr.bf16.mxu1 %v12746_v0  ;;  %v10944_v33 = vpop.permute.xlu0 %2105  ;;  %v10946_v42 = vpop.permute.xlu1 %2107 }
  0xf5   : > { %9469 = vmatprep.subr.msk.bf16.mxu0 %vm390_vm1, %v10515_v44  ;;  %9471 = vmatprep.subr.msk.bf16.mxu1 %vm390_vm1, %v10545_v56 }
  0xf6   : > { %3132 = vrot.lane.b32.xlu1 %v10573_v6, %s10363_s22  ;;  %3134 = vrot.lane.b32.xlu0 %v10563_v63, %s10363_s22 }
  0xf8   : > { %v10960_v58 = vpop.permute.xlu0 %2101  ;;  %v10962_v10 = vpop.permute.xlu1 %2111 }
  0xfa   : > { %9466 = vmatmul.mubr.msk.bf16.vlgmr.msra.gmra.mrb[16].mxu0 %vm386_vm2, %v10846_v25  ;;  %9468 = vmatmul.mubr.msk.bf16.vlgmr.msra.gmra.mrb[16].mxu1 %vm386_vm2, %v10846_v25 }
  0xfb   : > { %1757 = vmatpush1.bf16.msra.mxu0 %v1288_v45  ;;  %1800 = vmatpush1.bf16.msra.mxu1 %v1294_v57  ;;  %v1300_v57 = vsel %vm390_vm1, %v10523_v47, 0 }
  0xfc   : > { %1788 = vmatprep.mubr.bf16.mxu0 %v12746_v0  ;;  %1831 = vmatprep.mubr.bf16.mxu1 %v12746_v0  ;;  %v10970_v17 = vpop.permute.xlu0 %2113  ;;  %v10980_v45 = vpop.permute.xlu1 %2115 }
  0xfd   : > { %9473 = vmatprep.subr.msk.bf16.mxu0 %vm390_vm1, %v10535_v52  ;;  %9475 = vmatprep.subr.msk.bf16.mxu1 %vm390_vm1, %v10565_v1  ;;  %v1318_v1 = vsel %vm390_vm1, %v10553_v59, 0  ;;  %v2132_v59 = vsel %vm2131_vm4, %v10807_v13, %v10809_v14  ;;  %v2136_v13 = vsel %vm2131_vm4, %v10827_v22, %v10835_v26 }
  0xfe   : > { %4077 = vrot.lane.b32.xlu1 %v10416_v5, %s10366_s25  ;;  %4079 = vrot.lane.b32.xlu0 %v10425_v8, %s10366_s25  ;;  %v12775_v5 = vmov 0  }
 0x100   : > { %v10986_v0 = vpop.permute.xlu0 %2109 }
 0x101   : > { %v10994_v8 = vpop.permute.xlu1 %2119 }
 0x102   : > { %9470 = vmatmul.mubr.msk.bf16.vlgmr.msra.gmra.mrb[20].mxu0 %vm386_vm2, %v10846_v25  ;;  %9472 = vmatmul.mubr.msk.bf16.vlgmr.msra.gmra.mrb[20].mxu1 %vm386_vm2, %v10846_v25 }
 0x103   : > { %1843 = vmatpush1.bf16.msra.mxu0 %v1300_v57  ;;  %1886 = vmatpush1.bf16.msra.mxu1 %v1306_v53  ;;  %v1312_v53 = vsel %vm390_vm1, %v10543_v55, 0 }
 0x104   : > { %1874 = vmatprep.mubr.bf16.mxu0 %v12775_v5  ;;  %1917 = vmatprep.mubr.bf16.mxu1 %v12775_v5 }
 0x105   : > { %9477 = vmatprep.subr.msk.bf16.mxu0 %vm390_vm1, %v10555_v60  ;;  %9479 = vmatprep.subr.msk.bf16.mxu1 %vm390_vm1, %v10573_v6  ;;  %v12776_v60 = vmov 0.0  }
 0x106   : > { %4081 = vrot.lane.b32.xlu1 %v10414_v4, %s10366_s25  ;;  %3136 = vrot.lane.b32.xlu0 %v10575_v9, %s10363_s22  ;;  %v11004_v57 = vpop.permute.xlu0 %2121  ;;  %v2133_v4 = vsel %vm2131_vm4, %v10809_v14, %v10825_v21  ;;  %v11017_v6 = vpop.permute.xlu1 %2123  ;;  %v11060_v14 = vld [vmem:[%s12741_s1 + $0x10] sm:$0x3f]  }
 0x10a   : > { %9474 = vmatmul.mubr.msk.bf16.vlgmr.msra.gmra.mrb[24].mxu0 %vm386_vm2, %v10846_v25  ;;  %9476 = vmatmul.mubr.msk.bf16.vlgmr.msra.gmra.mrb[24].mxu1 %vm386_vm2, %v10846_v25  ;;  %v11019_v9 = vpop.permute.xlu0 %2117  ;;  %v11035_v55 = vpop.permute.xlu1 %2127 }
 0x10b   : > { %1929 = vmatpush1.bf16.msra.mxu0 %v1312_v53  ;;  %1972 = vmatpush1.bf16.msra.mxu1 %v1318_v1  ;;  %v2169_v1 = vsel %vm390_vm1, %v2132_v59, 0  ;;  %v1324_v53 = vsel %vm390_vm1, %v10563_v63, 0  ;;  %v2137_v59 = vsel %vm2131_vm4, %v10835_v26, %v10837_v29 }
 0x10c   : > { %1960 = vmatprep.mubr.bf16.mxu0 %v12775_v5  ;;  %2003 = vmatprep.mubr.bf16.mxu1 %v12775_v5 }
 0x10d   : > { %9485 = vmatprep.subr.msk.bf16.mxu0 %vm390_vm1, %v2133_v4  ;;  %9760 = vmatprep.subr.bf16.mxu1 %v12776_v60  ;;  %v2135_v4 = vsel %vm2131_vm4, %v10856_v34, %v10827_v22  ;;  %v2134_v22 = vsel %vm2131_vm4, %v10825_v21, %v10856_v34  ;;  %v2141_v21 = vsel %vm2131_vm4, %v10866_v38, %v10868_v41 }
 0x10e   : > { %4085 = vrot.lane.b32.xlu1 %v10423_v7, %s10366_s25  ;;  %4087 = vrot.lane.b32.xlu0 %v10435_v12, %s10366_s25  ;;  %v2140_v34 = vsel %vm2131_vm4, %v10858_v37, %v10866_v38  ;;  %v2143_v38 = vsel %vm2131_vm4, %v10908_v61, %v10884_v49 }
 0x10f   : > { %v11037_v56 = vpop.permute.xlu0 %2129 }
 0x112   : > { %9478 = vmatmul.mubr.msk.bf16.vlgmr.msra.gmra.mrb[28].mxu0 %vm386_vm2, %v10846_v25  ;;  %9480 = vmatmul.mubr.msk.bf16.vlgmr.msra.gmra.mrb[28].mxu1 %vm386_vm2, %v10846_v25 }
 0x113   : > { %2268 = vmatpush1.bf16.msra.mxu0 %v2169_v1  ;;  %9761 = vmatpush3.bf16.msra.mxu1 %v1324_v53  ;;  %v11066_v1 = vpop.permute.xlu1 %2125  ;;  %v11071_v26 = vpop.permute.xlu0 %3070  ;;  %v2181_v53 = vsel %vm390_vm1, %v2136_v13, 0 }
 0x114   : > { %9762 = vmatprep.mubr.msk.bf16.mxu1 %vm10365_vm3, %v12776_v60  ;;  %2299 = vmatprep.mubr.bf16.mxu0 %v12775_v5 }
 0x115   : > { %9487 = vmatprep.subr.msk.bf16.mxu1 %vm390_vm1, %v2135_v4  ;;  %9489 = vmatprep.subr.msk.bf16.mxu0 %vm390_vm1, %v2137_v59  ;;  %v2175_v4 = vsel %vm390_vm1, %v2134_v22, 0  ;;  %v2139_v59 = vsel %vm2131_vm4, %v10882_v46, %v10858_v37  ;;  %v2138_v22 = vsel %vm2131_vm4, %v10837_v29, %v10882_v46  ;;  %v2144_v46 = vsel %vm2131_vm4, %v10884_v49, %v10892_v50 }
 0x116   : > { %4089 = vrot.lane.b32.xlu1 %v10433_v11, %s10366_s25  ;;  %4083 = vrot.lane.b32.xlu0 %v10445_v16, %s10366_s25  ;;  %v2187_v37 = vsel %vm390_vm1, %v2138_v22, 0 }
 0x117   : > { %v11094_v13 = vpop.permute.xlu0 %3074 }
 0x11a   : > { %9763 = vmatmul.mubr.msk.bf16.vlgmr.msra.gmra.mrb[32].mxu1 %vm386_vm2, %v10846_v25  ;;  %9486 = vmatmul.mubr.msk.bf16.vlgmr.msra.gmra.mrb[0].mxu0 %vm386_vm2, %v11060_v14  ;;  %v11087_v25 = vpop.permute.xlu1 %3072 }
 0x11b   : > { %2311 = vmatpush1.bf16.msra.mxu1 %v2175_v4  ;;  %2354 = vmatpush1.bf16.msra.mxu0 %v2181_v53  ;;  %v2193_v53 = vsel %vm390_vm1, %v2140_v34, 0  ;;  %v2145_v4 = vsel %vm2131_vm4, %v10892_v50, %v10894_v54  ;;  %v11117_v29 = vpop.permute.xlu0 %3078  ;;  %v2205_v34 = vsel %vm390_vm1, %v2144_v46, 0  ;;  %v2147_v50 = vsel %vm2131_vm4, %v10934_v18, %v10910_v62 }
 0x11c   : > { %2342 = vmatprep.mubr.bf16.mxu1 %v12775_v5  ;;  %2385 = vmatprep.mubr.bf16.mxu0 %v12775_v5  ;;  %v2151_v46 = vsel %vm2131_vm4, %v10960_v58, %v10936_v30 }
 0x11d   : > { %9491 = vmatprep.subr.msk.bf16.mxu1 %vm390_vm1, %v2139_v59  ;;  %9493 = vmatprep.subr.msk.bf16.mxu0 %vm390_vm1, %v2141_v21  ;;  %v2142_v21 = vsel %vm2131_vm4, %v10868_v41, %v10908_v61  ;;  %v2149_v41 = vsel %vm2131_vm4, %v10918_v2, %v10920_v3  ;;  %v2148_v61 = vsel %vm2131_vm4, %v10910_v62, %v10918_v2 }
 0x11e   : > { %4093 = vrot.lane.b32.xlu1 %v10443_v15, %s10366_s25  ;;  %4095 = vrot.lane.b32.xlu0 %v10455_v20, %s10366_s25  ;;  %v11115_v59 = vpop.permute.xlu1 %3076  ;;  %v2199_v49 = vsel %vm390_vm1, %v2142_v21, 0  ;;  %v2217_v62 = vsel %vm390_vm1, %v2148_v61, 0  ;;  %v2152_v21 = vsel %vm2131_vm4, %v10936_v30, %v10944_v33  ;;  %v2156_v61 = vsel %vm2131_vm4, %v10962_v10, %v10970_v17 }
 0x122   : > { %9488 = vmatmul.mubr.msk.bf16.vlgmr.msra.gmra.mrb[0].mxu1 %vm386_vm2, %v11060_v14  ;;  %9490 = vmatmul.mubr.msk.bf16.vlgmr.msra.gmra.mrb[4].mxu0 %vm386_vm2, %v11060_v14  ;;  %v11134_v22 = vpop.permute.xlu1 %3080 }
 0x123   : > { %2397 = vmatpush1.bf16.msra.mxu1 %v2187_v37  ;;  %2440 = vmatpush1.bf16.msra.mxu0 %v2193_v53  ;;  %v11136_v53 = vpop.permute.xlu0 %3082 }
 0x124   : > { %2428 = vmatprep.mubr.bf16.mxu1 %v12775_v5  ;;  %2471 = vmatprep.mubr.bf16.mxu0 %v12775_v5 }
 0x125   : > { %9495 = vmatprep.subr.msk.bf16.mxu1 %vm390_vm1, %v2143_v38  ;;  %9497 = vmatprep.subr.msk.bf16.mxu0 %vm390_vm1, %v2145_v4  ;;  %v2146_v38 = vsel %vm2131_vm4, %v10894_v54, %v10934_v18  ;;  %v2153_v54 = vsel %vm2131_vm4, %v10944_v33, %v10946_v42 }
 0x126   : > { %4097 = vrot.lane.b32.xlu1 %v10453_v19, %s10366_s25  ;;  %4091 = vrot.lane.b32.xlu0 %v10465_v24, %s10366_s25  ;;  %v11160_v37 = vpop.permute.xlu1 %3084  ;;  %v2211_v2 = vsel %vm390_vm1, %v2146_v38, 0  ;;  %v2154_v38 = vsel %vm2131_vm4, %v10946_v42, %v10986_v0  ;;  %v2159_v42 = vsel %vm2131_vm4, %v11019_v9, %v10994_v8 }
 0x127   : > { %v11165_v4 = vpop.permute.xlu0 %3086 }
 0x12a   : > { %9492 = vmatmul.mubr.msk.bf16.vlgmr.msra.gmra.mrb[4].mxu1 %vm386_vm2, %v11060_v14  ;;  %9494 = vmatmul.mubr.msk.bf16.vlgmr.msra.gmra.mrb[8].mxu0 %vm386_vm2, %v11060_v14  ;;  %v11183_v18 = vpop.permute.xlu1 %3088 }
 0x12b   : > { %2483 = vmatpush1.bf16.msra.mxu1 %v2199_v49  ;;  %2526 = vmatpush1.bf16.msra.mxu0 %v2205_v34  ;;  %v11190_v34 = vpop.permute.xlu0 %3090  ;;  %v2150_v49 = vsel %vm2131_vm4, %v10920_v3, %v10960_v58  ;;  %v2155_v3 = vsel %vm2131_vm4, %v10986_v0, %v10962_v10  ;;  %v2157_v58 = vsel %vm2131_vm4, %v10970_v17, %v10980_v45  ;;  %v2235_v0 = vsel %vm390_vm1, %v2154_v38, 0  ;;  %v12778_v38 = vld [vmem:[#allocation5_spill] sm:$0xff] }
 0x12c   : > { %2514 = vmatprep.mubr.bf16.mxu1 %v12775_v5  ;;  %2557 = vmatprep.mubr.bf16.mxu0 %v12775_v5  ;;  %v2223_v30 = vsel %vm390_vm1, %v2150_v49, 0 }
 0x12d   : > { %9499 = vmatprep.subr.msk.bf16.mxu1 %vm390_vm1, %v2147_v50  ;;  %9501 = vmatprep.subr.msk.bf16.mxu0 %vm390_vm1, %v2149_v41  ;;  %v2229_v50 = vsel %vm390_vm1, %v2152_v21, 0  ;;  %v2158_v21 = vsel %vm2131_vm4, %v10980_v45, %v11019_v9  ;;  %v2163_v9 = vsel %vm2131_vm4, %v11066_v1, %v11035_v55  ;;  %v12777_v45 = vld [vmem:[#allocation6_spill] sm:$0xff] }
 0x12e   : > { %4101 = vrot.lane.b32.xlu1 %v10463_v23, %s10366_s25  ;;  %4103 = vrot.lane.b32.xlu0 %v10475_v28, %s10366_s25  ;;  %v11207_v33 = vpop.permute.xlu1 %3092 }
 0x12f   : > { %v11215_v41 = vpop.permute.xlu0 %3094 }
 0x132   : > { %9496 = vmatmul.mubr.msk.bf16.vlgmr.msra.gmra.mrb[8].mxu1 %vm386_vm2, %v11060_v14  ;;  %9498 = vmatmul.mubr.msk.bf16.vlgmr.msra.gmra.mrb[12].mxu0 %vm386_vm2, %v11060_v14  ;;  %v11236_v10 = vpop.permute.xlu1 %3096 }
 0x133   : > { %2569 = vmatpush1.bf16.msra.mxu1 %v2211_v2  ;;  %2612 = vmatpush1.bf16.msra.mxu0 %v2217_v62  ;;  %v2241_v62 = vsel %vm390_vm1, %v2156_v61, 0  ;;  %v11238_v17 = vpop.permute.xlu0 %3098  ;;  %v2161_v2 = vsel %vm2131_vm4, %v11004_v57, %v11017_v6 }
 0x134   : > { %4105 = vrot.lane.b32.xlu1 %v10473_v27, %s10366_s25  ;;  %4099 = vrot.lane.b32.xlu0 %v10485_v32, %s10366_s25 }
 0x135   : > { %2600 = vmatprep.mubr.bf16.mxu1 %v12775_v5  ;;  %2643 = vmatprep.mubr.bf16.mxu0 %v12775_v5 }
 0x136   : > { %9503 = vmatprep.subr.msk.bf16.mxu1 %vm390_vm1, %v2151_v46  ;;  %9505 = vmatprep.subr.msk.bf16.mxu0 %vm390_vm1, %v2153_v54  ;;  %v2160_v46 = vsel %vm2131_vm4, %v10994_v8, %v11004_v57  ;;  %v11262_v54 = vpop.permute.xlu1 %3100  ;;  %v2247_v8 = vsel %vm390_vm1, %v2158_v21, 0  ;;  %v3139_v21 = vsel %vm3138_vm5, %v11071_v26, %v11087_v25 }
 0x137   : > { %v11267_v49 = vpop.permute.xlu0 %3102  ;;  %v3176_v26 = vsel %vm390_vm1, %v3139_v21, 0 }
 0x138   : > { %4109 = vrot.lane.b32.xlu1 %v10483_v31, %s10366_s25  ;;  %4111 = vrot.lane.b32.xlu0 %v10495_v36, %s10366_s25 }
 0x13a   : > { %9500 = vmatmul.mubr.msk.bf16.vlgmr.msra.gmra.mrb[12].mxu1 %vm386_vm2, %v11060_v14  ;;  %9502 = vmatmul.mubr.msk.bf16.vlgmr.msra.gmra.mrb[16].mxu0 %vm386_vm2, %v11060_v14  ;;  %v11286_v57 = vpop.permute.xlu1 %3104 }
 0x13b   : > { %2655 = vmatpush1.bf16.msra.mxu1 %v2223_v30  ;;  %2698 = vmatpush1.bf16.msra.mxu0 %v2229_v50  ;;  %v2253_v50 = vsel %vm390_vm1, %v2160_v46, 0  ;;  %v2164_v30 = vsel %vm2131_vm4, %v11035_v55, %v11037_v56  ;;  %v12779_v55 = vld [vmem:[#allocation8_spill] sm:$0xff]  ;;  %v3141_v46 = vsel %vm3138_vm5, %v11094_v13, %v11115_v59 }
 0x13c   : > { %4113 = vrot.lane.b32.xlu1 %v10493_v35, %s10366_s25  ;;  %4107 = vrot.lane.b32.xlu0 %v10505_v40, %s10366_s25  ;;  %v2265_v61 = vsel %vm390_vm1, %v2164_v30, 0  ;;  %v12783_v30 = vld [vmem:[#allocation10_spill] sm:$0xff] }
 0x13d   : > { %2686 = vmatprep.mubr.bf16.mxu1 %v12775_v5  ;;  %2729 = vmatprep.mubr.bf16.mxu0 %v12775_v5 }
 0x13e   : > { %9507 = vmatprep.subr.msk.bf16.mxu1 %vm390_vm1, %v2155_v3  ;;  %9509 = vmatprep.subr.msk.bf16.mxu0 %vm390_vm1, %v2157_v58  ;;  %v11293_v3 = vpop.permute.xlu0 %3106  ;;  %v2162_v58 = vsel %vm2131_vm4, %v11017_v6, %v11066_v1  ;;  %v3140_v6 = vsel %vm3138_vm5, %v11087_v25, %v11094_v13  ;;  %v3142_v1 = vsel %vm3138_vm5, %v11115_v59, %v11117_v29  ;;  %v12782_v13 = vld [vmem:[#allocation11_spill] sm:$0xff] }
 0x13f   : > { %v2259_v56 = vsel %vm390_vm1, %v2162_v58, 0  ;;  %v3144_v25 = vsel %vm3138_vm5, %v11134_v22, %v11136_v53  ;;  %v12784_v58 = vld [vmem:[#allocation3_spill] sm:$0xff] }
 0x140   : > { %4117 = vrot.lane.b32.xlu1 %v10503_v39, %s10366_s25  ;;  %4119 = vrot.lane.b32.xlu0 %v10515_v44, %s10366_s25 }
 0x142   : > { %9504 = vmatmul.mubr.msk.bf16.vlgmr.msra.gmra.mrb[16].mxu1 %vm386_vm2, %v11060_v14  ;;  %9506 = vmatmul.mubr.msk.bf16.vlgmr.msra.gmra.mrb[20].mxu0 %vm386_vm2, %v11060_v14 }
 0x143   : > { %2741 = vmatpush1.bf16.msra.mxu1 %v2235_v0  ;;  %2784 = vmatpush1.bf16.msra.mxu0 %v2241_v62  ;;  %v11310_v62 = vpop.permute.xlu1 %3108  ;;  %v11318_v0 = vpop.permute.xlu0 %3110 }
 0x144   : > { %4121 = vrot.lane.b32.xlu1 %v10513_v43, %s10366_s25  ;;  %4115 = vrot.lane.b32.xlu0 %v10525_v48, %s10366_s25 }
 0x145   : > { %2772 = vmatprep.mubr.bf16.mxu1 %v12775_v5  ;;  %2815 = vmatprep.mubr.bf16.mxu0 %v12775_v5 }
 0x146   : > { %9511 = vmatprep.subr.msk.bf16.mxu1 %vm390_vm1, %v2159_v42  ;;  %9513 = vmatprep.subr.msk.bf16.mxu0 %vm390_vm1, %v2161_v2  ;;  %v12780_v42 = vld [vmem:[#allocation7_spill] sm:$0xff]  ;;  %v12781_v2 = vld [vmem:[#allocation9_spill] sm:$0xff] }
 0x147   : > { %v11340_v59 = vpop.permute.xlu1 %3112 }
 0x148   : > { %4125 = vrot.lane.b32.xlu1 %v10523_v47, %s10366_s25  ;;  %4127 = vrot.lane.b32.xlu0 %v10535_v52, %s10366_s25 }
 0x14a   : > { %9508 = vmatmul.mubr.msk.bf16.vlgmr.msra.gmra.mrb[20].mxu1 %vm386_vm2, %v11060_v14  ;;  %9510 = vmatmul.mubr.msk.bf16.vlgmr.msra.gmra.mrb[24].mxu0 %vm386_vm2, %v11060_v14 }
 0x14b   : > { %2827 = vmatpush1.bf16.msra.mxu1 %v2247_v8  ;;  %2870 = vmatpush1.bf16.msra.mxu0 %v2253_v50  ;;  %v3182_v50 = vsel %vm390_vm1, %v3141_v46, 0  ;;  %v11342_v8 = vpop.permute.xlu0 %3114  ;;  %v12786_v46 = vld [vmem:[#allocation2_spill] sm:$0xff] }
 0x14c   : > { %4129 = vrot.lane.b32.xlu1 %v10533_v51, %s10366_s25  ;;  %4123 = vrot.lane.b32.xlu0 %v12777_v45, %s10366_s25 }
 0x14d   : > { %2858 = vmatprep.mubr.bf16.mxu1 %v12775_v5  ;;  %2901 = vmatprep.mubr.bf16.mxu0 %v12775_v5 }
 0x14e   : > { %9515 = vmatprep.subr.msk.bf16.mxu1 %vm390_vm1, %v2163_v9  ;;  %9766 = vmatprep.subr.bf16.mxu0 %v12776_v60  ;;  %v3146_v9 = vsel %vm3138_vm5, %v11160_v37, %v11165_v4 }
 0x150   : > { %4133 = vrot.lane.b32.xlu1 %v12778_v38, %s10366_s25  ;;  %4135 = vrot.lane.b32.xlu0 %v12779_v55, %s10366_s25 }
 0x152   : > { %9512 = vmatmul.mubr.msk.bf16.vlgmr.msra.gmra.mrb[24].mxu1 %vm386_vm2, %v11060_v14  ;;  %9514 = vmatmul.mubr.msk.bf16.vlgmr.msra.gmra.mrb[28].mxu0 %vm386_vm2, %v11060_v14 }
 0x153   : > { %2913 = vmatpush1.bf16.msra.mxu1 %v2259_v56  ;;  %9767 = vmatpush3.bf16.msra.mxu0 %v2265_v61  ;;  %v11368_v61 = vld [vmem:[%s12741_s1 + $0x18] sm:$0x3f]   ;;  %v11371_v56 = vpop.permute.xlu1 %3116 }
 0x154   : > { %4137 = vrot.lane.b32.xlu1 %v12780_v42, %s10366_s25  ;;  %4131 = vrot.lane.b32.xlu0 %v12781_v2, %s10366_s25 }
 0x155   : > { %2944 = vmatprep.mubr.bf16.mxu1 %v12775_v5  ;;  %9768 = vmatprep.mubr.msk.bf16.mxu0 %vm10365_vm3, %v12776_v60 }
 0x156   : > { %9521 = vmatprep.subr.msk.bf16.mxu0 %vm390_vm1, %v3140_v6  ;;  %9523 = vmatprep.subr.msk.bf16.mxu1 %vm390_vm1, %v3142_v1  ;;  %v3143_v6 = vsel %vm3138_vm5, %v11117_v29, %v11134_v22  ;;  %v12785_v1 = vld [vmem:[#allocation4_spill] sm:$0xff]  ;;  %v3148_v29 = vsel %vm3138_vm5, %v11183_v18, %v11190_v34  ;;  %v3150_v22 = vsel %vm3138_vm5, %v11207_v33, %v11215_v41 }
 0x157   : > { %v3188_v21 = vsel %vm390_vm1, %v3143_v6, 0 }
 0x158   : > { %4141 = vrot.lane.b32.xlu1 %v10563_v63, %s10366_s25  ;;  %4143 = vrot.lane.b32.xlu0 %v12782_v13, %s10366_s25 }
 0x15a   : > { %9516 = vmatmul.mubr.msk.bf16.vlgmr.msra.gmra.mrb[28].mxu1 %vm386_vm2, %v11060_v14  ;;  %9769 = vmatmul.mubr.msk.bf16.vlgmr.msra.gmra.mrb[36].mxu0 %vm386_vm2, %v11060_v14  ;;  %v3145_v14 = vsel %vm3138_vm5, %v11136_v53, %v11160_v37  ;;  %v11376_v53 = vpop.permute.xlu0 %3118 }
 0x15b   : > { %3275 = vmatpush1.bf16.msra.mxu0 %v3176_v26  ;;  %3318 = vmatpush1.bf16.msra.mxu1 %v3182_v50  ;;  %v3194_v37 = vsel %vm390_vm1, %v3145_v14, 0  ;;  %v11398_v50 = vpop.permute.xlu1 %3120  ;;  %v3149_v26 = vsel %vm3138_vm5, %v11190_v34, %v11207_v33 }
 0x15c   : > { %4139 = vrot.lane.b32.xlu1 %v12783_v30, %s10366_s25  ;;  %5084 = vrot.lane.b32.xlu0 %v12784_v58, %s10367_s28 }
 0x15d   : > { %3306 = vmatprep.mubr.bf16.mxu0 %v12775_v5  ;;  %3349 = vmatprep.mubr.bf16.mxu1 %v12775_v5 }
 0x15e   : > { %9525 = vmatprep.subr.msk.bf16.mxu0 %vm390_vm1, %v3144_v25  ;;  %9527 = vmatprep.subr.msk.bf16.mxu1 %vm390_vm1, %v3146_v9  ;;  %v11405_v25 = vpop.permute.xlu0 %3122  ;;  %v3151_v9 = vsel %vm3138_vm5, %v11215_v41, %v11236_v10 }
 0x15f   : > { %v11422_v33 = vpop.permute.xlu1 %3124  ;;  %v3212_v41 = vsel %vm390_vm1, %v3151_v9, 0 }
 0x160   : > { %5086 = vrot.lane.b32.xlu1 %v12785_v1, %s10367_s28  ;;  %5088 = vrot.lane.b32.xlu0 %v12786_v46, %s10367_s28 }
 0x162   : > { %9522 = vmatmul.mubr.msk.bf16.vlgmr.msra.gmra.mrb[0].mxu0 %vm386_vm2, %v11368_v61  ;;  %9524 = vmatmul.mubr.msk.bf16.vlgmr.msra.gmra.mrb[0].mxu1 %vm386_vm2, %v11368_v61 }
 0x163   : > { %3361 = vmatpush1.bf16.msra.mxu0 %v3188_v21  ;;  %3404 = vmatpush1.bf16.msra.mxu1 %v3194_v37 }
 0x164   : > { %5090 = vrot.lane.b32.xlu1 %v10445_v16, %s10367_s28  ;;  %5092 = vrot.lane.b32.xlu0 %v10423_v7, %s10367_s28  ;;  %v3147_v7 = vsel %vm3138_vm5, %v11165_v4, %v11183_v18  ;;  %v3206_v16 = vsel %vm390_vm1, %v3149_v26, 0  ;;  %v3152_v4 = vsel %vm3138_vm5, %v11236_v10, %v11238_v17  ;;  %v3153_v18 = vsel %vm3138_vm5, %v11238_v17, %v11262_v54  ;;  %v6084_v26 = vld [vmem:[%s10407_s17 + $0x10] sm:$0xff] }
 0x165   : > { %3392 = vmatprep.mubr.bf16.mxu0 %v12775_v5  ;;  %3435 = vmatprep.mubr.bf16.mxu1 %v12775_v5  ;;  %v3200_v34 = vsel %vm390_vm1, %v3147_v7, 0  ;;  %v3157_v10 = vsel %vm3138_vm5, %v11293_v3, %v11310_v62 }
 0x166   : > { %9529 = vmatprep.subr.msk.bf16.mxu0 %vm390_vm1, %v3148_v29  ;;  %9531 = vmatprep.subr.msk.bf16.mxu1 %vm390_vm1, %v3150_v22 }
 0x168   : > { %5094 = vrot.lane.b32.xlu1 %v10435_v12, %s10367_s28  ;;  %5096 = vrot.lane.b32.xlu0 %v10433_v11, %s10367_s28  ;;  %v3154_v11 = vsel %vm3138_vm5, %v11262_v54, %v11267_v49  ;;  %v11430_v12 = vpop.permute.xlu0 %3126 }
 0x16a   : > { %9526 = vmatmul.mubr.msk.bf16.vlgmr.msra.gmra.mrb[4].mxu0 %vm386_vm2, %v11368_v61  ;;  %9528 = vmatmul.mubr.msk.bf16.vlgmr.msra.gmra.mrb[4].mxu1 %vm386_vm2, %v11368_v61 }
 0x16b   : > { %3447 = vmatpush1.bf16.msra.mxu0 %v3200_v34  ;;  %3490 = vmatpush1.bf16.msra.mxu1 %v3206_v16 }
 0x16c   : > { %5098 = vrot.lane.b32.xlu1 %v10465_v24, %s10367_s28  ;;  %5100 = vrot.lane.b32.xlu0 %v10443_v15, %s10367_s28  ;;  %v3218_v24 = vsel %vm390_vm1, %v3153_v18, 0  ;;  %v11451_v15 = vpop.permute.xlu1 %3128  ;;  %v11453_v17 = vpop.permute.xlu0 %3130 }
 0x16d   : > { %3478 = vmatprep.mubr.bf16.mxu0 %v12775_v5  ;;  %3521 = vmatprep.mubr.bf16.mxu1 %v12775_v5 }
 0x16e   : > { %9533 = vmatprep.subr.msk.bf16.mxu0 %vm390_vm1, %v3152_v4  ;;  %9535 = vmatprep.subr.msk.bf16.mxu1 %vm390_vm1, %v3154_v11  ;;  %v6085_v11 = vld [vmem:[%s10407_s17 + $0x18] sm:$0xff] }
 0x16f   : > { %v11644_v9 = vpack.c.bf16 %v6085_v11, %v6085_v11 }
 0x170   : > { %5102 = vrot.lane.b32.xlu1 %v10455_v20, %s10367_s28  ;;  %5104 = vrot.lane.b32.xlu0 %v10453_v19, %s10367_s28  ;;  %v3156_v20 = vsel %vm3138_vm5, %v11286_v57, %v11293_v3  ;;  %v3158_v19 = vsel %vm3138_vm5, %v11310_v62, %v11318_v0  ;;  %v3133_v54 = vpop.permute.xlu1 %3132  ;;  %v11480_v58 = vpop.permute.xlu0 %3134 }
 0x172   : > { %9530 = vmatmul.mubr.msk.bf16.vlgmr.msra.gmra.mrb[8].mxu0 %vm386_vm2, %v11368_v61  ;;  %9532 = vmatmul.mubr.msk.bf16.vlgmr.msra.gmra.mrb[8].mxu1 %vm386_vm2, %v11368_v61 }
 0x173   : > { %3533 = vmatpush1.bf16.msra.mxu0 %v3212_v41  ;;  %3576 = vmatpush1.bf16.msra.mxu1 %v3218_v24 }
 0x174   : > { %5106 = vrot.lane.b32.xlu1 %v10485_v32, %s10367_s28  ;;  %5108 = vrot.lane.b32.xlu0 %v10463_v23, %s10367_s28  ;;  %v3155_v32 = vsel %vm3138_vm5, %v11267_v49, %v11286_v57  ;;  %v3230_v23 = vsel %vm390_vm1, %v3157_v10, 0  ;;  %v3160_v49 = vsel %vm3138_vm5, %v11340_v59, %v11342_v8  ;;  %v3161_v57 = vsel %vm3138_vm5, %v11342_v8, %v11371_v56  ;;  %v4080_v62 = vpop.permute.xlu0 %4079 }
 0x175   : > { %3564 = vmatprep.mubr.bf16.mxu0 %v12775_v5  ;;  %3607 = vmatprep.mubr.bf16.mxu1 %v12775_v5  ;;  %v3224_v3 = vsel %vm390_vm1, %v3155_v32, 0 }
 0x176   : > { %9537 = vmatprep.subr.msk.bf16.mxu0 %vm390_vm1, %v3156_v20  ;;  %9539 = vmatprep.subr.msk.bf16.mxu1 %vm390_vm1, %v3158_v19 }
 0x178   : > { %5110 = vrot.lane.b32.xlu1 %v10475_v28, %s10367_s28  ;;  %5112 = vrot.lane.b32.xlu0 %v10473_v27, %s10367_s28  ;;  %v3162_v28 = vsel %vm3138_vm5, %v11371_v56, %v11376_v53  ;;  %v11502_v27 = vpop.permute.xlu1 %4077  ;;  %v3163_v56 = vsel %vm3138_vm5, %v11376_v53, %v11398_v50  ;;  %v3168_v53 = vsel %vm3138_vm5, %v11451_v15, %v11453_v17 }
 0x179   : > { %v3248_v37 = vsel %vm390_vm1, %v3163_v56, 0 }
 0x17a   : > { %9534 = vmatmul.mubr.msk.bf16.vlgmr.msra.gmra.mrb[12].mxu0 %vm386_vm2, %v11368_v61  ;;  %9536 = vmatmul.mubr.msk.bf16.vlgmr.msra.gmra.mrb[12].mxu1 %vm386_vm2, %v11368_v61 }
 0x17b   : > { %3619 = vmatpush1.bf16.msra.mxu0 %v3224_v3  ;;  %3662 = vmatpush1.bf16.msra.mxu1 %v3230_v23  ;;  %v6086_v23 = vld [vmem:[%s10407_s17 + $0x20] sm:$0xff] }
 0x17c   : > { %5114 = vrot.lane.b32.xlu1 %v10505_v40, %s10367_s28  ;;  %5116 = vrot.lane.b32.xlu0 %v10483_v31, %s10367_s28  ;;  %v3159_v40 = vsel %vm3138_vm5, %v11318_v0, %v11340_v59  ;;  %v3242_v31 = vsel %vm390_vm1, %v3161_v57, 0  ;;  %v11524_v14 = vpop.permute.xlu1 %4081  ;;  %v3164_v0 = vsel %vm3138_vm5, %v11398_v50, %v11405_v25  ;;  %v3165_v59 = vsel %vm3138_vm5, %v11405_v25, %v11422_v33 }
 0x17d   : > { %3650 = vmatprep.mubr.bf16.mxu0 %v12775_v5  ;;  %3693 = vmatprep.mubr.bf16.mxu1 %v12775_v5  ;;  %v3236_v8 = vsel %vm390_vm1, %v3159_v40, 0  ;;  %v4147_v29 = vsel %vm4145_vm6, %v4080_v62, %v11524_v14 }
 0x17e   : > { %9541 = vmatprep.subr.msk.bf16.mxu0 %vm390_vm1, %v3160_v49  ;;  %9543 = vmatprep.subr.msk.bf16.mxu1 %vm390_vm1, %v3162_v28 }
 0x180   : > { %5118 = vrot.lane.b32.xlu1 %v10495_v36, %s10367_s28  ;;  %5120 = vrot.lane.b32.xlu0 %v10493_v35, %s10367_s28  ;;  %v3166_v35 = vsel %vm3138_vm5, %v11422_v33, %v11430_v12  ;;  %v3137_v36 = vpop.permute.xlu0 %3136  ;;  %v11623_v33 = vpack.c.bf16 %v6084_v26, %v6084_v26 }
 0x181   : > { %v3171_v50 = vsel %vm3138_vm5, %v11480_v58, %v3137_v36 }
 0x182   : > { %9538 = vmatmul.mubr.msk.bf16.vlgmr.msra.gmra.mrb[16].mxu0 %vm386_vm2, %v11368_v61  ;;  %9540 = vmatmul.mubr.msk.bf16.vlgmr.msra.gmra.mrb[16].mxu1 %vm386_vm2, %v11368_v61  ;;  %v3272_v25 = vsel %vm390_vm1, %v3171_v50, 0 }
 0x183   : > { %3705 = vmatpush1.bf16.msra.mxu0 %v3236_v8  ;;  %3748 = vmatpush1.bf16.msra.mxu1 %v3242_v31  ;;  %v11686_v31 = vpack.c.bf16 %v6086_v23, %v6086_v23  ;;  %v6091_v8 = vld [vmem:[%s10407_s17 + $0x48] sm:$0xff] }
 0x184   : > { %5122 = vrot.lane.b32.xlu1 %v10525_v48, %s10367_s28  ;;  %5124 = vrot.lane.b32.xlu0 %v10503_v39, %s10367_s28  ;;  %v3254_v48 = vsel %vm390_vm1, %v3165_v59, 0  ;;  %v4086_v39 = vpop.permute.xlu1 %4085  ;;  %v4088_v6 = vpop.permute.xlu0 %4087 }
 0x185   : > { %3736 = vmatprep.mubr.bf16.mxu0 %v12775_v5  ;;  %3779 = vmatprep.mubr.bf16.mxu1 %v12775_v5  ;;  %v4150_v4 = vsel %vm4145_vm6, %v4086_v39, %v4088_v6 }
 0x186   : > { %9545 = vmatprep.subr.msk.bf16.mxu0 %vm390_vm1, %v3164_v0  ;;  %9547 = vmatprep.subr.msk.bf16.mxu1 %vm390_vm1, %v3166_v35 }
 0x188   : > { %5126 = vrot.lane.b32.xlu1 %v10515_v44, %s10367_s28  ;;  %5128 = vrot.lane.b32.xlu0 %v10513_v43, %s10367_s28  ;;  %v3170_v44 = vsel %vm3138_vm5, %v3133_v54, %v11480_v58  ;;  %v3169_v43 = vsel %vm3138_vm5, %v11453_v17, %v3133_v54  ;;  %v11571_v1 = vpop.permute.xlu1 %4089  ;;  %v4084_v46 = vpop.permute.xlu0 %4083  ;;  %v6088_v17 = vld [vmem:[%s10407_s17 + $0x30] sm:$0xff]  ;;  %v6089_v58 = vld [vmem:[%s10407_s17 + $0x38] sm:$0xff] }
 0x189   : > { %v11662_v10 = vpack.c.bf16 %v6088_v17, %v6088_v17  ;;  %v11684_v40 = vpack.c.bf16 %v6089_v58, %v6089_v58 }
 0x18a   : > { %9542 = vmatmul.mubr.msk.bf16.vlgmr.msra.gmra.mrb[20].mxu0 %vm386_vm2, %v11368_v61  ;;  %9544 = vmatmul.mubr.msk.bf16.vlgmr.msra.gmra.mrb[20].mxu1 %vm386_vm2, %v11368_v61 }
 0x18b   : > { %3791 = vmatpush1.bf16.msra.mxu0 %v3248_v37  ;;  %3834 = vmatpush1.bf16.msra.mxu1 %v3254_v48  ;;  %v11702_v48 = vpack.c.bf16 %v6091_v8, %v6091_v8  ;;  %v6093_v37 = vld [vmem:[%s10407_s17 + $0x58] sm:$0xff] }
 0x18c   : > { %5130 = vrot.lane.b32.xlu1 %v12777_v45, %s10367_s28  ;;  %5132 = vrot.lane.b32.xlu0 %v10523_v47, %s10367_s28  ;;  %v3167_v45 = vsel %vm3138_vm5, %v11430_v12, %v11451_v15  ;;  %v3266_v47 = vsel %vm390_vm1, %v3169_v43, 0  ;;  %v4195_v12 = vsel %vm390_vm1, %v4150_v4, 0  ;;  %v6087_v15 = vld [vmem:[%s10407_s17 + $0x28] sm:$0xff] }
 0x18d   : > { %3822 = vmatprep.mubr.bf16.mxu0 %v12775_v5  ;;  %3865 = vmatprep.mubr.bf16.mxu1 %v12775_v5  ;;  %v3260_v21 = vsel %vm390_vm1, %v3167_v45, 0 }
 0x18e   : > { %9549 = vmatprep.subr.msk.bf16.mxu0 %vm390_vm1, %v3168_v53  ;;  %9551 = vmatprep.subr.msk.bf16.mxu1 %vm390_vm1, %v3170_v44  ;;  %v6090_v53 = vld [vmem:[%s10407_s17 + $0x40] sm:$0xff] }
 0x190   : > { %5134 = vrot.lane.b32.xlu1 %v10535_v52, %s10367_s28  ;;  %5136 = vrot.lane.b32.xlu0 %v10533_v51, %s10367_s28  ;;  %v4094_v51 = vpop.permute.xlu1 %4093  ;;  %v4146_v52 = vsel %vm4145_vm6, %v11502_v27, %v4080_v62  ;;  %v4096_v22 = vpop.permute.xlu0 %4095 }
 0x191   : > { %v4154_v54 = vsel %vm4145_vm6, %v4094_v51, %v4096_v22 }
 0x192   : > { %9546 = vmatmul.mubr.msk.bf16.vlgmr.msra.gmra.mrb[24].mxu0 %vm386_vm2, %v11368_v61  ;;  %9548 = vmatmul.mubr.msk.bf16.vlgmr.msra.gmra.mrb[24].mxu1 %vm386_vm2, %v11368_v61  ;;  %v4207_v62 = vsel %vm390_vm1, %v4154_v54, 0 }
 0x193   : > { %3877 = vmatpush1.bf16.msra.mxu0 %v3260_v21  ;;  %3920 = vmatpush1.bf16.msra.mxu1 %v3266_v47  ;;  %v11722_v47 = vpack.c.bf16 %v6090_v53, %v6090_v53  ;;  %v6095_v21 = vld [vmem:[%s10407_s17 + $0x68] sm:$0xff] }
 0x194   : > { %5138 = vrot.lane.b32.xlu1 %v12781_v2, %s10367_s28  ;;  %5140 = vrot.lane.b32.xlu0 %v12778_v38, %s10367_s28  ;;  %v4183_v2 = vsel %vm390_vm1, %v4146_v52, 0  ;;  %v6083_v38 = vld [vmem:[%s10407_s17 + $0x8] sm:$0xff] }
 0x195   : > { %3908 = vmatprep.mubr.bf16.mxu0 %v12775_v5  ;;  %3951 = vmatprep.mubr.bf16.mxu1 %v12775_v5  ;;  %v11621_v34 = vpack.c.bf16 %v6083_v38, %v6083_v38  ;;  %v11737_v38 = vpack.c.bf16 %v6095_v21, %v6095_v21 }
 0x196   : > { %9772 = vmatprep.subr.bf16.mxu1 %v12776_v60  ;;  %9557 = vmatprep.subr.msk.bf16.mxu0 %vm390_vm1, %v4147_v29  ;;  %v6096_v29 = vld [vmem:[%s10407_s17 + $0x70] sm:$0xff] }
 0x197   : > { %v11739_v26 = vpack.c.bf16 %v6096_v29, %v6096_v29 }
 0x198   : > { %5142 = vrot.lane.b32.xlu1 %v12779_v55, %s10367_s28  ;;  %5144 = vrot.lane.b32.xlu0 %v12780_v42, %s10367_s28  ;;  %v11612_v7 = vpop.permute.xlu1 %4097  ;;  %v4149_v55 = vsel %vm4145_vm6, %v4084_v46, %v4086_v39  ;;  %v4151_v42 = vsel %vm4145_vm6, %v4088_v6, %v11571_v1  ;;  %v4092_v16 = vpop.permute.xlu0 %4091 }
 0x199   : > { %v4153_v20 = vsel %vm4145_vm6, %v4092_v16, %v4094_v51  ;;  %v4155_v19 = vsel %vm4145_vm6, %v4096_v22, %v11612_v7  ;;  %v4152_v49 = vsel %vm4145_vm6, %v11571_v1, %v4092_v16 }
 0x19a   : > { %9550 = vmatmul.mubr.msk.bf16.vlgmr.msra.gmra.mrb[28].mxu0 %vm386_vm2, %v11368_v61  ;;  %9552 = vmatmul.mubr.msk.bf16.vlgmr.msra.gmra.mrb[28].mxu1 %vm386_vm2, %v11368_v61  ;;  %v4201_v0 = vsel %vm390_vm1, %v4152_v49, 0 }
 0x19b   : > { %9773 = vmatpush3.bf16.msra.mxu1 %v3272_v25  ;;  %4282 = vmatpush1.bf16.msra.mxu0 %v4183_v2 }
 0x19c   : > { %5146 = vrot.lane.b32.xlu1 %v12783_v30, %s10367_s28  ;;  %5148 = vrot.lane.b32.xlu0 %v10563_v63, %s10367_s28  ;;  %v11635_v63 = vld [vmem:[%s12741_s1 + $0x20] sm:$0x3f]   ;;  %v4148_v30 = vsel %vm4145_vm6, %v11524_v14, %v4084_v46  ;;  %v6092_v14 = vld [vmem:[%s10407_s17 + $0x50] sm:$0xff]  ;;  %v11720_v46 = vpack.c.bf16 %v6093_v37, %v6093_v37 }
 0x19d   : > { %9774 = vmatprep.mubr.msk.bf16.mxu1 %vm10365_vm3, %v12776_v60  ;;  %4313 = vmatprep.mubr.bf16.mxu0 %v12775_v5  ;;  %v4189_v41 = vsel %vm390_vm1, %v4148_v30, 0  ;;  %v11704_v39 = vpack.c.bf16 %v6092_v14, %v6092_v14 }
 0x19e   : > { %9559 = vmatprep.subr.msk.bf16.mxu1 %vm390_vm1, %v4149_v55  ;;  %9561 = vmatprep.subr.msk.bf16.mxu0 %vm390_vm1, %v4151_v42  ;;  %v6094_v55 = vld [vmem:[%s10407_s17 + $0x60] sm:$0xff] }
 0x1a0   : > { %6193 = vrot.lane.b32.xlu1 %v11621_v34, %s10368_s6  ;;  %6195 = vrot.lane.b32.xlu0 %v11623_v33, %s10368_s6  ;;  %v4102_v18 = vpop.permute.xlu1 %4101  ;;  %v4104_v24 = vpop.permute.xlu0 %4103 }
 0x1a1   : > { %v4158_v6 = vsel %vm4145_vm6, %v4102_v18, %v4104_v24 }
 0x1a2   : > { %9775 = vmatmul.mubr.msk.bf16.vlgmr.msra.gmra.mrb[36].mxu1 %vm386_vm2, %v11368_v61  ;;  %9558 = vmatmul.mubr.msk.bf16.vlgmr.msra.gmra.mrb[0].mxu0 %vm386_vm2, %v11635_v63  ;;  %v11660_v61 = vpack.c.bf16 %v6087_v15, %v6087_v15  ;;  %v4219_v45 = vsel %vm390_vm1, %v4158_v6, 0 }
 0x1a3   : > { %4325 = vmatpush1.bf16.msra.mxu1 %v4189_v41  ;;  %4368 = vmatpush1.bf16.msra.mxu0 %v4195_v12  ;;  %v11757_v12 = vpack.c.bf16 %v6094_v55, %v6094_v55 }
 0x1a4   : > { %6197 = vrot.lane.b32.xlu1 %v11644_v9, %s10368_s6  ;;  %5150 = vrot.lane.b32.xlu0 %v12782_v13, %s10367_s28 }
 0x1a5   : > { %v11665_v32 = vpop.f32.mrb[32].mxu0  ;;  %4356 = vmatprep.mubr.bf16.mxu1 %v12775_v5  ;;  %4399 = vmatprep.mubr.bf16.mxu0 %v12775_v5 }
 0x1a6   : > { %v9758_v3 = vpop.f32.mrb[33].mxu0  ;;  %9563 = vmatprep.subr.msk.bf16.mxu1 %vm390_vm1, %v4153_v20  ;;  %9565 = vmatprep.subr.msk.bf16.mxu0 %vm390_vm1, %v4155_v19  ;;  %v11673_v13 = vpop.permute.xlu1 %4105 }
 0x1a7   : > { %v11677_v28 = vpop.f32.mrb[34].mxu0  ;;  %v4100_v27 = vpop.permute.xlu0 %4099  ;;  %v4159_v56 = vsel %vm4145_vm6, %v4104_v24, %v11673_v13  ;;  %v6100_v24 = vld [vmem:[%s10407_s17 + $0x90] sm:$0xff]  ;;  %v6101_v3 = vld [vmem:[%s10407_s17 + $0x98] sm:$0xff] }
 0x1a8   : > { %v9759_v57 = vpop.f32.mrb[35].mxu0  ;;  %6201 = vrot.lane.b32.xlu1 %v11660_v61, %s10368_s6  ;;  %6203 = vrot.lane.b32.xlu0 %v11662_v10, %s10368_s6  ;;  %v4157_v59 = vsel %vm4145_vm6, %v4100_v27, %v4102_v18  ;;  %v4156_v43 = vsel %vm4145_vm6, %v11612_v7, %v4100_v27  ;;  %v6097_v7 = vld [vmem:[%s10407_s17 + $0x78] sm:$0xff]  ;;  %v6099_v18 = vld [vmem:[%s10407_s17 + $0x88] sm:$0xff]  ;;  %v11774_v58 = vpack.c.bf16 %v6100_v24, %v6100_v24 }
 0x1a9   : > { %v4213_v51 = vsel %vm390_vm1, %v4156_v43, 0  ;;  %v11755_v30 = vpack.c.bf16 %v6097_v7, %v6097_v7  ;;  %v11772_v54 = vpack.c.bf16 %v6099_v18, %v6099_v18  ;;  %v11789_v8 = vpack.c.bf16 %v6101_v3, %v6101_v3 }
 0x1aa   : > { %9560 = vmatmul.mubr.msk.bf16.vlgmr.msra.gmra.mrb[0].mxu1 %vm386_vm2, %v11635_v63  ;;  %9562 = vmatmul.mubr.msk.bf16.vlgmr.msra.gmra.mrb[4].mxu0 %vm386_vm2, %v11635_v63  ;;  %v4110_v35 = vpop.permute.xlu1 %4109 }
 0x1ab   : > { %4411 = vmatpush1.bf16.msra.mxu1 %v4201_v0  ;;  %4454 = vmatpush1.bf16.msra.mxu0 %v4207_v62  ;;  %v4112_v36 = vpop.permute.xlu0 %4111  ;;  %v6103_v0 = vld [vmem:[%s10407_s17 + $0xa8] sm:$0xff] }
 0x1ac   : > { %6205 = vrot.lane.b32.xlu1 %v11684_v40, %s10368_s6  ;;  %6199 = vrot.lane.b32.xlu0 %v11686_v31, %s10368_s6  ;;  %v4162_v25 = vsel %vm4145_vm6, %v4110_v35, %v4112_v36  ;;  %v11806_v53 = vpack.c.bf16 %v6103_v0, %v6103_v0 }
 0x1ad   : > { %4442 = vmatprep.mubr.bf16.mxu1 %v12775_v5  ;;  %4485 = vmatprep.mubr.bf16.mxu0 %v12775_v5  ;;  %v4231_v11 = vsel %vm390_vm1, %v4162_v25, 0  ;;  %v6108_v25 = vld [vmem:[%s10407_s17 + $0xd0] sm:$0xff] }
 0x1ae   : > { %9567 = vmatprep.subr.msk.bf16.mxu1 %vm390_vm1, %v4157_v59  ;;  %9569 = vmatprep.subr.msk.bf16.mxu0 %vm390_vm1, %v4159_v56  ;;  %v4114_v44 = vpop.permute.xlu1 %4113  ;;  %v11842_v18 = vpack.c.bf16 %v6108_v25, %v6108_v25  ;;  %v6116_v25 = vld [vmem:[%s10407_s17 + $0x110] sm:$0xff] }
 0x1af   : > { %v4108_v1 = vpop.permute.xlu0 %4107  ;;  %v4163_v2 = vsel %vm4145_vm6, %v4112_v36, %v4114_v44 }
 0x1b0   : > { %6209 = vrot.lane.b32.xlu1 %v11702_v48, %s10368_s6  ;;  %6211 = vrot.lane.b32.xlu0 %v11704_v39, %s10368_s6  ;;  %v4161_v50 = vsel %vm4145_vm6, %v4108_v1, %v4110_v35  ;;  %v4160_v16 = vsel %vm4145_vm6, %v11673_v13, %v4108_v1  ;;  %v6098_v13 = vld [vmem:[%s10407_s17 + $0x80] sm:$0xff]  ;;  %v6104_v35 = vld [vmem:[%s10407_s17 + $0xb0] sm:$0xff] }
 0x1b1   : > { %v4225_v15 = vsel %vm390_vm1, %v4160_v16, 0  ;;  %v11791_v14 = vpack.c.bf16 %v6098_v13, %v6098_v13  ;;  %v6105_v1 = vld [vmem:[%s10407_s17 + $0xb8] sm:$0xff] }
 0x1b2   : > { %9564 = vmatmul.mubr.msk.bf16.vlgmr.msra.gmra.mrb[4].mxu1 %vm386_vm2, %v11635_v63  ;;  %9566 = vmatmul.mubr.msk.bf16.vlgmr.msra.gmra.mrb[8].mxu0 %vm386_vm2, %v11635_v63  ;;  %v4118_v52 = vpop.permute.xlu1 %4117 }
 0x1b3   : > { %4497 = vmatpush1.bf16.msra.mxu1 %v4213_v51  ;;  %4540 = vmatpush1.bf16.msra.mxu0 %v4219_v45  ;;  %v4120_v22 = vpop.permute.xlu0 %4119  ;;  %v6102_v45 = vld [vmem:[%s10407_s17 + $0xa0] sm:$0xff] }
 0x1b4   : > { %6213 = vrot.lane.b32.xlu1 %v11720_v46, %s10368_s6  ;;  %6207 = vrot.lane.b32.xlu0 %v11722_v47, %s10368_s6  ;;  %v4166_v23 = vsel %vm4145_vm6, %v4118_v52, %v4120_v22 }
 0x1b5   : > { %4528 = vmatprep.mubr.bf16.mxu1 %v12775_v5  ;;  %4571 = vmatprep.mubr.bf16.mxu0 %v12775_v5  ;;  %v4243_v62 = vsel %vm390_vm1, %v4166_v23, 0 }
 0x1b6   : > { %9571 = vmatprep.subr.msk.bf16.mxu1 %vm390_vm1, %v4161_v50  ;;  %9573 = vmatprep.subr.msk.bf16.mxu0 %vm390_vm1, %v4163_v2  ;;  %v4122_v42 = vpop.permute.xlu1 %4121  ;;  %v11825_v50 = vpack.c.bf16 %v6102_v45, %v6102_v45  ;;  %v6107_v2 = vld [vmem:[%s10407_s17 + $0xc8] sm:$0xff] }
 0x1b7   : > { %v4116_v4 = vpop.permute.xlu0 %4115  ;;  %v4167_v19 = vsel %vm4145_vm6, %v4120_v22, %v4122_v42  ;;  %v11823_v22 = vpack.c.bf16 %v6105_v1, %v6105_v1 }
 0x1b8   : > { %6217 = vrot.lane.b32.xlu1 %v11737_v38, %s10368_s6  ;;  %6219 = vrot.lane.b32.xlu0 %v11739_v26, %s10368_s6  ;;  %v4165_v20 = vsel %vm4145_vm6, %v4116_v4, %v4118_v52  ;;  %v4164_v27 = vsel %vm4145_vm6, %v4114_v44, %v4116_v4  ;;  %v11808_v44 = vpack.c.bf16 %v6104_v35, %v6104_v35 }
 0x1b9   : > { %v4237_v36 = vsel %vm390_vm1, %v4164_v27, 0  ;;  %v6111_v27 = vld [vmem:[%s10407_s17 + $0xe8] sm:$0xff] }
 0x1ba   : > { %9568 = vmatmul.mubr.msk.bf16.vlgmr.msra.gmra.mrb[8].mxu1 %vm386_vm2, %v11635_v63  ;;  %9570 = vmatmul.mubr.msk.bf16.vlgmr.msra.gmra.mrb[12].mxu0 %vm386_vm2, %v11635_v63  ;;  %v4126_v17 = vpop.permute.xlu1 %4125 }
 0x1bb   : > { %4583 = vmatpush1.bf16.msra.mxu1 %v4225_v15  ;;  %4626 = vmatpush1.bf16.msra.mxu0 %v4231_v11  ;;  %v4128_v41 = vpop.permute.xlu0 %4127  ;;  %v11840_v11 = vpack.c.bf16 %v6107_v2, %v6107_v2  ;;  %v6109_v15 = vld [vmem:[%s10407_s17 + $0xd8] sm:$0xff]  ;;  %v6115_v2 = vld [vmem:[%s10407_s17 + $0x108] sm:$0xff] }
 0x1bc   : > { %6221 = vrot.lane.b32.xlu1 %v11755_v30, %s10368_s6  ;;  %6215 = vrot.lane.b32.xlu0 %v11757_v12, %s10368_s6  ;;  %v4170_v43 = vsel %vm4145_vm6, %v4126_v17, %v4128_v41  ;;  %v11857_v3 = vpack.c.bf16 %v6109_v15, %v6109_v15 }
 0x1bd   : > { %4614 = vmatprep.mubr.bf16.mxu1 %v12775_v5  ;;  %4657 = vmatprep.mubr.bf16.mxu0 %v12775_v5  ;;  %v4255_v52 = vsel %vm390_vm1, %v4170_v43, 0 }
 0x1be   : > { %9575 = vmatprep.subr.msk.bf16.mxu1 %vm390_vm1, %v4165_v20  ;;  %9577 = vmatprep.subr.msk.bf16.mxu0 %vm390_vm1, %v4167_v19  ;;  %v4130_v49 = vpop.permute.xlu1 %4129 }
 0x1bf   : > { %v4124_v57 = vpop.permute.xlu0 %4123  ;;  %v4171_v37 = vsel %vm4145_vm6, %v4128_v41, %v4130_v49 }
 0x1c0   : > { %6225 = vrot.lane.b32.xlu1 %v11772_v54, %s10368_s6  ;;  %6227 = vrot.lane.b32.xlu0 %v11774_v58, %s10368_s6  ;;  %v4169_v6 = vsel %vm4145_vm6, %v4124_v57, %v4126_v17  ;;  %v4168_v29 = vsel %vm4145_vm6, %v4122_v42, %v4124_v57  ;;  %v6106_v17 = vld [vmem:[%s10407_s17 + $0xc0] sm:$0xff]  ;;  %v6112_v57 = vld [vmem:[%s10407_s17 + $0xf0] sm:$0xff] }
 0x1c1   : > { %v4249_v7 = vsel %vm390_vm1, %v4168_v29, 0  ;;  %v11859_v13 = vpack.c.bf16 %v6106_v17, %v6106_v17  ;;  %v6114_v17 = vld [vmem:[%s10407_s17 + $0x100] sm:$0xff] }
 0x1c2   : > { %9572 = vmatmul.mubr.msk.bf16.vlgmr.msra.gmra.mrb[12].mxu1 %vm386_vm2, %v11635_v63  ;;  %9574 = vmatmul.mubr.msk.bf16.vlgmr.msra.gmra.mrb[16].mxu0 %vm386_vm2, %v11635_v63  ;;  %v4134_v59 = vpop.permute.xlu1 %4133 }
 0x1c3   : > { %4669 = vmatpush1.bf16.msra.mxu1 %v4237_v36  ;;  %4712 = vmatpush1.bf16.msra.mxu0 %v4243_v62  ;;  %v4136_v56 = vpop.permute.xlu0 %4135  ;;  %v11873_v36 = vpack.c.bf16 %v6111_v27, %v6111_v27 }
 0x1c4   : > { %6229 = vrot.lane.b32.xlu1 %v11789_v8, %s10368_s6  ;;  %6223 = vrot.lane.b32.xlu0 %v11791_v14, %s10368_s6  ;;  %v4174_v24 = vsel %vm4145_vm6, %v4134_v59, %v4136_v56 }
 0x1c5   : > { %4700 = vmatprep.mubr.bf16.mxu1 %v12775_v5  ;;  %4743 = vmatprep.mubr.bf16.mxu0 %v12775_v5  ;;  %v4267_v23 = vsel %vm390_vm1, %v4174_v24, 0  ;;  %v11909_v24 = vpack.c.bf16 %v6116_v25, %v6116_v25 }
 0x1c6   : > { %9579 = vmatprep.subr.msk.bf16.mxu1 %vm390_vm1, %v4169_v6  ;;  %9581 = vmatprep.subr.msk.bf16.mxu0 %vm390_vm1, %v4171_v37  ;;  %v4138_v21 = vpop.permute.xlu1 %4137  ;;  %v6113_v6 = vld [vmem:[%s10407_s17 + $0xf8] sm:$0xff]  ;;  %v6110_v37 = vld [vmem:[%s10407_s17 + $0xe0] sm:$0xff] }
 0x1c7   : > { %v4132_v51 = vpop.permute.xlu0 %4131  ;;  %v4175_v4 = vsel %vm4145_vm6, %v4136_v56, %v4138_v21 }
 0x1c8   : > { %6233 = vrot.lane.b32.xlu1 %v11806_v53, %s10368_s6  ;;  %6235 = vrot.lane.b32.xlu0 %v11808_v44, %s10368_s6  ;;  %v4173_v16 = vsel %vm4145_vm6, %v4132_v51, %v4134_v59  ;;  %v4172_v20 = vsel %vm4145_vm6, %v4130_v49, %v4132_v51  ;;  %v11875_v59 = vpack.c.bf16 %v6112_v57, %v6112_v57 }
 0x1c9   : > { %v4261_v49 = vsel %vm390_vm1, %v4172_v20, 0  ;;  %v11890_v51 = vpack.c.bf16 %v6113_v6, %v6113_v6  ;;  %v11924_v57 = vpack.c.bf16 %v6114_v17, %v6114_v17 }
 0x1ca   : > { %9576 = vmatmul.mubr.msk.bf16.vlgmr.msra.gmra.mrb[16].mxu1 %vm386_vm2, %v11635_v63  ;;  %9578 = vmatmul.mubr.msk.bf16.vlgmr.msra.gmra.mrb[20].mxu0 %vm386_vm2, %v11635_v63  ;;  %v4142_v55 = vpop.permute.xlu1 %4141 }
 0x1cb   : > { %4755 = vmatpush1.bf16.msra.mxu1 %v4249_v7  ;;  %4798 = vmatpush1.bf16.msra.mxu0 %v4255_v52  ;;  %v4144_v42 = vpop.permute.xlu0 %4143  ;;  %v11892_v52 = vpack.c.bf16 %v6110_v37, %v6110_v37 }
 0x1cc   : > { %6237 = vrot.lane.b32.xlu1 %v11823_v22, %s10368_s6  ;;  %6231 = vrot.lane.b32.xlu0 %v11825_v50, %s10368_s6  ;;  %v4178_v56 = vsel %vm4145_vm6, %v4142_v55, %v4144_v42 }
 0x1cd   : > { %4786 = vmatprep.mubr.bf16.mxu1 %v12775_v5  ;;  %4829 = vmatprep.mubr.bf16.mxu0 %v12775_v5  ;;  %v4279_v29 = vsel %vm390_vm1, %v4178_v56, 0 }
 0x1ce   : > { %9583 = vmatprep.subr.msk.bf16.mxu1 %vm390_vm1, %v4173_v16  ;;  %9585 = vmatprep.subr.msk.bf16.mxu0 %vm390_vm1, %v4175_v4  ;;  %v4140_v41 = vpop.permute.xlu1 %4139  ;;  %v11907_v4 = vpack.c.bf16 %v6115_v2, %v6115_v2 }
 0x1cf   : > { %v5085_v19 = vpop.permute.xlu0 %5084  ;;  %v4177_v35 = vsel %vm4145_vm6, %v4140_v41, %v4142_v55  ;;  %v4176_v1 = vsel %vm4145_vm6, %v4138_v21, %v4140_v41 }
 0x1d0   : > { %6241 = vrot.lane.b32.xlu1 %v11840_v11, %s10368_s6  ;;  %6243 = vrot.lane.b32.xlu0 %v11842_v18, %s10368_s6  ;;  %v4273_v21 = vsel %vm390_vm1, %v4176_v1, 0 }
 0x1d2   : > { %9580 = vmatmul.mubr.msk.bf16.vlgmr.msra.gmra.mrb[20].mxu1 %vm386_vm2, %v11635_v63  ;;  %9582 = vmatmul.mubr.msk.bf16.vlgmr.msra.gmra.mrb[24].mxu0 %vm386_vm2, %v11635_v63  ;;  %v5087_v62 = vpop.permute.xlu1 %5086 }
 0x1d3   : > { %4841 = vmatpush1.bf16.msra.mxu1 %v4261_v49  ;;  %4884 = vmatpush1.bf16.msra.mxu0 %v4267_v23  ;;  %v5089_v0 = vpop.permute.xlu0 %5088  ;;  %v5153_v20 = vsel %vm5152_vm7, %v5085_v19, %v5087_v62 }
 0x1d4   : > { %6245 = vrot.lane.b32.xlu1 %v11857_v3, %s10368_s6  ;;  %6239 = vrot.lane.b32.xlu0 %v11859_v13, %s10368_s6  ;;  %v5154_v42 = vsel %vm5152_vm7, %v5087_v62, %v5089_v0  ;;  %v5190_v49 = vsel %vm390_vm1, %v5153_v20, 0 }
 0x1d5   : > { %4872 = vmatprep.mubr.bf16.mxu1 %v12775_v5  ;;  %4915 = vmatprep.mubr.bf16.mxu0 %v12775_v5 }
 0x1d6   : > { %9587 = vmatprep.subr.msk.bf16.mxu1 %vm390_vm1, %v4177_v35  ;;  %9778 = vmatprep.subr.bf16.mxu0 %v12776_v60  ;;  %v5091_v43 = vpop.permute.xlu1 %5090 }
 0x1d7   : > { %v5093_v45 = vpop.permute.xlu0 %5092  ;;  %v5155_v15 = vsel %vm5152_vm7, %v5089_v0, %v5091_v43 }
 0x1d8   : > { %6249 = vrot.lane.b32.xlu1 %v11873_v36, %s10368_s6  ;;  %6251 = vrot.lane.b32.xlu0 %v11875_v59, %s10368_s6  ;;  %v5156_v16 = vsel %vm5152_vm7, %v5091_v43, %v5093_v45  ;;  %v5196_v27 = vsel %vm390_vm1, %v5155_v15, 0 }
 0x1da   : > { %9584 = vmatmul.mubr.msk.bf16.vlgmr.msra.gmra.mrb[24].mxu1 %vm386_vm2, %v11635_v63  ;;  %9586 = vmatmul.mubr.msk.bf16.vlgmr.msra.gmra.mrb[28].mxu0 %vm386_vm2, %v11635_v63  ;;  %v5095_v7 = vpop.permute.xlu1 %5094 }
 0x1db   : > { %4927 = vmatpush1.bf16.msra.mxu1 %v4273_v21  ;;  %9779 = vmatpush3.bf16.msra.mxu0 %v4279_v29  ;;  %v5097_v55 = vpop.permute.xlu0 %5096  ;;  %v5157_v37 = vsel %vm5152_vm7, %v5093_v45, %v5095_v7 }
 0x1dc   : > { %6253 = vrot.lane.b32.xlu1 %v11890_v51, %s10368_s6  ;;  %6247 = vrot.lane.b32.xlu0 %v11892_v52, %s10368_s6  ;;  %v5158_v0 = vsel %vm5152_vm7, %v5095_v7, %v5097_v55  ;;  %v5202_v29 = vsel %vm390_vm1, %v5157_v37, 0 }
 0x1dd   : > { %4958 = vmatprep.mubr.bf16.mxu1 %v12775_v5  ;;  %9780 = vmatprep.mubr.msk.bf16.mxu0 %vm10365_vm3, %v12776_v60 }
 0x1de   : > { %9593 = vmatprep.subr.msk.bf16.mxu0 %vm390_vm1, %v5154_v42  ;;  %9595 = vmatprep.subr.msk.bf16.mxu1 %vm390_vm1, %v5156_v16  ;;  %v5099_v41 = vpop.permute.xlu1 %5098 }
 0x1df   : > { %v5101_v23 = vpop.permute.xlu0 %5100  ;;  %v5159_v56 = vsel %vm5152_vm7, %v5097_v55, %v5099_v41 }
 0x1e0   : > { %6257 = vrot.lane.b32.xlu1 %v11907_v4, %s10368_s6  ;;  %6259 = vrot.lane.b32.xlu0 %v11909_v24, %s10368_s6  ;;  %v5160_v35 = vsel %vm5152_vm7, %v5099_v41, %v5101_v23  ;;  %v5208_v1 = vsel %vm390_vm1, %v5159_v56, 0 }
 0x1e2   : > { %9588 = vmatmul.mubr.msk.bf16.vlgmr.msra.gmra.mrb[28].mxu1 %vm386_vm2, %v11635_v63  ;;  %9781 = vmatmul.mubr.msk.bf16.vlgmr.msra.gmra.mrb[40].mxu0 %vm386_vm2, %v11635_v63  ;;  %v5103_v19 = vpop.permute.xlu1 %5102  ;;  %v11944_v63 = vld [vmem:[%s12741_s1 + $0x28] sm:$0x3f]  }
 0x1e3   : > { %5289 = vmatpush1.bf16.msra.mxu0 %v5190_v49  ;;  %5332 = vmatpush1.bf16.msra.mxu1 %v5196_v27  ;;  %v5105_v62 = vpop.permute.xlu0 %5104  ;;  %v5161_v17 = vsel %vm5152_vm7, %v5101_v23, %v5103_v19 }
 0x1e4   : > { %6255 = vrot.lane.b32.xlu1 %v11924_v57, %s10368_s6  ;;  %7200 = vrot.lane.b32.xlu0 %v11621_v34, %s10369_s7  ;;  %v5162_v25 = vsel %vm5152_vm7, %v5103_v19, %v5105_v62 }
 0x1e5   : > { %5320 = vmatprep.mubr.bf16.mxu0 %v12775_v5  ;;  %5363 = vmatprep.mubr.bf16.mxu1 %v12775_v5 }
 0x1e6   : > { %9597 = vmatprep.subr.msk.bf16.mxu0 %vm390_vm1, %v5158_v0  ;;  %9599 = vmatprep.subr.msk.bf16.mxu1 %vm390_vm1, %v5160_v35  ;;  %v5107_v6 = vpop.permute.xlu1 %5106 }
 0x1e7   : > { %v5109_v43 = vpop.permute.xlu0 %5108  ;;  %v5163_v7 = vsel %vm5152_vm7, %v5105_v62, %v5107_v6 }
 0x1e8   : > { %7202 = vrot.lane.b32.xlu1 %v11623_v33, %s10369_s7  ;;  %7204 = vrot.lane.b32.xlu0 %v11644_v9, %s10369_s7  ;;  %v5164_v21 = vsel %vm5152_vm7, %v5107_v6, %v5109_v43  ;;  %v5220_v62 = vsel %vm390_vm1, %v5163_v7, 0 }
 0x1ea   : > { %9594 = vmatmul.mubr.msk.bf16.vlgmr.msra.gmra.mrb[0].mxu0 %vm386_vm2, %v11944_v63  ;;  %9596 = vmatmul.mubr.msk.bf16.vlgmr.msra.gmra.mrb[0].mxu1 %vm386_vm2, %v11944_v63  ;;  %v5111_v2 = vpop.permute.xlu1 %5110 }
 0x1eb   : > { %5375 = vmatpush1.bf16.msra.mxu0 %v5202_v29  ;;  %5418 = vmatpush1.bf16.msra.mxu1 %v5208_v1  ;;  %v5113_v45 = vpop.permute.xlu0 %5112  ;;  %v5165_v6 = vsel %vm5152_vm7, %v5109_v43, %v5111_v2 }
 0x1ec   : > { %7206 = vrot.lane.b32.xlu1 %v11686_v31, %s10369_s7  ;;  %7208 = vrot.lane.b32.xlu0 %v11660_v61, %s10369_s7  ;;  %v5166_v19 = vsel %vm5152_vm7, %v5111_v2, %v5113_v45  ;;  %v5226_v29 = vsel %vm390_vm1, %v5165_v6, 0 }
 0x1ed   : > { %v2048_v55 = vpop.f32.mrb[32].mxu1  ;;  %5406 = vmatprep.mubr.bf16.mxu0 %v12775_v5  ;;  %5449 = vmatprep.mubr.bf16.mxu1 %v12775_v5 }
 0x1ee   : > { %v11968_v42 = vadd.f32 %v2048_v55, %v11665_v32  ;;  %v9764_v16 = vpop.f32.mrb[33].mxu1  ;;  %9601 = vmatprep.subr.msk.bf16.mxu0 %vm390_vm1, %v5162_v25  ;;  %9603 = vmatprep.subr.msk.bf16.mxu1 %vm390_vm1, %v5164_v21  ;;  %v5115_v15 = vpop.permute.xlu1 %5114  ;;  %v5214_v32 = vsel %vm390_vm1, %v5161_v17, 0 }
 0x1ef   : > { %v2051_v41 = vpop.f32.mrb[34].mxu1  ;;  %v5117_v20 = vpop.permute.xlu0 %5116  ;;  %v5167_v35 = vsel %vm5152_vm7, %v5113_v45, %v5115_v15 }
 0x1f0   : > { %v11974_v27 = vadd.f32 %v2051_v41, %v11677_v28  ;;  %v9765_v49 = vpop.f32.mrb[35].mxu1  ;;  %7210 = vrot.lane.b32.xlu1 %v11662_v10, %s10369_s7  ;;  %7212 = vrot.lane.b32.xlu0 %v11684_v40, %s10369_s7  ;;  %v5168_v0 = vsel %vm5152_vm7, %v5115_v15, %v5117_v20  ;;  %v5232_v1 = vsel %vm390_vm1, %v5167_v35, 0 }
 0x1f2   : > { %9598 = vmatmul.mubr.msk.bf16.vlgmr.msra.gmra.mrb[4].mxu0 %vm386_vm2, %v11944_v63  ;;  %9600 = vmatmul.mubr.msk.bf16.vlgmr.msra.gmra.mrb[4].mxu1 %vm386_vm2, %v11944_v63  ;;  %v5119_v23 = vpop.permute.xlu1 %5118 }
 0x1f3   : > { %5461 = vmatpush1.bf16.msra.mxu0 %v5214_v32  ;;  %5504 = vmatpush1.bf16.msra.mxu1 %v5220_v62  ;;  %v5121_v28 = vpop.permute.xlu0 %5120  ;;  %v5169_v55 = vsel %vm5152_vm7, %v5117_v20, %v5119_v23 }
 0x1f4   : > { %7214 = vrot.lane.b32.xlu1 %v11722_v47, %s10369_s7  ;;  %7216 = vrot.lane.b32.xlu0 %v11702_v48, %s10369_s7  ;;  %v5170_v2 = vsel %vm5152_vm7, %v5119_v23, %v5121_v28  ;;  %v5238_v17 = vsel %vm390_vm1, %v5169_v55, 0 }
 0x1f5   : > { %5492 = vmatprep.mubr.bf16.mxu0 %v12775_v5  ;;  %5535 = vmatprep.mubr.bf16.mxu1 %v12775_v5 }
 0x1f6   : > { %9605 = vmatprep.subr.msk.bf16.mxu0 %vm390_vm1, %v5166_v19  ;;  %9607 = vmatprep.subr.msk.bf16.mxu1 %vm390_vm1, %v5168_v0  ;;  %v5123_v56 = vpop.permute.xlu1 %5122 }
 0x1f7   : > { %v5125_v37 = vpop.permute.xlu0 %5124  ;;  %v5171_v21 = vsel %vm5152_vm7, %v5121_v28, %v5123_v56 }
 0x1f8   : > { %7218 = vrot.lane.b32.xlu1 %v11704_v39, %s10369_s7  ;;  %7220 = vrot.lane.b32.xlu0 %v11720_v46, %s10369_s7  ;;  %v5172_v25 = vsel %vm5152_vm7, %v5123_v56, %v5125_v37  ;;  %v5244_v15 = vsel %vm390_vm1, %v5171_v21, 0 }
 0x1fa   : > { %9602 = vmatmul.mubr.msk.bf16.vlgmr.msra.gmra.mrb[8].mxu0 %vm386_vm2, %v11944_v63  ;;  %9604 = vmatmul.mubr.msk.bf16.vlgmr.msra.gmra.mrb[8].mxu1 %vm386_vm2, %v11944_v63  ;;  %v5127_v45 = vpop.permute.xlu1 %5126 }
 0x1fb   : > { %5547 = vmatpush1.bf16.msra.mxu0 %v5226_v29  ;;  %5590 = vmatpush1.bf16.msra.mxu1 %v5232_v1  ;;  %v5129_v43 = vpop.permute.xlu0 %5128  ;;  %v5173_v28 = vsel %vm5152_vm7, %v5125_v37, %v5127_v45 }
 0x1fc   : > { %7222 = vrot.lane.b32.xlu1 %v11757_v12, %s10369_s7  ;;  %7224 = vrot.lane.b32.xlu0 %v11737_v38, %s10369_s7  ;;  %v5174_v49 = vsel %vm5152_vm7, %v5127_v45, %v5129_v43  ;;  %v5250_v35 = vsel %vm390_vm1, %v5173_v28, 0 }
 0x1fd   : > { %5578 = vmatprep.mubr.bf16.mxu0 %v12775_v5  ;;  %5621 = vmatprep.mubr.bf16.mxu1 %v12775_v5 }
 0x1fe   : > { %9609 = vmatprep.subr.msk.bf16.mxu0 %vm390_vm1, %v5170_v2  ;;  %9611 = vmatprep.subr.msk.bf16.mxu1 %vm390_vm1, %v5172_v25  ;;  %v5131_v7 = vpop.permute.xlu1 %5130 }
 0x1ff   : > { %v5133_v16 = vpop.permute.xlu0 %5132  ;;  %v5175_v32 = vsel %vm5152_vm7, %v5129_v43, %v5131_v7 }
 0x200   : > { %7226 = vrot.lane.b32.xlu1 %v11739_v26, %s10369_s7  ;;  %7228 = vrot.lane.b32.xlu0 %v11755_v30, %s10369_s7  ;;  %v5176_v62 = vsel %vm5152_vm7, %v5131_v7, %v5133_v16  ;;  %v5256_v0 = vsel %vm390_vm1, %v5175_v32, 0 }
 0x202   : > { %9606 = vmatmul.mubr.msk.bf16.vlgmr.msra.gmra.mrb[12].mxu0 %vm386_vm2, %v11944_v63  ;;  %9608 = vmatmul.mubr.msk.bf16.vlgmr.msra.gmra.mrb[12].mxu1 %vm386_vm2, %v11944_v63  ;;  %v5135_v41 = vpop.permute.xlu1 %5134 }
 0x203   : > { %5633 = vmatpush1.bf16.msra.mxu0 %v5238_v17  ;;  %5676 = vmatpush1.bf16.msra.mxu1 %v5244_v15  ;;  %v5137_v20 = vpop.permute.xlu0 %5136  ;;  %v5177_v43 = vsel %vm5152_vm7, %v5133_v16, %v5135_v41 }
 0x204   : > { %7230 = vrot.lane.b32.xlu1 %v11791_v14, %s10369_s7  ;;  %7232 = vrot.lane.b32.xlu0 %v11772_v54, %s10369_s7  ;;  %v5178_v37 = vsel %vm5152_vm7, %v5135_v41, %v5137_v20  ;;  %v5262_v21 = vsel %vm390_vm1, %v5177_v43, 0 }
 0x205   : > { %5664 = vmatprep.mubr.bf16.mxu0 %v12775_v5  ;;  %5707 = vmatprep.mubr.bf16.mxu1 %v12775_v5 }
 0x206   : > { %9613 = vmatprep.subr.msk.bf16.mxu0 %vm390_vm1, %v5174_v49  ;;  %9615 = vmatprep.subr.msk.bf16.mxu1 %vm390_vm1, %v5176_v62  ;;  %v5139_v23 = vpop.permute.xlu1 %5138 }
 0x207   : > { %v5141_v19 = vpop.permute.xlu0 %5140  ;;  %v5179_v29 = vsel %vm5152_vm7, %v5137_v20, %v5139_v23 }
 0x208   : > { %7234 = vrot.lane.b32.xlu1 %v11774_v58, %s10369_s7  ;;  %7236 = vrot.lane.b32.xlu0 %v11789_v8, %s10369_s7  ;;  %v5180_v1 = vsel %vm5152_vm7, %v5139_v23, %v5141_v19  ;;  %v5268_v25 = vsel %vm390_vm1, %v5179_v29, 0 }
 0x20a   : > { %9610 = vmatmul.mubr.msk.bf16.vlgmr.msra.gmra.mrb[16].mxu0 %vm386_vm2, %v11944_v63  ;;  %9612 = vmatmul.mubr.msk.bf16.vlgmr.msra.gmra.mrb[16].mxu1 %vm386_vm2, %v11944_v63  ;;  %v5143_v56 = vpop.permute.xlu1 %5142 }
 0x20b   : > { %5719 = vmatpush1.bf16.msra.mxu0 %v5250_v35  ;;  %5762 = vmatpush1.bf16.msra.mxu1 %v5256_v0  ;;  %v5145_v6 = vpop.permute.xlu0 %5144  ;;  %v5181_v20 = vsel %vm5152_vm7, %v5141_v19, %v5143_v56 }
 0x20c   : > { %7238 = vrot.lane.b32.xlu1 %v11825_v50, %s10369_s7  ;;  %7240 = vrot.lane.b32.xlu0 %v11806_v53, %s10369_s7  ;;  %v5182_v16 = vsel %vm5152_vm7, %v5143_v56, %v5145_v6  ;;  %v5274_v32 = vsel %vm390_vm1, %v5181_v20, 0 }
 0x20d   : > { %5750 = vmatprep.mubr.bf16.mxu0 %v12775_v5  ;;  %5793 = vmatprep.mubr.bf16.mxu1 %v12775_v5 }
 0x20e   : > { %9617 = vmatprep.subr.msk.bf16.mxu0 %vm390_vm1, %v5178_v37  ;;  %9619 = vmatprep.subr.msk.bf16.mxu1 %vm390_vm1, %v5180_v1  ;;  %v5147_v45 = vpop.permute.xlu1 %5146 }
 0x20f   : > { %v5149_v2 = vpop.permute.xlu0 %5148  ;;  %v5183_v17 = vsel %vm5152_vm7, %v5145_v6, %v5147_v45 }
 0x210   : > { %7242 = vrot.lane.b32.xlu1 %v11808_v44, %s10369_s7  ;;  %7244 = vrot.lane.b32.xlu0 %v11823_v22, %s10369_s7  ;;  %v5184_v15 = vsel %vm5152_vm7, %v5147_v45, %v5149_v2  ;;  %v5280_v62 = vsel %vm390_vm1, %v5183_v17, 0 }
 0x212   : > { %9614 = vmatmul.mubr.msk.bf16.vlgmr.msra.gmra.mrb[20].mxu0 %vm386_vm2, %v11944_v63  ;;  %9616 = vmatmul.mubr.msk.bf16.vlgmr.msra.gmra.mrb[20].mxu1 %vm386_vm2, %v11944_v63  ;;  %v6194_v7 = vpop.permute.xlu1 %6193 }
 0x213   : > { %5805 = vmatpush1.bf16.msra.mxu0 %v5262_v21  ;;  %5848 = vmatpush1.bf16.msra.mxu1 %v5268_v25  ;;  %v6196_v55 = vpop.permute.xlu0 %6195  ;;  %v12132_v21 = vld [vmem:[%s12741_s1 + $0x30] sm:$0x3f]  }
 0x214   : > { %7246 = vrot.lane.b32.xlu1 %v11859_v13, %s10369_s7  ;;  %7248 = vrot.lane.b32.xlu0 %v11840_v11, %s10369_s7  ;;  %v6262_v0 = vsel %vm6261_vm8, %v6194_v7, %v6196_v55 }
 0x215   : > { %5836 = vmatprep.mubr.bf16.mxu0 %v12775_v5  ;;  %5879 = vmatprep.mubr.bf16.mxu1 %v12775_v5  ;;  %v6299_v37 = vsel %vm390_vm1, %v6262_v0, 0 }
 0x216   : > { %9621 = vmatprep.subr.msk.bf16.mxu0 %vm390_vm1, %v5182_v16  ;;  %9623 = vmatprep.subr.msk.bf16.mxu1 %vm390_vm1, %v5184_v15  ;;  %v6198_v41 = vpop.permute.xlu1 %6197 }
 0x217   : > { %v5151_v49 = vpop.permute.xlu0 %5150  ;;  %v6263_v19 = vsel %vm6261_vm8, %v6196_v55, %v6198_v41 }
 0x218   : > { %7250 = vrot.lane.b32.xlu1 %v11842_v18, %s10369_s7  ;;  %7252 = vrot.lane.b32.xlu0 %v11857_v3, %s10369_s7  ;;  %v5185_v56 = vsel %vm5152_vm7, %v5149_v2, %v5151_v49 }
 0x219   : > { %v5286_v1 = vsel %vm390_vm1, %v5185_v56, 0 }
 0x21a   : > { %9618 = vmatmul.mubr.msk.bf16.vlgmr.msra.gmra.mrb[24].mxu0 %vm386_vm2, %v11944_v63  ;;  %9620 = vmatmul.mubr.msk.bf16.vlgmr.msra.gmra.mrb[24].mxu1 %vm386_vm2, %v11944_v63  ;;  %v6202_v23 = vpop.permute.xlu1 %6201 }
 0x21b   : > { %5891 = vmatpush1.bf16.msra.mxu0 %v5274_v32  ;;  %5934 = vmatpush1.bf16.msra.mxu1 %v5280_v62  ;;  %v6204_v28 = vpop.permute.xlu0 %6203 }
 0x21c   : > { %7254 = vrot.lane.b32.xlu1 %v11892_v52, %s10369_s7  ;;  %7256 = vrot.lane.b32.xlu0 %v11873_v36, %s10369_s7  ;;  %v6266_v25 = vsel %vm6261_vm8, %v6202_v23, %v6204_v28 }
 0x21d   : > { %5922 = vmatprep.mubr.bf16.mxu0 %v12775_v5  ;;  %5965 = vmatprep.mubr.bf16.mxu1 %v12775_v5  ;;  %v6311_v15 = vsel %vm390_vm1, %v6266_v25, 0 }
 0x21e   : > { %9784 = vmatprep.subr.bf16.mxu1 %v12776_v60  ;;  %9629 = vmatprep.subr.msk.bf16.mxu0 %vm390_vm1, %v6263_v19  ;;  %v6206_v35 = vpop.permute.xlu1 %6205 }
 0x21f   : > { %v6200_v6 = vpop.permute.xlu0 %6199  ;;  %v6267_v2 = vsel %vm6261_vm8, %v6204_v28, %v6206_v35 }
 0x220   : > { %7258 = vrot.lane.b32.xlu1 %v11875_v59, %s10369_s7  ;;  %7260 = vrot.lane.b32.xlu0 %v11890_v51, %s10369_s7  ;;  %v6265_v45 = vsel %vm6261_vm8, %v6200_v6, %v6202_v23  ;;  %v6264_v55 = vsel %vm6261_vm8, %v6198_v41, %v6200_v6 }
 0x221   : > { %v6305_v17 = vsel %vm390_vm1, %v6264_v55, 0 }
 0x222   : > { %9622 = vmatmul.mubr.msk.bf16.vlgmr.msra.gmra.mrb[28].mxu0 %vm386_vm2, %v11944_v63  ;;  %9624 = vmatmul.mubr.msk.bf16.vlgmr.msra.gmra.mrb[28].mxu1 %vm386_vm2, %v11944_v63  ;;  %v6210_v29 = vpop.permute.xlu1 %6209 }
 0x223   : > { %9785 = vmatpush3.bf16.msra.mxu1 %v5286_v1  ;;  %6398 = vmatpush1.bf16.msra.mxu0 %v6299_v37  ;;  %v6212_v43 = vpop.permute.xlu0 %6211 }
 0x224   : > { %7262 = vrot.lane.b32.xlu1 %v11924_v57, %s10369_s7  ;;  %7264 = vrot.lane.b32.xlu0 %v11907_v4, %s10369_s7 }
 0x225   : > { %9786 = vmatprep.mubr.msk.bf16.mxu1 %vm10365_vm3, %v12776_v60  ;;  %6429 = vmatprep.mubr.bf16.mxu0 %v12775_v5 }
 0x226   : > { %9631 = vmatprep.subr.msk.bf16.mxu1 %vm390_vm1, %v6265_v45  ;;  %9633 = vmatprep.subr.msk.bf16.mxu0 %vm390_vm1, %v6267_v2  ;;  %v6214_v7 = vpop.permute.xlu1 %6213 }
 0x227   : > { %v6208_v16 = vpop.permute.xlu0 %6207  ;;  %v6271_v41 = vsel %vm6261_vm8, %v6212_v43, %v6214_v7 }
 0x228   : > { %8207 = vrot.lane.b32.xlu1 %v11621_v34, %s10370_s14  ;;  %8209 = vrot.lane.b32.xlu0 %v11623_v33, %s10370_s14  ;;  %v6269_v49 = vsel %vm6261_vm8, %v6208_v16, %v6210_v29  ;;  %v6270_v34 = vsel %vm6261_vm8, %v6210_v29, %v6212_v43 }
 0x229   : > { %v6323_v0 = vsel %vm390_vm1, %v6270_v34, 0 }
 0x22a   : > { %9787 = vmatmul.mubr.msk.bf16.vlgmr.msra.gmra.mrb[40].mxu1 %vm386_vm2, %v11944_v63  ;;  %9630 = vmatmul.mubr.msk.bf16.vlgmr.msra.gmra.mrb[0].mxu0 %vm386_vm2, %v12132_v21  ;;  %v6218_v20 = vpop.permute.xlu1 %6217 }
 0x22b   : > { %6441 = vmatpush1.bf16.msra.mxu1 %v6305_v17  ;;  %6484 = vmatpush1.bf16.msra.mxu0 %v6311_v15  ;;  %v6220_v62 = vpop.permute.xlu0 %6219 }
 0x22c   : > { %8211 = vrot.lane.b32.xlu1 %v11644_v9, %s10370_s14  ;;  %7266 = vrot.lane.b32.xlu0 %v11909_v24, %s10369_s7  ;;  %v6268_v9 = vsel %vm6261_vm8, %v6206_v35, %v6208_v16 }
 0x22d   : > { %v2989_v33 = vpop.f32.mrb[36].mxu0  ;;  %6472 = vmatprep.mubr.bf16.mxu1 %v12775_v5  ;;  %6515 = vmatprep.mubr.bf16.mxu0 %v12775_v5 }
 0x22e   : > { %v12155_v63 = vadd.f32 %v2989_v33, %v11968_v42  ;;  %v9770_v32 = vpop.f32.mrb[37].mxu0  ;;  %9635 = vmatprep.subr.msk.bf16.mxu1 %vm390_vm1, %v6269_v49  ;;  %9637 = vmatprep.subr.msk.bf16.mxu0 %vm390_vm1, %v6271_v41  ;;  %v6222_v23 = vpop.permute.xlu1 %6221  ;;  %v6317_v42 = vsel %vm390_vm1, %v6268_v9, 0 }
 0x22f   : > { %v2992_v28 = vpop.f32.mrb[38].mxu0  ;;  %v6216_v19 = vpop.permute.xlu0 %6215 }
 0x230   : > { %v12162_v56 = vadd.f32 %v2992_v28, %v11974_v27  ;;  %v9771_v6 = vpop.f32.mrb[39].mxu0  ;;  %8215 = vrot.lane.b32.xlu1 %v11660_v61, %s10370_s14  ;;  %8217 = vrot.lane.b32.xlu0 %v11662_v10, %s10370_s14  ;;  %v6275_v27 = vsel %vm6261_vm8, %v6220_v62, %v6222_v23  ;;  %v6273_v37 = vsel %vm6261_vm8, %v6216_v19, %v6218_v20 }
 0x231   : > { %v6274_v61 = vsel %vm6261_vm8, %v6218_v20, %v6220_v62  ;;  %v6272_v29 = vsel %vm6261_vm8, %v6214_v7, %v6216_v19 }
 0x232   : > { %9632 = vmatmul.mubr.msk.bf16.vlgmr.msra.gmra.mrb[0].mxu1 %vm386_vm2, %v12132_v21  ;;  %9634 = vmatmul.mubr.msk.bf16.vlgmr.msra.gmra.mrb[4].mxu0 %vm386_vm2, %v12132_v21  ;;  %v6226_v35 = vpop.permute.xlu1 %6225  ;;  %v6335_v43 = vsel %vm390_vm1, %v6274_v61, 0 }
 0x233   : > { %6527 = vmatpush1.bf16.msra.mxu1 %v6317_v42  ;;  %6570 = vmatpush1.bf16.msra.mxu0 %v6323_v0  ;;  %v6228_v1 = vpop.permute.xlu0 %6227 }
 0x234   : > { %8219 = vrot.lane.b32.xlu1 %v11684_v40, %s10370_s14  ;;  %8213 = vrot.lane.b32.xlu0 %v11686_v31, %s10370_s14  ;;  %v6329_v40 = vsel %vm390_vm1, %v6272_v29, 0 }
 0x235   : > { %6558 = vmatprep.mubr.bf16.mxu1 %v12775_v5  ;;  %6601 = vmatprep.mubr.bf16.mxu0 %v12775_v5 }
 0x236   : > { %9639 = vmatprep.subr.msk.bf16.mxu1 %vm390_vm1, %v6273_v37  ;;  %9641 = vmatprep.subr.msk.bf16.mxu0 %vm390_vm1, %v6275_v27  ;;  %v6230_v10 = vpop.permute.xlu1 %6229 }
 0x237   : > { %v6224_v45 = vpop.permute.xlu0 %6223  ;;  %v6279_v2 = vsel %vm6261_vm8, %v6228_v1, %v6230_v10 }
 0x238   : > { %8223 = vrot.lane.b32.xlu1 %v11702_v48, %s10370_s14  ;;  %8225 = vrot.lane.b32.xlu0 %v11704_v39, %s10370_s14  ;;  %v6277_v25 = vsel %vm6261_vm8, %v6224_v45, %v6226_v35  ;;  %v6278_v48 = vsel %vm6261_vm8, %v6226_v35, %v6228_v1  ;;  %v6276_v55 = vsel %vm6261_vm8, %v6222_v23, %v6224_v45 }
 0x239   : > { %v6347_v15 = vsel %vm390_vm1, %v6278_v48, 0 }
 0x23a   : > { %9636 = vmatmul.mubr.msk.bf16.vlgmr.msra.gmra.mrb[4].mxu1 %vm386_vm2, %v12132_v21  ;;  %9638 = vmatmul.mubr.msk.bf16.vlgmr.msra.gmra.mrb[8].mxu0 %vm386_vm2, %v12132_v21  ;;  %v6234_v31 = vpop.permute.xlu1 %6233 }
 0x23b   : > { %6613 = vmatpush1.bf16.msra.mxu1 %v6329_v40  ;;  %6656 = vmatpush1.bf16.msra.mxu0 %v6335_v43  ;;  %v6236_v7 = vpop.permute.xlu0 %6235 }
 0x23c   : > { %8227 = vrot.lane.b32.xlu1 %v11720_v46, %s10370_s14  ;;  %8221 = vrot.lane.b32.xlu0 %v11722_v47, %s10370_s14  ;;  %v6341_v46 = vsel %vm390_vm1, %v6276_v55, 0 }
 0x23d   : > { %6644 = vmatprep.mubr.bf16.mxu1 %v12775_v5  ;;  %6687 = vmatprep.mubr.bf16.mxu0 %v12775_v5 }
 0x23e   : > { %9643 = vmatprep.subr.msk.bf16.mxu1 %vm390_vm1, %v6277_v25  ;;  %9645 = vmatprep.subr.msk.bf16.mxu0 %vm390_vm1, %v6279_v2  ;;  %v6238_v39 = vpop.permute.xlu1 %6237 }
 0x23f   : > { %v6232_v16 = vpop.permute.xlu0 %6231  ;;  %v6283_v17 = vsel %vm6261_vm8, %v6236_v7, %v6238_v39 }
 0x240   : > { %8231 = vrot.lane.b32.xlu1 %v11737_v38, %s10370_s14  ;;  %8233 = vrot.lane.b32.xlu0 %v11739_v26, %s10370_s14  ;;  %v6281_v20 = vsel %vm6261_vm8, %v6232_v16, %v6234_v31  ;;  %v6282_v38 = vsel %vm6261_vm8, %v6234_v31, %v6236_v7  ;;  %v6280_v49 = vsel %vm6261_vm8, %v6230_v10, %v6232_v16 }
 0x241   : > { %v6359_v34 = vsel %vm390_vm1, %v6282_v38, 0 }
 0x242   : > { %9640 = vmatmul.mubr.msk.bf16.vlgmr.msra.gmra.mrb[8].mxu1 %vm386_vm2, %v12132_v21  ;;  %9642 = vmatmul.mubr.msk.bf16.vlgmr.msra.gmra.mrb[12].mxu0 %vm386_vm2, %v12132_v21  ;;  %v6242_v47 = vpop.permute.xlu1 %6241 }
 0x243   : > { %6699 = vmatpush1.bf16.msra.mxu1 %v6341_v46  ;;  %6742 = vmatpush1.bf16.msra.mxu0 %v6347_v15  ;;  %v6244_v41 = vpop.permute.xlu0 %6243 }
 0x244   : > { %8235 = vrot.lane.b32.xlu1 %v11755_v30, %s10370_s14  ;;  %8229 = vrot.lane.b32.xlu0 %v11757_v12, %s10370_s14  ;;  %v6353_v30 = vsel %vm390_vm1, %v6280_v49, 0 }
 0x245   : > { %6730 = vmatprep.mubr.bf16.mxu1 %v12775_v5  ;;  %6773 = vmatprep.mubr.bf16.mxu0 %v12775_v5 }
 0x246   : > { %9647 = vmatprep.subr.msk.bf16.mxu1 %vm390_vm1, %v6281_v20  ;;  %9649 = vmatprep.subr.msk.bf16.mxu0 %vm390_vm1, %v6283_v17  ;;  %v6246_v26 = vpop.permute.xlu1 %6245 }
 0x247   : > { %v6240_v62 = vpop.permute.xlu0 %6239  ;;  %v6287_v33 = vsel %vm6261_vm8, %v6244_v41, %v6246_v26 }
 0x248   : > { %8239 = vrot.lane.b32.xlu1 %v11772_v54, %s10370_s14  ;;  %8241 = vrot.lane.b32.xlu0 %v11774_v58, %s10370_s14  ;;  %v6285_v32 = vsel %vm6261_vm8, %v6240_v62, %v6242_v47  ;;  %v6286_v54 = vsel %vm6261_vm8, %v6242_v47, %v6244_v41  ;;  %v6284_v9 = vsel %vm6261_vm8, %v6238_v39, %v6240_v62 }
 0x249   : > { %v6371_v19 = vsel %vm390_vm1, %v6286_v54, 0 }
 0x24a   : > { %9644 = vmatmul.mubr.msk.bf16.vlgmr.msra.gmra.mrb[12].mxu1 %vm386_vm2, %v12132_v21  ;;  %9646 = vmatmul.mubr.msk.bf16.vlgmr.msra.gmra.mrb[16].mxu0 %vm386_vm2, %v12132_v21  ;;  %v6250_v12 = vpop.permute.xlu1 %6249 }
 0x24b   : > { %6785 = vmatpush1.bf16.msra.mxu1 %v6353_v30  ;;  %6828 = vmatpush1.bf16.msra.mxu0 %v6359_v34  ;;  %v6252_v23 = vpop.permute.xlu0 %6251 }
 0x24c   : > { %8243 = vrot.lane.b32.xlu1 %v11789_v8, %s10370_s14  ;;  %8237 = vrot.lane.b32.xlu0 %v11791_v14, %s10370_s14  ;;  %v6365_v8 = vsel %vm390_vm1, %v6284_v9, 0 }
 0x24d   : > { %6816 = vmatprep.mubr.bf16.mxu1 %v12775_v5  ;;  %6859 = vmatprep.mubr.bf16.mxu0 %v12775_v5 }
 0x24e   : > { %9651 = vmatprep.subr.msk.bf16.mxu1 %vm390_vm1, %v6285_v32  ;;  %9653 = vmatprep.subr.msk.bf16.mxu0 %vm390_vm1, %v6287_v33  ;;  %v6254_v58 = vpop.permute.xlu1 %6253 }
 0x24f   : > { %v6248_v28 = vpop.permute.xlu0 %6247  ;;  %v6291_v0 = vsel %vm6261_vm8, %v6252_v23, %v6254_v58 }
 0x250   : > { %8247 = vrot.lane.b32.xlu1 %v11806_v53, %s10370_s14  ;;  %8249 = vrot.lane.b32.xlu0 %v11808_v44, %s10370_s14  ;;  %v6289_v6 = vsel %vm6261_vm8, %v6248_v28, %v6250_v12  ;;  %v6290_v53 = vsel %vm6261_vm8, %v6250_v12, %v6252_v23  ;;  %v6288_v35 = vsel %vm6261_vm8, %v6246_v26, %v6248_v28 }
 0x251   : > { %v6383_v37 = vsel %vm390_vm1, %v6290_v53, 0  ;;  %v9207_v53 = vld [vmem:[%s12742_s2 + $0x8] sm:$0xf] }
 0x252   : > { %9648 = vmatmul.mubr.msk.bf16.vlgmr.msra.gmra.mrb[16].mxu1 %vm386_vm2, %v12132_v21  ;;  %9650 = vmatmul.mubr.msk.bf16.vlgmr.msra.gmra.mrb[20].mxu0 %vm386_vm2, %v12132_v21  ;;  %v6258_v14 = vpop.permute.xlu1 %6257 }
 0x253   : > { %6871 = vmatpush1.bf16.msra.mxu1 %v6365_v8  ;;  %6914 = vmatpush1.bf16.msra.mxu0 %v6371_v19  ;;  %v6260_v42 = vpop.permute.xlu0 %6259 }
 0x254   : > { %8251 = vrot.lane.b32.xlu1 %v11823_v22, %s10370_s14  ;;  %8245 = vrot.lane.b32.xlu0 %v11825_v50, %s10370_s14  ;;  %v6377_v22 = vsel %vm390_vm1, %v6288_v35, 0 }
 0x255   : > { %6902 = vmatprep.mubr.bf16.mxu1 %v12775_v5  ;;  %6945 = vmatprep.mubr.bf16.mxu0 %v12775_v5 }
 0x256   : > { %9655 = vmatprep.subr.msk.bf16.mxu1 %vm390_vm1, %v6289_v6  ;;  %9657 = vmatprep.subr.msk.bf16.mxu0 %vm390_vm1, %v6291_v0  ;;  %v6256_v44 = vpop.permute.xlu1 %6255 }
 0x257   : > { %v7201_v27 = vpop.permute.xlu0 %7200  ;;  %v6293_v1 = vsel %vm6261_vm8, %v6256_v44, %v6258_v14  ;;  %v6292_v10 = vsel %vm6261_vm8, %v6254_v58, %v6256_v44 }
 0x258   : > { %8255 = vrot.lane.b32.xlu1 %v11840_v11, %s10370_s14  ;;  %8257 = vrot.lane.b32.xlu0 %v11842_v18, %s10370_s14  ;;  %v6294_v11 = vsel %vm6261_vm8, %v6258_v14, %v6260_v42  ;;  %v9206_v42 = vld [vmem:[%s12742_s2] sm:$0xff] }
 0x259   : > { %v6395_v45 = vsel %vm390_vm1, %v6294_v11, 0 }
 0x25a   : > { %9652 = vmatmul.mubr.msk.bf16.vlgmr.msra.gmra.mrb[20].mxu1 %vm386_vm2, %v12132_v21  ;;  %9654 = vmatmul.mubr.msk.bf16.vlgmr.msra.gmra.mrb[24].mxu0 %vm386_vm2, %v12132_v21  ;;  %v7203_v50 = vpop.permute.xlu1 %7202 }
 0x25b   : > { %6957 = vmatpush1.bf16.msra.mxu1 %v6377_v22  ;;  %7000 = vmatpush1.bf16.msra.mxu0 %v6383_v37  ;;  %v7205_v61 = vpop.permute.xlu0 %7204  ;;  %v7269_v2 = vsel %vm7268_vm9, %v7201_v27, %v7203_v50 }
 0x25c   : > { %8259 = vrot.lane.b32.xlu1 %v11857_v3, %s10370_s14  ;;  %8253 = vrot.lane.b32.xlu0 %v11859_v13, %s10370_s14  ;;  %v6389_v3 = vsel %vm390_vm1, %v6292_v10, 0  ;;  %v7270_v43 = vsel %vm7268_vm9, %v7203_v50, %v7205_v61 }
 0x25d   : > { %6988 = vmatprep.mubr.bf16.mxu1 %v12775_v5  ;;  %7031 = vmatprep.mubr.bf16.mxu0 %v12775_v5 }
 0x25e   : > { %9659 = vmatprep.subr.msk.bf16.mxu1 %vm390_vm1, %v6293_v1  ;;  %9790 = vmatprep.subr.bf16.mxu0 %v12776_v60  ;;  %v7207_v18 = vpop.permute.xlu1 %7206 }
 0x25f   : > { %v7209_v29 = vpop.permute.xlu0 %7208 }
 0x260   : > { %8263 = vrot.lane.b32.xlu1 %v11873_v36, %s10370_s14  ;;  %8265 = vrot.lane.b32.xlu0 %v11875_v59, %s10370_s14  ;;  %v7272_v40 = vsel %vm7268_vm9, %v7207_v18, %v7209_v29  ;;  %v7271_v59 = vsel %vm7268_vm9, %v7205_v61, %v7207_v18 }
 0x262   : > { %9656 = vmatmul.mubr.msk.bf16.vlgmr.msra.gmra.mrb[24].mxu1 %vm386_vm2, %v12132_v21  ;;  %9658 = vmatmul.mubr.msk.bf16.vlgmr.msra.gmra.mrb[28].mxu0 %vm386_vm2, %v12132_v21  ;;  %v7211_v13 = vpop.permute.xlu1 %7210 }
 0x263   : > { %7043 = vmatpush1.bf16.msra.mxu1 %v6389_v3  ;;  %9791 = vmatpush3.bf16.msra.mxu0 %v6395_v45  ;;  %v7213_v36 = vpop.permute.xlu0 %7212  ;;  %v7273_v16 = vsel %vm7268_vm9, %v7209_v29, %v7211_v13 }
 0x264   : > { %8267 = vrot.lane.b32.xlu1 %v11890_v51, %s10370_s14  ;;  %8261 = vrot.lane.b32.xlu0 %v11892_v52, %s10370_s14  ;;  %v7312_v51 = vsel %vm390_vm1, %v7271_v59, 0  ;;  %v7306_v52 = vsel %vm390_vm1, %v7269_v2, 0  ;;  %v7274_v7 = vsel %vm7268_vm9, %v7211_v13, %v7213_v36  ;;  %v7318_v46 = vsel %vm390_vm1, %v7273_v16, 0 }
 0x265   : > { %7074 = vmatprep.mubr.bf16.mxu1 %v12775_v5  ;;  %9792 = vmatprep.mubr.msk.bf16.mxu0 %vm10365_vm3, %v12776_v60 }
 0x266   : > { %9665 = vmatprep.subr.msk.bf16.mxu0 %vm390_vm1, %v7270_v43  ;;  %9667 = vmatprep.subr.msk.bf16.mxu1 %vm390_vm1, %v7272_v40  ;;  %v7215_v31 = vpop.permute.xlu1 %7214 }
 0x267   : > { %v7217_v25 = vpop.permute.xlu0 %7216 }
 0x268   : > { %8271 = vrot.lane.b32.xlu1 %v11907_v4, %s10370_s14  ;;  %8273 = vrot.lane.b32.xlu0 %v11909_v24, %s10370_s14  ;;  %v7276_v39 = vsel %vm7268_vm9, %v7215_v31, %v7217_v25  ;;  %v7275_v4 = vsel %vm7268_vm9, %v7213_v36, %v7215_v31  ;;  %v12338_v24 = vld [vmem:[%s12741_s1 + $0x38] sm:$0x3f]  }
 0x26a   : > { %9660 = vmatmul.mubr.msk.bf16.vlgmr.msra.gmra.mrb[28].mxu1 %vm386_vm2, %v12132_v21  ;;  %9793 = vmatmul.mubr.msk.bf16.vlgmr.msra.gmra.mrb[44].mxu0 %vm386_vm2, %v12132_v21  ;;  %v7219_v48 = vpop.permute.xlu1 %7218 }
 0x26b   : > { %7405 = vmatpush1.bf16.msra.mxu0 %v7306_v52  ;;  %7448 = vmatpush1.bf16.msra.mxu1 %v7312_v51  ;;  %v7221_v55 = vpop.permute.xlu0 %7220  ;;  %v7277_v30 = vsel %vm7268_vm9, %v7217_v25, %v7219_v48 }
 0x26c   : > { %8269 = vrot.lane.b32.xlu1 %v11924_v57, %s10370_s14  ;;  %7436 = vmatprep.mubr.bf16.mxu0 %v12775_v5  ;;  %v7324_v57 = vsel %vm390_vm1, %v7275_v4, 0  ;;  %v7278_v47 = vsel %vm7268_vm9, %v7219_v48, %v7221_v55  ;;  %v7330_v58 = vsel %vm390_vm1, %v7277_v30, 0 }
 0x26d   : > { %7479 = vmatprep.mubr.bf16.mxu1 %v12775_v5  ;;  %9669 = vmatprep.subr.msk.bf16.mxu0 %vm390_vm1, %v7274_v7 }
 0x26e   : > { %9671 = vmatprep.subr.msk.bf16.mxu1 %vm390_vm1, %v7276_v39  ;;  %v7223_v21 = vpop.permute.xlu1 %7222  ;;  %9210 = vperm.xlu0 %10341, %v9206_v42  }
 0x26f   : > { %v7225_v15 = vpop.permute.xlu0 %7224  ;;  %v7279_v38 = vsel %vm7268_vm9, %v7221_v55, %v7223_v21 }
 0x270   : > { %v7280_v17 = vsel %vm7268_vm9, %v7223_v21, %v7225_v15  ;;  %v7336_v32 = vsel %vm390_vm1, %v7279_v38, 0  ;;  %9215 = vperm.xlu1 %10342, %v9207_v53  }
 0x272   : > { %9666 = vmatmul.mubr.msk.bf16.vlgmr.msra.gmra.mrb[0].mxu0 %vm386_vm2, %v12338_v24  ;;  %9668 = vmatmul.mubr.msk.bf16.vlgmr.msra.gmra.mrb[0].mxu1 %vm386_vm2, %v12338_v24  ;;  %v7227_v20 = vpop.permute.xlu1 %7226 }
 0x273   : > { %7491 = vmatpush1.bf16.msra.mxu0 %v7318_v46  ;;  %7534 = vmatpush1.bf16.msra.mxu1 %v7324_v57  ;;  %v7229_v41 = vpop.permute.xlu0 %7228  ;;  %v7281_v14 = vsel %vm7268_vm9, %v7225_v15, %v7227_v20 }
 0x274   : > { %7522 = vmatprep.mubr.bf16.mxu0 %v12775_v5  ;;  %7565 = vmatprep.mubr.bf16.mxu1 %v12775_v5  ;;  %v7282_v9 = vsel %vm7268_vm9, %v7227_v20, %v7229_v41  ;;  %v7342_v44 = vsel %vm390_vm1, %v7281_v14, 0 }
 0x275   : > { %v3996_v26 = vpop.f32.mrb[36].mxu1  ;;  %9673 = vmatprep.subr.msk.bf16.mxu0 %vm390_vm1, %v7278_v47  ;;  %9675 = vmatprep.subr.msk.bf16.mxu1 %vm390_vm1, %v7280_v17 }
 0x276   : > { %v12356_v49 = vadd.f32 %v3996_v26, %v12155_v63  ;;  %v9776_v62 = vpop.f32.mrb[37].mxu1  ;;  %v7231_v34 = vpop.permute.xlu1 %7230 }
 0x277   : > { %v3999_v12 = vpop.f32.mrb[38].mxu1  ;;  %v7233_v33 = vpop.permute.xlu0 %7232 }
 0x278   : > { %v12361_v23 = vadd.f32 %v3999_v12, %v12162_v56  ;;  %v9777_v54 = vpop.f32.mrb[39].mxu1  ;;  %v7284_v63 = vsel %vm7268_vm9, %v7231_v34, %v7233_v33  ;;  %v7283_v56 = vsel %vm7268_vm9, %v7229_v41, %v7231_v34 }
 0x279   : > { %v7348_v6 = vsel %vm390_vm1, %v7283_v56, 0 }
 0x27a   : > { %9670 = vmatmul.mubr.msk.bf16.vlgmr.msra.gmra.mrb[4].mxu0 %vm386_vm2, %v12338_v24  ;;  %9672 = vmatmul.mubr.msk.bf16.vlgmr.msra.gmra.mrb[4].mxu1 %vm386_vm2, %v12338_v24  ;;  %v7235_v28 = vpop.permute.xlu1 %7234 }
 0x27b   : > { %7577 = vmatpush1.bf16.msra.mxu0 %v7330_v58  ;;  %7620 = vmatpush1.bf16.msra.mxu1 %v7336_v32  ;;  %v7237_v19 = vpop.permute.xlu0 %7236  ;;  %v7285_v61 = vsel %vm7268_vm9, %v7233_v33, %v7235_v28 }
 0x27c   : > { %7608 = vmatprep.mubr.bf16.mxu0 %v12775_v5  ;;  %7651 = vmatprep.mubr.bf16.mxu1 %v12775_v5  ;;  %v7286_v35 = vsel %vm7268_vm9, %v7235_v28, %v7237_v19  ;;  %v7354_v10 = vsel %vm390_vm1, %v7285_v61, 0 }
 0x27d   : > { %9677 = vmatprep.subr.msk.bf16.mxu0 %vm390_vm1, %v7282_v9  ;;  %9679 = vmatprep.subr.msk.bf16.mxu1 %vm390_vm1, %v7284_v63 }
 0x27e   : > { %v7239_v8 = vpop.permute.xlu1 %7238 }
 0x27f   : > { %v7241_v0 = vpop.permute.xlu0 %7240  ;;  %v7287_v50 = vsel %vm7268_vm9, %v7237_v19, %v7239_v8 }
 0x280   : > { %v7288_v27 = vsel %vm7268_vm9, %v7239_v8, %v7241_v0  ;;  %v7360_v18 = vsel %vm390_vm1, %v7287_v50, 0 }
 0x282   : > { %9674 = vmatmul.mubr.msk.bf16.vlgmr.msra.gmra.mrb[8].mxu0 %vm386_vm2, %v12338_v24  ;;  %9676 = vmatmul.mubr.msk.bf16.vlgmr.msra.gmra.mrb[8].mxu1 %vm386_vm2, %v12338_v24  ;;  %v7243_v37 = vpop.permute.xlu1 %7242 }
 0x283   : > { %7663 = vmatpush1.bf16.msra.mxu0 %v7342_v44  ;;  %7706 = vmatpush1.bf16.msra.mxu1 %v7348_v6  ;;  %v7245_v22 = vpop.permute.xlu0 %7244  ;;  %v7289_v36 = vsel %vm7268_vm9, %v7241_v0, %v7243_v37  ;;  %v12468_v0 = vld [vmem:[%s12741_s1 + $0x40] sm:$0x3f]  }
 0x284   : > { %7694 = vmatprep.mubr.bf16.mxu0 %v12775_v5  ;;  %7737 = vmatprep.mubr.bf16.mxu1 %v12775_v5  ;;  %v7290_v29 = vsel %vm7268_vm9, %v7243_v37, %v7245_v22  ;;  %v7366_v2 = vsel %vm390_vm1, %v7289_v36, 0 }
 0x285   : > { %9681 = vmatprep.subr.msk.bf16.mxu0 %vm390_vm1, %v7286_v35  ;;  %9683 = vmatprep.subr.msk.bf16.mxu1 %vm390_vm1, %v7288_v27 }
 0x286   : > { %v7247_v1 = vpop.permute.xlu1 %7246 }
 0x287   : > { %v7249_v11 = vpop.permute.xlu0 %7248  ;;  %v7291_v43 = vsel %vm7268_vm9, %v7245_v22, %v7247_v1 }
 0x288   : > { %v7292_v45 = vsel %vm7268_vm9, %v7247_v1, %v7249_v11  ;;  %v7372_v31 = vsel %vm390_vm1, %v7291_v43, 0 }
 0x28a   : > { %9678 = vmatmul.mubr.msk.bf16.vlgmr.msra.gmra.mrb[12].mxu0 %vm386_vm2, %v12338_v24  ;;  %9680 = vmatmul.mubr.msk.bf16.vlgmr.msra.gmra.mrb[12].mxu1 %vm386_vm2, %v12338_v24  ;;  %v7251_v3 = vpop.permute.xlu1 %7250 }
 0x28b   : > { %7749 = vmatpush1.bf16.msra.mxu0 %v7354_v10  ;;  %7792 = vmatpush1.bf16.msra.mxu1 %v7360_v18  ;;  %v7253_v13 = vpop.permute.xlu0 %7252  ;;  %v7293_v55 = vsel %vm7268_vm9, %v7249_v11, %v7251_v3 }
 0x28c   : > { %7780 = vmatprep.mubr.bf16.mxu0 %v12775_v5  ;;  %7823 = vmatprep.mubr.bf16.mxu1 %v12775_v5  ;;  %v7294_v25 = vsel %vm7268_vm9, %v7251_v3, %v7253_v13  ;;  %v7378_v16 = vsel %vm390_vm1, %v7293_v55, 0 }
 0x28d   : > { %9685 = vmatprep.subr.msk.bf16.mxu0 %vm390_vm1, %v7290_v29  ;;  %9687 = vmatprep.subr.msk.bf16.mxu1 %vm390_vm1, %v7292_v45 }
 0x28e   : > { %v7255_v40 = vpop.permute.xlu1 %7254 }
 0x28f   : > { %v7257_v59 = vpop.permute.xlu0 %7256  ;;  %v7295_v48 = vsel %vm7268_vm9, %v7253_v13, %v7255_v40 }
 0x290   : > { %v7296_v51 = vsel %vm7268_vm9, %v7255_v40, %v7257_v59  ;;  %v7384_v21 = vsel %vm390_vm1, %v7295_v48, 0 }
 0x292   : > { %9682 = vmatmul.mubr.msk.bf16.vlgmr.msra.gmra.mrb[16].mxu0 %vm386_vm2, %v12338_v24  ;;  %9684 = vmatmul.mubr.msk.bf16.vlgmr.msra.gmra.mrb[16].mxu1 %vm386_vm2, %v12338_v24  ;;  %v7259_v52 = vpop.permute.xlu1 %7258 }
 0x293   : > { %7835 = vmatpush1.bf16.msra.mxu0 %v7366_v2  ;;  %7878 = vmatpush1.bf16.msra.mxu1 %v7372_v31  ;;  %v7261_v7 = vpop.permute.xlu0 %7260  ;;  %v7297_v41 = vsel %vm7268_vm9, %v7257_v59, %v7259_v52 }
 0x294   : > { %7866 = vmatprep.mubr.bf16.mxu0 %v12775_v5  ;;  %7909 = vmatprep.mubr.bf16.mxu1 %v12775_v5  ;;  %v7298_v15 = vsel %vm7268_vm9, %v7259_v52, %v7261_v7  ;;  %v7390_v62 = vsel %vm390_vm1, %v7297_v41, 0 }
 0x295   : > { %9689 = vmatprep.subr.msk.bf16.mxu0 %vm390_vm1, %v7294_v25  ;;  %9691 = vmatprep.subr.msk.bf16.mxu1 %vm390_vm1, %v7296_v51 }
 0x296   : > { %v7263_v39 = vpop.permute.xlu1 %7262 }
 0x297   : > { %v7265_v4 = vpop.permute.xlu0 %7264  ;;  %v7299_v17 = vsel %vm7268_vm9, %v7261_v7, %v7263_v39 }
 0x298   : > { %v7300_v57 = vsel %vm7268_vm9, %v7263_v39, %v7265_v4  ;;  %v7396_v26 = vsel %vm390_vm1, %v7299_v17, 0 }
 0x29a   : > { %9686 = vmatmul.mubr.msk.bf16.vlgmr.msra.gmra.mrb[20].mxu0 %vm386_vm2, %v12338_v24  ;;  %9688 = vmatmul.mubr.msk.bf16.vlgmr.msra.gmra.mrb[20].mxu1 %vm386_vm2, %v12338_v24  ;;  %v8208_v46 = vpop.permute.xlu1 %8207 }
 0x29b   : > { %7921 = vmatpush1.bf16.msra.mxu0 %v7378_v16  ;;  %7964 = vmatpush1.bf16.msra.mxu1 %v7384_v21  ;;  %v8210_v47 = vpop.permute.xlu0 %8209 }
 0x29c   : > { %7952 = vmatprep.mubr.bf16.mxu0 %v12775_v5  ;;  %7995 = vmatprep.mubr.bf16.mxu1 %v12775_v5  ;;  %v8276_v33 = vsel %vm8275_vm10, %v8208_v46, %v8210_v47 }
 0x29d   : > { %9693 = vmatprep.subr.msk.bf16.mxu0 %vm390_vm1, %v7298_v15  ;;  %9695 = vmatprep.subr.msk.bf16.mxu1 %vm390_vm1, %v7300_v57  ;;  %v8313_v9 = vsel %vm390_vm1, %v8276_v33, 0 }
 0x29e   : > { %v8212_v20 = vpop.permute.xlu1 %8211 }
 0x29f   : > { %v7267_v38 = vpop.permute.xlu0 %7266  ;;  %v8277_v34 = vsel %vm8275_vm10, %v8210_v47, %v8212_v20 }
 0x2a0   : > { %v7301_v54 = vsel %vm7268_vm9, %v7265_v4, %v7267_v38 }
 0x2a1   : > { %v7402_v63 = vsel %vm390_vm1, %v7301_v54, 0 }
 0x2a2   : > { %9690 = vmatmul.mubr.msk.bf16.vlgmr.msra.gmra.mrb[24].mxu0 %vm386_vm2, %v12338_v24  ;;  %9692 = vmatmul.mubr.msk.bf16.vlgmr.msra.gmra.mrb[24].mxu1 %vm386_vm2, %v12338_v24  ;;  %v8216_v30 = vpop.permute.xlu1 %8215 }
 0x2a3   : > { %8007 = vmatpush1.bf16.msra.mxu0 %v7390_v62  ;;  %8050 = vmatpush1.bf16.msra.mxu1 %v7396_v26  ;;  %v8218_v12 = vpop.permute.xlu0 %8217 }
 0x2a4   : > { %8038 = vmatprep.mubr.bf16.mxu0 %v12775_v5  ;;  %8081 = vmatprep.mubr.bf16.mxu1 %v12775_v5  ;;  %v8280_v14 = vsel %vm8275_vm10, %v8216_v30, %v8218_v12 }
 0x2a5   : > { %9796 = vmatprep.subr.bf16.mxu1 %v12776_v60  ;;  %9701 = vmatprep.subr.msk.bf16.mxu0 %vm390_vm1, %v8277_v34  ;;  %v8325_v44 = vsel %vm390_vm1, %v8280_v14, 0 }
 0x2a6   : > { %v8220_v32 = vpop.permute.xlu1 %8219 }
 0x2a7   : > { %v8214_v58 = vpop.permute.xlu0 %8213  ;;  %v8281_v28 = vsel %vm8275_vm10, %v8218_v12, %v8220_v32 }
 0x2a8   : > { %v8279_v19 = vsel %vm8275_vm10, %v8214_v58, %v8216_v30  ;;  %v8278_v42 = vsel %vm8275_vm10, %v8212_v20, %v8214_v58 }
 0x2a9   : > { %v8319_v35 = vsel %vm390_vm1, %v8278_v42, 0 }
 0x2aa   : > { %9694 = vmatmul.mubr.msk.bf16.vlgmr.msra.gmra.mrb[28].mxu0 %vm386_vm2, %v12338_v24  ;;  %9696 = vmatmul.mubr.msk.bf16.vlgmr.msra.gmra.mrb[28].mxu1 %vm386_vm2, %v12338_v24  ;;  %v8224_v56 = vpop.permute.xlu1 %8223 }
 0x2ab   : > { %9797 = vmatpush3.bf16.msra.mxu1 %v7402_v63  ;;  %8412 = vmatpush1.bf16.msra.mxu0 %v8313_v9  ;;  %v8226_v8 = vpop.permute.xlu0 %8225 }
 0x2ac   : > { %9798 = vmatprep.mubr.msk.bf16.mxu1 %vm10365_vm3, %v12776_v60  ;;  %8443 = vmatprep.mubr.bf16.mxu0 %v12775_v5  ;;  %v8284_v1 = vsel %vm8275_vm10, %v8224_v56, %v8226_v8 }
 0x2ad   : > { %9703 = vmatprep.subr.msk.bf16.mxu1 %vm390_vm1, %v8279_v19  ;;  %9705 = vmatprep.subr.msk.bf16.mxu0 %vm390_vm1, %v8281_v28  ;;  %v8337_v3 = vsel %vm390_vm1, %v8284_v1, 0 }
 0x2ae   : > { %v8228_v6 = vpop.permute.xlu1 %8227 }
 0x2af   : > { %v8222_v53 = vpop.permute.xlu0 %8221  ;;  %v8285_v27 = vsel %vm8275_vm10, %v8226_v8, %v8228_v6 }
 0x2b0   : > { %v8283_v37 = vsel %vm8275_vm10, %v8222_v53, %v8224_v56  ;;  %v8282_v10 = vsel %vm8275_vm10, %v8220_v32, %v8222_v53 }
 0x2b1   : > { %v8331_v40 = vsel %vm390_vm1, %v8282_v10, 0 }
 0x2b2   : > { %9799 = vmatmul.mubr.msk.bf16.vlgmr.msra.gmra.mrb[44].mxu1 %vm386_vm2, %v12338_v24  ;;  %9702 = vmatmul.mubr.msk.bf16.vlgmr.msra.gmra.mrb[0].mxu0 %vm386_vm2, %v12468_v0  ;;  %v8232_v22 = vpop.permute.xlu1 %8231 }
 0x2b3   : > { %8455 = vmatpush1.bf16.msra.mxu1 %v8319_v35  ;;  %8498 = vmatpush1.bf16.msra.mxu0 %v8325_v44  ;;  %v8234_v50 = vpop.permute.xlu0 %8233 }
 0x2b4   : > { %8486 = vmatprep.mubr.bf16.mxu1 %v12775_v5  ;;  %8529 = vmatprep.mubr.bf16.mxu0 %v12775_v5 }
 0x2b5   : > { %v5003_v61 = vpop.f32.mrb[40].mxu0  ;;  %9707 = vmatprep.subr.msk.bf16.mxu1 %vm390_vm1, %v8283_v37  ;;  %9709 = vmatprep.subr.msk.bf16.mxu0 %vm390_vm1, %v8285_v27 }
 0x2b6   : > { %v12485_v24 = vadd.f32 %v5003_v61, %v12356_v49  ;;  %v9782_v11 = vpop.f32.mrb[41].mxu0  ;;  %v8236_v18 = vpop.permute.xlu1 %8235 }
 0x2b7   : > { %v5006_v29 = vpop.f32.mrb[42].mxu0  ;;  %v8230_v45 = vpop.permute.xlu0 %8229  ;;  %v8289_v49 = vsel %vm8275_vm10, %v8234_v50, %v8236_v18 }
 0x2b8   : > { %v12490_v13 = vadd.f32 %v5006_v29, %v12361_v23  ;;  %v9783_v43 = vpop.f32.mrb[43].mxu0  ;;  %v8287_v36 = vsel %vm8275_vm10, %v8230_v45, %v8232_v22  ;;  %v8288_v23 = vsel %vm8275_vm10, %v8232_v22, %v8234_v50  ;;  %v8286_v25 = vsel %vm8275_vm10, %v8228_v6, %v8230_v45 }
 0x2b9   : > { %v8349_v52 = vsel %vm390_vm1, %v8288_v23, 0  ;;  %v8343_v7 = vsel %vm390_vm1, %v8286_v25, 0 }
 0x2ba   : > { %9704 = vmatmul.mubr.msk.bf16.vlgmr.msra.gmra.mrb[0].mxu1 %vm386_vm2, %v12468_v0  ;;  %9706 = vmatmul.mubr.msk.bf16.vlgmr.msra.gmra.mrb[4].mxu0 %vm386_vm2, %v12468_v0  ;;  %v8240_v59 = vpop.permute.xlu1 %8239 }
 0x2bb   : > { %8541 = vmatpush1.bf16.msra.mxu1 %v8331_v40  ;;  %8584 = vmatpush1.bf16.msra.mxu0 %v8337_v3  ;;  %v8242_v31 = vpop.permute.xlu0 %8241 }
 0x2bc   : > { %8572 = vmatprep.mubr.bf16.mxu1 %v12775_v5  ;;  %8615 = vmatprep.mubr.bf16.mxu0 %v12775_v5  ;;  %v8292_v21 = vsel %vm8275_vm10, %v8240_v59, %v8242_v31 }
 0x2bd   : > { %9711 = vmatprep.subr.msk.bf16.mxu1 %vm390_vm1, %v8287_v36  ;;  %9713 = vmatprep.subr.msk.bf16.mxu0 %vm390_vm1, %v8289_v49  ;;  %v8361_v46 = vsel %vm390_vm1, %v8292_v21, 0 }
 0x2be   : > { %v8244_v2 = vpop.permute.xlu1 %8243 }
 0x2bf   : > { %v8238_v51 = vpop.permute.xlu0 %8237  ;;  %v8293_v48 = vsel %vm8275_vm10, %v8242_v31, %v8244_v2 }
 0x2c0   : > { %v8291_v39 = vsel %vm8275_vm10, %v8238_v51, %v8240_v59  ;;  %v8290_v15 = vsel %vm8275_vm10, %v8236_v18, %v8238_v51 }
 0x2c1   : > { %v8355_v47 = vsel %vm390_vm1, %v8290_v15, 0 }
 0x2c2   : > { %9708 = vmatmul.mubr.msk.bf16.vlgmr.msra.gmra.mrb[4].mxu1 %vm386_vm2, %v12468_v0  ;;  %9710 = vmatmul.mubr.msk.bf16.vlgmr.msra.gmra.mrb[8].mxu0 %vm386_vm2, %v12468_v0  ;;  %v8248_v55 = vpop.permute.xlu1 %8247 }
 0x2c3   : > { %8627 = vmatpush1.bf16.msra.mxu1 %v8343_v7  ;;  %8670 = vmatpush1.bf16.msra.mxu0 %v8349_v52  ;;  %v8250_v4 = vpop.permute.xlu0 %8249 }
 0x2c4   : > { %8658 = vmatprep.mubr.bf16.mxu1 %v12775_v5  ;;  %8701 = vmatprep.mubr.bf16.mxu0 %v12775_v5  ;;  %v8296_v26 = vsel %vm8275_vm10, %v8248_v55, %v8250_v4 }
 0x2c5   : > { %9715 = vmatprep.subr.msk.bf16.mxu1 %vm390_vm1, %v8291_v39  ;;  %9717 = vmatprep.subr.msk.bf16.mxu0 %vm390_vm1, %v8293_v48  ;;  %v8373_v12 = vsel %vm390_vm1, %v8296_v26, 0 }
 0x2c6   : > { %v8252_v16 = vpop.permute.xlu1 %8251 }
 0x2c7   : > { %v8246_v57 = vpop.permute.xlu0 %8245  ;;  %v8297_v17 = vsel %vm8275_vm10, %v8250_v4, %v8252_v16 }
 0x2c8   : > { %v8295_v20 = vsel %vm8275_vm10, %v8246_v57, %v8248_v55  ;;  %v8294_v34 = vsel %vm8275_vm10, %v8244_v2, %v8246_v57 }
 0x2c9   : > { %v8367_v33 = vsel %vm390_vm1, %v8294_v34, 0 }
 0x2ca   : > { %9712 = vmatmul.mubr.msk.bf16.vlgmr.msra.gmra.mrb[8].mxu1 %vm386_vm2, %v12468_v0  ;;  %9714 = vmatmul.mubr.msk.bf16.vlgmr.msra.gmra.mrb[12].mxu0 %vm386_vm2, %v12468_v0  ;;  %v8256_v41 = vpop.permute.xlu1 %8255 }
 0x2cb   : > { %8713 = vmatpush1.bf16.msra.mxu1 %v8355_v47  ;;  %8756 = vmatpush1.bf16.msra.mxu0 %v8361_v46  ;;  %v8258_v38 = vpop.permute.xlu0 %8257 }
 0x2cc   : > { %8744 = vmatprep.mubr.bf16.mxu1 %v12775_v5  ;;  %8787 = vmatprep.mubr.bf16.mxu0 %v12775_v5  ;;  %v8300_v63 = vsel %vm8275_vm10, %v8256_v41, %v8258_v38 }
 0x2cd   : > { %9719 = vmatprep.subr.msk.bf16.mxu1 %vm390_vm1, %v8295_v20  ;;  %9721 = vmatprep.subr.msk.bf16.mxu0 %vm390_vm1, %v8297_v17  ;;  %v8385_v56 = vsel %vm390_vm1, %v8300_v63, 0 }
 0x2ce   : > { %v8260_v62 = vpop.permute.xlu1 %8259 }
 0x2cf   : > { %v8254_v30 = vpop.permute.xlu0 %8253  ;;  %v8301_v32 = vsel %vm8275_vm10, %v8258_v38, %v8260_v62 }
 0x2d0   : > { %v8299_v54 = vsel %vm8275_vm10, %v8254_v30, %v8256_v41  ;;  %v8298_v19 = vsel %vm8275_vm10, %v8252_v16, %v8254_v30 }
 0x2d1   : > { %v8379_v14 = vsel %vm390_vm1, %v8298_v19, 0 }
 0x2d2   : > { %9716 = vmatmul.mubr.msk.bf16.vlgmr.msra.gmra.mrb[12].mxu1 %vm386_vm2, %v12468_v0  ;;  %9718 = vmatmul.mubr.msk.bf16.vlgmr.msra.gmra.mrb[16].mxu0 %vm386_vm2, %v12468_v0  ;;  %v8264_v58 = vpop.permute.xlu1 %8263 }
 0x2d3   : > { %8799 = vmatpush1.bf16.msra.mxu1 %v8367_v33  ;;  %8842 = vmatpush1.bf16.msra.mxu0 %v8373_v12  ;;  %v8266_v9 = vpop.permute.xlu0 %8265 }
 0x2d4   : > { %8830 = vmatprep.mubr.bf16.mxu1 %v12775_v5  ;;  %8873 = vmatprep.mubr.bf16.mxu0 %v12775_v5  ;;  %v8304_v44 = vsel %vm8275_vm10, %v8264_v58, %v8266_v9 }
 0x2d5   : > { %9723 = vmatprep.subr.msk.bf16.mxu1 %vm390_vm1, %v8299_v54  ;;  %9725 = vmatprep.subr.msk.bf16.mxu0 %vm390_vm1, %v8301_v32  ;;  %v8397_v27 = vsel %vm390_vm1, %v8304_v44, 0 }
 0x2d6   : > { %v8268_v28 = vpop.permute.xlu1 %8267 }
 0x2d7   : > { %v8262_v8 = vpop.permute.xlu0 %8261  ;;  %v8305_v6 = vsel %vm8275_vm10, %v8266_v9, %v8268_v28 }
 0x2d8   : > { %v8303_v42 = vsel %vm8275_vm10, %v8262_v8, %v8264_v58  ;;  %v8302_v35 = vsel %vm8275_vm10, %v8260_v62, %v8262_v8 }
 0x2d9   : > { %v8391_v22 = vsel %vm390_vm1, %v8302_v35, 0 }
 0x2da   : > { %9720 = vmatmul.mubr.msk.bf16.vlgmr.msra.gmra.mrb[16].mxu1 %vm386_vm2, %v12468_v0  ;;  %9722 = vmatmul.mubr.msk.bf16.vlgmr.msra.gmra.mrb[20].mxu0 %vm386_vm2, %v12468_v0  ;;  %v8272_v53 = vpop.permute.xlu1 %8271 }
 0x2db   : > { %8885 = vmatpush1.bf16.msra.mxu1 %v8379_v14  ;;  %8928 = vmatpush1.bf16.msra.mxu0 %v8385_v56  ;;  %v8274_v1 = vpop.permute.xlu0 %8273 }
 0x2dc   : > { %8916 = vmatprep.mubr.bf16.mxu1 %v12775_v5  ;;  %8959 = vmatprep.mubr.bf16.mxu0 %v12775_v5  ;;  %v8308_v61 = vsel %vm8275_vm10, %v8272_v53, %v8274_v1 }
 0x2dd   : > { %9727 = vmatprep.subr.msk.bf16.mxu1 %vm390_vm1, %v8303_v42  ;;  %9729 = vmatprep.subr.msk.bf16.mxu0 %vm390_vm1, %v8305_v6  ;;  %v8409_v18 = vsel %vm390_vm1, %v8308_v61, 0 }
 0x2de   : > { %v8270_v37 = vpop.permute.xlu1 %8269 }
 0x2df   : > { %v8307_v50 = vsel %vm8275_vm10, %v8270_v37, %v8272_v53  ;;  %v8306_v11 = vsel %vm8275_vm10, %v8268_v28, %v8270_v37 }
 0x2e0   : > { %v8403_v10 = vsel %vm390_vm1, %v8306_v11, 0 }
 0x2e2   : > { %9724 = vmatmul.mubr.msk.bf16.vlgmr.msra.gmra.mrb[20].mxu1 %vm386_vm2, %v12468_v0  ;;  %9726 = vmatmul.mubr.msk.bf16.vlgmr.msra.gmra.mrb[24].mxu0 %vm386_vm2, %v12468_v0 }
 0x2e3   : > { %8971 = vmatpush1.bf16.msra.mxu1 %v8391_v22  ;;  %9014 = vmatpush1.bf16.msra.mxu0 %v8397_v27 }
 0x2e4   : > { %9002 = vmatprep.mubr.bf16.mxu1 %v12775_v5  ;;  %9045 = vmatprep.mubr.bf16.mxu0 %v12775_v5 }
 0x2e5   : > { %9731 = vmatprep.subr.msk.bf16.mxu1 %vm390_vm1, %v8307_v50  ;;  %9802 = vmatprep.subr.bf16.mxu0 %v12776_v60 }
 0x2ea   : > { %9728 = vmatmul.mubr.msk.bf16.vlgmr.msra.gmra.mrb[24].mxu1 %vm386_vm2, %v12468_v0  ;;  %9730 = vmatmul.mubr.msk.bf16.vlgmr.msra.gmra.mrb[28].mxu0 %vm386_vm2, %v12468_v0 }
 0x2eb   : > { %9057 = vmatpush1.bf16.msra.mxu1 %v8403_v10  ;;  %9803 = vmatpush3.bf16.msra.mxu0 %v8409_v18 }
 0x2ec   : > { %9088 = vmatprep.mubr.bf16.mxu1 %v12775_v5  ;;  %9804 = vmatprep.mubr.msk.bf16.mxu0 %vm10365_vm3, %v12776_v60 }
 0x2ed   : > { %v12590_v2 = vpop.permute.xlu0 %9210 }
 0x2ef   : > { %v12592_v25 = vpop.permute.xlu1 %9215 }
 0x2f2   : > { %9732 = vmatmul.mubr.msk.bf16.vlgmr.msra.gmra.mrb[28].mxu1 %vm386_vm2, %v12468_v0  ;;  %9805 = vmatmul.mubr.msk.bf16.vlgmr.msra.gmra.mrb[48].mxu0 %vm386_vm2, %v12468_v0 }
 0x2fd   : > { %v6010_v29 = vpop.f32.mrb[40].mxu1 }
 0x2fe   : > { %v6049_v45 = vadd.f32 %v6010_v29, %v12485_v24  ;;  %v9788_v3 = vpop.f32.mrb[41].mxu1 }
 0x2ff   : > { %v6013_v43 = vpop.f32.mrb[42].mxu1 }
 0x300   : > { %v6082_v40 = vadd.f32 %v6013_v43, %v12490_v13  ;;  %v9789_v49 = vpop.f32.mrb[43].mxu1 }
 0x33d   : > { %v7119_v36 = vpop.f32.mrb[44].mxu0 }
 0x33e   : > { %v7158_v5 = vadd.f32 %v7119_v36, %v6049_v45  ;;  %v9794_v59 = vpop.f32.mrb[45].mxu0 }
 0x33f   : > { %v7122_v31 = vpop.f32.mrb[46].mxu0 }
 0x340   : > { %v7191_v23 = vadd.f32 %v7122_v31, %v6082_v40  ;;  %v9795_v60 = vpop.f32.mrb[47].mxu0 }
 0x385   : > { %v8126_v0 = vpop.f32.mrb[44].mxu1  ;;  %v8445_v24 = vpop.f32.mrb[0].mxu0 }
 0x386   : > { %v12599_v13 = vadd.f32 %v8126_v0, %v7158_v5  ;;  %v9218_v51 = vadd.f32 %v12590_v2, %v8445_v24  ;;  %v9800_v52 = vpop.f32.mrb[45].mxu1  ;;  %v8447_v7 = vpop.f32.mrb[1].mxu0 }
 0x387   : > { %v9219_v48 = vadd.f32 %v12590_v2, %v8447_v7  ;;  %v8129_v39 = vpop.f32.mrb[46].mxu1  ;;  %v8449_v55 = vpop.f32.mrb[2].mxu0 }
 0x388   : > { %9284 = vst [vmem:[%s12597_s26] sm:$0xff] %v9218_v51  ;;  %v12604_v4 = vadd.f32 %v8129_v39, %v7191_v23  ;;  %v9251_v21 = vadd.f32 %v12592_v25, %v8449_v55  ;;  %v8451_v16 = vpop.f32.mrb[3].mxu0  ;;  %v9801_v15 = vpop.f32.mrb[47].mxu1 }
 0x389   : > { %9285 = vst [vmem:[%s12597_s26 + $0x8] sm:$0xff] %v9219_v48  ;;  %v9252_v57 = vadd.f32 %v12592_v25, %v8451_v16 }
 0x38a   : > { %9317 = vst [vmem:[%s12597_s26 + $0x108] sm:$0xf] %v9251_v21 }
 0x38b   : > { %9318 = vst [vmem:[%s12597_s26 + $0x110] sm:$0xf] %v9252_v57 }
 0x38d   : > { %v8488_v46 = vpop.f32.mrb[0].mxu1  ;;  %v8531_v47 = vpop.f32.mrb[4].mxu0 }
 0x38e   : > { %v9220_v17 = vadd.f32 %v12590_v2, %v8488_v46  ;;  %v9222_v20 = vadd.f32 %v12590_v2, %v8531_v47  ;;  %v8490_v41 = vpop.f32.mrb[1].mxu1  ;;  %v8533_v38 = vpop.f32.mrb[5].mxu0 }
 0x38f   : > { %v9221_v26 = vadd.f32 %v12590_v2, %v8490_v41  ;;  %v9223_v62 = vadd.f32 %v12590_v2, %v8533_v38  ;;  %v8492_v34 = vpop.f32.mrb[2].mxu1  ;;  %v8535_v30 = vpop.f32.mrb[6].mxu0 }
 0x390   : > { %9286 = vst [vmem:[%s12597_s26 + $0x10] sm:$0xff] %v9220_v17  ;;  %9288 = vst [vmem:[%s12597_s26 + $0x20] sm:$0xff] %v9222_v20  ;;  %v9253_v12 = vadd.f32 %v12592_v25, %v8492_v34  ;;  %v9255_v33 = vadd.f32 %v12592_v25, %v8535_v30  ;;  %v8494_v32 = vpop.f32.mrb[3].mxu1  ;;  %v8537_v54 = vpop.f32.mrb[7].mxu0 }
 0x391   : > { %9287 = vst [vmem:[%s12597_s26 + $0x18] sm:$0xff] %v9221_v26  ;;  %9289 = vst [vmem:[%s12597_s26 + $0x28] sm:$0xff] %v9223_v62  ;;  %v9254_v58 = vadd.f32 %v12592_v25, %v8494_v32  ;;  %v9256_v9 = vadd.f32 %v12592_v25, %v8537_v54 }
 0x392   : > { %9319 = vst [vmem:[%s12597_s26 + $0x118] sm:$0xf] %v9253_v12  ;;  %9321 = vst [vmem:[%s12597_s26 + $0x128] sm:$0xf] %v9255_v33 }
 0x393   : > { %9320 = vst [vmem:[%s12597_s26 + $0x120] sm:$0xf] %v9254_v58  ;;  %9322 = vst [vmem:[%s12597_s26 + $0x130] sm:$0xf] %v9256_v9 }
 0x395   : > { %v8574_v63 = vpop.f32.mrb[4].mxu1  ;;  %v8617_v28 = vpop.f32.mrb[8].mxu0 }
 0x396   : > { %v9224_v19 = vadd.f32 %v12590_v2, %v8574_v63  ;;  %v9226_v56 = vadd.f32 %v12590_v2, %v8617_v28  ;;  %v8576_v8 = vpop.f32.mrb[5].mxu1  ;;  %v8619_v14 = vpop.f32.mrb[9].mxu0 }
 0x397   : > { %v9225_v6 = vadd.f32 %v12590_v2, %v8576_v8  ;;  %v9227_v42 = vadd.f32 %v12590_v2, %v8619_v14  ;;  %v8578_v53 = vpop.f32.mrb[6].mxu1  ;;  %v8621_v44 = vpop.f32.mrb[10].mxu0 }
 0x398   : > { %9290 = vst [vmem:[%s12597_s26 + $0x30] sm:$0xff] %v9224_v19  ;;  %9292 = vst [vmem:[%s12597_s26 + $0x40] sm:$0xff] %v9226_v56  ;;  %v9257_v35 = vadd.f32 %v12592_v25, %v8578_v53  ;;  %v9259_v27 = vadd.f32 %v12592_v25, %v8621_v44  ;;  %v8580_v37 = vpop.f32.mrb[7].mxu1  ;;  %v8623_v22 = vpop.f32.mrb[11].mxu0 }
 0x399   : > { %9291 = vst [vmem:[%s12597_s26 + $0x38] sm:$0xff] %v9225_v6  ;;  %9293 = vst [vmem:[%s12597_s26 + $0x48] sm:$0xff] %v9227_v42  ;;  %v9258_v50 = vadd.f32 %v12592_v25, %v8580_v37  ;;  %v9260_v1 = vadd.f32 %v12592_v25, %v8623_v22 }
 0x39a   : > { %9323 = vst [vmem:[%s12597_s26 + $0x138] sm:$0xf] %v9257_v35  ;;  %9325 = vst [vmem:[%s12597_s26 + $0x148] sm:$0xf] %v9259_v27 }
 0x39b   : > { %9324 = vst [vmem:[%s12597_s26 + $0x140] sm:$0xf] %v9258_v50  ;;  %9326 = vst [vmem:[%s12597_s26 + $0x150] sm:$0xf] %v9260_v1 }
 0x39d   : > { %v8660_v61 = vpop.f32.mrb[8].mxu1  ;;  %v8703_v11 = vpop.f32.mrb[12].mxu0 }
 0x39e   : > { %v9228_v18 = vadd.f32 %v12590_v2, %v8660_v61  ;;  %v9230_v10 = vadd.f32 %v12590_v2, %v8703_v11  ;;  %v8662_v29 = vpop.f32.mrb[9].mxu1  ;;  %v8705_v45 = vpop.f32.mrb[13].mxu0 }
 0x39f   : > { %v9229_v3 = vadd.f32 %v12590_v2, %v8662_v29  ;;  %v9231_v43 = vadd.f32 %v12590_v2, %v8705_v45  ;;  %v8664_v40 = vpop.f32.mrb[10].mxu1  ;;  %v8707_v49 = vpop.f32.mrb[14].mxu0 }
 0x3a0   : > { %9294 = vst [vmem:[%s12597_s26 + $0x50] sm:$0xff] %v9228_v18  ;;  %9296 = vst [vmem:[%s12597_s26 + $0x60] sm:$0xff] %v9230_v10  ;;  %v9261_v36 = vadd.f32 %v12592_v25, %v8664_v40  ;;  %v9263_v5 = vadd.f32 %v12592_v25, %v8707_v49  ;;  %v8666_v59 = vpop.f32.mrb[11].mxu1  ;;  %v8709_v31 = vpop.f32.mrb[15].mxu0 }
 0x3a1   : > { %9295 = vst [vmem:[%s12597_s26 + $0x58] sm:$0xff] %v9229_v3  ;;  %9297 = vst [vmem:[%s12597_s26 + $0x68] sm:$0xff] %v9231_v43  ;;  %v9262_v23 = vadd.f32 %v12592_v25, %v8666_v59  ;;  %v9264_v60 = vadd.f32 %v12592_v25, %v8709_v31 }
 0x3a2   : > { %9327 = vst [vmem:[%s12597_s26 + $0x158] sm:$0xf] %v9261_v36  ;;  %9329 = vst [vmem:[%s12597_s26 + $0x168] sm:$0xf] %v9263_v5 }
 0x3a3   : > { %9328 = vst [vmem:[%s12597_s26 + $0x160] sm:$0xf] %v9262_v23  ;;  %9330 = vst [vmem:[%s12597_s26 + $0x170] sm:$0xf] %v9264_v60 }
 0x3a5   : > { %v8746_v0 = vpop.f32.mrb[12].mxu1  ;;  %v8789_v24 = vpop.f32.mrb[16].mxu0 }
 0x3a6   : > { %v9232_v51 = vadd.f32 %v12590_v2, %v8746_v0  ;;  %v9234_v52 = vadd.f32 %v12590_v2, %v8789_v24  ;;  %v8748_v7 = vpop.f32.mrb[13].mxu1  ;;  %v8791_v48 = vpop.f32.mrb[17].mxu0 }
 0x3a7   : > { %v9233_v39 = vadd.f32 %v12590_v2, %v8748_v7  ;;  %v9235_v55 = vadd.f32 %v12590_v2, %v8791_v48  ;;  %v8750_v21 = vpop.f32.mrb[14].mxu1  ;;  %v8793_v16 = vpop.f32.mrb[18].mxu0 }
 0x3a8   : > { %9298 = vst [vmem:[%s12597_s26 + $0x70] sm:$0xff] %v9232_v51  ;;  %9300 = vst [vmem:[%s12597_s26 + $0x80] sm:$0xff] %v9234_v52  ;;  %v9265_v15 = vadd.f32 %v12592_v25, %v8750_v21  ;;  %v9267_v57 = vadd.f32 %v12592_v25, %v8793_v16  ;;  %v8752_v46 = vpop.f32.mrb[15].mxu1  ;;  %v8795_v47 = vpop.f32.mrb[19].mxu0 }
 0x3a9   : > { %9299 = vst [vmem:[%s12597_s26 + $0x78] sm:$0xff] %v9233_v39  ;;  %9301 = vst [vmem:[%s12597_s26 + $0x88] sm:$0xff] %v9235_v55  ;;  %v9266_v17 = vadd.f32 %v12592_v25, %v8752_v46  ;;  %v9268_v20 = vadd.f32 %v12592_v25, %v8795_v47 }
 0x3aa   : > { %9331 = vst [vmem:[%s12597_s26 + $0x178] sm:$0xf] %v9265_v15  ;;  %9333 = vst [vmem:[%s12597_s26 + $0x188] sm:$0xf] %v9267_v57 }
 0x3ab   : > { %9332 = vst [vmem:[%s12597_s26 + $0x180] sm:$0xf] %v9266_v17  ;;  %9334 = vst [vmem:[%s12597_s26 + $0x190] sm:$0xf] %v9268_v20 }
 0x3ad   : > { %v8832_v41 = vpop.f32.mrb[16].mxu1  ;;  %v8875_v38 = vpop.f32.mrb[20].mxu0 }
 0x3ae   : > { %v9236_v26 = vadd.f32 %v12590_v2, %v8832_v41  ;;  %v9238_v62 = vadd.f32 %v12590_v2, %v8875_v38  ;;  %v8834_v34 = vpop.f32.mrb[17].mxu1  ;;  %v8877_v30 = vpop.f32.mrb[21].mxu0 }
 0x3af   : > { %v9237_v12 = vadd.f32 %v12590_v2, %v8834_v34  ;;  %v9239_v33 = vadd.f32 %v12590_v2, %v8877_v30  ;;  %v8836_v32 = vpop.f32.mrb[18].mxu1  ;;  %v8879_v54 = vpop.f32.mrb[22].mxu0 }
 0x3b0   : > { %9302 = vst [vmem:[%s12597_s26 + $0x90] sm:$0xff] %v9236_v26  ;;  %9304 = vst [vmem:[%s12597_s26 + $0xa0] sm:$0xff] %v9238_v62  ;;  %v9269_v58 = vadd.f32 %v12592_v25, %v8836_v32  ;;  %v9271_v9 = vadd.f32 %v12592_v25, %v8879_v54  ;;  %v8838_v63 = vpop.f32.mrb[19].mxu1  ;;  %v8881_v28 = vpop.f32.mrb[23].mxu0 }
 0x3b1   : > { %9303 = vst [vmem:[%s12597_s26 + $0x98] sm:$0xff] %v9237_v12  ;;  %9305 = vst [vmem:[%s12597_s26 + $0xa8] sm:$0xff] %v9239_v33  ;;  %v9270_v19 = vadd.f32 %v12592_v25, %v8838_v63  ;;  %v9272_v56 = vadd.f32 %v12592_v25, %v8881_v28 }
 0x3b2   : > { %9335 = vst [vmem:[%s12597_s26 + $0x198] sm:$0xf] %v9269_v58  ;;  %9337 = vst [vmem:[%s12597_s26 + $0x1a8] sm:$0xf] %v9271_v9 }
 0x3b3   : > { %9336 = vst [vmem:[%s12597_s26 + $0x1a0] sm:$0xf] %v9270_v19  ;;  %9338 = vst [vmem:[%s12597_s26 + $0x1b0] sm:$0xf] %v9272_v56 }
 0x3b5   : > { %v8918_v8 = vpop.f32.mrb[20].mxu1  ;;  %v8961_v14 = vpop.f32.mrb[24].mxu0 }
 0x3b6   : > { %v9240_v6 = vadd.f32 %v12590_v2, %v8918_v8  ;;  %v9242_v42 = vadd.f32 %v12590_v2, %v8961_v14  ;;  %v8920_v53 = vpop.f32.mrb[21].mxu1  ;;  %v8963_v44 = vpop.f32.mrb[25].mxu0 }
 0x3b7   : > { %v9241_v35 = vadd.f32 %v12590_v2, %v8920_v53  ;;  %v9243_v27 = vadd.f32 %v12590_v2, %v8963_v44  ;;  %v8922_v37 = vpop.f32.mrb[22].mxu1  ;;  %v8965_v22 = vpop.f32.mrb[26].mxu0 }
 0x3b8   : > { %9306 = vst [vmem:[%s12597_s26 + $0xb0] sm:$0xff] %v9240_v6  ;;  %9308 = vst [vmem:[%s12597_s26 + $0xc0] sm:$0xff] %v9242_v42  ;;  %v9273_v50 = vadd.f32 %v12592_v25, %v8922_v37  ;;  %v9275_v1 = vadd.f32 %v12592_v25, %v8965_v22  ;;  %v8924_v61 = vpop.f32.mrb[23].mxu1  ;;  %v8967_v11 = vpop.f32.mrb[27].mxu0 }
 0x3b9   : > { %9307 = vst [vmem:[%s12597_s26 + $0xb8] sm:$0xff] %v9241_v35  ;;  %9309 = vst [vmem:[%s12597_s26 + $0xc8] sm:$0xff] %v9243_v27  ;;  %v9274_v18 = vadd.f32 %v12592_v25, %v8924_v61  ;;  %v9276_v10 = vadd.f32 %v12592_v25, %v8967_v11 }
 0x3ba   : > { %9339 = vst [vmem:[%s12597_s26 + $0x1b8] sm:$0xf] %v9273_v50  ;;  %9341 = vst [vmem:[%s12597_s26 + $0x1c8] sm:$0xf] %v9275_v1 }
 0x3bb   : > { %9340 = vst [vmem:[%s12597_s26 + $0x1c0] sm:$0xf] %v9274_v18  ;;  %9342 = vst [vmem:[%s12597_s26 + $0x1d0] sm:$0xf] %v9276_v10 }
 0x3bd   : > { %v9004_v29 = vpop.f32.mrb[24].mxu1  ;;  %v9047_v45 = vpop.f32.mrb[28].mxu0 }
 0x3be   : > { %v9244_v3 = vadd.f32 %v12590_v2, %v9004_v29  ;;  %v9246_v43 = vadd.f32 %v12590_v2, %v9047_v45  ;;  %v9006_v40 = vpop.f32.mrb[25].mxu1  ;;  %v9049_v49 = vpop.f32.mrb[29].mxu0 }
 0x3bf   : > { %v9245_v36 = vadd.f32 %v12590_v2, %v9006_v40  ;;  %v9247_v5 = vadd.f32 %v12590_v2, %v9049_v49  ;;  %v9008_v59 = vpop.f32.mrb[26].mxu1  ;;  %v9051_v31 = vpop.f32.mrb[30].mxu0 }
 0x3c0   : > { %9310 = vst [vmem:[%s12597_s26 + $0xd0] sm:$0xff] %v9244_v3  ;;  %9312 = vst [vmem:[%s12597_s26 + $0xe0] sm:$0xff] %v9246_v43  ;;  %v9277_v23 = vadd.f32 %v12592_v25, %v9008_v59  ;;  %v9279_v60 = vadd.f32 %v12592_v25, %v9051_v31  ;;  %v9010_v0 = vpop.f32.mrb[27].mxu1  ;;  %v9053_v24 = vpop.f32.mrb[31].mxu0 }
 0x3c1   : > { %9311 = vst [vmem:[%s12597_s26 + $0xd8] sm:$0xff] %v9245_v36  ;;  %9313 = vst [vmem:[%s12597_s26 + $0xe8] sm:$0xff] %v9247_v5  ;;  %v9278_v51 = vadd.f32 %v12592_v25, %v9010_v0  ;;  %v9280_v52 = vadd.f32 %v12592_v25, %v9053_v24 }
 0x3c2   : > { %9343 = vst [vmem:[%s12597_s26 + $0x1d8] sm:$0xf] %v9277_v23  ;;  %9345 = vst [vmem:[%s12597_s26 + $0x1e8] sm:$0xf] %v9279_v60 }
 0x3c3   : > { %9344 = vst [vmem:[%s12597_s26 + $0x1e0] sm:$0xf] %v9278_v51  ;;  %9346 = vst [vmem:[%s12597_s26 + $0x1f0] sm:$0xf] %v9280_v52 }
 0x3c5   : > { %v9090_v7 = vpop.f32.mrb[28].mxu1  ;;  %v9133_v48 = vpop.f32.mrb[48].mxu0 }
 0x3c6   : > { %v9248_v39 = vadd.f32 %v12590_v2, %v9090_v7  ;;  %v9172_v55 = vadd.f32 %v9133_v48, %v12599_v13  ;;  %v9092_v21 = vpop.f32.mrb[29].mxu1  ;;  %v9806_v16 = vpop.f32.mrb[49].mxu0 }
 0x3c7   : > { %v9249_v15 = vadd.f32 %v12590_v2, %v9092_v21  ;;  %v9094_v57 = vpop.f32.mrb[30].mxu1  ;;  %v9136_v46 = vpop.f32.mrb[50].mxu0 }
 0x3c8   : > { %9314 = vst [vmem:[%s12597_s26 + $0xf0] sm:$0xff] %v9248_v39  ;;  %v9250_v47 = vadd.f32 %v12590_v2, %v9172_v55  ;;  %v9281_v17 = vadd.f32 %v12592_v25, %v9094_v57  ;;  %v9205_v20 = vadd.f32 %v9136_v46, %v12604_v4  ;;  %v9096_v41 = vpop.f32.mrb[31].mxu1  ;;  %v9807_v38 = vpop.f32.mrb[51].mxu0 }
 0x3c9   : > { %9315 = vst [vmem:[%s12597_s26 + $0xf8] sm:$0xff] %v9249_v15  ;;  %v9282_v13 = vadd.f32 %v12592_v25, %v9096_v41 }
 0x3ca   : > { %9316 = vst [vmem:[%s12597_s26 + $0x100] sm:$0xff] %v9250_v47  ;;  %9347 = vst [vmem:[%s12597_s26 + $0x1f8] sm:$0xf] %v9281_v17  ;;  %v9283_v26 = vadd.f32 %v12592_v25, %v9205_v20 }
 0x3cb   : > { %9348 = vst [vmem:[%s12597_s26 + $0x200] sm:$0xf] %v9282_v13 }
 0x3cc   : > { %9349 = vst [vmem:[%s12597_s26 + $0x208] sm:$0xf] %v9283_v26 }
 0x3cd PF: > { %s13_s12 = sadd.s32 1, %s10358_s12  }
 0x3ce   : > { %p10_p4 = scmp.ge.s32.totalorder %s13_s12, 4  }
 0x3d0   :  { %12 = sbr.rel (!%p10_p4) target bundleno = 1 (0x1), region = 70 }

</bundles_post_ra>
